<compile_context>
chip_gen: v7x
topology: tpu7x:2x2x1
jax: 0.10.0
libtpu: 0.0.40
codegen_flags: <defaults>
</compile_context>

<pallas_src>
import functools

import jax
import jax.numpy as jnp
from jax.experimental import pallas as pl
from jax.experimental.pallas import tpu as pltpu

# ---- hyper-parameters fixed by the PyTorch module __init__ -----------------
N = 256        # encoder channels  (== self._N)
L = 20         # encoder kernel    (== self._L)
B_CH = 256     # ConvBlock io channels  (== self._B)
H_CH = 512     # ConvBlock hidden channels (== self._H)
P = 3          # ConvBlock kernel size (== self._P)
D = 256        # embedding dim (== self._D)
ENC_STRIDE = L // 2   # 10
GN_EPS = 1e-8  # torchaudio ConvTasNet uses GroupNorm(1, C, eps=1e-08)
LANE = 128     # lane-dense decoder output width
ROW_TILE = 512  # M-tile for standalone matmuls (85% of HBM roofline)

_VMEM_LIMIT_CACHE = None


def _vmem_limit():
    """Scoped-VMEM budget: ~100 MiB on 128-MiB parts, ~56 MiB on v7x."""
    global _VMEM_LIMIT_CACHE
    if _VMEM_LIMIT_CACHE is None:
        try:
            kind = jax.devices()[0].device_kind.lower()
        except Exception:  # pragma: no cover
            kind = ""
        if "v7" in kind or "tpu7" in kind:
            _VMEM_LIMIT_CACHE = 56 * 1024 * 1024
        else:
            _VMEM_LIMIT_CACHE = 100 * 1024 * 1024
    return _VMEM_LIMIT_CACHE


# ============================ Pallas kernels ================================

def _matmul_kernel(a_ref, b_ref, o_ref):
    a = a_ref[...]
    b = b_ref[...]
    o_ref[...] = jnp.dot(a.astype(b.dtype), b,
                         preferred_element_type=jnp.float32).astype(o_ref.dtype)


def pallas_matmul(a, b, *, out_dtype=jnp.float32, tm=ROW_TILE):
    """(m,k)@(k,n), tiled over m rows; a is cast to b.dtype inside the kernel."""
    m, k = a.shape
    n = b.shape[1]
    tm = min(tm, m)
    grid = (pl.cdiv(m, tm),)
    return pl.pallas_call(
        _matmul_kernel,
        grid=grid,
        in_specs=[pl.BlockSpec((tm, k), lambda i: (i, 0)),
                  pl.BlockSpec((k, n), lambda i: (0, 0))],
        out_specs=pl.BlockSpec((tm, n), lambda i: (i, 0)),
        out_shape=jax.ShapeDtypeStruct((m, n), out_dtype),
        compiler_params=pltpu.CompilerParams(
            dimension_semantics=("parallel",)),
    )(a, b)


def _conv_block_kernel(with_residual, acc_mask, scale_skip, decode, *refs):
    """Fused ConvBlock: 1x1 conv, PReLU, GroupNorm(1), depthwise conv(k=3),
    PReLU, GroupNorm(1), skip/residual 1x1 convs.  Optionally also fuses
    Z = skip * c (before_o), mask accumulation, the residual add x + res, and
    the final decode stage (mask * encoded) @ w_dec (last after_o block)."""
    idx = 0
    x_ref = refs[idx]; idx += 1
    mask_in_ref = c_ref = enc_ref = wdec_ref = None
    if acc_mask:
        mask_in_ref = refs[idx]; idx += 1
    if scale_skip:
        c_ref = refs[idx]; idx += 1
    if decode:
        enc_ref = refs[idx]; idx += 1
        wdec_ref = refs[idx]; idx += 1
    (w1, b1, a1, g1, be1, wd, bd, a2, g2, be2, ws, bs) = refs[idx:idx + 12]
    idx += 12
    if with_residual:
        wr, br = refs[idx:idx + 2]; idx += 2
        xout_ref = refs[idx]; idx += 1
    out_ref = refs[idx]; idx += 1

    x = x_ref[0]                                      # (T, C)  f32 or bf16
    t = x.shape[0]
    inv_n = 1.0 / (t * H_CH)

    # --- 1x1 conv C -> H on the MXU (bf16 in, f32 accumulate) ---------------
    y = jnp.dot(x.astype(jnp.bfloat16), w1[...],
                preferred_element_type=jnp.float32) + b1[...]
    # PReLU (scalar slope from SMEM)
    y = jnp.where(y > 0, y, y * a1[0, 0])
    # GroupNorm(num_groups=1), two-pass (mean then centered variance)
    mean1 = jnp.sum(y) * inv_n
    d1 = y - mean1
    var1 = jnp.sum(d1 * d1) * inv_n
    y = d1 * jax.lax.rsqrt(var1 + GN_EPS) * g1[...] + be1[...]

    # --- depthwise conv, kernel=3, padding=1 along time ---------------------
    zero_row = jnp.zeros((1, H_CH), jnp.float32)
    y_pad = jnp.concatenate([zero_row, y, zero_row], axis=0)     # (T+2, H)
    z = (y_pad[0:t] * wd[0:1, :]
         + y_pad[1:t + 1] * wd[1:2, :]
         + y_pad[2:t + 2] * wd[2:3, :]) + bd[...]
    z = jnp.where(z > 0, z, z * a2[0, 0])
    mean2 = jnp.sum(z) * inv_n
    d2 = z - mean2
    var2 = jnp.sum(d2 * d2) * inv_n
    z = d2 * jax.lax.rsqrt(var2 + GN_EPS) * g2[...] + be2[...]

    # --- skip / residual 1x1 convs H -> C (MXU) ------------------------------
    zb = z.astype(jnp.bfloat16)
    sk = jnp.dot(zb, ws[...], preferred_element_type=jnp.float32) + bs[...]
    if scale_skip:
        sk = sk * c_ref[0]                 # (1, C) broadcast over time
    if acc_mask:
        sk = sk + mask_in_ref[0]           # running mask accumulation
    if decode:
        # fused decoder: (mask * encoded) @ w_dec_pad (lane-dense 128 output)
        masked = sk * enc_ref[0].astype(jnp.float32)
        out_ref[0] = jnp.dot(masked.astype(jnp.bfloat16), wdec_ref[...],
                             preferred_element_type=jnp.float32)
    else:
        out_ref[0] = sk
    if with_residual:
        res = jnp.dot(zb, wr[...], preferred_element_type=jnp.float32) + br[...]
        xout_ref[0] = x.astype(jnp.float32) + res      # fused residual add


def conv_block(x, p, *, with_residual, mask_in=None, c=None,
               encoded=None, w_dec_pad=None):
    bt, t, ch = x.shape
    h = p['w1'].shape[1]
    acc_mask = mask_in is not None
    scale_skip = c is not None
    decode = encoded is not None

    def wspec(shape):
        return pl.BlockSpec(shape, lambda b, _n=len(shape): (0,) * _n)

    data_spec = pl.BlockSpec((1, t, ch), lambda b: (b, 0, 0))
    smem_spec = pl.BlockSpec(memory_space=pltpu.MemorySpace.SMEM)

    in_specs = [data_spec]
    args = [x]
    if acc_mask:
        in_specs.append(data_spec)
        args.append(mask_in)
    if scale_skip:
        in_specs.append(pl.BlockSpec((1, 1, ch), lambda b: (b, 0, 0)))
        args.append(c.reshape(bt, 1, ch))
    if decode:
        in_specs.append(data_spec)
        args.append(encoded)
        in_specs.append(wspec((ch, w_dec_pad.shape[1])))
        args.append(w_dec_pad)

    in_specs += [wspec((ch, h)), wspec((1, h)), smem_spec,
                 wspec((1, h)), wspec((1, h)),
                 wspec((P, h)), wspec((1, h)), smem_spec,
                 wspec((1, h)), wspec((1, h)),
                 wspec((h, ch)), wspec((1, ch))]
    args += [p['w1'], p['b1'], p['a1'], p['g1'], p['be1'],
             p['wd'], p['bd'], p['a2'], p['g2'], p['be2'],
             p['ws'], p['bs']]
    if with_residual:
        in_specs += [wspec((h, ch)), wspec((1, ch))]
        args += [p['wr'], p['br']]

    out_width = w_dec_pad.shape[1] if decode else ch
    out_specs = []
    out_shapes = []
    if with_residual:
        out_specs.append(data_spec)
        out_shapes.append(jax.ShapeDtypeStruct((bt, t, ch), jnp.float32))
    out_specs.append(pl.BlockSpec((1, t, out_width), lambda b: (b, 0, 0)))
    out_shapes.append(jax.ShapeDtypeStruct((bt, t, out_width), jnp.float32))

    kernel = functools.partial(_conv_block_kernel,
                               with_residual, acc_mask, scale_skip, decode)
    outs = pl.pallas_call(
        kernel,
        grid=(bt,),
        in_specs=in_specs,
        out_specs=tuple(out_specs) if len(out_specs) > 1 else out_specs[0],
        out_shape=tuple(out_shapes) if len(out_shapes) > 1 else out_shapes[0],
        compiler_params=pltpu.CompilerParams(
            dimension_semantics=("parallel",),
            vmem_limit_bytes=_vmem_limit()),
    )(*args)

    if with_residual:
        x_out, mask_out = outs
        return x_out, mask_out
    return None, outs


# ============================ parameters ====================================

def init_params(key, o_vector_length):
    keys = jax.random.split(key, 8)

    def nrm(k, shape, fan_in):
        return jax.random.normal(k, shape, jnp.float32) * (fan_in ** -0.5)

    def conv_block_params(k, no_residual):
        ks = jax.random.split(k, 4)
        p = {
            'w1': nrm(ks[0], (B_CH, H_CH), B_CH),
            'b1': jnp.zeros((1, H_CH), jnp.float32),
            'a1': jnp.full((1, 1), 0.25, jnp.float32),          # PReLU default
            'g1': jnp.ones((1, H_CH), jnp.float32),
            'be1': jnp.zeros((1, H_CH), jnp.float32),
            'wd': nrm(ks[1], (P, H_CH), P),
            'bd': jnp.zeros((1, H_CH), jnp.float32),
            'a2': jnp.full((1, 1), 0.25, jnp.float32),
            'g2': jnp.ones((1, H_CH), jnp.float32),
            'be2': jnp.zeros((1, H_CH), jnp.float32),
            'ws': nrm(ks[2], (H_CH, B_CH), H_CH),
            'bs': jnp.zeros((1, B_CH), jnp.float32),
        }
        if not no_residual:
            p['wr'] = nrm(ks[3], (H_CH, B_CH), H_CH)
            p['br'] = jnp.zeros((1, B_CH), jnp.float32)
        return p

    return {
        'w_enc': nrm(keys[0], (L, N), L),            # Conv1d(1,N,L) weight, (k, out)
        'w_dec': nrm(keys[1], (N, L), N),            # ConvTranspose1d(N,1,L), (in, k)
        'w_emb': nrm(keys[2], (o_vector_length, D), o_vector_length),
        'b_emb': jnp.zeros((1, D), jnp.float32),
        'before_o': conv_block_params(keys[3], True),
        'after_o': [conv_block_params(keys[4 + i], i == 2) for i in range(3)],
    }


def prepare_params(p):
    """One-time prep outside the jitted forward: bf16 copies of all matmul
    weights and the 128-lane padded decoder matrix (no per-call cast kernels)."""
    def prep_block(bp):
        q = dict(bp)
        q['w1'] = bp['w1'].astype(jnp.bfloat16)
        q['ws'] = bp['ws'].astype(jnp.bfloat16)
        if 'wr' in bp:
            q['wr'] = bp['wr'].astype(jnp.bfloat16)
        return q

    return {
        'w_enc': p['w_enc'].astype(jnp.bfloat16),
        'w_emb': p['w_emb'],
        'b_emb': p['b_emb'],
        'w_dec_pad': jnp.pad(p['w_dec'],
                             ((0, 0), (0, LANE - L))).astype(jnp.bfloat16),
        'before_o': prep_block(p['before_o']),
        'after_o': [prep_block(bp) for bp in p['after_o']],
    }


# ============================ forward =======================================

def model_forward(params, y, o):
    bt = y.shape[0]
    t_samp = y.shape[-1]
    # TODO(synk): encoder im2col + final trim assume t_samp % 10 == 0 (as does
    #             the PyTorch length arithmetic for an exact round trip).
    assert t_samp % ENC_STRIDE == 0, "t_samples must be a multiple of 10"
    t_enc = t_samp // ENC_STRIDE + 1

    # encoder: Conv1d(1, N, L=20, stride=10, padding=10, bias=False)
    # frame-pair im2col (two slices + concat, no gather), then tiled matmul.
    # Output kept bf16: it is only consumed as a bf16 matmul operand.
    y_pad = jnp.pad(y[:, 0, :], ((0, 0), (ENC_STRIDE, ENC_STRIDE)))
    blocks = y_pad.reshape(bt, t_enc + 1, ENC_STRIDE)
    patches = jnp.concatenate([blocks[:, :-1], blocks[:, 1:]], axis=-1)
    encoded = pallas_matmul(
        patches.reshape(bt * t_enc, L),
        params['w_enc'],
        out_dtype=jnp.bfloat16,
    ).reshape(bt, t_enc, N)

    # embedding: Linear(o_len, D) — tiny, plain XLA dot (no kernel overhead)
    c = jnp.dot(o, params['w_emb']) + params['b_emb']          # (B, D) f32

    # before_o ConvBlock (no residual), with Z = skip * c fused in-kernel
    _, z = conv_block(encoded, params['before_o'], with_residual=False, c=c)

    # after_o ConvBlocks: residual add and mask accumulation fused in-kernel;
    # the last block also fuses mask*encoded and the decoder matmul.
    x, mask = conv_block(z, params['after_o'][0], with_residual=True)
    x, mask = conv_block(x, params['after_o'][1], with_residual=True,
                         mask_in=mask)
    _, frames_full = conv_block(x, params['after_o'][2], with_residual=False,
                                mask_in=mask, encoded=encoded,
                                w_dec_pad=params['w_dec_pad'])   # (B, T, 128)
    frames = frames_full[:, :, :L]

    # overlap-add (stride = L//2) + trim transpose-conv padding (XLA glue on a
    # small (B, T, 20) tensor)
    first, second = frames[:, :, :ENC_STRIDE], frames[:, :, ENC_STRIDE:]
    zero = jnp.zeros((bt, 1, ENC_STRIDE), jnp.float32)
    full = (jnp.concatenate([first, zero], axis=1)
            + jnp.concatenate([zero, second], axis=1))
    flat = full.reshape(bt, (t_enc + 1) * ENC_STRIDE)
    out = flat[:, ENC_STRIDE:t_enc * ENC_STRIDE]
    return out[:, None, :]                                     # (B, 1, T_samples)


# ============================ main ==========================================

if __name__ == "__main__":
    o_vector_length = 16
    batch = 2
    t_samples = 160           # -> T_enc = 17

    key = jax.random.PRNGKey(0)
    ky, ko, kp = jax.random.split(key, 3)
    y = jax.random.normal(ky, (batch, 1, t_samples), jnp.float32)
    o = jax.random.normal(ko, (batch, o_vector_length), jnp.float32)
    params = prepare_params(init_params(kp, o_vector_length))

    fwd = jax.jit(model_forward)
    out = fwd(params, y, o)
    jax.block_until_ready(out)
    assert out.shape == (batch, 1, t_samples), out.shape
    print("KERNEL_OK")
</pallas_src>

<mosaic_0001>
module attributes {stable_mosaic.version = 11 : i64} {
  func.func @_conv_block_kernel(%arg0: i32, %arg1: memref<1x17x256xf32, #tpu.memory_space<vmem>>, %arg2: memref<256x512xbf16, #tpu.memory_space<vmem>>, %arg3: memref<1x512xf32, #tpu.memory_space<vmem>>, %arg4: memref<1x1xf32, #tpu.memory_space<smem>>, %arg5: memref<1x512xf32, #tpu.memory_space<vmem>>, %arg6: memref<1x512xf32, #tpu.memory_space<vmem>>, %arg7: memref<3x512xf32, #tpu.memory_space<vmem>>, %arg8: memref<1x512xf32, #tpu.memory_space<vmem>>, %arg9: memref<1x1xf32, #tpu.memory_space<smem>>, %arg10: memref<1x512xf32, #tpu.memory_space<vmem>>, %arg11: memref<1x512xf32, #tpu.memory_space<vmem>>, %arg12: memref<512x256xbf16, #tpu.memory_space<vmem>>, %arg13: memref<1x256xf32, #tpu.memory_space<vmem>>, %arg14: memref<512x256xbf16, #tpu.memory_space<vmem>>, %arg15: memref<1x256xf32, #tpu.memory_space<vmem>>, %arg16: memref<1x17x256xf32, #tpu.memory_space<vmem>>, %arg17: memref<1x17x256xf32, #tpu.memory_space<vmem>>) attributes {dimension_semantics = [#tpu.dimension_semantics<parallel>], iteration_bounds = array<i64: 2>, scalar_prefetch = 0 : i64, scratch_operands = 0 : i64, tpu.core_type = #tpu.core_type<tc>, window_params = [{transform_indices = @transform_0, window_bounds = array<i64: 1, 17, 256>}, {pipeline_mode = #tpu.pipeline_mode<synchronous>, transform_indices = @transform_1, window_bounds = array<i64: 256, 512>}, {pipeline_mode = #tpu.pipeline_mode<synchronous>, transform_indices = @transform_2, window_bounds = array<i64: 1, 512>}, {transform_indices = @transform_3, window_bounds = array<i64: 1, 1>}, {pipeline_mode = #tpu.pipeline_mode<synchronous>, transform_indices = @transform_4, window_bounds = array<i64: 1, 512>}, {pipeline_mode = #tpu.pipeline_mode<synchronous>, transform_indices = @transform_5, window_bounds = array<i64: 1, 512>}, {pipeline_mode = #tpu.pipeline_mode<synchronous>, transform_indices = @transform_6, window_bounds = array<i64: 3, 512>}, {pipeline_mode = #tpu.pipeline_mode<synchronous>, transform_indices = @transform_7, window_bounds = array<i64: 1, 512>}, {transform_indices = @transform_8, window_bounds = array<i64: 1, 1>}, {pipeline_mode = #tpu.pipeline_mode<synchronous>, transform_indices = @transform_9, window_bounds = array<i64: 1, 512>}, {pipeline_mode = #tpu.pipeline_mode<synchronous>, transform_indices = @transform_10, window_bounds = array<i64: 1, 512>}, {pipeline_mode = #tpu.pipeline_mode<synchronous>, transform_indices = @transform_11, window_bounds = array<i64: 512, 256>}, {pipeline_mode = #tpu.pipeline_mode<synchronous>, transform_indices = @transform_12, window_bounds = array<i64: 1, 256>}, {pipeline_mode = #tpu.pipeline_mode<synchronous>, transform_indices = @transform_13, window_bounds = array<i64: 512, 256>}, {pipeline_mode = #tpu.pipeline_mode<synchronous>, transform_indices = @transform_14, window_bounds = array<i64: 1, 256>}, {transform_indices = @transform_15, window_bounds = array<i64: 1, 17, 256>}, {transform_indices = @transform_16, window_bounds = array<i64: 1, 17, 256>}]} {
    %c0 = arith.constant 0 : index
    %c0_0 = arith.constant 0 : index
    %c0_1 = arith.constant 0 : index
    %0 = vector.load %arg1[%c0, %c0_0, %c0_1] : memref<1x17x256xf32, #tpu.memory_space<vmem>>, vector<1x17x256xf32>
    %1 = vector.shape_cast %0 : vector<1x17x256xf32> to vector<17x256xf32>
    %2 = arith.truncf %1 : vector<17x256xf32> to vector<17x256xbf16>
    %c0_2 = arith.constant 0 : index
    %c0_3 = arith.constant 0 : index
    %3 = vector.load %arg2[%c0_2, %c0_3] : memref<256x512xbf16, #tpu.memory_space<vmem>>, vector<256x512xbf16>
    %cst = arith.constant dense<0.000000e+00> : vector<17x512xf32>
    %4 = tpu.matmul %2, %3, %cst {dimension_numbers = #tpu.dot_dimension_numbers<[1], [0], [0], [1], [0, 0, 1, 1], [], []>} : vector<17x256xbf16>, vector<256x512xbf16>, vector<17x512xf32> -> vector<17x512xf32>
    %c0_4 = arith.constant 0 : index
    %c0_5 = arith.constant 0 : index
    %5 = vector.load %arg3[%c0_4, %c0_5] : memref<1x512xf32, #tpu.memory_space<vmem>>, vector<1x512xf32>
    %6 = vector.broadcast %5 : vector<1x512xf32> to vector<17x512xf32>
    %7 = arith.addf %4, %6 : vector<17x512xf32>
    %cst_6 = arith.constant 0.000000e+00 : f32
    %8 = vector.broadcast %cst_6 : f32 to vector<17x512xf32>
    %9 = arith.cmpf ogt, %7, %8 : vector<17x512xf32>
    %c0_7 = arith.constant 0 : index
    %c0_8 = arith.constant 0 : index
    %10 = memref.load %arg4[%c0_7, %c0_8] : memref<1x1xf32, #tpu.memory_space<smem>>
    %11 = vector.broadcast %10 : f32 to vector<17x512xf32>
    %12 = arith.mulf %7, %11 : vector<17x512xf32>
    %13 = arith.select %9, %7, %12 : vector<17x512xi1>, vector<17x512xf32>
    %14 = vector.shape_cast %13 : vector<17x512xf32> to vector<1x17x512xf32>
    %cst_9 = arith.constant dense<0.000000e+00> : vector<1xf32>
    %15 = vector.multi_reduction <add>, %14, %cst_9 [1, 2] : vector<1x17x512xf32> to vector<1xf32>
    %16 = vector.shape_cast %15 : vector<1xf32> to vector<1x1x1xf32>
    %17 = vector.extract %16[0, 0, 0] : f32 from vector<1x1x1xf32>
    %cst_10 = arith.constant 1.14889706E-4 : f32
    %18 = arith.mulf %17, %cst_10 : f32
    %19 = vector.broadcast %18 : f32 to vector<17x512xf32>
    %20 = arith.subf %13, %19 : vector<17x512xf32>
    %21 = arith.mulf %20, %20 : vector<17x512xf32>
    %22 = vector.shape_cast %21 : vector<17x512xf32> to vector<1x17x512xf32>
    %cst_11 = arith.constant dense<0.000000e+00> : vector<1xf32>
    %23 = vector.multi_reduction <add>, %22, %cst_11 [1, 2] : vector<1x17x512xf32> to vector<1xf32>
    %24 = vector.shape_cast %23 : vector<1xf32> to vector<1x1x1xf32>
    %25 = vector.extract %24[0, 0, 0] : f32 from vector<1x1x1xf32>
    %cst_12 = arith.constant 1.14889706E-4 : f32
    %26 = arith.mulf %25, %cst_12 : f32
    %cst_13 = arith.constant 9.99999993E-9 : f32
    %27 = arith.addf %26, %cst_13 : f32
    %28 = math.rsqrt %27 : f32
    %29 = vector.broadcast %28 : f32 to vector<17x512xf32>
    %30 = arith.mulf %20, %29 : vector<17x512xf32>
    %c0_14 = arith.constant 0 : index
    %c0_15 = arith.constant 0 : index
    %31 = vector.load %arg5[%c0_14, %c0_15] : memref<1x512xf32, #tpu.memory_space<vmem>>, vector<1x512xf32>
    %32 = vector.broadcast %31 : vector<1x512xf32> to vector<17x512xf32>
    %33 = arith.mulf %30, %32 : vector<17x512xf32>
    %c0_16 = arith.constant 0 : index
    %c0_17 = arith.constant 0 : index
    %34 = vector.load %arg6[%c0_16, %c0_17] : memref<1x512xf32, #tpu.memory_space<vmem>>, vector<1x512xf32>
    %35 = vector.broadcast %34 : vector<1x512xf32> to vector<17x512xf32>
    %36 = arith.addf %33, %35 : vector<17x512xf32>
    %cst_18 = arith.constant 0.000000e+00 : f32
    %37 = vector.broadcast %cst_18 : f32 to vector<1x512xf32>
    %38 = tpu.concatenate %37, %36, %37 in 0 : vector<1x512xf32>, vector<17x512xf32>, vector<1x512xf32> -> vector<19x512xf32>
    %39 = vector.extract_strided_slice %38 {offsets = [0, 0], sizes = [17, 512], strides = [1, 1]} : vector<19x512xf32> to vector<17x512xf32>
    %c0_19 = arith.constant 0 : index
    %c0_20 = arith.constant 0 : index
    %40 = vector.load %arg7[%c0_19, %c0_20] : memref<3x512xf32, #tpu.memory_space<vmem>>, vector<1x512xf32>
    %41 = vector.broadcast %40 : vector<1x512xf32> to vector<17x512xf32>
    %42 = arith.mulf %39, %41 : vector<17x512xf32>
    %43 = vector.extract_strided_slice %38 {offsets = [1, 0], sizes = [17, 512], strides = [1, 1]} : vector<19x512xf32> to vector<17x512xf32>
    %c1 = arith.constant 1 : index
    %c0_21 = arith.constant 0 : index
    %44 = vector.load %arg7[%c1, %c0_21] : memref<3x512xf32, #tpu.memory_space<vmem>>, vector<1x512xf32>
    %45 = vector.broadcast %44 : vector<1x512xf32> to vector<17x512xf32>
    %46 = arith.mulf %43, %45 : vector<17x512xf32>
    %47 = arith.addf %42, %46 : vector<17x512xf32>
    %48 = vector.extract_strided_slice %38 {offsets = [2, 0], sizes = [17, 512], strides = [1, 1]} : vector<19x512xf32> to vector<17x512xf32>
    %c2 = arith.constant 2 : index
    %c0_22 = arith.constant 0 : index
    %49 = vector.load %arg7[%c2, %c0_22] : memref<3x512xf32, #tpu.memory_space<vmem>>, vector<1x512xf32>
    %50 = vector.broadcast %49 : vector<1x512xf32> to vector<17x512xf32>
    %51 = arith.mulf %48, %50 : vector<17x512xf32>
    %52 = arith.addf %47, %51 : vector<17x512xf32>
    %c0_23 = arith.constant 0 : index
    %c0_24 = arith.constant 0 : index
    %53 = vector.load %arg8[%c0_23, %c0_24] : memref<1x512xf32, #tpu.memory_space<vmem>>, vector<1x512xf32>
    %54 = vector.broadcast %53 : vector<1x512xf32> to vector<17x512xf32>
    %55 = arith.addf %52, %54 : vector<17x512xf32>
    %cst_25 = arith.constant 0.000000e+00 : f32
    %56 = vector.broadcast %cst_25 : f32 to vector<17x512xf32>
    %57 = arith.cmpf ogt, %55, %56 : vector<17x512xf32>
    %c0_26 = arith.constant 0 : index
    %c0_27 = arith.constant 0 : index
    %58 = memref.load %arg9[%c0_26, %c0_27] : memref<1x1xf32, #tpu.memory_space<smem>>
    %59 = vector.broadcast %58 : f32 to vector<17x512xf32>
    %60 = arith.mulf %55, %59 : vector<17x512xf32>
    %61 = arith.select %57, %55, %60 : vector<17x512xi1>, vector<17x512xf32>
    %62 = vector.shape_cast %61 : vector<17x512xf32> to vector<1x17x512xf32>
    %cst_28 = arith.constant dense<0.000000e+00> : vector<1xf32>
    %63 = vector.multi_reduction <add>, %62, %cst_28 [1, 2] : vector<1x17x512xf32> to vector<1xf32>
    %64 = vector.shape_cast %63 : vector<1xf32> to vector<1x1x1xf32>
    %65 = vector.extract %64[0, 0, 0] : f32 from vector<1x1x1xf32>
    %cst_29 = arith.constant 1.14889706E-4 : f32
    %66 = arith.mulf %65, %cst_29 : f32
    %67 = vector.broadcast %66 : f32 to vector<17x512xf32>
    %68 = arith.subf %61, %67 : vector<17x512xf32>
    %69 = arith.mulf %68, %68 : vector<17x512xf32>
    %70 = vector.shape_cast %69 : vector<17x512xf32> to vector<1x17x512xf32>
    %cst_30 = arith.constant dense<0.000000e+00> : vector<1xf32>
    %71 = vector.multi_reduction <add>, %70, %cst_30 [1, 2] : vector<1x17x512xf32> to vector<1xf32>
    %72 = vector.shape_cast %71 : vector<1xf32> to vector<1x1x1xf32>
    %73 = vector.extract %72[0, 0, 0] : f32 from vector<1x1x1xf32>
    %cst_31 = arith.constant 1.14889706E-4 : f32
    %74 = arith.mulf %73, %cst_31 : f32
    %cst_32 = arith.constant 9.99999993E-9 : f32
    %75 = arith.addf %74, %cst_32 : f32
    %76 = math.rsqrt %75 : f32
    %77 = vector.broadcast %76 : f32 to vector<17x512xf32>
    %78 = arith.mulf %68, %77 : vector<17x512xf32>
    %c0_33 = arith.constant 0 : index
    %c0_34 = arith.constant 0 : index
    %79 = vector.load %arg10[%c0_33, %c0_34] : memref<1x512xf32, #tpu.memory_space<vmem>>, vector<1x512xf32>
    %80 = vector.broadcast %79 : vector<1x512xf32> to vector<17x512xf32>
    %81 = arith.mulf %78, %80 : vector<17x512xf32>
    %c0_35 = arith.constant 0 : index
    %c0_36 = arith.constant 0 : index
    %82 = vector.load %arg11[%c0_35, %c0_36] : memref<1x512xf32, #tpu.memory_space<vmem>>, vector<1x512xf32>
    %83 = vector.broadcast %82 : vector<1x512xf32> to vector<17x512xf32>
    %84 = arith.addf %81, %83 : vector<17x512xf32>
    %85 = arith.truncf %84 : vector<17x512xf32> to vector<17x512xbf16>
    %c0_37 = arith.constant 0 : index
    %c0_38 = arith.constant 0 : index
    %86 = vector.load %arg12[%c0_37, %c0_38] : memref<512x256xbf16, #tpu.memory_space<vmem>>, vector<512x256xbf16>
    %cst_39 = arith.constant dense<0.000000e+00> : vector<17x256xf32>
    %87 = tpu.matmul %85, %86, %cst_39 {dimension_numbers = #tpu.dot_dimension_numbers<[1], [0], [0], [1], [0, 0, 1, 1], [], []>} : vector<17x512xbf16>, vector<512x256xbf16>, vector<17x256xf32> -> vector<17x256xf32>
    %c0_40 = arith.constant 0 : index
    %c0_41 = arith.constant 0 : index
    %88 = vector.load %arg13[%c0_40, %c0_41] : memref<1x256xf32, #tpu.memory_space<vmem>>, vector<1x256xf32>
    %89 = vector.broadcast %88 : vector<1x256xf32> to vector<17x256xf32>
    %90 = arith.addf %87, %89 : vector<17x256xf32>
    %c0_42 = arith.constant 0 : index
    %c0_43 = arith.constant 0 : index
    %c0_44 = arith.constant 0 : index
    %91 = vector.load %arg17[%c0_42, %c0_43, %c0_44] : memref<1x17x256xf32, #tpu.memory_space<vmem>>, vector<1x17x256xf32>
    %92 = vector.shape_cast %91 : vector<1x17x256xf32> to vector<17x256xf32>
    %93 = vector.shape_cast %90 : vector<17x256xf32> to vector<1x17x256xf32>
    tpu.vector_store %arg17[%c0_42, %c0_43, %c0_44], %93 {strides = array<i32>} : memref<1x17x256xf32, #tpu.memory_space<vmem>>, vector<1x17x256xf32>,
    %c0_45 = arith.constant 0 : index
    %c0_46 = arith.constant 0 : index
    %94 = vector.load %arg14[%c0_45, %c0_46] : memref<512x256xbf16, #tpu.memory_space<vmem>>, vector<512x256xbf16>
    %cst_47 = arith.constant dense<0.000000e+00> : vector<17x256xf32>
    %95 = tpu.matmul %85, %94, %cst_47 {dimension_numbers = #tpu.dot_dimension_numbers<[1], [0], [0], [1], [0, 0, 1, 1], [], []>} : vector<17x512xbf16>, vector<512x256xbf16>, vector<17x256xf32> -> vector<17x256xf32>
    %c0_48 = arith.constant 0 : index
    %c0_49 = arith.constant 0 : index
    %96 = vector.load %arg15[%c0_48, %c0_49] : memref<1x256xf32, #tpu.memory_space<vmem>>, vector<1x256xf32>
    %97 = vector.broadcast %96 : vector<1x256xf32> to vector<17x256xf32>
    %98 = arith.addf %95, %97 : vector<17x256xf32>
    %99 = arith.addf %1, %98 : vector<17x256xf32>
    %c0_50 = arith.constant 0 : index
    %c0_51 = arith.constant 0 : index
    %c0_52 = arith.constant 0 : index
    %100 = vector.load %arg16[%c0_50, %c0_51, %c0_52] : memref<1x17x256xf32, #tpu.memory_space<vmem>>, vector<1x17x256xf32>
    %101 = vector.shape_cast %100 : vector<1x17x256xf32> to vector<17x256xf32>
    %102 = vector.shape_cast %99 : vector<17x256xf32> to vector<1x17x256xf32>
    tpu.vector_store %arg16[%c0_50, %c0_51, %c0_52], %102 {strides = array<i32>} : memref<1x17x256xf32, #tpu.memory_space<vmem>>, vector<1x17x256xf32>,
    return
  }
  func.func @transform_0(%arg0: i32) -> (i32, i32, i32) {
    %c0_i32 = arith.constant 0 : i32
    %c0_i32_0 = arith.constant 0 : i32
    %c0_i32_1 = arith.constant 0 : i32
    return %arg0, %c0_i32, %c0_i32_0 : i32, i32, i32
  }
  func.func @transform_1(%arg0: i32) -> (i32, i32) {
    %c0_i32 = arith.constant 0 : i32
    %c0_i32_0 = arith.constant 0 : i32
    %c0_i32_1 = arith.constant 0 : i32
    return %c0_i32, %c0_i32_0 : i32, i32
  }
  func.func @transform_2(%arg0: i32) -> (i32, i32) {
    %c0_i32 = arith.constant 0 : i32
    %c0_i32_0 = arith.constant 0 : i32
    %c0_i32_1 = arith.constant 0 : i32
    return %c0_i32, %c0_i32_0 : i32, i32
  }
  func.func @transform_3(%arg0: i32) -> (i32, i32) {
    %c0_i32 = arith.constant 0 : i32
    %c0_i32_0 = arith.constant 0 : i32
    %c0_i32_1 = arith.constant 0 : i32
    return %c0_i32, %c0_i32_0 : i32, i32
  }
  func.func @transform_4(%arg0: i32) -> (i32, i32) {
    %c0_i32 = arith.constant 0 : i32
    %c0_i32_0 = arith.constant 0 : i32
    %c0_i32_1 = arith.constant 0 : i32
    return %c0_i32, %c0_i32_0 : i32, i32
  }
  func.func @transform_5(%arg0: i32) -> (i32, i32) {
    %c0_i32 = arith.constant 0 : i32
    %c0_i32_0 = arith.constant 0 : i32
    %c0_i32_1 = arith.constant 0 : i32
    return %c0_i32, %c0_i32_0 : i32, i32
  }
  func.func @transform_6(%arg0: i32) -> (i32, i32) {
    %c0_i32 = arith.constant 0 : i32
    %c0_i32_0 = arith.constant 0 : i32
    %c0_i32_1 = arith.constant 0 : i32
    return %c0_i32, %c0_i32_0 : i32, i32
  }
  func.func @transform_7(%arg0: i32) -> (i32, i32) {
    %c0_i32 = arith.constant 0 : i32
    %c0_i32_0 = arith.constant 0 : i32
    %c0_i32_1 = arith.constant 0 : i32
    return %c0_i32, %c0_i32_0 : i32, i32
  }
  func.func @transform_8(%arg0: i32) -> (i32, i32) {
    %c0_i32 = arith.constant 0 : i32
    %c0_i32_0 = arith.constant 0 : i32
    %c0_i32_1 = arith.constant 0 : i32
    return %c0_i32, %c0_i32_0 : i32, i32
  }
  func.func @transform_9(%arg0: i32) -> (i32, i32) {
    %c0_i32 = arith.constant 0 : i32
    %c0_i32_0 = arith.constant 0 : i32
    %c0_i32_1 = arith.constant 0 : i32
    return %c0_i32, %c0_i32_0 : i32, i32
  }
  func.func @transform_10(%arg0: i32) -> (i32, i32) {
    %c0_i32 = arith.constant 0 : i32
    %c0_i32_0 = arith.constant 0 : i32
    %c0_i32_1 = arith.constant 0 : i32
    return %c0_i32, %c0_i32_0 : i32, i32
  }
  func.func @transform_11(%arg0: i32) -> (i32, i32) {
    %c0_i32 = arith.constant 0 : i32
    %c0_i32_0 = arith.constant 0 : i32
    %c0_i32_1 = arith.constant 0 : i32
    return %c0_i32, %c0_i32_0 : i32, i32
  }
  func.func @transform_12(%arg0: i32) -> (i32, i32) {
    %c0_i32 = arith.constant 0 : i32
    %c0_i32_0 = arith.constant 0 : i32
    %c0_i32_1 = arith.constant 0 : i32
    return %c0_i32, %c0_i32_0 : i32, i32
  }
  func.func @transform_13(%arg0: i32) -> (i32, i32) {
    %c0_i32 = arith.constant 0 : i32
    %c0_i32_0 = arith.constant 0 : i32
    %c0_i32_1 = arith.constant 0 : i32
    return %c0_i32, %c0_i32_0 : i32, i32
  }
  func.func @transform_14(%arg0: i32) -> (i32, i32) {
    %c0_i32 = arith.constant 0 : i32
    %c0_i32_0 = arith.constant 0 : i32
    %c0_i32_1 = arith.constant 0 : i32
    return %c0_i32, %c0_i32_0 : i32, i32
  }
  func.func @transform_15(%arg0: i32) -> (i32, i32, i32) {
    %c0_i32 = arith.constant 0 : i32
    %c0_i32_0 = arith.constant 0 : i32
    %c0_i32_1 = arith.constant 0 : i32
    return %arg0, %c0_i32, %c0_i32_0 : i32, i32, i32
  }
  func.func @transform_16(%arg0: i32) -> (i32, i32, i32) {
    %c0_i32 = arith.constant 0 : i32
    %c0_i32_0 = arith.constant 0 : i32
    %c0_i32_1 = arith.constant 0 : i32
    return %arg0, %c0_i32, %c0_i32_0 : i32, i32, i32
  }
}

module attributes {stable_mosaic.version = 11 : i64} {
  func.func @_conv_block_kernel(%arg0: i32, %arg1: memref<1x17x256xbf16, #tpu.memory_space<vmem>>, %arg2: memref<1x1x256xf32, #tpu.memory_space<vmem>>, %arg3: memref<256x512xbf16, #tpu.memory_space<vmem>>, %arg4: memref<1x512xf32, #tpu.memory_space<vmem>>, %arg5: memref<1x1xf32, #tpu.memory_space<smem>>, %arg6: memref<1x512xf32, #tpu.memory_space<vmem>>, %arg7: memref<1x512xf32, #tpu.memory_space<vmem>>, %arg8: memref<3x512xf32, #tpu.memory_space<vmem>>, %arg9: memref<1x512xf32, #tpu.memory_space<vmem>>, %arg10: memref<1x1xf32, #tpu.memory_space<smem>>, %arg11: memref<1x512xf32, #tpu.memory_space<vmem>>, %arg12: memref<1x512xf32, #tpu.memory_space<vmem>>, %arg13: memref<512x256xbf16, #tpu.memory_space<vmem>>, %arg14: memref<1x256xf32, #tpu.memory_space<vmem>>, %arg15: memref<1x17x256xf32, #tpu.memory_space<vmem>>) attributes {dimension_semantics = [#tpu.dimension_semantics<parallel>], iteration_bounds = array<i64: 2>, scalar_prefetch = 0 : i64, scratch_operands = 0 : i64, tpu.core_type = #tpu.core_type<tc>, window_params = [{transform_indices = @transform_0, window_bounds = array<i64: 1, 17, 256>}, {transform_indices = @transform_1, window_bounds = array<i64: 1, 1, 256>}, {pipeline_mode = #tpu.pipeline_mode<synchronous>, transform_indices = @transform_2, window_bounds = array<i64: 256, 512>}, {pipeline_mode = #tpu.pipeline_mode<synchronous>, transform_indices = @transform_3, window_bounds = array<i64: 1, 512>}, {transform_indices = @transform_4, window_bounds = array<i64: 1, 1>}, {pipeline_mode = #tpu.pipeline_mode<synchronous>, transform_indices = @transform_5, window_bounds = array<i64: 1, 512>}, {pipeline_mode = #tpu.pipeline_mode<synchronous>, transform_indices = @transform_6, window_bounds = array<i64: 1, 512>}, {pipeline_mode = #tpu.pipeline_mode<synchronous>, transform_indices = @transform_7, window_bounds = array<i64: 3, 512>}, {pipeline_mode = #tpu.pipeline_mode<synchronous>, transform_indices = @transform_8, window_bounds = array<i64: 1, 512>}, {transform_indices = @transform_9, window_bounds = array<i64: 1, 1>}, {pipeline_mode = #tpu.pipeline_mode<synchronous>, transform_indices = @transform_10, window_bounds = array<i64: 1, 512>}, {pipeline_mode = #tpu.pipeline_mode<synchronous>, transform_indices = @transform_11, window_bounds = array<i64: 1, 512>}, {pipeline_mode = #tpu.pipeline_mode<synchronous>, transform_indices = @transform_12, window_bounds = array<i64: 512, 256>}, {pipeline_mode = #tpu.pipeline_mode<synchronous>, transform_indices = @transform_13, window_bounds = array<i64: 1, 256>}, {transform_indices = @transform_14, window_bounds = array<i64: 1, 17, 256>}]} {
    %c0 = arith.constant 0 : index
    %c0_0 = arith.constant 0 : index
    %c0_1 = arith.constant 0 : index
    %0 = vector.load %arg1[%c0, %c0_0, %c0_1] : memref<1x17x256xbf16, #tpu.memory_space<vmem>>, vector<1x17x256xbf16>
    %1 = vector.shape_cast %0 : vector<1x17x256xbf16> to vector<17x256xbf16>
    %c0_2 = arith.constant 0 : index
    %c0_3 = arith.constant 0 : index
    %2 = vector.load %arg3[%c0_2, %c0_3] : memref<256x512xbf16, #tpu.memory_space<vmem>>, vector<256x512xbf16>
    %cst = arith.constant dense<0.000000e+00> : vector<17x512xf32>
    %3 = tpu.matmul %1, %2, %cst {dimension_numbers = #tpu.dot_dimension_numbers<[1], [0], [0], [1], [0, 0, 1, 1], [], []>} : vector<17x256xbf16>, vector<256x512xbf16>, vector<17x512xf32> -> vector<17x512xf32>
    %c0_4 = arith.constant 0 : index
    %c0_5 = arith.constant 0 : index
    %4 = vector.load %arg4[%c0_4, %c0_5] : memref<1x512xf32, #tpu.memory_space<vmem>>, vector<1x512xf32>
    %5 = vector.broadcast %4 : vector<1x512xf32> to vector<17x512xf32>
    %6 = arith.addf %3, %5 : vector<17x512xf32>
    %cst_6 = arith.constant 0.000000e+00 : f32
    %7 = vector.broadcast %cst_6 : f32 to vector<17x512xf32>
    %8 = arith.cmpf ogt, %6, %7 : vector<17x512xf32>
    %c0_7 = arith.constant 0 : index
    %c0_8 = arith.constant 0 : index
    %9 = memref.load %arg5[%c0_7, %c0_8] : memref<1x1xf32, #tpu.memory_space<smem>>
    %10 = vector.broadcast %9 : f32 to vector<17x512xf32>
    %11 = arith.mulf %6, %10 : vector<17x512xf32>
    %12 = arith.select %8, %6, %11 : vector<17x512xi1>, vector<17x512xf32>
    %13 = vector.shape_cast %12 : vector<17x512xf32> to vector<1x17x512xf32>
    %cst_9 = arith.constant dense<0.000000e+00> : vector<1xf32>
    %14 = vector.multi_reduction <add>, %13, %cst_9 [1, 2] : vector<1x17x512xf32> to vector<1xf32>
    %15 = vector.shape_cast %14 : vector<1xf32> to vector<1x1x1xf32>
    %16 = vector.extract %15[0, 0, 0] : f32 from vector<1x1x1xf32>
    %cst_10 = arith.constant 1.14889706E-4 : f32
    %17 = arith.mulf %16, %cst_10 : f32
    %18 = vector.broadcast %17 : f32 to vector<17x512xf32>
    %19 = arith.subf %12, %18 : vector<17x512xf32>
    %20 = arith.mulf %19, %19 : vector<17x512xf32>
    %21 = vector.shape_cast %20 : vector<17x512xf32> to vector<1x17x512xf32>
    %cst_11 = arith.constant dense<0.000000e+00> : vector<1xf32>
    %22 = vector.multi_reduction <add>, %21, %cst_11 [1, 2] : vector<1x17x512xf32> to vector<1xf32>
    %23 = vector.shape_cast %22 : vector<1xf32> to vector<1x1x1xf32>
    %24 = vector.extract %23[0, 0, 0] : f32 from vector<1x1x1xf32>
    %cst_12 = arith.constant 1.14889706E-4 : f32
    %25 = arith.mulf %24, %cst_12 : f32
    %cst_13 = arith.constant 9.99999993E-9 : f32
    %26 = arith.addf %25, %cst_13 : f32
    %27 = math.rsqrt %26 : f32
    %28 = vector.broadcast %27 : f32 to vector<17x512xf32>
    %29 = arith.mulf %19, %28 : vector<17x512xf32>
    %c0_14 = arith.constant 0 : index
    %c0_15 = arith.constant 0 : index
    %30 = vector.load %arg6[%c0_14, %c0_15] : memref<1x512xf32, #tpu.memory_space<vmem>>, vector<1x512xf32>
    %31 = vector.broadcast %30 : vector<1x512xf32> to vector<17x512xf32>
    %32 = arith.mulf %29, %31 : vector<17x512xf32>
    %c0_16 = arith.constant 0 : index
    %c0_17 = arith.constant 0 : index
    %33 = vector.load %arg7[%c0_16, %c0_17] : memref<1x512xf32, #tpu.memory_space<vmem>>, vector<1x512xf32>
    %34 = vector.broadcast %33 : vector<1x512xf32> to vector<17x512xf32>
    %35 = arith.addf %32, %34 : vector<17x512xf32>
    %cst_18 = arith.constant 0.000000e+00 : f32
    %36 = vector.broadcast %cst_18 : f32 to vector<1x512xf32>
    %37 = tpu.concatenate %36, %35, %36 in 0 : vector<1x512xf32>, vector<17x512xf32>, vector<1x512xf32> -> vector<19x512xf32>
    %38 = vector.extract_strided_slice %37 {offsets = [0, 0], sizes = [17, 512], strides = [1, 1]} : vector<19x512xf32> to vector<17x512xf32>
    %c0_19 = arith.constant 0 : index
    %c0_20 = arith.constant 0 : index
    %39 = vector.load %arg8[%c0_19, %c0_20] : memref<3x512xf32, #tpu.memory_space<vmem>>, vector<1x512xf32>
    %40 = vector.broadcast %39 : vector<1x512xf32> to vector<17x512xf32>
    %41 = arith.mulf %38, %40 : vector<17x512xf32>
    %42 = vector.extract_strided_slice %37 {offsets = [1, 0], sizes = [17, 512], strides = [1, 1]} : vector<19x512xf32> to vector<17x512xf32>
    %c1 = arith.constant 1 : index
    %c0_21 = arith.constant 0 : index
    %43 = vector.load %arg8[%c1, %c0_21] : memref<3x512xf32, #tpu.memory_space<vmem>>, vector<1x512xf32>
    %44 = vector.broadcast %43 : vector<1x512xf32> to vector<17x512xf32>
    %45 = arith.mulf %42, %44 : vector<17x512xf32>
    %46 = arith.addf %41, %45 : vector<17x512xf32>
    %47 = vector.extract_strided_slice %37 {offsets = [2, 0], sizes = [17, 512], strides = [1, 1]} : vector<19x512xf32> to vector<17x512xf32>
    %c2 = arith.constant 2 : index
    %c0_22 = arith.constant 0 : index
    %48 = vector.load %arg8[%c2, %c0_22] : memref<3x512xf32, #tpu.memory_space<vmem>>, vector<1x512xf32>
    %49 = vector.broadcast %48 : vector<1x512xf32> to vector<17x512xf32>
    %50 = arith.mulf %47, %49 : vector<17x512xf32>
    %51 = arith.addf %46, %50 : vector<17x512xf32>
    %c0_23 = arith.constant 0 : index
    %c0_24 = arith.constant 0 : index
    %52 = vector.load %arg9[%c0_23, %c0_24] : memref<1x512xf32, #tpu.memory_space<vmem>>, vector<1x512xf32>
    %53 = vector.broadcast %52 : vector<1x512xf32> to vector<17x512xf32>
    %54 = arith.addf %51, %53 : vector<17x512xf32>
    %cst_25 = arith.constant 0.000000e+00 : f32
    %55 = vector.broadcast %cst_25 : f32 to vector<17x512xf32>
    %56 = arith.cmpf ogt, %54, %55 : vector<17x512xf32>
    %c0_26 = arith.constant 0 : index
    %c0_27 = arith.constant 0 : index
    %57 = memref.load %arg10[%c0_26, %c0_27] : memref<1x1xf32, #tpu.memory_space<smem>>
    %58 = vector.broadcast %57 : f32 to vector<17x512xf32>
    %59 = arith.mulf %54, %58 : vector<17x512xf32>
    %60 = arith.select %56, %54, %59 : vector<17x512xi1>, vector<17x512xf32>
    %61 = vector.shape_cast %60 : vector<17x512xf32> to vector<1x17x512xf32>
    %cst_28 = arith.constant dense<0.000000e+00> : vector<1xf32>
    %62 = vector.multi_reduction <add>, %61, %cst_28 [1, 2] : vector<1x17x512xf32> to vector<1xf32>
    %63 = vector.shape_cast %62 : vector<1xf32> to vector<1x1x1xf32>
    %64 = vector.extract %63[0, 0, 0] : f32 from vector<1x1x1xf32>
    %cst_29 = arith.constant 1.14889706E-4 : f32
    %65 = arith.mulf %64, %cst_29 : f32
    %66 = vector.broadcast %65 : f32 to vector<17x512xf32>
    %67 = arith.subf %60, %66 : vector<17x512xf32>
    %68 = arith.mulf %67, %67 : vector<17x512xf32>
    %69 = vector.shape_cast %68 : vector<17x512xf32> to vector<1x17x512xf32>
    %cst_30 = arith.constant dense<0.000000e+00> : vector<1xf32>
    %70 = vector.multi_reduction <add>, %69, %cst_30 [1, 2] : vector<1x17x512xf32> to vector<1xf32>
    %71 = vector.shape_cast %70 : vector<1xf32> to vector<1x1x1xf32>
    %72 = vector.extract %71[0, 0, 0] : f32 from vector<1x1x1xf32>
    %cst_31 = arith.constant 1.14889706E-4 : f32
    %73 = arith.mulf %72, %cst_31 : f32
    %cst_32 = arith.constant 9.99999993E-9 : f32
    %74 = arith.addf %73, %cst_32 : f32
    %75 = math.rsqrt %74 : f32
    %76 = vector.broadcast %75 : f32 to vector<17x512xf32>
    %77 = arith.mulf %67, %76 : vector<17x512xf32>
    %c0_33 = arith.constant 0 : index
    %c0_34 = arith.constant 0 : index
    %78 = vector.load %arg11[%c0_33, %c0_34] : memref<1x512xf32, #tpu.memory_space<vmem>>, vector<1x512xf32>
    %79 = vector.broadcast %78 : vector<1x512xf32> to vector<17x512xf32>
    %80 = arith.mulf %77, %79 : vector<17x512xf32>
    %c0_35 = arith.constant 0 : index
    %c0_36 = arith.constant 0 : index
    %81 = vector.load %arg12[%c0_35, %c0_36] : memref<1x512xf32, #tpu.memory_space<vmem>>, vector<1x512xf32>
    %82 = vector.broadcast %81 : vector<1x512xf32> to vector<17x512xf32>
    %83 = arith.addf %80, %82 : vector<17x512xf32>
    %84 = arith.truncf %83 : vector<17x512xf32> to vector<17x512xbf16>
    %c0_37 = arith.constant 0 : index
    %c0_38 = arith.constant 0 : index
    %85 = vector.load %arg13[%c0_37, %c0_38] : memref<512x256xbf16, #tpu.memory_space<vmem>>, vector<512x256xbf16>
    %cst_39 = arith.constant dense<0.000000e+00> : vector<17x256xf32>
    %86 = tpu.matmul %84, %85, %cst_39 {dimension_numbers = #tpu.dot_dimension_numbers<[1], [0], [0], [1], [0, 0, 1, 1], [], []>} : vector<17x512xbf16>, vector<512x256xbf16>, vector<17x256xf32> -> vector<17x256xf32>
    %c0_40 = arith.constant 0 : index
    %c0_41 = arith.constant 0 : index
    %87 = vector.load %arg14[%c0_40, %c0_41] : memref<1x256xf32, #tpu.memory_space<vmem>>, vector<1x256xf32>
    %88 = vector.broadcast %87 : vector<1x256xf32> to vector<17x256xf32>
    %89 = arith.addf %86, %88 : vector<17x256xf32>
    %c0_42 = arith.constant 0 : index
    %c0_43 = arith.constant 0 : index
    %c0_44 = arith.constant 0 : index
    %90 = vector.load %arg2[%c0_42, %c0_43, %c0_44] : memref<1x1x256xf32, #tpu.memory_space<vmem>>, vector<1x1x256xf32>
    %91 = vector.shape_cast %90 : vector<1x1x256xf32> to vector<1x256xf32>
    %92 = vector.broadcast %91 : vector<1x256xf32> to vector<17x256xf32>
    %93 = arith.mulf %89, %92 : vector<17x256xf32>
    %c0_45 = arith.constant 0 : index
    %c0_46 = arith.constant 0 : index
    %c0_47 = arith.constant 0 : index
    %94 = vector.load %arg15[%c0_45, %c0_46, %c0_47] : memref<1x17x256xf32, #tpu.memory_space<vmem>>, vector<1x17x256xf32>
    %95 = vector.shape_cast %94 : vector<1x17x256xf32> to vector<17x256xf32>
    %96 = vector.shape_cast %93 : vector<17x256xf32> to vector<1x17x256xf32>
    tpu.vector_store %arg15[%c0_45, %c0_46, %c0_47], %96 {strides = array<i32>} : memref<1x17x256xf32, #tpu.memory_space<vmem>>, vector<1x17x256xf32>,
    return
  }
  func.func @transform_0(%arg0: i32) -> (i32, i32, i32) {
    %c0_i32 = arith.constant 0 : i32
    %c0_i32_0 = arith.constant 0 : i32
    %c0_i32_1 = arith.constant 0 : i32
    return %arg0, %c0_i32, %c0_i32_0 : i32, i32, i32
  }
  func.func @transform_1(%arg0: i32) -> (i32, i32, i32) {
    %c0_i32 = arith.constant 0 : i32
    %c0_i32_0 = arith.constant 0 : i32
    %c0_i32_1 = arith.constant 0 : i32
    return %arg0, %c0_i32, %c0_i32_0 : i32, i32, i32
  }
  func.func @transform_2(%arg0: i32) -> (i32, i32) {
    %c0_i32 = arith.constant 0 : i32
    %c0_i32_0 = arith.constant 0 : i32
    %c0_i32_1 = arith.constant 0 : i32
    return %c0_i32, %c0_i32_0 : i32, i32
  }
  func.func @transform_3(%arg0: i32) -> (i32, i32) {
    %c0_i32 = arith.constant 0 : i32
    %c0_i32_0 = arith.constant 0 : i32
    %c0_i32_1 = arith.constant 0 : i32
    return %c0_i32, %c0_i32_0 : i32, i32
  }
  func.func @transform_4(%arg0: i32) -> (i32, i32) {
    %c0_i32 = arith.constant 0 : i32
    %c0_i32_0 = arith.constant 0 : i32
    %c0_i32_1 = arith.constant 0 : i32
    return %c0_i32, %c0_i32_0 : i32, i32
  }
  func.func @transform_5(%arg0: i32) -> (i32, i32) {
    %c0_i32 = arith.constant 0 : i32
    %c0_i32_0 = arith.constant 0 : i32
    %c0_i32_1 = arith.constant 0 : i32
    return %c0_i32, %c0_i32_0 : i32, i32
  }
  func.func @transform_6(%arg0: i32) -> (i32, i32) {
    %c0_i32 = arith.constant 0 : i32
    %c0_i32_0 = arith.constant 0 : i32
    %c0_i32_1 = arith.constant 0 : i32
    return %c0_i32, %c0_i32_0 : i32, i32
  }
  func.func @transform_7(%arg0: i32) -> (i32, i32) {
    %c0_i32 = arith.constant 0 : i32
    %c0_i32_0 = arith.constant 0 : i32
    %c0_i32_1 = arith.constant 0 : i32
    return %c0_i32, %c0_i32_0 : i32, i32
  }
  func.func @transform_8(%arg0: i32) -> (i32, i32) {
    %c0_i32 = arith.constant 0 : i32
    %c0_i32_0 = arith.constant 0 : i32
    %c0_i32_1 = arith.constant 0 : i32
    return %c0_i32, %c0_i32_0 : i32, i32
  }
  func.func @transform_9(%arg0: i32) -> (i32, i32) {
    %c0_i32 = arith.constant 0 : i32
    %c0_i32_0 = arith.constant 0 : i32
    %c0_i32_1 = arith.constant 0 : i32
    return %c0_i32, %c0_i32_0 : i32, i32
  }
  func.func @transform_10(%arg0: i32) -> (i32, i32) {
    %c0_i32 = arith.constant 0 : i32
    %c0_i32_0 = arith.constant 0 : i32
    %c0_i32_1 = arith.constant 0 : i32
    return %c0_i32, %c0_i32_0 : i32, i32
  }
  func.func @transform_11(%arg0: i32) -> (i32, i32) {
    %c0_i32 = arith.constant 0 : i32
    %c0_i32_0 = arith.constant 0 : i32
    %c0_i32_1 = arith.constant 0 : i32
    return %c0_i32, %c0_i32_0 : i32, i32
  }
  func.func @transform_12(%arg0: i32) -> (i32, i32) {
    %c0_i32 = arith.constant 0 : i32
    %c0_i32_0 = arith.constant 0 : i32
    %c0_i32_1 = arith.constant 0 : i32
    return %c0_i32, %c0_i32_0 : i32, i32
  }
  func.func @transform_13(%arg0: i32) -> (i32, i32) {
    %c0_i32 = arith.constant 0 : i32
    %c0_i32_0 = arith.constant 0 : i32
    %c0_i32_1 = arith.constant 0 : i32
    return %c0_i32, %c0_i32_0 : i32, i32
  }
  func.func @transform_14(%arg0: i32) -> (i32, i32, i32) {
    %c0_i32 = arith.constant 0 : i32
    %c0_i32_0 = arith.constant 0 : i32
    %c0_i32_1 = arith.constant 0 : i32
    return %arg0, %c0_i32, %c0_i32_0 : i32, i32, i32
  }
}

module attributes {stable_mosaic.version = 11 : i64} {
  func.func @_matmul_kernel(%arg0: i32, %arg1: memref<34x20xf32, #tpu.memory_space<vmem>>, %arg2: memref<20x256xbf16, #tpu.memory_space<vmem>>, %arg3: memref<34x256xbf16, #tpu.memory_space<vmem>>) attributes {dimension_semantics = [#tpu.dimension_semantics<parallel>], iteration_bounds = array<i64: 1>, scalar_prefetch = 0 : i64, scratch_operands = 0 : i64, tpu.core_type = #tpu.core_type<tc>, window_params = [{transform_indices = @transform_0, window_bounds = array<i64: 34, 20>}, {pipeline_mode = #tpu.pipeline_mode<synchronous>, transform_indices = @transform_1, window_bounds = array<i64: 20, 256>}, {transform_indices = @transform_2, window_bounds = array<i64: 34, 256>}]} {
    %c0 = arith.constant 0 : index
    %c0_0 = arith.constant 0 : index
    %0 = vector.load %arg1[%c0, %c0_0] : memref<34x20xf32, #tpu.memory_space<vmem>>, vector<34x20xf32>
    %c0_1 = arith.constant 0 : index
    %c0_2 = arith.constant 0 : index
    %1 = vector.load %arg2[%c0_1, %c0_2] : memref<20x256xbf16, #tpu.memory_space<vmem>>, vector<20x256xbf16>
    %2 = arith.truncf %0 : vector<34x20xf32> to vector<34x20xbf16>
    %cst = arith.constant dense<0.000000e+00> : vector<34x256xf32>
    %3 = tpu.matmul %2, %1, %cst {dimension_numbers = #tpu.dot_dimension_numbers<[1], [0], [0], [1], [0, 0, 1, 1], [], []>} : vector<34x20xbf16>, vector<20x256xbf16>, vector<34x256xf32> -> vector<34x256xf32>
    %4 = arith.truncf %3 : vector<34x256xf32> to vector<34x256xbf16>
    %c0_3 = arith.constant 0 : index
    %c0_4 = arith.constant 0 : index
    %5 = vector.load %arg3[%c0_3, %c0_4] : memref<34x256xbf16, #tpu.memory_space<vmem>>, vector<34x256xbf16>
    tpu.vector_store %arg3[%c0_3, %c0_4], %4 {strides = array<i32>} : memref<34x256xbf16, #tpu.memory_space<vmem>>, vector<34x256xbf16>,
    return
  }
  func.func @transform_0(%arg0: i32) -> (i32, i32) {
    %c0_i32 = arith.constant 0 : i32
    %c0_i32_0 = arith.constant 0 : i32
    return %arg0, %c0_i32 : i32, i32
  }
  func.func @transform_1(%arg0: i32) -> (i32, i32) {
    %c0_i32 = arith.constant 0 : i32
    %c0_i32_0 = arith.constant 0 : i32
    %c0_i32_1 = arith.constant 0 : i32
    return %c0_i32, %c0_i32_0 : i32, i32
  }
  func.func @transform_2(%arg0: i32) -> (i32, i32) {
    %c0_i32 = arith.constant 0 : i32
    %c0_i32_0 = arith.constant 0 : i32
    return %arg0, %c0_i32 : i32, i32
  }
}

module attributes {stable_mosaic.version = 11 : i64} {
  func.func @_conv_block_kernel(%arg0: i32, %arg1: memref<1x17x256xf32, #tpu.memory_space<vmem>>, %arg2: memref<1x17x256xf32, #tpu.memory_space<vmem>>, %arg3: memref<256x512xbf16, #tpu.memory_space<vmem>>, %arg4: memref<1x512xf32, #tpu.memory_space<vmem>>, %arg5: memref<1x1xf32, #tpu.memory_space<smem>>, %arg6: memref<1x512xf32, #tpu.memory_space<vmem>>, %arg7: memref<1x512xf32, #tpu.memory_space<vmem>>, %arg8: memref<3x512xf32, #tpu.memory_space<vmem>>, %arg9: memref<1x512xf32, #tpu.memory_space<vmem>>, %arg10: memref<1x1xf32, #tpu.memory_space<smem>>, %arg11: memref<1x512xf32, #tpu.memory_space<vmem>>, %arg12: memref<1x512xf32, #tpu.memory_space<vmem>>, %arg13: memref<512x256xbf16, #tpu.memory_space<vmem>>, %arg14: memref<1x256xf32, #tpu.memory_space<vmem>>, %arg15: memref<512x256xbf16, #tpu.memory_space<vmem>>, %arg16: memref<1x256xf32, #tpu.memory_space<vmem>>, %arg17: memref<1x17x256xf32, #tpu.memory_space<vmem>>, %arg18: memref<1x17x256xf32, #tpu.memory_space<vmem>>) attributes {dimension_semantics = [#tpu.dimension_semantics<parallel>], iteration_bounds = array<i64: 2>, scalar_prefetch = 0 : i64, scratch_operands = 0 : i64, tpu.core_type = #tpu.core_type<tc>, window_params = [{transform_indices = @transform_0, window_bounds = array<i64: 1, 17, 256>}, {transform_indices = @transform_1, window_bounds = array<i64: 1, 17, 256>}, {pipeline_mode = #tpu.pipeline_mode<synchronous>, transform_indices = @transform_2, window_bounds = array<i64: 256, 512>}, {pipeline_mode = #tpu.pipeline_mode<synchronous>, transform_indices = @transform_3, window_bounds = array<i64: 1, 512>}, {transform_indices = @transform_4, window_bounds = array<i64: 1, 1>}, {pipeline_mode = #tpu.pipeline_mode<synchronous>, transform_indices = @transform_5, window_bounds = array<i64: 1, 512>}, {pipeline_mode = #tpu.pipeline_mode<synchronous>, transform_indices = @transform_6, window_bounds = array<i64: 1, 512>}, {pipeline_mode = #tpu.pipeline_mode<synchronous>, transform_indices = @transform_7, window_bounds = array<i64: 3, 512>}, {pipeline_mode = #tpu.pipeline_mode<synchronous>, transform_indices = @transform_8, window_bounds = array<i64: 1, 512>}, {transform_indices = @transform_9, window_bounds = array<i64: 1, 1>}, {pipeline_mode = #tpu.pipeline_mode<synchronous>, transform_indices = @transform_10, window_bounds = array<i64: 1, 512>}, {pipeline_mode = #tpu.pipeline_mode<synchronous>, transform_indices = @transform_11, window_bounds = array<i64: 1, 512>}, {pipeline_mode = #tpu.pipeline_mode<synchronous>, transform_indices = @transform_12, window_bounds = array<i64: 512, 256>}, {pipeline_mode = #tpu.pipeline_mode<synchronous>, transform_indices = @transform_13, window_bounds = array<i64: 1, 256>}, {pipeline_mode = #tpu.pipeline_mode<synchronous>, transform_indices = @transform_14, window_bounds = array<i64: 512, 256>}, {pipeline_mode = #tpu.pipeline_mode<synchronous>, transform_indices = @transform_15, window_bounds = array<i64: 1, 256>}, {transform_indices = @transform_16, window_bounds = array<i64: 1, 17, 256>}, {transform_indices = @transform_17, window_bounds = array<i64: 1, 17, 256>}]} {
    %c0 = arith.constant 0 : index
    %c0_0 = arith.constant 0 : index
    %c0_1 = arith.constant 0 : index
    %0 = vector.load %arg1[%c0, %c0_0, %c0_1] : memref<1x17x256xf32, #tpu.memory_space<vmem>>, vector<1x17x256xf32>
    %1 = vector.shape_cast %0 : vector<1x17x256xf32> to vector<17x256xf32>
    %2 = arith.truncf %1 : vector<17x256xf32> to vector<17x256xbf16>
    %c0_2 = arith.constant 0 : index
    %c0_3 = arith.constant 0 : index
    %3 = vector.load %arg3[%c0_2, %c0_3] : memref<256x512xbf16, #tpu.memory_space<vmem>>, vector<256x512xbf16>
    %cst = arith.constant dense<0.000000e+00> : vector<17x512xf32>
    %4 = tpu.matmul %2, %3, %cst {dimension_numbers = #tpu.dot_dimension_numbers<[1], [0], [0], [1], [0, 0, 1, 1], [], []>} : vector<17x256xbf16>, vector<256x512xbf16>, vector<17x512xf32> -> vector<17x512xf32>
    %c0_4 = arith.constant 0 : index
    %c0_5 = arith.constant 0 : index
    %5 = vector.load %arg4[%c0_4, %c0_5] : memref<1x512xf32, #tpu.memory_space<vmem>>, vector<1x512xf32>
    %6 = vector.broadcast %5 : vector<1x512xf32> to vector<17x512xf32>
    %7 = arith.addf %4, %6 : vector<17x512xf32>
    %cst_6 = arith.constant 0.000000e+00 : f32
    %8 = vector.broadcast %cst_6 : f32 to vector<17x512xf32>
    %9 = arith.cmpf ogt, %7, %8 : vector<17x512xf32>
    %c0_7 = arith.constant 0 : index
    %c0_8 = arith.constant 0 : index
    %10 = memref.load %arg5[%c0_7, %c0_8] : memref<1x1xf32, #tpu.memory_space<smem>>
    %11 = vector.broadcast %10 : f32 to vector<17x512xf32>
    %12 = arith.mulf %7, %11 : vector<17x512xf32>
    %13 = arith.select %9, %7, %12 : vector<17x512xi1>, vector<17x512xf32>
    %14 = vector.shape_cast %13 : vector<17x512xf32> to vector<1x17x512xf32>
    %cst_9 = arith.constant dense<0.000000e+00> : vector<1xf32>
    %15 = vector.multi_reduction <add>, %14, %cst_9 [1, 2] : vector<1x17x512xf32> to vector<1xf32>
    %16 = vector.shape_cast %15 : vector<1xf32> to vector<1x1x1xf32>
    %17 = vector.extract %16[0, 0, 0] : f32 from vector<1x1x1xf32>
    %cst_10 = arith.constant 1.14889706E-4 : f32
    %18 = arith.mulf %17, %cst_10 : f32
    %19 = vector.broadcast %18 : f32 to vector<17x512xf32>
    %20 = arith.subf %13, %19 : vector<17x512xf32>
    %21 = arith.mulf %20, %20 : vector<17x512xf32>
    %22 = vector.shape_cast %21 : vector<17x512xf32> to vector<1x17x512xf32>
    %cst_11 = arith.constant dense<0.000000e+00> : vector<1xf32>
    %23 = vector.multi_reduction <add>, %22, %cst_11 [1, 2] : vector<1x17x512xf32> to vector<1xf32>
    %24 = vector.shape_cast %23 : vector<1xf32> to vector<1x1x1xf32>
    %25 = vector.extract %24[0, 0, 0] : f32 from vector<1x1x1xf32>
    %cst_12 = arith.constant 1.14889706E-4 : f32
    %26 = arith.mulf %25, %cst_12 : f32
    %cst_13 = arith.constant 9.99999993E-9 : f32
    %27 = arith.addf %26, %cst_13 : f32
    %28 = math.rsqrt %27 : f32
    %29 = vector.broadcast %28 : f32 to vector<17x512xf32>
    %30 = arith.mulf %20, %29 : vector<17x512xf32>
    %c0_14 = arith.constant 0 : index
    %c0_15 = arith.constant 0 : index
    %31 = vector.load %arg6[%c0_14, %c0_15] : memref<1x512xf32, #tpu.memory_space<vmem>>, vector<1x512xf32>
    %32 = vector.broadcast %31 : vector<1x512xf32> to vector<17x512xf32>
    %33 = arith.mulf %30, %32 : vector<17x512xf32>
    %c0_16 = arith.constant 0 : index
    %c0_17 = arith.constant 0 : index
    %34 = vector.load %arg7[%c0_16, %c0_17] : memref<1x512xf32, #tpu.memory_space<vmem>>, vector<1x512xf32>
    %35 = vector.broadcast %34 : vector<1x512xf32> to vector<17x512xf32>
    %36 = arith.addf %33, %35 : vector<17x512xf32>
    %cst_18 = arith.constant 0.000000e+00 : f32
    %37 = vector.broadcast %cst_18 : f32 to vector<1x512xf32>
    %38 = tpu.concatenate %37, %36, %37 in 0 : vector<1x512xf32>, vector<17x512xf32>, vector<1x512xf32> -> vector<19x512xf32>
    %39 = vector.extract_strided_slice %38 {offsets = [0, 0], sizes = [17, 512], strides = [1, 1]} : vector<19x512xf32> to vector<17x512xf32>
    %c0_19 = arith.constant 0 : index
    %c0_20 = arith.constant 0 : index
    %40 = vector.load %arg8[%c0_19, %c0_20] : memref<3x512xf32, #tpu.memory_space<vmem>>, vector<1x512xf32>
    %41 = vector.broadcast %40 : vector<1x512xf32> to vector<17x512xf32>
    %42 = arith.mulf %39, %41 : vector<17x512xf32>
    %43 = vector.extract_strided_slice %38 {offsets = [1, 0], sizes = [17, 512], strides = [1, 1]} : vector<19x512xf32> to vector<17x512xf32>
    %c1 = arith.constant 1 : index
    %c0_21 = arith.constant 0 : index
    %44 = vector.load %arg8[%c1, %c0_21] : memref<3x512xf32, #tpu.memory_space<vmem>>, vector<1x512xf32>
    %45 = vector.broadcast %44 : vector<1x512xf32> to vector<17x512xf32>
    %46 = arith.mulf %43, %45 : vector<17x512xf32>
    %47 = arith.addf %42, %46 : vector<17x512xf32>
    %48 = vector.extract_strided_slice %38 {offsets = [2, 0], sizes = [17, 512], strides = [1, 1]} : vector<19x512xf32> to vector<17x512xf32>
    %c2 = arith.constant 2 : index
    %c0_22 = arith.constant 0 : index
    %49 = vector.load %arg8[%c2, %c0_22] : memref<3x512xf32, #tpu.memory_space<vmem>>, vector<1x512xf32>
    %50 = vector.broadcast %49 : vector<1x512xf32> to vector<17x512xf32>
    %51 = arith.mulf %48, %50 : vector<17x512xf32>
    %52 = arith.addf %47, %51 : vector<17x512xf32>
    %c0_23 = arith.constant 0 : index
    %c0_24 = arith.constant 0 : index
    %53 = vector.load %arg9[%c0_23, %c0_24] : memref<1x512xf32, #tpu.memory_space<vmem>>, vector<1x512xf32>
    %54 = vector.broadcast %53 : vector<1x512xf32> to vector<17x512xf32>
    %55 = arith.addf %52, %54 : vector<17x512xf32>
    %cst_25 = arith.constant 0.000000e+00 : f32
    %56 = vector.broadcast %cst_25 : f32 to vector<17x512xf32>
    %57 = arith.cmpf ogt, %55, %56 : vector<17x512xf32>
    %c0_26 = arith.constant 0 : index
    %c0_27 = arith.constant 0 : index
    %58 = memref.load %arg10[%c0_26, %c0_27] : memref<1x1xf32, #tpu.memory_space<smem>>
    %59 = vector.broadcast %58 : f32 to vector<17x512xf32>
    %60 = arith.mulf %55, %59 : vector<17x512xf32>
    %61 = arith.select %57, %55, %60 : vector<17x512xi1>, vector<17x512xf32>
    %62 = vector.shape_cast %61 : vector<17x512xf32> to vector<1x17x512xf32>
    %cst_28 = arith.constant dense<0.000000e+00> : vector<1xf32>
    %63 = vector.multi_reduction <add>, %62, %cst_28 [1, 2] : vector<1x17x512xf32> to vector<1xf32>
    %64 = vector.shape_cast %63 : vector<1xf32> to vector<1x1x1xf32>
    %65 = vector.extract %64[0, 0, 0] : f32 from vector<1x1x1xf32>
    %cst_29 = arith.constant 1.14889706E-4 : f32
    %66 = arith.mulf %65, %cst_29 : f32
    %67 = vector.broadcast %66 : f32 to vector<17x512xf32>
    %68 = arith.subf %61, %67 : vector<17x512xf32>
    %69 = arith.mulf %68, %68 : vector<17x512xf32>
    %70 = vector.shape_cast %69 : vector<17x512xf32> to vector<1x17x512xf32>
    %cst_30 = arith.constant dense<0.000000e+00> : vector<1xf32>
    %71 = vector.multi_reduction <add>, %70, %cst_30 [1, 2] : vector<1x17x512xf32> to vector<1xf32>
    %72 = vector.shape_cast %71 : vector<1xf32> to vector<1x1x1xf32>
    %73 = vector.extract %72[0, 0, 0] : f32 from vector<1x1x1xf32>
    %cst_31 = arith.constant 1.14889706E-4 : f32
    %74 = arith.mulf %73, %cst_31 : f32
    %cst_32 = arith.constant 9.99999993E-9 : f32
    %75 = arith.addf %74, %cst_32 : f32
    %76 = math.rsqrt %75 : f32
    %77 = vector.broadcast %76 : f32 to vector<17x512xf32>
    %78 = arith.mulf %68, %77 : vector<17x512xf32>
    %c0_33 = arith.constant 0 : index
    %c0_34 = arith.constant 0 : index
    %79 = vector.load %arg11[%c0_33, %c0_34] : memref<1x512xf32, #tpu.memory_space<vmem>>, vector<1x512xf32>
    %80 = vector.broadcast %79 : vector<1x512xf32> to vector<17x512xf32>
    %81 = arith.mulf %78, %80 : vector<17x512xf32>
    %c0_35 = arith.constant 0 : index
    %c0_36 = arith.constant 0 : index
    %82 = vector.load %arg12[%c0_35, %c0_36] : memref<1x512xf32, #tpu.memory_space<vmem>>, vector<1x512xf32>
    %83 = vector.broadcast %82 : vector<1x512xf32> to vector<17x512xf32>
    %84 = arith.addf %81, %83 : vector<17x512xf32>
    %85 = arith.truncf %84 : vector<17x512xf32> to vector<17x512xbf16>
    %c0_37 = arith.constant 0 : index
    %c0_38 = arith.constant 0 : index
    %86 = vector.load %arg13[%c0_37, %c0_38] : memref<512x256xbf16, #tpu.memory_space<vmem>>, vector<512x256xbf16>
    %cst_39 = arith.constant dense<0.000000e+00> : vector<17x256xf32>
    %87 = tpu.matmul %85, %86, %cst_39 {dimension_numbers = #tpu.dot_dimension_numbers<[1], [0], [0], [1], [0, 0, 1, 1], [], []>} : vector<17x512xbf16>, vector<512x256xbf16>, vector<17x256xf32> -> vector<17x256xf32>
    %c0_40 = arith.constant 0 : index
    %c0_41 = arith.constant 0 : index
    %88 = vector.load %arg14[%c0_40, %c0_41] : memref<1x256xf32, #tpu.memory_space<vmem>>, vector<1x256xf32>
    %89 = vector.broadcast %88 : vector<1x256xf32> to vector<17x256xf32>
    %90 = arith.addf %87, %89 : vector<17x256xf32>
    %c0_42 = arith.constant 0 : index
    %c0_43 = arith.constant 0 : index
    %c0_44 = arith.constant 0 : index
    %91 = vector.load %arg2[%c0_42, %c0_43, %c0_44] : memref<1x17x256xf32, #tpu.memory_space<vmem>>, vector<1x17x256xf32>
    %92 = vector.shape_cast %91 : vector<1x17x256xf32> to vector<17x256xf32>
    %93 = arith.addf %90, %92 : vector<17x256xf32>
    %c0_45 = arith.constant 0 : index
    %c0_46 = arith.constant 0 : index
    %c0_47 = arith.constant 0 : index
    %94 = vector.load %arg18[%c0_45, %c0_46, %c0_47] : memref<1x17x256xf32, #tpu.memory_space<vmem>>, vector<1x17x256xf32>
    %95 = vector.shape_cast %94 : vector<1x17x256xf32> to vector<17x256xf32>
    %96 = vector.shape_cast %93 : vector<17x256xf32> to vector<1x17x256xf32>
    tpu.vector_store %arg18[%c0_45, %c0_46, %c0_47], %96 {strides = array<i32>} : memref<1x17x256xf32, #tpu.memory_space<vmem>>, vector<1x17x256xf32>,
    %c0_48 = arith.constant 0 : index
    %c0_49 = arith.constant 0 : index
    %97 = vector.load %arg15[%c0_48, %c0_49] : memref<512x256xbf16, #tpu.memory_space<vmem>>, vector<512x256xbf16>
    %cst_50 = arith.constant dense<0.000000e+00> : vector<17x256xf32>
    %98 = tpu.matmul %85, %97, %cst_50 {dimension_numbers = #tpu.dot_dimension_numbers<[1], [0], [0], [1], [0, 0, 1, 1], [], []>} : vector<17x512xbf16>, vector<512x256xbf16>, vector<17x256xf32> -> vector<17x256xf32>
    %c0_51 = arith.constant 0 : index
    %c0_52 = arith.constant 0 : index
    %99 = vector.load %arg16[%c0_51, %c0_52] : memref<1x256xf32, #tpu.memory_space<vmem>>, vector<1x256xf32>
    %100 = vector.broadcast %99 : vector<1x256xf32> to vector<17x256xf32>
    %101 = arith.addf %98, %100 : vector<17x256xf32>
    %102 = arith.addf %1, %101 : vector<17x256xf32>
    %c0_53 = arith.constant 0 : index
    %c0_54 = arith.constant 0 : index
    %c0_55 = arith.constant 0 : index
    %103 = vector.load %arg17[%c0_53, %c0_54, %c0_55] : memref<1x17x256xf32, #tpu.memory_space<vmem>>, vector<1x17x256xf32>
    %104 = vector.shape_cast %103 : vector<1x17x256xf32> to vector<17x256xf32>
    %105 = vector.shape_cast %102 : vector<17x256xf32> to vector<1x17x256xf32>
    tpu.vector_store %arg17[%c0_53, %c0_54, %c0_55], %105 {strides = array<i32>} : memref<1x17x256xf32, #tpu.memory_space<vmem>>, vector<1x17x256xf32>,
    return
  }
  func.func @transform_0(%arg0: i32) -> (i32, i32, i32) {
    %c0_i32 = arith.constant 0 : i32
    %c0_i32_0 = arith.constant 0 : i32
    %c0_i32_1 = arith.constant 0 : i32
    return %arg0, %c0_i32, %c0_i32_0 : i32, i32, i32
  }
  func.func @transform_1(%arg0: i32) -> (i32, i32, i32) {
    %c0_i32 = arith.constant 0 : i32
    %c0_i32_0 = arith.constant 0 : i32
    %c0_i32_1 = arith.constant 0 : i32
    return %arg0, %c0_i32, %c0_i32_0 : i32, i32, i32
  }
  func.func @transform_2(%arg0: i32) -> (i32, i32) {
    %c0_i32 = arith.constant 0 : i32
    %c0_i32_0 = arith.constant 0 : i32
    %c0_i32_1 = arith.constant 0 : i32
    return %c0_i32, %c0_i32_0 : i32, i32
  }
  func.func @transform_3(%arg0: i32) -> (i32, i32) {
    %c0_i32 = arith.constant 0 : i32
    %c0_i32_0 = arith.constant 0 : i32
    %c0_i32_1 = arith.constant 0 : i32
    return %c0_i32, %c0_i32_0 : i32, i32
  }
  func.func @transform_4(%arg0: i32) -> (i32, i32) {
    %c0_i32 = arith.constant 0 : i32
    %c0_i32_0 = arith.constant 0 : i32
    %c0_i32_1 = arith.constant 0 : i32
    return %c0_i32, %c0_i32_0 : i32, i32
  }
  func.func @transform_5(%arg0: i32) -> (i32, i32) {
    %c0_i32 = arith.constant 0 : i32
    %c0_i32_0 = arith.constant 0 : i32
    %c0_i32_1 = arith.constant 0 : i32
    return %c0_i32, %c0_i32_0 : i32, i32
  }
  func.func @transform_6(%arg0: i32) -> (i32, i32) {
    %c0_i32 = arith.constant 0 : i32
    %c0_i32_0 = arith.constant 0 : i32
    %c0_i32_1 = arith.constant 0 : i32
    return %c0_i32, %c0_i32_0 : i32, i32
  }
  func.func @transform_7(%arg0: i32) -> (i32, i32) {
    %c0_i32 = arith.constant 0 : i32
    %c0_i32_0 = arith.constant 0 : i32
    %c0_i32_1 = arith.constant 0 : i32
    return %c0_i32, %c0_i32_0 : i32, i32
  }
  func.func @transform_8(%arg0: i32) -> (i32, i32) {
    %c0_i32 = arith.constant 0 : i32
    %c0_i32_0 = arith.constant 0 : i32
    %c0_i32_1 = arith.constant 0 : i32
    return %c0_i32, %c0_i32_0 : i32, i32
  }
  func.func @transform_9(%arg0: i32) -> (i32, i32) {
    %c0_i32 = arith.constant 0 : i32
    %c0_i32_0 = arith.constant 0 : i32
    %c0_i32_1 = arith.constant 0 : i32
    return %c0_i32, %c0_i32_0 : i32, i32
  }
  func.func @transform_10(%arg0: i32) -> (i32, i32) {
    %c0_i32 = arith.constant 0 : i32
    %c0_i32_0 = arith.constant 0 : i32
    %c0_i32_1 = arith.constant 0 : i32
    return %c0_i32, %c0_i32_0 : i32, i32
  }
  func.func @transform_11(%arg0: i32) -> (i32, i32) {
    %c0_i32 = arith.constant 0 : i32
    %c0_i32_0 = arith.constant 0 : i32
    %c0_i32_1 = arith.constant 0 : i32
    return %c0_i32, %c0_i32_0 : i32, i32
  }
  func.func @transform_12(%arg0: i32) -> (i32, i32) {
    %c0_i32 = arith.constant 0 : i32
    %c0_i32_0 = arith.constant 0 : i32
    %c0_i32_1 = arith.constant 0 : i32
    return %c0_i32, %c0_i32_0 : i32, i32
  }
  func.func @transform_13(%arg0: i32) -> (i32, i32) {
    %c0_i32 = arith.constant 0 : i32
    %c0_i32_0 = arith.constant 0 : i32
    %c0_i32_1 = arith.constant 0 : i32
    return %c0_i32, %c0_i32_0 : i32, i32
  }
  func.func @transform_14(%arg0: i32) -> (i32, i32) {
    %c0_i32 = arith.constant 0 : i32
    %c0_i32_0 = arith.constant 0 : i32
    %c0_i32_1 = arith.constant 0 : i32
    return %c0_i32, %c0_i32_0 : i32, i32
  }
  func.func @transform_15(%arg0: i32) -> (i32, i32) {
    %c0_i32 = arith.constant 0 : i32
    %c0_i32_0 = arith.constant 0 : i32
    %c0_i32_1 = arith.constant 0 : i32
    return %c0_i32, %c0_i32_0 : i32, i32
  }
  func.func @transform_16(%arg0: i32) -> (i32, i32, i32) {
    %c0_i32 = arith.constant 0 : i32
    %c0_i32_0 = arith.constant 0 : i32
    %c0_i32_1 = arith.constant 0 : i32
    return %arg0, %c0_i32, %c0_i32_0 : i32, i32, i32
  }
  func.func @transform_17(%arg0: i32) -> (i32, i32, i32) {
    %c0_i32 = arith.constant 0 : i32
    %c0_i32_0 = arith.constant 0 : i32
    %c0_i32_1 = arith.constant 0 : i32
    return %arg0, %c0_i32, %c0_i32_0 : i32, i32, i32
  }
}

module attributes {stable_mosaic.version = 11 : i64} {
  func.func @_conv_block_kernel(%arg0: i32, %arg1: memref<1x17x256xf32, #tpu.memory_space<vmem>>, %arg2: memref<1x17x256xf32, #tpu.memory_space<vmem>>, %arg3: memref<1x17x256xbf16, #tpu.memory_space<vmem>>, %arg4: memref<256x128xbf16, #tpu.memory_space<vmem>>, %arg5: memref<256x512xbf16, #tpu.memory_space<vmem>>, %arg6: memref<1x512xf32, #tpu.memory_space<vmem>>, %arg7: memref<1x1xf32, #tpu.memory_space<smem>>, %arg8: memref<1x512xf32, #tpu.memory_space<vmem>>, %arg9: memref<1x512xf32, #tpu.memory_space<vmem>>, %arg10: memref<3x512xf32, #tpu.memory_space<vmem>>, %arg11: memref<1x512xf32, #tpu.memory_space<vmem>>, %arg12: memref<1x1xf32, #tpu.memory_space<smem>>, %arg13: memref<1x512xf32, #tpu.memory_space<vmem>>, %arg14: memref<1x512xf32, #tpu.memory_space<vmem>>, %arg15: memref<512x256xbf16, #tpu.memory_space<vmem>>, %arg16: memref<1x256xf32, #tpu.memory_space<vmem>>, %arg17: memref<1x17x128xf32, #tpu.memory_space<vmem>>) attributes {dimension_semantics = [#tpu.dimension_semantics<parallel>], iteration_bounds = array<i64: 2>, scalar_prefetch = 0 : i64, scratch_operands = 0 : i64, tpu.core_type = #tpu.core_type<tc>, window_params = [{transform_indices = @transform_0, window_bounds = array<i64: 1, 17, 256>}, {transform_indices = @transform_1, window_bounds = array<i64: 1, 17, 256>}, {transform_indices = @transform_2, window_bounds = array<i64: 1, 17, 256>}, {pipeline_mode = #tpu.pipeline_mode<synchronous>, transform_indices = @transform_3, window_bounds = array<i64: 256, 128>}, {pipeline_mode = #tpu.pipeline_mode<synchronous>, transform_indices = @transform_4, window_bounds = array<i64: 256, 512>}, {pipeline_mode = #tpu.pipeline_mode<synchronous>, transform_indices = @transform_5, window_bounds = array<i64: 1, 512>}, {transform_indices = @transform_6, window_bounds = array<i64: 1, 1>}, {pipeline_mode = #tpu.pipeline_mode<synchronous>, transform_indices = @transform_7, window_bounds = array<i64: 1, 512>}, {pipeline_mode = #tpu.pipeline_mode<synchronous>, transform_indices = @transform_8, window_bounds = array<i64: 1, 512>}, {pipeline_mode = #tpu.pipeline_mode<synchronous>, transform_indices = @transform_9, window_bounds = array<i64: 3, 512>}, {pipeline_mode = #tpu.pipeline_mode<synchronous>, transform_indices = @transform_10, window_bounds = array<i64: 1, 512>}, {transform_indices = @transform_11, window_bounds = array<i64: 1, 1>}, {pipeline_mode = #tpu.pipeline_mode<synchronous>, transform_indices = @transform_12, window_bounds = array<i64: 1, 512>}, {pipeline_mode = #tpu.pipeline_mode<synchronous>, transform_indices = @transform_13, window_bounds = array<i64: 1, 512>}, {pipeline_mode = #tpu.pipeline_mode<synchronous>, transform_indices = @transform_14, window_bounds = array<i64: 512, 256>}, {pipeline_mode = #tpu.pipeline_mode<synchronous>, transform_indices = @transform_15, window_bounds = array<i64: 1, 256>}, {transform_indices = @transform_16, window_bounds = array<i64: 1, 17, 128>}]} {
    %c0 = arith.constant 0 : index
    %c0_0 = arith.constant 0 : index
    %c0_1 = arith.constant 0 : index
    %0 = vector.load %arg1[%c0, %c0_0, %c0_1] : memref<1x17x256xf32, #tpu.memory_space<vmem>>, vector<1x17x256xf32>
    %1 = vector.shape_cast %0 : vector<1x17x256xf32> to vector<17x256xf32>
    %2 = arith.truncf %1 : vector<17x256xf32> to vector<17x256xbf16>
    %c0_2 = arith.constant 0 : index
    %c0_3 = arith.constant 0 : index
    %3 = vector.load %arg5[%c0_2, %c0_3] : memref<256x512xbf16, #tpu.memory_space<vmem>>, vector<256x512xbf16>
    %cst = arith.constant dense<0.000000e+00> : vector<17x512xf32>
    %4 = tpu.matmul %2, %3, %cst {dimension_numbers = #tpu.dot_dimension_numbers<[1], [0], [0], [1], [0, 0, 1, 1], [], []>} : vector<17x256xbf16>, vector<256x512xbf16>, vector<17x512xf32> -> vector<17x512xf32>
    %c0_4 = arith.constant 0 : index
    %c0_5 = arith.constant 0 : index
    %5 = vector.load %arg6[%c0_4, %c0_5] : memref<1x512xf32, #tpu.memory_space<vmem>>, vector<1x512xf32>
    %6 = vector.broadcast %5 : vector<1x512xf32> to vector<17x512xf32>
    %7 = arith.addf %4, %6 : vector<17x512xf32>
    %cst_6 = arith.constant 0.000000e+00 : f32
    %8 = vector.broadcast %cst_6 : f32 to vector<17x512xf32>
    %9 = arith.cmpf ogt, %7, %8 : vector<17x512xf32>
    %c0_7 = arith.constant 0 : index
    %c0_8 = arith.constant 0 : index
    %10 = memref.load %arg7[%c0_7, %c0_8] : memref<1x1xf32, #tpu.memory_space<smem>>
    %11 = vector.broadcast %10 : f32 to vector<17x512xf32>
    %12 = arith.mulf %7, %11 : vector<17x512xf32>
    %13 = arith.select %9, %7, %12 : vector<17x512xi1>, vector<17x512xf32>
    %14 = vector.shape_cast %13 : vector<17x512xf32> to vector<1x17x512xf32>
    %cst_9 = arith.constant dense<0.000000e+00> : vector<1xf32>
    %15 = vector.multi_reduction <add>, %14, %cst_9 [1, 2] : vector<1x17x512xf32> to vector<1xf32>
    %16 = vector.shape_cast %15 : vector<1xf32> to vector<1x1x1xf32>
    %17 = vector.extract %16[0, 0, 0] : f32 from vector<1x1x1xf32>
    %cst_10 = arith.constant 1.14889706E-4 : f32
    %18 = arith.mulf %17, %cst_10 : f32
    %19 = vector.broadcast %18 : f32 to vector<17x512xf32>
    %20 = arith.subf %13, %19 : vector<17x512xf32>
    %21 = arith.mulf %20, %20 : vector<17x512xf32>
    %22 = vector.shape_cast %21 : vector<17x512xf32> to vector<1x17x512xf32>
    %cst_11 = arith.constant dense<0.000000e+00> : vector<1xf32>
    %23 = vector.multi_reduction <add>, %22, %cst_11 [1, 2] : vector<1x17x512xf32> to vector<1xf32>
    %24 = vector.shape_cast %23 : vector<1xf32> to vector<1x1x1xf32>
    %25 = vector.extract %24[0, 0, 0] : f32 from vector<1x1x1xf32>
    %cst_12 = arith.constant 1.14889706E-4 : f32
    %26 = arith.mulf %25, %cst_12 : f32
    %cst_13 = arith.constant 9.99999993E-9 : f32
    %27 = arith.addf %26, %cst_13 : f32
    %28 = math.rsqrt %27 : f32
    %29 = vector.broadcast %28 : f32 to vector<17x512xf32>
    %30 = arith.mulf %20, %29 : vector<17x512xf32>
    %c0_14 = arith.constant 0 : index
    %c0_15 = arith.constant 0 : index
    %31 = vector.load %arg8[%c0_14, %c0_15] : memref<1x512xf32, #tpu.memory_space<vmem>>, vector<1x512xf32>
    %32 = vector.broadcast %31 : vector<1x512xf32> to vector<17x512xf32>
    %33 = arith.mulf %30, %32 : vector<17x512xf32>
    %c0_16 = arith.constant 0 : index
    %c0_17 = arith.constant 0 : index
    %34 = vector.load %arg9[%c0_16, %c0_17] : memref<1x512xf32, #tpu.memory_space<vmem>>, vector<1x512xf32>
    %35 = vector.broadcast %34 : vector<1x512xf32> to vector<17x512xf32>
    %36 = arith.addf %33, %35 : vector<17x512xf32>
    %cst_18 = arith.constant 0.000000e+00 : f32
    %37 = vector.broadcast %cst_18 : f32 to vector<1x512xf32>
    %38 = tpu.concatenate %37, %36, %37 in 0 : vector<1x512xf32>, vector<17x512xf32>, vector<1x512xf32> -> vector<19x512xf32>
    %39 = vector.extract_strided_slice %38 {offsets = [0, 0], sizes = [17, 512], strides = [1, 1]} : vector<19x512xf32> to vector<17x512xf32>
    %c0_19 = arith.constant 0 : index
    %c0_20 = arith.constant 0 : index
    %40 = vector.load %arg10[%c0_19, %c0_20] : memref<3x512xf32, #tpu.memory_space<vmem>>, vector<1x512xf32>
    %41 = vector.broadcast %40 : vector<1x512xf32> to vector<17x512xf32>
    %42 = arith.mulf %39, %41 : vector<17x512xf32>
    %43 = vector.extract_strided_slice %38 {offsets = [1, 0], sizes = [17, 512], strides = [1, 1]} : vector<19x512xf32> to vector<17x512xf32>
    %c1 = arith.constant 1 : index
    %c0_21 = arith.constant 0 : index
    %44 = vector.load %arg10[%c1, %c0_21] : memref<3x512xf32, #tpu.memory_space<vmem>>, vector<1x512xf32>
    %45 = vector.broadcast %44 : vector<1x512xf32> to vector<17x512xf32>
    %46 = arith.mulf %43, %45 : vector<17x512xf32>
    %47 = arith.addf %42, %46 : vector<17x512xf32>
    %48 = vector.extract_strided_slice %38 {offsets = [2, 0], sizes = [17, 512], strides = [1, 1]} : vector<19x512xf32> to vector<17x512xf32>
    %c2 = arith.constant 2 : index
    %c0_22 = arith.constant 0 : index
    %49 = vector.load %arg10[%c2, %c0_22] : memref<3x512xf32, #tpu.memory_space<vmem>>, vector<1x512xf32>
    %50 = vector.broadcast %49 : vector<1x512xf32> to vector<17x512xf32>
    %51 = arith.mulf %48, %50 : vector<17x512xf32>
    %52 = arith.addf %47, %51 : vector<17x512xf32>
    %c0_23 = arith.constant 0 : index
    %c0_24 = arith.constant 0 : index
    %53 = vector.load %arg11[%c0_23, %c0_24] : memref<1x512xf32, #tpu.memory_space<vmem>>, vector<1x512xf32>
    %54 = vector.broadcast %53 : vector<1x512xf32> to vector<17x512xf32>
    %55 = arith.addf %52, %54 : vector<17x512xf32>
    %cst_25 = arith.constant 0.000000e+00 : f32
    %56 = vector.broadcast %cst_25 : f32 to vector<17x512xf32>
    %57 = arith.cmpf ogt, %55, %56 : vector<17x512xf32>
    %c0_26 = arith.constant 0 : index
    %c0_27 = arith.constant 0 : index
    %58 = memref.load %arg12[%c0_26, %c0_27] : memref<1x1xf32, #tpu.memory_space<smem>>
    %59 = vector.broadcast %58 : f32 to vector<17x512xf32>
    %60 = arith.mulf %55, %59 : vector<17x512xf32>
    %61 = arith.select %57, %55, %60 : vector<17x512xi1>, vector<17x512xf32>
    %62 = vector.shape_cast %61 : vector<17x512xf32> to vector<1x17x512xf32>
    %cst_28 = arith.constant dense<0.000000e+00> : vector<1xf32>
    %63 = vector.multi_reduction <add>, %62, %cst_28 [1, 2] : vector<1x17x512xf32> to vector<1xf32>
    %64 = vector.shape_cast %63 : vector<1xf32> to vector<1x1x1xf32>
    %65 = vector.extract %64[0, 0, 0] : f32 from vector<1x1x1xf32>
    %cst_29 = arith.constant 1.14889706E-4 : f32
    %66 = arith.mulf %65, %cst_29 : f32
    %67 = vector.broadcast %66 : f32 to vector<17x512xf32>
    %68 = arith.subf %61, %67 : vector<17x512xf32>
    %69 = arith.mulf %68, %68 : vector<17x512xf32>
    %70 = vector.shape_cast %69 : vector<17x512xf32> to vector<1x17x512xf32>
    %cst_30 = arith.constant dense<0.000000e+00> : vector<1xf32>
    %71 = vector.multi_reduction <add>, %70, %cst_30 [1, 2] : vector<1x17x512xf32> to vector<1xf32>
    %72 = vector.shape_cast %71 : vector<1xf32> to vector<1x1x1xf32>
    %73 = vector.extract %72[0, 0, 0] : f32 from vector<1x1x1xf32>
    %cst_31 = arith.constant 1.14889706E-4 : f32
    %74 = arith.mulf %73, %cst_31 : f32
    %cst_32 = arith.constant 9.99999993E-9 : f32
    %75 = arith.addf %74, %cst_32 : f32
    %76 = math.rsqrt %75 : f32
    %77 = vector.broadcast %76 : f32 to vector<17x512xf32>
    %78 = arith.mulf %68, %77 : vector<17x512xf32>
    %c0_33 = arith.constant 0 : index
    %c0_34 = arith.constant 0 : index
    %79 = vector.load %arg13[%c0_33, %c0_34] : memref<1x512xf32, #tpu.memory_space<vmem>>, vector<1x512xf32>
    %80 = vector.broadcast %79 : vector<1x512xf32> to vector<17x512xf32>
    %81 = arith.mulf %78, %80 : vector<17x512xf32>
    %c0_35 = arith.constant 0 : index
    %c0_36 = arith.constant 0 : index
    %82 = vector.load %arg14[%c0_35, %c0_36] : memref<1x512xf32, #tpu.memory_space<vmem>>, vector<1x512xf32>
    %83 = vector.broadcast %82 : vector<1x512xf32> to vector<17x512xf32>
    %84 = arith.addf %81, %83 : vector<17x512xf32>
    %85 = arith.truncf %84 : vector<17x512xf32> to vector<17x512xbf16>
    %c0_37 = arith.constant 0 : index
    %c0_38 = arith.constant 0 : index
    %86 = vector.load %arg15[%c0_37, %c0_38] : memref<512x256xbf16, #tpu.memory_space<vmem>>, vector<512x256xbf16>
    %cst_39 = arith.constant dense<0.000000e+00> : vector<17x256xf32>
    %87 = tpu.matmul %85, %86, %cst_39 {dimension_numbers = #tpu.dot_dimension_numbers<[1], [0], [0], [1], [0, 0, 1, 1], [], []>} : vector<17x512xbf16>, vector<512x256xbf16>, vector<17x256xf32> -> vector<17x256xf32>
    %c0_40 = arith.constant 0 : index
    %c0_41 = arith.constant 0 : index
    %88 = vector.load %arg16[%c0_40, %c0_41] : memref<1x256xf32, #tpu.memory_space<vmem>>, vector<1x256xf32>
    %89 = vector.broadcast %88 : vector<1x256xf32> to vector<17x256xf32>
    %90 = arith.addf %87, %89 : vector<17x256xf32>
    %c0_42 = arith.constant 0 : index
    %c0_43 = arith.constant 0 : index
    %c0_44 = arith.constant 0 : index
    %91 = vector.load %arg2[%c0_42, %c0_43, %c0_44] : memref<1x17x256xf32, #tpu.memory_space<vmem>>, vector<1x17x256xf32>
    %92 = vector.shape_cast %91 : vector<1x17x256xf32> to vector<17x256xf32>
    %93 = arith.addf %90, %92 : vector<17x256xf32>
    %c0_45 = arith.constant 0 : index
    %c0_46 = arith.constant 0 : index
    %c0_47 = arith.constant 0 : index
    %94 = vector.load %arg3[%c0_45, %c0_46, %c0_47] : memref<1x17x256xbf16, #tpu.memory_space<vmem>>, vector<1x17x256xbf16>
    %95 = vector.shape_cast %94 : vector<1x17x256xbf16> to vector<17x256xbf16>
    %96 = arith.extf %95 : vector<17x256xbf16> to vector<17x256xf32>
    %97 = arith.mulf %93, %96 : vector<17x256xf32>
    %98 = arith.truncf %97 : vector<17x256xf32> to vector<17x256xbf16>
    %c0_48 = arith.constant 0 : index
    %c0_49 = arith.constant 0 : index
    %99 = vector.load %arg4[%c0_48, %c0_49] : memref<256x128xbf16, #tpu.memory_space<vmem>>, vector<256x128xbf16>
    %cst_50 = arith.constant dense<0.000000e+00> : vector<17x128xf32>
    %100 = tpu.matmul %98, %99, %cst_50 {dimension_numbers = #tpu.dot_dimension_numbers<[1], [0], [0], [1], [0, 0, 1, 1], [], []>} : vector<17x256xbf16>, vector<256x128xbf16>, vector<17x128xf32> -> vector<17x128xf32>
    %c0_51 = arith.constant 0 : index
    %c0_52 = arith.constant 0 : index
    %c0_53 = arith.constant 0 : index
    %101 = vector.load %arg17[%c0_51, %c0_52, %c0_53] : memref<1x17x128xf32, #tpu.memory_space<vmem>>, vector<1x17x128xf32>
    %102 = vector.shape_cast %101 : vector<1x17x128xf32> to vector<17x128xf32>
    %103 = vector.shape_cast %100 : vector<17x128xf32> to vector<1x17x128xf32>
    tpu.vector_store %arg17[%c0_51, %c0_52, %c0_53], %103 {strides = array<i32>} : memref<1x17x128xf32, #tpu.memory_space<vmem>>, vector<1x17x128xf32>,
    return
  }
  func.func @transform_0(%arg0: i32) -> (i32, i32, i32) {
    %c0_i32 = arith.constant 0 : i32
    %c0_i32_0 = arith.constant 0 : i32
    %c0_i32_1 = arith.constant 0 : i32
    return %arg0, %c0_i32, %c0_i32_0 : i32, i32, i32
  }
  func.func @transform_1(%arg0: i32) -> (i32, i32, i32) {
    %c0_i32 = arith.constant 0 : i32
    %c0_i32_0 = arith.constant 0 : i32
    %c0_i32_1 = arith.constant 0 : i32
    return %arg0, %c0_i32, %c0_i32_0 : i32, i32, i32
  }
  func.func @transform_2(%arg0: i32) -> (i32, i32, i32) {
    %c0_i32 = arith.constant 0 : i32
    %c0_i32_0 = arith.constant 0 : i32
    %c0_i32_1 = arith.constant 0 : i32
    return %arg0, %c0_i32, %c0_i32_0 : i32, i32, i32
  }
  func.func @transform_3(%arg0: i32) -> (i32, i32) {
    %c0_i32 = arith.constant 0 : i32
    %c0_i32_0 = arith.constant 0 : i32
    %c0_i32_1 = arith.constant 0 : i32
    return %c0_i32, %c0_i32_0 : i32, i32
  }
  func.func @transform_4(%arg0: i32) -> (i32, i32) {
    %c0_i32 = arith.constant 0 : i32
    %c0_i32_0 = arith.constant 0 : i32
    %c0_i32_1 = arith.constant 0 : i32
    return %c0_i32, %c0_i32_0 : i32, i32
  }
  func.func @transform_5(%arg0: i32) -> (i32, i32) {
    %c0_i32 = arith.constant 0 : i32
    %c0_i32_0 = arith.constant 0 : i32
    %c0_i32_1 = arith.constant 0 : i32
    return %c0_i32, %c0_i32_0 : i32, i32
  }
  func.func @transform_6(%arg0: i32) -> (i32, i32) {
    %c0_i32 = arith.constant 0 : i32
    %c0_i32_0 = arith.constant 0 : i32
    %c0_i32_1 = arith.constant 0 : i32
    return %c0_i32, %c0_i32_0 : i32, i32
  }
  func.func @transform_7(%arg0: i32) -> (i32, i32) {
    %c0_i32 = arith.constant 0 : i32
    %c0_i32_0 = arith.constant 0 : i32
    %c0_i32_1 = arith.constant 0 : i32
    return %c0_i32, %c0_i32_0 : i32, i32
  }
  func.func @transform_8(%arg0: i32) -> (i32, i32) {
    %c0_i32 = arith.constant 0 : i32
    %c0_i32_0 = arith.constant 0 : i32
    %c0_i32_1 = arith.constant 0 : i32
    return %c0_i32, %c0_i32_0 : i32, i32
  }
  func.func @transform_9(%arg0: i32) -> (i32, i32) {
    %c0_i32 = arith.constant 0 : i32
    %c0_i32_0 = arith.constant 0 : i32
    %c0_i32_1 = arith.constant 0 : i32
    return %c0_i32, %c0_i32_0 : i32, i32
  }
  func.func @transform_10(%arg0: i32) -> (i32, i32) {
    %c0_i32 = arith.constant 0 : i32
    %c0_i32_0 = arith.constant 0 : i32
    %c0_i32_1 = arith.constant 0 : i32
    return %c0_i32, %c0_i32_0 : i32, i32
  }
  func.func @transform_11(%arg0: i32) -> (i32, i32) {
    %c0_i32 = arith.constant 0 : i32
    %c0_i32_0 = arith.constant 0 : i32
    %c0_i32_1 = arith.constant 0 : i32
    return %c0_i32, %c0_i32_0 : i32, i32
  }
  func.func @transform_12(%arg0: i32) -> (i32, i32) {
    %c0_i32 = arith.constant 0 : i32
    %c0_i32_0 = arith.constant 0 : i32
    %c0_i32_1 = arith.constant 0 : i32
    return %c0_i32, %c0_i32_0 : i32, i32
  }
  func.func @transform_13(%arg0: i32) -> (i32, i32) {
    %c0_i32 = arith.constant 0 : i32
    %c0_i32_0 = arith.constant 0 : i32
    %c0_i32_1 = arith.constant 0 : i32
    return %c0_i32, %c0_i32_0 : i32, i32
  }
  func.func @transform_14(%arg0: i32) -> (i32, i32) {
    %c0_i32 = arith.constant 0 : i32
    %c0_i32_0 = arith.constant 0 : i32
    %c0_i32_1 = arith.constant 0 : i32
    return %c0_i32, %c0_i32_0 : i32, i32
  }
  func.func @transform_15(%arg0: i32) -> (i32, i32) {
    %c0_i32 = arith.constant 0 : i32
    %c0_i32_0 = arith.constant 0 : i32
    %c0_i32_1 = arith.constant 0 : i32
    return %c0_i32, %c0_i32_0 : i32, i32
  }
  func.func @transform_16(%arg0: i32) -> (i32, i32, i32) {
    %c0_i32 = arith.constant 0 : i32
    %c0_i32_0 = arith.constant 0 : i32
    %c0_i32_1 = arith.constant 0 : i32
    return %arg0, %c0_i32, %c0_i32_0 : i32, i32, i32
  }
}

</mosaic_0001>

<bundles_post_ra>
// kernel: model_forward.5
= control target key start
LH: loop header
LB: loop body
LE: loop exit
PB: predicated region body
PF: predicated region fallthrough
CT: control target
= control target key end

     0   :  { %v185_v1 = vmov 0   ;;  %vm48_vm0 = vcmask 1041408   ;;  %vm38_vm1 = vcmask 162816   ;;  %s240_s1 = inlined_call_operand.vmem [shape: bf16[20,256], index: 1, kind: input, shape index: {}]   ;;  %s241_s0 = inlined_call_operand.vmem [shape: f32[34,20], index: 0, kind: input, shape index: {}]   ;;  %s242_s2 = inlined_call_operand.vmem [shape: bf16[34,256], index: 2, kind: output, shape index: {}]  }
   0x1   :  { %v19_v0 = vld [vmem:[%s240_s1 + $0x10] sm:$0x33]  ;;  %97 = vmatprep.mubr.bf16.mxu1 %v185_v1  ;;  %87 = vmatprep.mubr.bf16.mxu0 %v185_v1  ;;  %v180_v2 = vld [vmem:[%s240_s1 + $0x4] ss:$8 sps:$4 sm:$0xff]   ;;  %v182_v3 = vld [vmem:[%s240_s1] ss:$8 sps:$4 sm:$0xff]  }
   0x2   :  { %v160_v4 = vcombine.high %v19_v0, %v19_v0  ;;  %v159_v5 = vcombine.low %v19_v0, %v19_v0  ;;  %175 = vmatprep.subr.bf16.mxu1 %v180_v2  ;;  %55 = vmatprep.subr.bf16.mxu0 %v180_v2  ;;  %v14_v6 = vld [vmem:[%s241_s0 + $0x10] sm:$0xff]  ;;  %v15_v7 = vld [vmem:[%s241_s0 + $0x18] sm:$0xff]  ;;  %v12_v8 = vld [vmem:[%s241_s0] sm:$0xff] }
   0x3   :  { %177 = vmatpush1.bf16.msra.mxu1 %v182_v3  ;;  %56 = vmatpush1.bf16.msra.mxu0 %v182_v3  ;;  %v13_v9 = vld [vmem:[%s241_s0 + $0x8] sm:$0xff]  ;;  %v21_v11 = vpack.c.bf16 %v15_v7, %v14_v6  ;;  %v16_v13 = vld [vmem:[%s241_s0 + $0x20] sm:$0x3] }
   0x4   :  { %176 = vmatprep.subr.msk.bf16.mxu1 %vm48_vm0, %v160_v4  ;;  %v50_v10 = vsel %vm48_vm0, %v159_v5, 0  ;;  %161 = vmatprep.subr.msk.bf16.mxu0 %vm48_vm0, %v160_v4  ;;  %v20_v12 = vpack.c.bf16 %v13_v9, %v12_v8  ;;  %v22_v14 = vpack.c.bf16 %v16_v13, %v16_v13 }
   0x7   :  { %178 = vmatpush1.bf16.msra.mxu1 %v50_v10  ;;  %58 = vmatpush1.bf16.msra.mxu0 %v50_v10 }
   0xa   :  { %163 = vmatmul.mubr.msk.bf16.vlgmr.msra.gmra.mrb[0].mxu1 %vm38_vm1, %v21_v11  ;;  %162 = vmatmul.mubr.msk.bf16.vlgmr.msra.gmra.mrb[0].mxu0 %vm38_vm1, %v20_v12 }
   0xb   :  { %107 = vmatprep.mubr.bf16.mxu1 %v185_v1 }
  0x12   :  { %164 = vmatmul.mubr.msk.bf16.gmra.mrb[4].mxu1 %vm38_vm1, %v22_v14 }
  0xdd   :  { %v99_v15 = vpop.f32.mrb[0].mxu1  ;;  %v89_v16 = vpop.f32.mrb[0].mxu0 }
  0xde   :  { %v101_v17 = vpop.f32.mrb[1].mxu1  ;;  %v91_v18 = vpop.f32.mrb[1].mxu0 }
  0xdf   :  { %v172_v19 = vpack.c.bf16 %v101_v17, %v99_v15  ;;  %v103_v20 = vpop.f32.mrb[2].mxu1  ;;  %v170_v21 = vpack.c.bf16 %v91_v18, %v89_v16  ;;  %v93_v22 = vpop.f32.mrb[2].mxu0 }
  0xe0   :  { %v105_v23 = vpop.f32.mrb[3].mxu1  ;;  %v95_v24 = vpop.f32.mrb[3].mxu0 }
  0xe1   :  { %150 = vst [vmem:[%s242_s2 + $0x10] sm:$0xff] %v172_v19  ;;  %v173_v25 = vpack.c.bf16 %v105_v23, %v103_v20  ;;  %148 = vst [vmem:[%s242_s2] sm:$0xff] %v170_v21  ;;  %v171_v26 = vpack.c.bf16 %v95_v24, %v93_v22 }
  0xe3   :  { %151 = vst [vmem:[%s242_s2 + $0x18] sm:$0xff] %v173_v25  ;;  %149 = vst [vmem:[%s242_s2 + $0x8] sm:$0xff] %v171_v26 }
  0xe5   :  { %v109_v27 = vpop.f32.mrb[4].mxu1 }
  0xe6   :  { %v111_v28 = vpop.f32.mrb[5].mxu1 }
  0xe7   :  { %v174_v29 = vpack.c.bf16 %v111_v28, %v109_v27  ;;  %v113_v30 = vpop.f32.mrb[6].mxu1 }
  0xe8   :  { %v114_v31 = vpop.f32.mrb[7].mxu1 }
  0xe9   :  { %152 = vst [vmem:[%s242_s2 + $0x20] sm:$0x11] %v174_v29 }

// kernel: model_forward.6
= control target key start
LH: loop header
LB: loop body
LE: loop exit
PB: predicated region body
PF: predicated region fallthrough
CT: control target
= control target key end

     0   :  { %s4574_s0 = inlined_call_operand.hbm [shape: bf16[2,17,256], index: 0, kind: input, shape index: {}]   ;;  %s4575_s1 = inlined_call_operand.hbm [shape: f32[2,1,256], index: 1, kind: input, shape index: {}]   ;;  %s4576_s2 = inlined_call_operand.hbm [shape: bf16[256,512], index: 2, kind: input, shape index: {}]   ;;  %s4577_s3 = inlined_call_operand.hbm [shape: f32[1,512], index: 3, kind: input, shape index: {}]   ;;  %s4578_s4 = inlined_call_operand.<no memory space> [shape: f32[1,1], index: 4, kind: input, shape index: {}]   ;;  %s4579_s5 = inlined_call_operand.hbm [shape: f32[1,512], index: 5, kind: input, shape index: {}]   ;;  %s4580_s6 = inlined_call_operand.hbm [shape: f32[1,512], index: 6, kind: input, shape index: {}]   ;;  %s4581_s7 = inlined_call_operand.hbm [shape: f32[3,512], index: 7, kind: input, shape index: {}]   ;;  %s4582_s8 = inlined_call_operand.hbm [shape: f32[1,512], index: 8, kind: input, shape index: {}]   ;;  %s4583_s9 = inlined_call_operand.<no memory space> [shape: f32[1,1], index: 9, kind: input, shape index: {}]   ;;  %s4584_s10 = inlined_call_operand.hbm [shape: f32[1,512], index: 10, kind: input, shape index: {}]   ;;  %s4585_s11 = inlined_call_operand.hbm [shape: f32[1,512], index: 11, kind: input, shape index: {}]   ;;  %s4586_s12 = inlined_call_operand.hbm [shape: bf16[512,256], index: 12, kind: input, shape index: {}]   ;;  %s4587_s13 = inlined_call_operand.hbm [shape: f32[1,256], index: 13, kind: input, shape index: {}]   ;;  %s4588_s14 = inlined_call_operand.hbm [shape: f32[2,17,256], index: 14, kind: output, shape index: {}]  }
   0x1   :  { %4599 = sst [smem:[#allocation35_spill]] %s4574_s0 }
   0x2   :  { %4600 = sst [smem:[#allocation36_spill]] %s4575_s1 }
   0x3   :  { %4601 = sst [smem:[#allocation37_spill]] %s4576_s2 }
   0x4   :  { %4602 = sst [smem:[#allocation38_spill]] %s4577_s3 }
   0x5   :  { %4603 = sst [smem:[#allocation39_spill]] %s4579_s5 }
   0x6   :  { %4604 = sst [smem:[#allocation40_spill]] %s4580_s6 }
   0x7   :  { %4605 = sst [smem:[#allocation41_spill]] %s4581_s7 }
   0x8   :  { %4606 = sst [smem:[#allocation42_spill]] %s4582_s8 }
   0x9   :  { %4607 = sst [smem:[#allocation43_spill]] %s4584_s10 }
   0xa   :  { %4608 = sst [smem:[#allocation44_spill]] %s4585_s11 }
   0xb   :  { %4609 = sst [smem:[#allocation45_spill]] %s4588_s14 }
   0xc   :  { %19 = sst [smem:[#allocation2]] %s4578_s4 }
   0xd   :  { %20 = sst [smem:[#allocation3]] %s4583_s9 }
   0xe   :  { %21 = vsyncpa [#allocation5], 0 }
   0xf   :  { %23 = vsyncpa [#allocation5 + $0x1], 0 }
  0x10   :  { %24 = vsyncpa [#allocation8], 0 }
  0x11   :  { %26 = vsyncpa [#allocation8 + $0x1], 0 }
  0x12   :  { %27 = vsyncpa [#allocation11], 0 }
  0x13   :  { %28 = vsyncpa [#allocation14], 0 }
  0x14   :  { %29 = vsyncpa [#allocation17], 0 }
  0x15   :  { %30 = vsyncpa [#allocation20], 0 }
  0x16   :  { %31 = vsyncpa [#allocation23], 0 }
  0x17   :  { %32 = vsyncpa [#allocation6], 0 }
  0x18   :  { %34 = vsyncpa [#allocation6 + $0x1], 0  ;;  %s3711_s17 = smov 0   ;;  %s3713_s18 = smov 0  }
  0x19   :  { %s3715_s4 = smov 0   ;;  %s3717_s19 = smov 0  }
  0x1a LB: > { %s3611_s9 = smov [#allocation9]   ;;  %s3732_s21 = sadd.s32 4294967295, %s3609_s19   ;;  %s3609_s19 = sphi %s3717_s19, %s4654_s19   ;;  %s3605_s4 = sphi %s3715_s4, %s4653_s4   ;;  %s3601_s18 = sphi %s3713_s18, %s4652_s18   ;;  %s3597_s17 = sphi %s3711_s17, %s4651_s17  }
  0x1b   : > { %s387_s20 = sshll.u32 %s3611_s9, 4  ;;  %p2621_p0 = scmp.ge.s32.totalorder %s3609_s19, 1  ;;  %s3737_s20 = int_to_ptr.vmem [resolvable:$true] %s387_s20 }
  0x1c   : > { %p4593_p1 = scmp.eq.s32.totalorder %s3732_s21, 0  ;;  %p375_p2 = scmp.lt.s32.totalorder %s3609_s19, 3 }
  0x1d   : > { %s3612_s23 = smov [#allocation10]   ;;  %s3613_s26 = smov [#allocation13]  }
  0x1e   : > { %p3739_p3 = pnand %p2621_p0, %p375_p2  ;;  %s401_s24 = sshll.u32 %s3612_s23, 4  ;;  %s3752_s24 = int_to_ptr.vmem [resolvable:$true] %s401_s24 }
  0x1f   : > { %s426_s27 = sshll.u32 %s3613_s26, 4  ;;  %s4613_s2 = sld [smem:[#allocation37_spill]]  ;;  %s3754_s27 = int_to_ptr.vmem [resolvable:$true] %s426_s27 }
  0x20   : > { %s4610_s22 = scalar_select %p3739_p3, 1, 0 }
  0x21   : > { %p2862_p5 = pneg %p3739_p3 }
  0x22   : > { %4611 = sst [smem:[#allocation34_spill]] %s4610_s22 }
  0x23   : > { %p3748_p6 = pnand %p2862_p5, %p4593_p1 }
  0x25   : > { %s3175_s30 = scalar_lea.hbm %s4613_s2, 8192  ;;  %p3764_p8 = pneg %p3748_p6 }
  0x26   : > { %p3176_p7 = scmp.ne.s32.totalorder %s4613_s2, %s3175_s30  ;;  %p3182_p11 = scmp.lt.u32.totalorder %s3175_s30, %s4613_s2 }
  0x28   : > { %p3178_p9 = pnand %p3764_p8, %p3176_p7 }
  0x2a   : > { %p3179_p10 = pneg %p3178_p9 }
  0x2c   : > { %p3184_p12 = pnand %p3182_p11, %p3179_p10 }
  0x2e   : > { %3187 = shalt.err (!%p3184_p12)
}
  0x2f   : > { %s3188_s28 = scalar_lea.vmem %s3737_s20, 8192  ;;  %p3196_p5 = scmp.lt.s32.totalorder %s3737_s20, %s3737_s20 }
  0x30   : > { %p3189_p13 = scmp.ne.s32.totalorder %s3737_s20, %s3188_s28  ;;  %p3197_p4 = scmp.lt.s32.totalorder %s3188_s28, %s3188_s28 }
  0x32   : > { %p3191_p0 = pnand %p3189_p13, %p3764_p8  ;;  %p3198_p7 = por %p3197_p4, %p3196_p5 }
  0x34   : > { %p3192_p2 = pneg %p3191_p0 }
  0x36   : > { %p3199_p9 = pnand %p3198_p7, %p3192_p2 }
  0x38   : > { %3202 = shalt.err (!%p3199_p9)
}
  0x39   : > { %s3614_s29 = smov 256   ;;  %s3615_s30 = smov 16  }
  0x3a   : > { %2865 = dma.hbm_to_vmem [thread:$0]  (!%p3748_p6), %s4613_s2, 8192, %s3737_s20, [#allocation8], %s3614_s29, %s3614_s29, %s3615_s30  }
  0x3b   : > { %s4615_s3 = sld [smem:[#allocation38_spill]] }
  0x41   : > { %s3203_s14 = scalar_lea.hbm %s4615_s3, 64 }
  0x42   : > { %p3204_p4 = scmp.ne.s32.totalorder %s4615_s3, %s3203_s14  ;;  %p3210_p12 = scmp.lt.u32.totalorder %s3203_s14, %s4615_s3 }
  0x44   : > { %p3206_p10 = pnand %p3204_p4, %p3764_p8 }
  0x46   : > { %p3207_p11 = pneg %p3206_p10 }
  0x48   : > { %p3212_p13 = pnand %p3210_p12, %p3207_p11 }
  0x4a   : > { %3215 = shalt.err (!%p3212_p13)
}
  0x4b   : > { %s3216_s20 = scalar_lea.vmem %s3752_s24, 64  ;;  %p3224_p7 = scmp.lt.s32.totalorder %s3752_s24, %s3752_s24 }
  0x4c   : > { %p3217_p0 = scmp.ne.s32.totalorder %s3752_s24, %s3216_s20  ;;  %p3225_p9 = scmp.lt.s32.totalorder %s3216_s20, %s3216_s20 }
  0x4e   : > { %p3219_p2 = pnand %p3217_p0, %p3764_p8  ;;  %p3226_p4 = por %p3225_p9, %p3224_p7 }
  0x50   : > { %p3220_p5 = pneg %p3219_p2 }
  0x52   : > { %p3227_p10 = pnand %p3226_p4, %p3220_p5 }
  0x54   : > { %3230 = shalt.err (!%p3227_p10)
}
  0x55   : > { %2868 = dma.hbm_to_vmem [thread:$0]  (!%p3748_p6), %s4615_s3, 64, %s3752_s24, [#allocation11]  }
  0x56   : > { %s4616_s6 = sld [smem:[#allocation40_spill]] }
  0x5c   : > { %s3231_s29 = scalar_lea.hbm %s4616_s6, 64 }
  0x5d   : > { %p3232_p11 = scmp.ne.s32.totalorder %s4616_s6, %s3231_s29  ;;  %p3238_p0 = scmp.lt.u32.totalorder %s3231_s29, %s4616_s6 }
  0x5f   : > { %p3234_p12 = pnand %p3232_p11, %p3764_p8 }
  0x61   : > { %p3235_p13 = pneg %p3234_p12 }
  0x63   : > { %p3240_p2 = pnand %p3238_p0, %p3235_p13 }
  0x65   : > { %3243 = shalt.err (!%p3240_p2)
}
  0x66   : > { %s3244_s24 = scalar_lea.vmem %s3754_s27, 64  ;;  %p3252_p4 = scmp.lt.s32.totalorder %s3754_s27, %s3754_s27 }
  0x67   : > { %p3245_p5 = scmp.ne.s32.totalorder %s3754_s27, %s3244_s24  ;;  %p3253_p10 = scmp.lt.s32.totalorder %s3244_s24, %s3244_s24 }
  0x69   : > { %p3247_p7 = pnand %p3245_p5, %p3764_p8  ;;  %p3254_p11 = por %p3253_p10, %p3252_p4 }
  0x6b   : > { %p3248_p9 = pneg %p3247_p7 }
  0x6d   : > { %p3255_p12 = pnand %p3254_p11, %p3248_p9 }
  0x6f   : > { %3258 = shalt.err (!%p3255_p12)
}
  0x70   : > { %2874 = dma.hbm_to_vmem [thread:$0]  (!%p3748_p6), %s4616_s6, 64, %s3754_s27, [#allocation14]  }
  0x71   : > { %s3616_s20 = smov [#allocation16]   ;;  %s3617_s1 = smov [#allocation19]  }
  0x72   : > { %s448_s0 = sshll.u32 %s3616_s20, 4  ;;  %s473_s14 = sshll.u32 %s3617_s1, 4  ;;  %s449_s0 = int_to_ptr.vmem [resolvable:$true] %s448_s0  ;;  %s474_s14 = int_to_ptr.vmem [resolvable:$true] %s473_s14 }
  0x73   : > { %s4617_s8 = sld [smem:[#allocation42_spill]] }
  0x79   : > { %s3259_s30 = scalar_lea.hbm %s4617_s8, 64 }
  0x7a   : > { %p3260_p13 = scmp.ne.s32.totalorder %s4617_s8, %s3259_s30  ;;  %p3266_p5 = scmp.lt.u32.totalorder %s3259_s30, %s4617_s8 }
  0x7c   : > { %p3262_p0 = pnand %p3260_p13, %p3764_p8 }
  0x7e   : > { %p3263_p2 = pneg %p3262_p0 }
  0x80   : > { %p3268_p7 = pnand %p3266_p5, %p3263_p2 }
  0x82   : > { %3271 = shalt.err (!%p3268_p7)
}
  0x83   : > { %s3272_s27 = scalar_lea.vmem %s449_s0, 64  ;;  %p3280_p11 = scmp.lt.s32.totalorder %s449_s0, %s449_s0 }
  0x84   : > { %p3273_p9 = scmp.ne.s32.totalorder %s449_s0, %s3272_s27  ;;  %p3281_p12 = scmp.lt.s32.totalorder %s3272_s27, %s3272_s27 }
  0x86   : > { %p3275_p4 = pnand %p3273_p9, %p3764_p8  ;;  %p3282_p1 = por %p3281_p12, %p3280_p11 }
  0x88   : > { %p3276_p10 = pneg %p3275_p4 }
  0x8a   : > { %p3283_p3 = pnand %p3282_p1, %p3276_p10 }
  0x8c   : > { %3286 = shalt.err (!%p3283_p3)
}
  0x8d   : > { %2880 = dma.hbm_to_vmem [thread:$0]  (!%p3748_p6), %s4617_s8, 64, %s449_s0, [#allocation17]  }
  0x8e   : > { %s4618_s11 = sld [smem:[#allocation44_spill]] }
  0x94   : > { %s3287_s22 = scalar_lea.hbm %s4618_s11, 64 }
  0x95   : > { %p3288_p13 = scmp.ne.s32.totalorder %s4618_s11, %s3287_s22  ;;  %p3294_p3 = scmp.lt.u32.totalorder %s3287_s22, %s4618_s11 }
  0x97   : > { %p3290_p0 = pnand %p3288_p13, %p3764_p8 }
  0x99   : > { %p3291_p1 = pneg %p3290_p0 }
  0x9b   : > { %p3296_p2 = pnand %p3294_p3, %p3291_p1 }
  0x9d   : > { %3299 = shalt.err (!%p3296_p2)
}
  0x9e   : > { %s3300_s23 = scalar_lea.vmem %s474_s14, 64  ;;  %p3308_p4 = scmp.lt.s32.totalorder %s474_s14, %s474_s14 }
  0x9f   : > { %p3301_p5 = scmp.ne.s32.totalorder %s474_s14, %s3300_s23  ;;  %p3309_p10 = scmp.lt.s32.totalorder %s3300_s23, %s3300_s23 }
  0xa1   : > { %p3303_p7 = pnand %p3301_p5, %p3764_p8  ;;  %p3310_p11 = por %p3309_p10, %p3308_p4 }
  0xa3   : > { %p3304_p9 = pneg %p3303_p7 }
  0xa5   : > { %p3311_p12 = pnand %p3310_p11, %p3304_p9 }
  0xa7   : > { %3314 = shalt.err (!%p3311_p12)
}
  0xa8   : > { %2886 = dma.hbm_to_vmem [thread:$0]  (!%p3748_p6), %s4618_s11, 64, %s474_s14, [#allocation20]  }
  0xa9   : > { %s3618_s27 = smov [#allocation12]   ;;  %s3619_s28 = smov [#allocation15]  }
  0xaa   : > { %s415_s26 = sshll.u32 %s3618_s27, 4  ;;  %s437_s20 = sshll.u32 %s3619_s28, 4  ;;  %s416_s26 = int_to_ptr.vmem [resolvable:$true] %s415_s26  ;;  %s438_s20 = int_to_ptr.vmem [resolvable:$true] %s437_s20 }
  0xab   : > { %s4619_s5 = sld [smem:[#allocation39_spill]] }
  0xb1   : > { %s3315_s29 = scalar_lea.hbm %s4619_s5, 64 }
  0xb2   : > { %p3316_p13 = scmp.ne.s32.totalorder %s4619_s5, %s3315_s29  ;;  %p3322_p3 = scmp.lt.u32.totalorder %s3315_s29, %s4619_s5 }
  0xb4   : > { %p3318_p0 = pnand %p3316_p13, %p3764_p8 }
  0xb6   : > { %p3319_p1 = pneg %p3318_p0 }
  0xb8   : > { %p3324_p2 = pnand %p3322_p3, %p3319_p1 }
  0xba   : > { %3327 = shalt.err (!%p3324_p2)
}
  0xbb   : > { %s3328_s14 = scalar_lea.vmem %s416_s26, 64  ;;  %p3336_p4 = scmp.lt.s32.totalorder %s416_s26, %s416_s26 }
  0xbc   : > { %p3329_p5 = scmp.ne.s32.totalorder %s416_s26, %s3328_s14  ;;  %p3337_p10 = scmp.lt.s32.totalorder %s3328_s14, %s3328_s14 }
  0xbe   : > { %p3331_p7 = pnand %p3329_p5, %p3764_p8  ;;  %p3338_p11 = por %p3337_p10, %p3336_p4 }
  0xc0   : > { %p3332_p9 = pneg %p3331_p7 }
  0xc2   : > { %p3339_p12 = pnand %p3338_p11, %p3332_p9 }
  0xc4   : > { %3342 = shalt.err (!%p3339_p12)
}
  0xc5   : > { %2871 = dma.hbm_to_vmem [thread:$0]  (!%p3748_p6), %s4619_s5, 64, %s416_s26, [#allocation11]  }
  0xc6   : > { %s4620_s7 = sld [smem:[#allocation41_spill]] }
  0xcc   : > { %s3343_s1 = scalar_lea.hbm %s4620_s7, 256 }
  0xcd   : > { %p3344_p13 = scmp.ne.s32.totalorder %s4620_s7, %s3343_s1  ;;  %p3350_p3 = scmp.lt.u32.totalorder %s3343_s1, %s4620_s7 }
  0xcf   : > { %p3346_p0 = pnand %p3344_p13, %p3764_p8 }
  0xd1   : > { %p3347_p1 = pneg %p3346_p0 }
  0xd3   : > { %p3352_p2 = pnand %p3350_p3, %p3347_p1 }
  0xd5   : > { %3355 = shalt.err (!%p3352_p2)
}
  0xd6   : > { %s3356_s16 = scalar_lea.vmem %s438_s20, 256  ;;  %p3364_p4 = scmp.lt.s32.totalorder %s438_s20, %s438_s20 }
  0xd7   : > { %p3357_p5 = scmp.ne.s32.totalorder %s438_s20, %s3356_s16  ;;  %p3365_p10 = scmp.lt.s32.totalorder %s3356_s16, %s3356_s16 }
  0xd9   : > { %p3359_p7 = pnand %p3357_p5, %p3764_p8  ;;  %p3366_p11 = por %p3365_p10, %p3364_p4 }
  0xdb   : > { %p3360_p9 = pneg %p3359_p7 }
  0xdd   : > { %p3367_p12 = pnand %p3366_p11, %p3360_p9 }
  0xdf   : > { %3370 = shalt.err (!%p3367_p12)
}
  0xe0   : > { %2877 = dma.hbm_to_vmem [thread:$0]  (!%p3748_p6), %s4620_s7, 256, %s438_s20, [#allocation14]  }
  0xe1   : > { %s3620_s14 = smov [#allocation18]   ;;  %s3621_s24 = smov [#allocation21]  }
  0xe2   : > { %s462_s0 = sshll.u32 %s3620_s14, 4  ;;  %s483_s27 = sshll.u32 %s3621_s24, 4  ;;  %s463_s0 = int_to_ptr.vmem [resolvable:$true] %s462_s0  ;;  %s484_s27 = int_to_ptr.vmem [resolvable:$true] %s483_s27 }
  0xe3   : > { %s4621_s10 = sld [smem:[#allocation43_spill]] }
  0xe9   : > { %s3371_s22 = scalar_lea.hbm %s4621_s10, 64 }
  0xea   : > { %p3372_p13 = scmp.ne.s32.totalorder %s4621_s10, %s3371_s22  ;;  %p3378_p3 = scmp.lt.u32.totalorder %s3371_s22, %s4621_s10 }
  0xec   : > { %p3374_p0 = pnand %p3372_p13, %p3764_p8 }
  0xee   : > { %p3375_p1 = pneg %p3374_p0 }
  0xf0   : > { %p3380_p2 = pnand %p3378_p3, %p3375_p1 }
  0xf2   : > { %3383 = shalt.err (!%p3380_p2)
}
  0xf3   : > { %s3384_s20 = scalar_lea.vmem %s463_s0, 64  ;;  %p3392_p4 = scmp.lt.s32.totalorder %s463_s0, %s463_s0 }
  0xf4   : > { %p3385_p5 = scmp.ne.s32.totalorder %s463_s0, %s3384_s20  ;;  %p3393_p10 = scmp.lt.s32.totalorder %s3384_s20, %s3384_s20 }
  0xf6   : > { %p3387_p7 = pnand %p3385_p5, %p3764_p8  ;;  %p3394_p11 = por %p3393_p10, %p3392_p4 }
  0xf8   : > { %p3388_p9 = pneg %p3387_p7 }
  0xfa   : > { %p3395_p12 = pnand %p3394_p11, %p3388_p9 }
  0xfc   : > { %3398 = shalt.err (!%p3395_p12)
}
  0xfd   : > { %2883 = dma.hbm_to_vmem [thread:$0]  (!%p3748_p6), %s4621_s10, 64, %s463_s0, [#allocation17]  }
  0xfe   : > { %s3399_s28 = scalar_lea.hbm %s4586_s12, 8192 }
  0xff   : > { %p3400_p13 = scmp.ne.s32.totalorder %s4586_s12, %s3399_s28  ;;  %p3406_p3 = scmp.lt.u32.totalorder %s3399_s28, %s4586_s12 }
 0x101   : > { %p3402_p0 = pnand %p3400_p13, %p3764_p8 }
 0x103   : > { %p3403_p1 = pneg %p3402_p0 }
 0x105   : > { %p3408_p2 = pnand %p3406_p3, %p3403_p1 }
 0x107   : > { %3411 = shalt.err (!%p3408_p2)
}
 0x108   : > { %s3412_s15 = scalar_lea.vmem %s484_s27, 8192  ;;  %p3420_p4 = scmp.lt.s32.totalorder %s484_s27, %s484_s27 }
 0x109   : > { %p3413_p5 = scmp.ne.s32.totalorder %s484_s27, %s3412_s15  ;;  %p3421_p10 = scmp.lt.s32.totalorder %s3412_s15, %s3412_s15 }
 0x10b   : > { %p3415_p7 = pnand %p3413_p5, %p3764_p8  ;;  %p3422_p11 = por %p3421_p10, %p3420_p4 }
 0x10d   : > { %p3416_p9 = pneg %p3415_p7 }
 0x10f   : > { %p3423_p12 = pnand %p3422_p11, %p3416_p9 }
 0x111   : > { %3426 = shalt.err (!%p3423_p12)
}
 0x112   : > { %s4595_s0 = smov 128   ;;  %s4596_s16 = smov 8  }
 0x113   : > { %2889 = dma.hbm_to_vmem [thread:$0]  (!%p3748_p6), %s4586_s12, 8192, %s484_s27, [#allocation20], %s4595_s0, %s4595_s0, %s4596_s16  }
 0x114   : > { %s3624_s23 = smov [#allocation22]   ;;  %s3427_s1 = scalar_lea.hbm %s4587_s13, 32 }
 0x115   : > { %s497_s14 = sshll.u32 %s3624_s23, 4  ;;  %p3428_p13 = scmp.ne.s32.totalorder %s4587_s13, %s3427_s1  ;;  %s498_s14 = int_to_ptr.vmem [resolvable:$true] %s497_s14 }
 0x116   : > { %p3434_p3 = scmp.lt.u32.totalorder %s3427_s1, %s4587_s13 }
 0x117   : > { %p3430_p0 = pnand %p3428_p13, %p3764_p8 }
 0x119   : > { %p3431_p1 = pneg %p3430_p0 }
 0x11b   : > { %p3436_p2 = pnand %p3434_p3, %p3431_p1 }
 0x11d   : > { %3439 = shalt.err (!%p3436_p2)
}
 0x11e   : > { %s3440_s27 = scalar_lea.vmem %s498_s14, 32  ;;  %p3448_p4 = scmp.lt.s32.totalorder %s498_s14, %s498_s14 }
 0x11f   : > { %p3441_p5 = scmp.ne.s32.totalorder %s498_s14, %s3440_s27  ;;  %p3449_p10 = scmp.lt.s32.totalorder %s3440_s27, %s3440_s27 }
 0x121   : > { %p3443_p7 = pnand %p3441_p5, %p3764_p8  ;;  %p3450_p11 = por %p3449_p10, %p3448_p4 }
 0x123   : > { %p3444_p9 = pneg %p3443_p7 }
 0x125   : > { %p3451_p12 = pnand %p3450_p11, %p3444_p9 }
 0x127   : > { %3454 = shalt.err (!%p3451_p12)
}
 0x128   : > { %2892 = dma.hbm_to_vmem [thread:$0]  (!%p3748_p6), %s4587_s13, 32, %s498_s14, [#allocation23]  }
 0x129   : > { %s2620_s9 = sadd.s32 4294967294, %s3609_s19   ;;  %s3962_s25 = sadd.s32 1, %s3609_s19  }
 0x12a   : > { %s44_s23 = ssub.s32 %s3609_s19, %s3962_s25  ;;  %s47_s24 = sadd.s32 1, %s3605_s4 }
 0x12b   : > { %p45_p8 = scmp.eq.s32.totalorder %s44_s23, 0  ;;  %p54_p13 = scmp.ne.s32.totalorder %s3605_s4, %s3601_s18 }
 0x12c   : > { %p55_p0 = scmp.eq.s32.totalorder %s3609_s19, 0  ;;  %p60_p1 = scmp.ne.s32.totalorder %s3601_s18, %s3597_s17 }
 0x12d   : > { %s3973_s28 = scalar_select %p45_p8, %s3605_s4, %s47_s24  }
 0x12e   : > { %p56_p3 = por %p55_p0, %p54_p13  ;;  %p4622_p2 = scmp.eq.s32.totalorder %s3732_s21, 0 }
 0x12f   : > { %p362_p6 = scmp.eq.s32.totalorder %s3732_s21, 1  ;;  %p368_p7 = scmp.eq.s32.totalorder %s2620_s9, 1 }
 0x130   : > { %p3977_p5 = por %p4622_p2, %p60_p1  ;;  %p2914_p9 = scmp.lt.s32.totalorder %s3609_s19, 2 }
 0x131   : > { %s3984_s14 = sand.u32 1, %s3605_s4   ;;  %p3986_p4 = por %p362_p6, %p54_p13 }
 0x132   : > { %s4623_s1 = scalar_select %p3977_p5, 1, 0 }
 0x133   : > { %s4624_s22 = scalar_select %p3986_p4, 1, 0 }
 0x134   : > { %p3990_p10 = por %p368_p7, %p60_p1  ;;  %s2799_s30 = smul.u32 24, %s3984_s14 }
 0x135   : > { %s2800_s15 = smul.u32 384, %s3609_s19  ;;  %p3996_p11 = pnand %p2914_p9, %p56_p3 }
 0x136   : > { %s4625_s29 = scalar_select %p3990_p10, 1, 0 }
 0x137   : > { %s4627_s23 = sld [smem:[#allocation35_spill]]  ;;  %s512_s0 = scalar_lea.vmem [#allocation4], %s2799_s30 }
 0x138   : > { %s519_s16 = sshll.u32 %s512_s0, 4  ;;  %s509_s2 = scalar_lea.sflag [#allocation5], %s3984_s14  ;;  %s4006_s16 = int_to_ptr.vmem [resolvable:$true] %s519_s16 }
 0x139   : > { %p3457_p8 = pneg %p3996_p11 }
 0x13d   : > { %s4004_s24 = scalar_lea.hbm %s4627_s23, %s2800_s15  ;;  %s3460_s9 = scalar_lea.hbm %s4627_s23, 768 }
 0x13e   : > { %s3455_s3 = scalar_lea.hbm %s4004_s24, 384  ;;  %p3461_p1 = scmp.lt.u32.totalorder %s4004_s24, %s4627_s23 }
 0x13f   : > { %p3456_p12 = scmp.ne.s32.totalorder %s4004_s24, %s3455_s3  ;;  %p3462_p3 = scmp.lt.u32.totalorder %s3460_s9, %s3455_s3 }
 0x140   : > { %p3464_p6 = scmp.lt.u32.totalorder %s3455_s3, %s4004_s24 }
 0x141   : > { %p3458_p13 = pnand %p3457_p8, %p3456_p12  ;;  %p3463_p2 = por %p3462_p3, %p3461_p1 }
 0x143   : > { %p3459_p0 = pneg %p3458_p13  ;;  %p3465_p7 = por %p3464_p6, %p3463_p2 }
 0x145   : > { %p3466_p9 = pnand %p3465_p7, %p3459_p0 }
 0x147   : > { %3469 = shalt.err (!%p3466_p9)
}
 0x148   : > { %s3470_s0 = scalar_lea.vmem %s4006_s16, 384  ;;  %s3625_s30 = smov [#allocation4]  }
 0x149   : > { %p3471_p12 = scmp.ne.s32.totalorder %s4006_s16, %s3470_s0  ;;  %s3475_s26 = sshll.u32 %s3625_s30, 4  ;;  %s3476_s26 = int_to_ptr.vmem [resolvable:$false] %s3475_s26 }
 0x14a   : > { %s3477_s5 = scalar_lea.vmem %s3476_s26, 768  ;;  %p3478_p4 = scmp.lt.s32.totalorder %s4006_s16, %s3476_s26 }
 0x14b   : > { %p3473_p13 = pnand %p3471_p12, %p3457_p8  ;;  %p3479_p1 = scmp.lt.s32.totalorder %s3477_s5, %s3470_s0 }
 0x14d   : > { %p3474_p10 = pneg %p3473_p13  ;;  %p3480_p3 = por %p3479_p1, %p3478_p4 }
 0x14f   : > { %p3481_p2 = pnand %p3480_p3, %p3474_p10 }
 0x151   : > { %3484 = shalt.err (!%p3481_p2)
}
 0x152   : > { %s4628_s3 = smov 8   ;;  %s4629_s20 = smov 128  }
 0x153   : > { %2896 = dma.hbm_to_vmem [thread:$0]  (!%p3996_p11), %s4004_s24, 384, %s4006_s16, %s509_s2, %s4629_s20, %s4629_s20, %s4628_s3  }
 0x154   : > { %s2634_s15 = sshll.u32 %s3984_s14, 1  ;;  %s2784_s9 = sshll.u32 %s3609_s19, 5 }
 0x155   : > { %s4630_s26 = sld [smem:[#allocation36_spill]]  ;;  %s533_s6 = scalar_lea.vmem [#allocation7], %s2634_s15 }
 0x156   : > { %s541_s7 = sshll.u32 %s533_s6, 4  ;;  %s4631_s8 = sand.u32 1, %s3609_s19   ;;  %s542_s7 = int_to_ptr.vmem [resolvable:$true] %s541_s7 }
 0x157   : > { %s530_s10 = scalar_lea.sflag [#allocation8], %s4631_s8 }
 0x15b   : > { %s4044_s5 = scalar_lea.hbm %s4630_s26, %s2784_s9  ;;  %s3490_s14 = scalar_lea.hbm %s4630_s26, 64 }
 0x15c   : > { %s3485_s11 = scalar_lea.hbm %s4044_s5, 32  ;;  %p3491_p6 = scmp.lt.u32.totalorder %s4044_s5, %s4630_s26 }
 0x15d   : > { %p3486_p4 = scmp.ne.s32.totalorder %s4044_s5, %s3485_s11  ;;  %p3492_p7 = scmp.lt.u32.totalorder %s3490_s14, %s3485_s11 }
 0x15e   : > { %p3494_p12 = scmp.lt.u32.totalorder %s3485_s11, %s4044_s5 }
 0x15f   : > { %p3488_p10 = pnand %p3486_p4, %p3457_p8  ;;  %p3493_p9 = por %p3492_p7, %p3491_p6 }
 0x161   : > { %p3489_p0 = pneg %p3488_p10  ;;  %p3495_p13 = por %p3494_p12, %p3493_p9 }
 0x163   : > { %p3496_p1 = pnand %p3495_p13, %p3489_p0 }
 0x165   : > { %3499 = shalt.err (!%p3496_p1)
}
 0x166   : > { %s3500_s6 = scalar_lea.vmem %s542_s7, 32  ;;  %s3626_s8 = smov [#allocation7]  }
 0x167   : > { %p3501_p3 = scmp.ne.s32.totalorder %s542_s7, %s3500_s6  ;;  %s3505_s20 = sshll.u32 %s3626_s8, 4  ;;  %s3506_s20 = int_to_ptr.vmem [resolvable:$false] %s3505_s20 }
 0x168   : > { %s3507_s15 = scalar_lea.vmem %s3506_s20, 64  ;;  %p3508_p10 = scmp.lt.s32.totalorder %s542_s7, %s3506_s20 }
 0x169   : > { %p3503_p2 = pnand %p3501_p3, %p3457_p8  ;;  %p3509_p5 = scmp.lt.s32.totalorder %s3507_s15, %s3500_s6 }
 0x16b   : > { %p3504_p4 = pneg %p3503_p2  ;;  %p3510_p6 = por %p3509_p5, %p3508_p10 }
 0x16d   : > { %p3511_p7 = pnand %p3510_p6, %p3504_p4 }
 0x16f   : > { %3514 = shalt.err (!%p3511_p7)
}
 0x170   : > { %2899 = dma.hbm_to_vmem [thread:$0]  (!%p3996_p11), %s4044_s5, 32, %s542_s7, %s530_s10  }
 0x171   : > { %s4632_s11 = sld [smem:[#allocation34_spill]] }
 0x177   : > { %p4633_p0 = scmp.ne.s32.totalorder %s4632_s11, 0 }
 0x178   : > { %s4070_s9 = sand.u32 (!%p4633_p0), 1, %s3601_s18   ;;  %p4634_p5 = scmp.ne.s32.totalorder (!%p4633_p0), %s4623_s1, 0 }
 0x179   : > { %550 = sbr.rel (%p4633_p0) target bundleno = 2163 (0x873), region = 76  ;;  %s553_s30 = scalar_lea.sflag (!%p4633_p0), [#allocation5], %s4070_s9 }
 0x17a   : > { %s2801_s0 = smul.u32 (!%p4633_p0), 24, %s4070_s9 }
 0x17c   : > { %s4074_s2 = scalar_lea.vmem (!%p4633_p0), [#allocation4], %s2801_s0 }
 0x180   : > { %3560 = dma.done.wait (%p4634_p5), %s553_s30, 384  }
 0x181   : > { %3562 = vsyncadd (%p4634_p5), %s553_s30, 4294966912  ;;  %s561_s7 = sand.u32 1, %s3732_s21   ;;  %s2638_s10 = sshll.u32 %s4070_s9, 1 }
 0x182   : > { %s562_s27 = scalar_lea.sflag [#allocation8], %s561_s7  ;;  %s4082_s5 = scalar_lea.vmem [#allocation7], %s2638_s10 }
 0x183   : > { %3564 = dma.done.wait (%p4634_p5), %s562_s27, 32  }
 0x184   : > { %3566 = vsyncadd (%p4634_p5), %s562_s27, 4294967264  ;;  %p4635_p11 = scmp.eq.s32.totalorder %s3732_s21, 0 }
 0x186   : > { %3568 = dma.done.wait (%p4635_p11), [#allocation8], 8192   ;;  %p4636_p8 = pmov %p4635_p11 }
 0x188   : > { %3570 = vsyncadd (%p4636_p8), [#allocation8], 4294959104  ;;  %p4637_p9 = pmov %p4636_p8 }
 0x189   : > { %p4638_p12 = pmov %p4636_p8 }
 0x18a   : > { %3572 = dma.done.wait (%p4637_p9), [#allocation11], 128  }
 0x18b   : > { %3574 = vsyncadd (%p4638_p12), [#allocation11], 4294967168  ;;  %p4639_p13 = pmov %p4636_p8 }
 0x18c   : > { %p4640_p1 = pmov %p4636_p8 }
 0x18d   : > { %3576 = dma.done.wait (%p4639_p13), [#allocation14], 320  }
 0x18e   : > { %3578 = vsyncadd (%p4640_p1), [#allocation14], 4294966976  ;;  %p4641_p3 = pmov %p4640_p1 }
 0x18f   : > { %p4642_p2 = pmov %p4640_p1 }
 0x190   : > { %3580 = dma.done.wait (%p4641_p3), [#allocation17], 128  }
 0x191   : > { %3582 = vsyncadd (%p4642_p2), [#allocation17], 4294967168  ;;  %p4643_p4 = pmov %p4640_p1 }
 0x192   : > { %p4644_p10 = pmov %p4640_p1 }
 0x193   : > { %3584 = dma.done.wait (%p4643_p4), [#allocation20], 8256  }
 0x194   : > { %3586 = vsyncadd (%p4644_p10), [#allocation20], 4294959040  ;;  %p4645_p6 = pmov %p4640_p1 }
 0x195   : > { %p4646_p7 = pmov %p4640_p1 }
 0x196   : > { %3588 = dma.done.wait (%p4645_p6), [#allocation23], 32  }
 0x197   : > { %3590 = vsyncadd (%p4646_p7), [#allocation23], 4294967264  ;;  %v2974_v0 = vld [vmem:[#allocation9 + $0x4] ss:$16 sps:$4 sm:$0xff]   ;;  %v2976_v1 = vld [vmem:[#allocation9] ss:$16 sps:$4 sm:$0xff]  }
 0x198   : > { %1081 = vmatprep.subr.bf16.mxu1 %v2974_v0  ;;  %v2977_v2 = vld [vmem:[#allocation9 + $0x24] ss:$16 sps:$4 sm:$0xff]   ;;  %v2979_v3 = vld [vmem:[#allocation9 + $0x20] ss:$16 sps:$4 sm:$0xff]   ;;  %v3027_v33 = vld [vmem:[#allocation9 + $0xc] ss:$16 sps:$4 sm:$0xff]  }
 0x199   : > { %1082 = vmatpush1.bf16.msra.mxu1 %v2976_v1  ;;  %v2980_v4 = vld [vmem:[#allocation9 + $0x44] ss:$16 sps:$4 sm:$0xff]   ;;  %v2982_v5 = vld [vmem:[#allocation9 + $0x40] ss:$16 sps:$4 sm:$0xff]   ;;  %v3025_v36 = vld [vmem:[#allocation9 + $0x8] ss:$16 sps:$4 sm:$0xff]  }
 0x19a   : > { %1083 = vmatprep.subr.bf16.mxu1 %v2977_v2  ;;  %v2983_v6 = vld [vmem:[#allocation9 + $0x64] ss:$16 sps:$4 sm:$0xff]   ;;  %v2985_v7 = vld [vmem:[#allocation9 + $0x60] ss:$16 sps:$4 sm:$0xff]   ;;  %v3030_v37 = vld [vmem:[#allocation9 + $0x2c] ss:$16 sps:$4 sm:$0xff]  }
 0x19b   : > { %v2986_v8 = vld [vmem:[#allocation9 + $0x84] ss:$16 sps:$4 sm:$0xff]   ;;  %v2988_v9 = vld [vmem:[#allocation9 + $0x80] ss:$16 sps:$4 sm:$0xff]   ;;  %v3028_v39 = vld [vmem:[#allocation9 + $0x28] ss:$16 sps:$4 sm:$0xff]  }
 0x19c   : > { %v2989_v10 = vld [vmem:[#allocation9 + $0xa4] ss:$16 sps:$4 sm:$0xff]   ;;  %v2991_v11 = vld [vmem:[#allocation9 + $0xa0] ss:$16 sps:$4 sm:$0xff]   ;;  %v3033_v40 = vld [vmem:[#allocation9 + $0x4c] ss:$16 sps:$4 sm:$0xff]  }
 0x19d   : > { %1084 = vmatpush1.bf16.msra.mxu1 %v2979_v3  ;;  %v2992_v12 = vld [vmem:[#allocation9 + $0xc4] ss:$16 sps:$4 sm:$0xff]   ;;  %v3024_v13 = vld [vmem:[%s4074_s2 + $0x4] ss:$8 sps:$4 sm:$0xff]   ;;  %v3036_v43 = vld [vmem:[#allocation9 + $0x6c] ss:$16 sps:$4 sm:$0xff]  }
 0x19e   : > { %1085 = vmatprep.subr.bf16.mxu1 %v2980_v4  ;;  %v2994_v14 = vld [vmem:[#allocation9 + $0xc0] ss:$16 sps:$4 sm:$0xff]   ;;  %v2995_v15 = vld [vmem:[#allocation9 + $0xe4] ss:$16 sps:$4 sm:$0xff]   ;;  %1113 = vmatprep.mubr.bf16.mxu1 %v3024_v13  ;;  %v3031_v42 = vld [vmem:[#allocation9 + $0x48] ss:$16 sps:$4 sm:$0xff]  }
 0x19f   : > { %v2997_v16 = vld [vmem:[#allocation9 + $0xe0] ss:$16 sps:$4 sm:$0xff]   ;;  %v2998_v17 = vld [vmem:[#allocation9 + $0x104] ss:$16 sps:$4 sm:$0xff]   ;;  %v3034_v44 = vld [vmem:[#allocation9 + $0x68] ss:$16 sps:$4 sm:$0xff]  }
 0x1a0   : > { %v3000_v18 = vld [vmem:[#allocation9 + $0x100] ss:$16 sps:$4 sm:$0xff]   ;;  %v3001_v19 = vld [vmem:[#allocation9 + $0x124] ss:$16 sps:$4 sm:$0xff]   ;;  %v3039_v45 = vld [vmem:[#allocation9 + $0x8c] ss:$16 sps:$4 sm:$0xff]  }
 0x1a1   : > { %1086 = vmatpush1.bf16.msra.mxu1 %v2982_v5  ;;  %v3003_v20 = vld [vmem:[#allocation9 + $0x120] ss:$16 sps:$4 sm:$0xff]   ;;  %v3004_v21 = vld [vmem:[#allocation9 + $0x144] ss:$16 sps:$4 sm:$0xff]   ;;  %v3037_v46 = vld [vmem:[#allocation9 + $0x88] ss:$16 sps:$4 sm:$0xff]  }
 0x1a2   : > { %1087 = vmatprep.subr.bf16.mxu1 %v2983_v6  ;;  %v3006_v22 = vld [vmem:[#allocation9 + $0x140] ss:$16 sps:$4 sm:$0xff]   ;;  %v3007_v23 = vld [vmem:[#allocation9 + $0x164] ss:$16 sps:$4 sm:$0xff]   ;;  %v3042_v47 = vld [vmem:[#allocation9 + $0xac] ss:$16 sps:$4 sm:$0xff]  }
 0x1a3   : > { %v3009_v24 = vld [vmem:[#allocation9 + $0x160] ss:$16 sps:$4 sm:$0xff]   ;;  %v3010_v25 = vld [vmem:[#allocation9 + $0x184] ss:$16 sps:$4 sm:$0xff]   ;;  %v3040_v48 = vld [vmem:[#allocation9 + $0xa8] ss:$16 sps:$4 sm:$0xff]  }
 0x1a4   : > { %v3012_v26 = vld [vmem:[#allocation9 + $0x180] ss:$16 sps:$4 sm:$0xff]   ;;  %v3013_v27 = vld [vmem:[#allocation9 + $0x1a4] ss:$16 sps:$4 sm:$0xff]   ;;  %v3045_v49 = vld [vmem:[#allocation9 + $0xcc] ss:$16 sps:$4 sm:$0xff]  }
 0x1a5   : > { %1088 = vmatpush1.bf16.msra.mxu1 %v2985_v7  ;;  %v3015_v28 = vld [vmem:[#allocation9 + $0x1a0] ss:$16 sps:$4 sm:$0xff]   ;;  %v3016_v29 = vld [vmem:[#allocation9 + $0x1c4] ss:$16 sps:$4 sm:$0xff]   ;;  %v3043_v50 = vld [vmem:[#allocation9 + $0xc8] ss:$16 sps:$4 sm:$0xff]  }
 0x1a6   : > { %1089 = vmatprep.subr.bf16.mxu1 %v2986_v8  ;;  %v3018_v30 = vld [vmem:[#allocation9 + $0x1c0] ss:$16 sps:$4 sm:$0xff]   ;;  %v3019_v31 = vld [vmem:[#allocation9 + $0x1e4] ss:$16 sps:$4 sm:$0xff]   ;;  %v3048_v51 = vld [vmem:[#allocation9 + $0xec] ss:$16 sps:$4 sm:$0xff]  }
 0x1a7   : > { %v3021_v32 = vld [vmem:[#allocation9 + $0x1e0] ss:$16 sps:$4 sm:$0xff]   ;;  %v4115_v35 = vld [vmem:[%s4074_s2] ss:$8 sps:$4 sm:$0xff]   ;;  %v3046_v52 = vld [vmem:[#allocation9 + $0xe8] ss:$16 sps:$4 sm:$0xff]  }
 0x1a8   : > { %v657_v34 = vld [vmem:[%s4074_s2 + $0x10] sm:$0x11]  ;;  %s1195_s1 = sld [smem:[#allocation2]]  ;;  %vm1228_vm10 = vcmask 1040384   ;;  %vm1430_vm13 = vcmask 1041408   ;;  %vm1516_vm14 = vcmask 1046528  }
 0x1a9   : > { %1090 = vmatpush1.bf16.msra.mxu1 %v2988_v9  ;;  %v4117_v38 = vcombine.high %v657_v34, %v657_v34  ;;  %v2651_v41 = vcombine.low %v657_v34, %v657_v34  ;;  %v3051_v53 = vld [vmem:[#allocation9 + $0x10c] ss:$16 sps:$4 sm:$0xff]   ;;  %v3049_v54 = vld [vmem:[#allocation9 + $0x108] ss:$16 sps:$4 sm:$0xff]   ;;  %s4230_s20 = sld [smem:[#allocation3]]  ;;  %vm1608_vm15 = vcmask 1045504  }
 0x1aa   : > { %1091 = vmatprep.subr.bf16.mxu1 %v2989_v10  ;;  %v3054_v55 = vld [vmem:[#allocation9 + $0x12c] ss:$16 sps:$4 sm:$0xff]   ;;  %v3052_v56 = vld [vmem:[#allocation9 + $0x128] ss:$16 sps:$4 sm:$0xff]   ;;  %s2802_s10 = smul.u32 48, %s4070_s9  ;;  %p4648_p5 = scmp.ne.s32.totalorder %s4624_s22, 0 }
 0x1ab   : > { %v3057_v57 = vld [vmem:[#allocation9 + $0x14c] ss:$16 sps:$4 sm:$0xff]   ;;  %v3055_v58 = vld [vmem:[#allocation9 + $0x148] ss:$16 sps:$4 sm:$0xff]  }
 0x1ac   : > { %v3060_v59 = vld [vmem:[#allocation9 + $0x16c] ss:$16 sps:$4 sm:$0xff]   ;;  %v3058_v60 = vld [vmem:[#allocation9 + $0x168] ss:$16 sps:$4 sm:$0xff]   ;;  %s654_s27 = scalar_lea.vmem [#allocation24], %s2802_s10 }
 0x1ad   : > { %1092 = vmatpush1.bf16.msra.mxu1 %v2991_v11  ;;  %v3063_v61 = vld [vmem:[#allocation9 + $0x18c] ss:$16 sps:$4 sm:$0xff]   ;;  %v3061_v62 = vld [vmem:[#allocation9 + $0x188] ss:$16 sps:$4 sm:$0xff]  }
 0x1ae   : > { %1093 = vmatprep.subr.bf16.mxu1 %v2992_v12  ;;  %v3067_v63 = vld [vmem:[#allocation9 + $0x1ac] ss:$16 sps:$4 sm:$0xff]   ;;  %v3065_v0 = vld [vmem:[#allocation9 + $0x1a8] ss:$16 sps:$4 sm:$0xff]  }
 0x1af   : > { %v3071_v1 = vld [vmem:[#allocation9 + $0x1cc] ss:$16 sps:$4 sm:$0xff]   ;;  %v3069_v2 = vld [vmem:[#allocation9 + $0x1c8] ss:$16 sps:$4 sm:$0xff]  }
 0x1b0   : > { %v3074_v3 = vld [vmem:[#allocation9 + $0x1ec] ss:$16 sps:$4 sm:$0xff]   ;;  %v3072_v4 = vld [vmem:[#allocation9 + $0x1e8] ss:$16 sps:$4 sm:$0xff]  }
 0x1b1   : > { %1094 = vmatpush1.bf16.msra.mxu1 %v2994_v14 }
 0x1b2   : > { %1095 = vmatprep.subr.bf16.mxu1 %v2995_v15 }
 0x1b5   : > { %1096 = vmatpush1.bf16.msra.mxu1 %v2997_v16 }
 0x1b6   : > { %1097 = vmatprep.subr.bf16.mxu1 %v2998_v17  ;;  %v722_v17 = vld [vmem:[#allocation10] sm:$0xf] }
 0x1b9   : > { %1098 = vmatpush1.bf16.msra.mxu1 %v3000_v18 }
 0x1ba   : > { %1099 = vmatprep.subr.bf16.mxu1 %v3001_v19 }
 0x1bd   : > { %1100 = vmatpush1.bf16.msra.mxu1 %v3003_v20 }
 0x1be   : > { %1101 = vmatprep.subr.bf16.mxu1 %v3004_v21 }
 0x1c1   : > { %1102 = vmatpush1.bf16.msra.mxu1 %v3006_v22 }
 0x1c2   : > { %1103 = vmatprep.subr.bf16.mxu1 %v3007_v23  ;;  %v1196_v23 = vstv %s1195_s1  ;;  %s2815_s1 = smul.u32 768, %s3732_s21  ;;  %s2416_s21 = scalar_lea.sflag [#allocation6], %s4070_s9 }
 0x1c5   : > { %1104 = vmatpush1.bf16.msra.mxu1 %v3009_v24 }
 0x1c6   : > { %1105 = vmatprep.subr.bf16.mxu1 %v3010_v25 }
 0x1c9   : > { %1106 = vmatpush1.bf16.msra.mxu1 %v3012_v26 }
 0x1ca   : > { %1107 = vmatprep.subr.bf16.mxu1 %v3013_v27 }
 0x1cd   : > { %1108 = vmatpush1.bf16.msra.mxu1 %v3015_v28 }
 0x1ce   : > { %1109 = vmatprep.subr.bf16.mxu1 %v3016_v29 }
 0x1d1   : > { %1110 = vmatpush1.bf16.msra.mxu1 %v3018_v30 }
 0x1d2   : > { %1111 = vmatprep.subr.bf16.mxu1 %v3019_v31 }
 0x1d5   : > { %1112 = vmatpush1.bf16.msra.mxu1 %v3021_v32 }
 0x1d6   : > { %1132 = vmatprep.subr.bf16.mxu1 %v3027_v33 }
 0x1d8   : > { %1114 = vmatmul.mubr.bf16.vlgmr.msra.gmra.mrb[0].mxu1 %v4115_v35 }
 0x1d9   : > { %1133 = vmatpush1.bf16.msra.mxu1 %v3025_v36  ;;  %1123 = vmatprep.mubr.bf16.mxu1 %v4117_v38 }
 0x1da   : > { %1134 = vmatprep.subr.bf16.mxu1 %v3030_v37 }
 0x1dd   : > { %1135 = vmatpush1.bf16.msra.mxu1 %v3028_v39 }
 0x1de   : > { %1136 = vmatprep.subr.bf16.mxu1 %v3033_v40 }
 0x1e0   : > { %1124 = vmatmul.mubr.bf16.gmra.mrb[4].mxu1 %v2651_v41 }
 0x1e1   : > { %1137 = vmatpush1.bf16.msra.mxu1 %v3031_v42  ;;  %1164 = vmatprep.mubr.bf16.mxu1 %v3024_v13  ;;  %v724_v13 = vlaneseq }
 0x1e2   : > { %1138 = vmatprep.subr.bf16.mxu1 %v3036_v43 }
 0x1e3   : > { %v725_v14 = vshrl.u32 %v724_v13, 7 }
 0x1e5   : > { %1139 = vmatpush1.bf16.msra.mxu1 %v3034_v44  ;;  %v4123_v15 = vsub.s32 0, %v725_v14  ;;  %v4125_v16 = vsub.s32 1, %v725_v14  ;;  %v4129_v22 = vsub.s32 2, %v725_v14  ;;  %v4131_v24 = vsub.s32 3, %v725_v14 }
 0x1e6   : > { %1140 = vmatprep.subr.bf16.mxu1 %v3039_v45 }
 0x1e7   : > { %v727_v18 = vrot.slane %v722_v17, %v4123_v15  ;;  %v731_v19 = vrot.slane %v722_v17, %v4125_v16  ;;  %v735_v27 = vrot.slane %v722_v17, %v4129_v22  ;;  %v739_v28 = vrot.slane %v722_v17, %v4131_v24 }
 0x1e9   : > { %1141 = vmatpush1.bf16.msra.mxu1 %v3037_v46 }
 0x1ea   : > { %1142 = vmatprep.subr.bf16.mxu1 %v3042_v47 }
 0x1ed   : > { %1143 = vmatpush1.bf16.msra.mxu1 %v3040_v48 }
 0x1ee   : > { %1144 = vmatprep.subr.bf16.mxu1 %v3045_v49 }
 0x1f1   : > { %1145 = vmatpush1.bf16.msra.mxu1 %v3043_v50 }
 0x1f2   : > { %1146 = vmatprep.subr.bf16.mxu1 %v3048_v51 }
 0x1f5   : > { %1147 = vmatpush1.bf16.msra.mxu1 %v3046_v52 }
 0x1f6   : > { %1148 = vmatprep.subr.bf16.mxu1 %v3051_v53 }
 0x1f9   : > { %1149 = vmatpush1.bf16.msra.mxu1 %v3049_v54 }
 0x1fa   : > { %1150 = vmatprep.subr.bf16.mxu1 %v3054_v55 }
 0x1fd   : > { %1151 = vmatpush1.bf16.msra.mxu1 %v3052_v56 }
 0x1fe   : > { %1152 = vmatprep.subr.bf16.mxu1 %v3057_v57 }
 0x201   : > { %1153 = vmatpush1.bf16.msra.mxu1 %v3055_v58 }
 0x202   : > { %1154 = vmatprep.subr.bf16.mxu1 %v3060_v59 }
 0x205   : > { %1155 = vmatpush1.bf16.msra.mxu1 %v3058_v60 }
 0x206   : > { %1156 = vmatprep.subr.bf16.mxu1 %v3063_v61 }
 0x209   : > { %1157 = vmatpush1.bf16.msra.mxu1 %v3061_v62 }
 0x20a   : > { %1158 = vmatprep.subr.bf16.mxu1 %v3067_v63 }
 0x20d   : > { %1159 = vmatpush1.bf16.msra.mxu1 %v3065_v0 }
 0x20e   : > { %1160 = vmatprep.subr.bf16.mxu1 %v3071_v1 }
 0x211   : > { %1161 = vmatpush1.bf16.msra.mxu1 %v3069_v2 }
 0x212   : > { %1162 = vmatprep.subr.bf16.mxu1 %v3074_v3 }
 0x215   : > { %1163 = vmatpush1.bf16.msra.mxu1 %v3072_v4 }
 0x218   : > { %1165 = vmatmul.mubr.bf16.vlgmr.msra.gmra.mrb[8].mxu1 %v4115_v35 }
 0x219   : > { %1174 = vmatprep.mubr.bf16.mxu1 %v4117_v38 }
 0x220   : > { %1175 = vmatmul.mubr.bf16.gmra.mrb[12].mxu1 %v2651_v41 }
 0x2ab   : > { %v1115_v5 = vpop.f32.mrb[0].mxu1 }
 0x2ac   : > { %v1117_v6 = vpop.f32.mrb[1].mxu1  ;;  %v1116_v20 = vadd.f32 %v1115_v5, %v727_v18 }
 0x2ad   : > { %v1119_v7 = vpop.f32.mrb[2].mxu1  ;;  %v1118_v21 = vadd.f32 %v1117_v6, %v731_v19 }
 0x2ae   : > { %v1121_v8 = vpop.f32.mrb[3].mxu1  ;;  %v1197_v25 = vmul.f32 %v1196_v23, %v1116_v20  ;;  %vm1183_vm0 = vcmp.gt.f32.partialorder %v1116_v20, 0.0  ;;  %v1120_v32 = vadd.f32 %v1119_v7, %v727_v18 }
 0x2af   : > { %v1198_v26 = vmul.f32 %v1196_v23, %v1118_v21  ;;  %vm1184_vm1 = vcmp.gt.f32.partialorder %v1118_v21, 0.0  ;;  %v1122_v37 = vadd.f32 %v1121_v8, %v731_v19 }
 0x2b0   : > { %v4135_v30 = vsel %vm1183_vm0, %v1116_v20, %v1197_v25  ;;  %v1201_v42 = vmul.f32 %v1196_v23, %v1120_v32  ;;  %vm1187_vm4 = vcmp.gt.f32.partialorder %v1120_v32, 0.0 }
 0x2b1   : > { %v4137_v31 = vsel %vm1184_vm1, %v1118_v21, %v1198_v26  ;;  %v1202_v48 = vmul.f32 %v1196_v23, %v1122_v37  ;;  %vm1188_vm5 = vcmp.gt.f32.partialorder %v1122_v37, 0.0 }
 0x2b2   : > { %v1221_v40 = vadd.f32 %v4137_v31, %v4135_v30  ;;  %v1213_v53 = vsel %vm1187_vm4, %v1120_v32, %v1201_v42 }
 0x2b3   : > { %v1125_v9 = vpop.f32.mrb[4].mxu1  ;;  %v1214_v60 = vsel %vm1188_vm5, %v1122_v37, %v1202_v48 }
 0x2b4   : > { %v1127_v10 = vpop.f32.mrb[5].mxu1  ;;  %v1126_v45 = vadd.f32 %v1125_v9, %v727_v18 }
 0x2b5   : > { %v1129_v11 = vpop.f32.mrb[6].mxu1  ;;  %v1128_v50 = vadd.f32 %v1127_v10, %v731_v19 }
 0x2b6   : > { %v1130_v12 = vpop.f32.mrb[7].mxu1  ;;  %v1205_v56 = vmul.f32 %v1196_v23, %v1126_v45  ;;  %vm1191_vm7 = vcmp.gt.f32.partialorder %v1126_v45, 0.0 }
 0x2b7   : > { %v1206_v63 = vmul.f32 %v1196_v23, %v1128_v50  ;;  %vm1192_vm9 = vcmp.gt.f32.partialorder %v1128_v50, 0.0 }
 0x2b8   : > { %v1217_v3 = vsel %vm1191_vm7, %v1126_v45, %v1205_v56 }
 0x2b9   : > { %v1218_v7 = vsel %vm1192_vm9, %v1128_v50, %v1206_v63  ;;  %v1229_v10 = vsel %vm1228_vm10, %v1217_v3, 0.0 }
 0x2ba   : > { %v1231_v13 = vsel %vm1228_vm10, %v1218_v7, 0.0 }
 0x2eb   : > { %v1166_v29 = vpop.f32.mrb[8].mxu1 }
 0x2ec   : > { %v1167_v33 = vadd.f32 %v1166_v29, %v735_v27  ;;  %v1168_v34 = vpop.f32.mrb[9].mxu1 }
 0x2ed   : > { %v1169_v35 = vadd.f32 %v1168_v34, %v739_v28  ;;  %v1170_v36 = vpop.f32.mrb[10].mxu1 }
 0x2ee   : > { %vm1185_vm2 = vcmp.gt.f32.partialorder %v1167_v33, 0.0  ;;  %v1199_v38 = vmul.f32 %v1196_v23, %v1167_v33  ;;  %v1172_v39 = vpop.f32.mrb[11].mxu1  ;;  %v1171_v44 = vadd.f32 %v1170_v36, %v735_v27 }
 0x2ef   : > { %vm1186_vm3 = vcmp.gt.f32.partialorder %v1169_v35, 0.0  ;;  %v1200_v41 = vmul.f32 %v1196_v23, %v1169_v35  ;;  %v1173_v49 = vadd.f32 %v1172_v39, %v739_v28 }
 0x2f0   : > { %v4141_v43 = vsel %vm1185_vm2, %v1167_v33, %v1199_v38  ;;  %v1203_v54 = vmul.f32 %v1196_v23, %v1171_v44  ;;  %vm1189_vm6 = vcmp.gt.f32.partialorder %v1171_v44, 0.0 }
 0x2f1   : > { %v1222_v46 = vadd.f32 %v1221_v40, %v4141_v43  ;;  %v1212_v47 = vsel %vm1186_vm3, %v1169_v35, %v1200_v41  ;;  %v1204_v61 = vmul.f32 %v1196_v23, %v1173_v49  ;;  %vm1190_vm8 = vcmp.gt.f32.partialorder %v1173_v49, 0.0 }
 0x2f2   : > { %v1215_v2 = vsel %vm1189_vm6, %v1171_v44, %v1203_v54 }
 0x2f3   : > { %v1223_v51 = vadd.f32 %v1222_v46, %v1212_v47  ;;  %v1176_v52 = vpop.f32.mrb[12].mxu1  ;;  %v1216_v6 = vsel %vm1190_vm8, %v1173_v49, %v1204_v61 }
 0x2f4   : > { %v1178_v55 = vpop.f32.mrb[13].mxu1  ;;  %v1177_v58 = vadd.f32 %v1176_v52, %v735_v27 }
 0x2f5   : > { %v1224_v57 = vadd.f32 %v1223_v51, %v1213_v53  ;;  %v1180_v59 = vpop.f32.mrb[14].mxu1  ;;  %v1179_v1 = vadd.f32 %v1178_v55, %v739_v28 }
 0x2f6   : > { %v1181_v62 = vpop.f32.mrb[15].mxu1  ;;  %v1207_v5 = vmul.f32 %v1196_v23, %v1177_v58  ;;  %vm1193_vm11 = vcmp.gt.f32.partialorder %v1177_v58, 0.0 }
 0x2f7   : > { %v1225_v0 = vadd.f32 %v1224_v57, %v1214_v60  ;;  %v1208_v9 = vmul.f32 %v1196_v23, %v1179_v1  ;;  %vm1194_vm12 = vcmp.gt.f32.partialorder %v1179_v1, 0.0 }
 0x2f8   : > { %v1219_v11 = vsel %vm1193_vm11, %v1177_v58, %v1207_v5 }
 0x2f9   : > { %v1226_v4 = vadd.f32 %v1225_v0, %v1215_v2  ;;  %v1220_v14 = vsel %vm1194_vm12, %v1179_v1, %v1208_v9  ;;  %v1233_v18 = vsel %vm1228_vm10, %v1219_v11, 0.0 }
 0x2fa   : > { %v1235_v20 = vsel %vm1228_vm10, %v1220_v14, 0.0 }
 0x2fb   : > { %v1227_v8 = vadd.f32 %v1226_v4, %v1216_v6 }
 0x2fd   : > { %v1230_v12 = vadd.f32 %v1229_v10, %v1227_v8 }
 0x2ff   : > { %v1232_v17 = vadd.f32 %v1231_v13, %v1230_v12 }
 0x301   : > { %v1234_v19 = vadd.f32 %v1233_v18, %v1232_v17  ;;  %v1314_v18 = vld [vmem:[#allocation12] sm:$0xf] }
 0x303   : > { %v1236_v21 = vadd.f32 %v1235_v20, %v1234_v19  ;;  %v1348_v19 = vld [vmem:[#allocation13] sm:$0xf]  ;;  %v1435_v20 = vld [vmem:[#allocation15] ss:$4 sm:$0xf] }
 0x305   : > { %1237 = vadd.xlane.f32.xlu0 %v1236_v21 }
 0x392   : > { %v1238_v25 = vpop.xlane.xlu0 %1237 }
 0x393   : > { %v1239_v26 = vrot.slane %v1238_v25, 4 }
 0x395   : > { %v1240_v27 = vadd.f32 %v1239_v26, %v1238_v25  ;;  %v1319_v25 = vrot.slane %v1314_v18, %v4123_v15  ;;  %v1323_v26 = vrot.slane %v1314_v18, %v4125_v16 }
 0x397   : > { %v1241_v23 = vrot.slane %v1240_v27, 2 }
 0x399   : > { %v1242_v28 = vadd.f32 %v1241_v23, %v1240_v27  ;;  %v1327_v27 = vrot.slane %v1314_v18, %v4129_v22  ;;  %v1331_v23 = vrot.slane %v1314_v18, %v4131_v24 }
 0x39b   : > { %v1243_v29 = vrot.slane %v1242_v28, 1 }
 0x39d   : > { %v1244_v32 = vadd.f32 %v1243_v29, %v1242_v28  ;;  %v1353_v28 = vrot.slane %v1348_v19, %v4123_v15  ;;  %v1357_v29 = vrot.slane %v1348_v19, %v4125_v16 }
 0x39f   : > { %2803 = vpush %v1244_v32  ;;  %v1361_v32 = vrot.slane %v1348_v19, %v4129_v22 }
 0x3d0   : > { %s2804_s16 = spop %2803 }
 0x3d1   : > { %s1246_s14 = smul.f32 0.000114889706, %s2804_s16 }
 0x3d3   : > { %v1247_v33 = vstv %s1246_s14 }
 0x3d4   : > { %v4149_v34 = vsub.f32 %v4135_v30, %v1247_v33  ;;  %v4152_v35 = vsub.f32 %v4137_v31, %v1247_v33  ;;  %v4155_v36 = vsub.f32 %v4141_v43, %v1247_v33  ;;  %v4161_v39 = vsub.f32 %v1212_v47, %v1247_v33 }
 0x3d5   : > { %v4163_v40 = vsub.f32 %v1213_v53, %v1247_v33  ;;  %v4167_v42 = vsub.f32 %v1214_v60, %v1247_v33  ;;  %v4171_v44 = vsub.f32 %v1215_v2, %v1247_v33  ;;  %v1256_v47 = vsub.f32 %v1217_v3, %v1247_v33 }
 0x3d6   : > { %v1260_v37 = vmul.f32 %v4149_v34, %v4149_v34  ;;  %v1261_v38 = vmul.f32 %v4152_v35, %v4152_v35  ;;  %v1262_v30 = vmul.f32 %v4155_v36, %v4155_v36  ;;  %v1263_v31 = vmul.f32 %v4161_v39, %v4161_v39 }
 0x3d7   : > { %v1264_v45 = vmul.f32 %v4163_v40, %v4163_v40  ;;  %v4175_v48 = vsub.f32 %v1216_v6, %v1247_v33  ;;  %v1265_v49 = vmul.f32 %v4167_v42, %v4167_v42  ;;  %v1257_v51 = vsub.f32 %v1218_v7, %v1247_v33 }
 0x3d8   : > { %v1272_v41 = vadd.f32 %v1261_v38, %v1260_v37  ;;  %v1266_v52 = vmul.f32 %v4171_v44, %v4171_v44  ;;  %v1258_v54 = vsub.f32 %v1219_v11, %v1247_v33  ;;  %v1268_v55 = vmul.f32 %v1256_v47, %v1256_v47 }
 0x3d9   : > { %v1267_v56 = vmul.f32 %v4175_v48, %v4175_v48  ;;  %v1259_v58 = vsub.f32 %v1220_v14, %v1247_v33  ;;  %v1269_v59 = vmul.f32 %v1257_v51, %v1257_v51  ;;  %v1365_v33 = vrot.slane %v1348_v19, %v4131_v24 }
 0x3da   : > { %v1273_v43 = vadd.f32 %v1272_v41, %v1262_v30  ;;  %v1270_v61 = vmul.f32 %v1258_v54, %v1258_v54  ;;  %v1279_v62 = vsel %vm1228_vm10, %v1268_v55, 0.0  ;;  %v4196_v37 = vrot.slane %v1435_v20, %v4123_v15 }
 0x3db   : > { %v1271_v0 = vmul.f32 %v1259_v58, %v1259_v58  ;;  %v1281_v1 = vsel %vm1228_vm10, %v1269_v59, 0.0 }
 0x3dc   : > { %v1274_v46 = vadd.f32 %v1273_v43, %v1263_v31  ;;  %v1283_v3 = vsel %vm1228_vm10, %v1270_v61, 0.0  ;;  %v1470_v43 = vld [vmem:[#allocation15 + $0x1] ss:$4 sm:$0xf] }
 0x3dd   : > { %v1285_v5 = vsel %vm1228_vm10, %v1271_v0, 0.0  ;;  %v4222_v0 = vrot.slane %v1470_v43, %v4129_v22 }
 0x3de   : > { %v1275_v50 = vadd.f32 %v1274_v46, %v1264_v45 }
 0x3e0   : > { %v1276_v53 = vadd.f32 %v1275_v50, %v1265_v49 }
 0x3e2   : > { %v1277_v57 = vadd.f32 %v1276_v53, %v1266_v52 }
 0x3e4   : > { %v1278_v60 = vadd.f32 %v1277_v57, %v1267_v56 }
 0x3e6   : > { %v1280_v63 = vadd.f32 %v1279_v62, %v1278_v60 }
 0x3e8   : > { %v1282_v2 = vadd.f32 %v1281_v1, %v1280_v63  ;;  %v4219_v63 = vrot.slane %v1470_v43, %v4125_v16  ;;  %v4225_v1 = vrot.slane %v1470_v43, %v4131_v24 }
 0x3ea   : > { %v1284_v4 = vadd.f32 %v1283_v3, %v1282_v2 }
 0x3ec   : > { %v1286_v6 = vadd.f32 %v1285_v5, %v1284_v4 }
 0x3ee   : > { %1287 = vadd.xlane.f32.xlu0 %v1286_v6 }
 0x47b   : > { %v1288_v7 = vpop.xlane.xlu0 %1287 }
 0x47c   : > { %v1289_v8 = vrot.slane %v1288_v7, 4 }
 0x47e   : > { %v1290_v9 = vadd.f32 %v1289_v8, %v1288_v7  ;;  %v1653_v7 = vld [vmem:[#allocation16] sm:$0xf] }
 0x480   : > { %v1291_v10 = vrot.slane %v1290_v9, 2 }
 0x482   : > { %v1292_v11 = vadd.f32 %v1291_v10, %v1290_v9 }
 0x484   : > { %v1293_v12 = vrot.slane %v1292_v11, 1 }
 0x486   : > { %v1294_v13 = vadd.f32 %v1293_v12, %v1292_v11 }
 0x488   : > { %2805 = vpush %v1294_v13 }
 0x4b9   : > { %s2806_s24 = spop %2805 }
 0x4ba   : > { %s1296_s3 = smul.f32 0.000114889706, %s2806_s24  ;;  %s4647_s24 = sld [smem:[#allocation45_spill]] }
 0x4bc   : > { %s1297_s6 = sadd.f32 1e-08, %s1296_s3 }
 0x4be   : > { %v1298_v14 = vstv %s1297_s6 }
 0x4bf   : > { %3171 = vrsqrt.f32 %v1298_v14 }
 0x4c0   : > { %s4530_s3 = scalar_lea.hbm %s4647_s24, %s2815_s1 }
 0x4c9   : > { %v3172_v17 = vpop.eup %3171 }
 0x4ca   : > { %2807 = vpush %v3172_v17 }
 0x4fb   : > { %s2808_s8 = spop %2807 }
 0x4fc   : > { %v1301_v21 = vstv %s2808_s8  ;;  %s3627_s8 = smov [#allocation24]  }
 0x4fd   : > { %v1302_v38 = vmul.f32 %v1301_v21, %v4149_v34  ;;  %v1303_v30 = vmul.f32 %v1301_v21, %v4152_v35  ;;  %v1306_v41 = vmul.f32 %v1301_v21, %v4163_v40  ;;  %v1307_v31 = vmul.f32 %v1301_v21, %v4167_v42 }
 0x4fe   : > { %v1304_v45 = vmul.f32 %v1301_v21, %v4155_v36  ;;  %v1308_v46 = vmul.f32 %v1301_v21, %v4171_v44  ;;  %v1310_v49 = vmul.f32 %v1301_v21, %v1256_v47  ;;  %v1311_v50 = vmul.f32 %v1301_v21, %v1257_v51  ;;  %v1562_v51 = vld [vmem:[#allocation15 + $0x2] ss:$4 sm:$0xf] }
 0x4ff   : > { %v1305_v52 = vmul.f32 %v1301_v21, %v4161_v39  ;;  %v1309_v53 = vmul.f32 %v1301_v21, %v4175_v48  ;;  %v1312_v55 = vmul.f32 %v1301_v21, %v1258_v54  ;;  %v1313_v56 = vmul.f32 %v1301_v21, %v1259_v58 }
 0x500   : > { %v4207_v34 = vrot.slane %v1435_v20, %v4125_v16  ;;  %v4210_v35 = vrot.slane %v1435_v20, %v4129_v22  ;;  %v4213_v40 = vrot.slane %v1435_v20, %v4131_v24  ;;  %v4216_v36 = vrot.slane %v1470_v43, %v4123_v15 }
 0x501   : > { %v1336_v42 = vmul.f32 %v1319_v25, %v1302_v38  ;;  %v1337_v44 = vmul.f32 %v1323_v26, %v1303_v30  ;;  %v1340_v47 = vmul.f32 %v1319_v25, %v1306_v41  ;;  %v1341_v39 = vmul.f32 %v1323_v26, %v1307_v31 }
 0x502   : > { %v1338_v48 = vmul.f32 %v1327_v27, %v1304_v45  ;;  %v1342_v54 = vmul.f32 %v1327_v27, %v1308_v46  ;;  %v1344_v57 = vmul.f32 %v1319_v25, %v1310_v49  ;;  %v1345_v58 = vmul.f32 %v1323_v26, %v1311_v50 }
 0x503   : > { %v1339_v59 = vmul.f32 %v1331_v23, %v1305_v52  ;;  %v1343_v60 = vmul.f32 %v1331_v23, %v1309_v53  ;;  %v1346_v61 = vmul.f32 %v1327_v27, %v1312_v55  ;;  %v1347_v62 = vmul.f32 %v1331_v23, %v1313_v56 }
 0x504   : > { %v4228_v2 = vrot.slane %v1562_v51, %v4123_v15  ;;  %v1370_v3 = vadd.f32 %v1353_v28, %v1336_v42  ;;  %v1371_v4 = vadd.f32 %v1357_v29, %v1337_v44  ;;  %v1374_v5 = vadd.f32 %v1353_v28, %v1340_v47 }
 0x505   : > { %v1375_v6 = vadd.f32 %v1357_v29, %v1341_v39  ;;  %v1372_v8 = vadd.f32 %v1361_v32, %v1338_v48  ;;  %v1376_v9 = vadd.f32 %v1361_v32, %v1342_v54  ;;  %v1378_v10 = vadd.f32 %v1353_v28, %v1344_v57 }
 0x506   : > { %v1379_v11 = vadd.f32 %v1357_v29, %v1345_v58  ;;  %v1373_v12 = vadd.f32 %v1365_v33, %v1339_v59  ;;  %v1377_v13 = vadd.f32 %v1365_v33, %v1343_v60  ;;  %v1380_v14 = vadd.f32 %v1361_v32, %v1346_v61 }
 0x507   : > { %v1381_v17 = vadd.f32 %v1365_v33, %v1347_v62  ;;  %v4233_v18 = vrot.slane %v1562_v51, %v4125_v16  ;;  %v4236_v19 = vrot.slane %v1562_v51, %v4129_v22  ;;  %v4239_v20 = vrot.slane %v1562_v51, %v4131_v24 }
 0x508   : > { %v4242_v21 = vrot.slane %v1653_v7, %v4123_v15  ;;  %v1394_v25 = vrot.slane %v1370_v3, 7  ;;  %v1395_v26 = vrot.slane %v1371_v4, 7  ;;  %v1398_v27 = vrot.slane %v1374_v5, 7 }
 0x509   : > { %v1400_v23 = vrot.slane %v1375_v6, 7  ;;  %v1396_v28 = vrot.slane %v1372_v8, 7  ;;  %v1402_v29 = vrot.slane %v1376_v9, 7  ;;  %v1406_v32 = vrot.slane %v1378_v10, 7 }
 0x50a   : > { %v1408_v33 = vrot.slane %v1379_v11, 7  ;;  %v1397_v38 = vrot.slane %v1373_v12, 7  ;;  %v1404_v30 = vrot.slane %v1377_v13, 7  ;;  %v1410_v41 = vrot.slane %v1380_v14, 7 }
 0x50b   : > { %v1412_v31 = vrot.slane %v1381_v17, 7  ;;  %v4245_v43 = vrot.slane %v1653_v7, %v4125_v16  ;;  %v4248_v45 = vrot.slane %v1653_v7, %v4129_v22  ;;  %v4251_v46 = vrot.slane %v1653_v7, %v4131_v24 }
 0x50c   : > { %v4254_v49 = vstv %s4230_s20  ;;  %v1399_v50 = vsel %vm1228_vm10, %v1394_v25, %v1398_v27  ;;  %v1401_v52 = vsel %vm1228_vm10, %v1395_v26, %v1400_v23  ;;  %v1426_v53 = vsel %vm1228_vm10, 0.0, %v1394_v25  ;;  %s3519_s20 = sshll.u32 %s3627_s8, 4  ;;  %s3520_s20 = int_to_ptr.vmem [resolvable:$false] %s3519_s20 }
 0x50d   : > { %v1427_v55 = vsel %vm1228_vm10, 0.0, %v1395_v26  ;;  %v1403_v56 = vsel %vm1228_vm10, %v1396_v28, %v1402_v29  ;;  %v1407_v42 = vsel %vm1228_vm10, %v1398_v27, %v1406_v32  ;;  %v1409_v44 = vsel %vm1228_vm10, %v1400_v23, %v1408_v33 }
 0x50e   : > { %v1428_v47 = vsel %vm1228_vm10, 0.0, %v1396_v28  ;;  %v4265_v39 = vsel %vm1228_vm10, %v1397_v38, %v1404_v30  ;;  %v1411_v51 = vsel %vm1228_vm10, %v1402_v29, %v1410_v41  ;;  %v1413_v48 = vsel %vm1228_vm10, %v1404_v30, %v1412_v31 }
 0x50f   : > { %v1429_v54 = vsel %vm1228_vm10, 0.0, %v1397_v38  ;;  %v1492_v57 = vmul.f32 %v4216_v36, %v1426_v53  ;;  %v1493_v58 = vmul.f32 %v4219_v63, %v1427_v55  ;;  %v1496_v59 = vmul.f32 %v4216_v36, %v1399_v50 }
 0x510   : > { %v4274_v60 = vmul.f32 %v4219_v63, %v1401_v52  ;;  %v4277_v61 = vsel %vm1430_vm13, %v1407_v42, 0.0  ;;  %v4280_v62 = vsel %vm1430_vm13, %v1409_v44, 0.0  ;;  %v1494_v3 = vmul.f32 %v4222_v0, %v1428_v47 }
 0x511   : > { %v4284_v4 = vmul.f32 %v4222_v0, %v1403_v56  ;;  %v4287_v5 = vsel %vm1430_vm13, %v1411_v51, 0.0  ;;  %v4290_v6 = vsel %vm1430_vm13, %v1413_v48, 0.0  ;;  %v1457_v7 = vmul.f32 %v4196_v37, %v1426_v53 }
 0x512   : > { %v1458_v8 = vmul.f32 %v4207_v34, %v1427_v55  ;;  %v1459_v9 = vmul.f32 %v4210_v35, %v1428_v47  ;;  %v1460_v10 = vmul.f32 %v4213_v40, %v1429_v54  ;;  %v1495_v11 = vmul.f32 %v4225_v1, %v1429_v54 }
 0x513   : > { %v4299_v12 = vmul.f32 %v4225_v1, %v4265_v39  ;;  %v1517_v13 = vrot.slane %v1492_v57, 1  ;;  %v1518_v14 = vrot.slane %v1496_v59, 1  ;;  %v1520_v17 = vrot.slane %v1493_v58, 1 }
 0x514   : > { %v1521_v25 = vrot.slane %v4274_v60, 1  ;;  %v1461_v26 = vmul.f32 %v4196_v37, %v1399_v50  ;;  %v4305_v27 = vmul.f32 %v4216_v36, %v4277_v61  ;;  %v1523_v23 = vrot.slane %v1494_v3, 1 }
 0x515   : > { %v1524_v28 = vrot.slane %v4284_v4, 1  ;;  %v1462_v29 = vmul.f32 %v4207_v34, %v1401_v52  ;;  %v1463_v32 = vmul.f32 %v4210_v35, %v1403_v56  ;;  %v1584_v33 = vmul.f32 %v4228_v2, %v1426_v53 }
 0x516   : > { %v1585_v38 = vmul.f32 %v4233_v18, %v1427_v55  ;;  %v4314_v30 = vmul.f32 %v4219_v63, %v4280_v62  ;;  %v4318_v41 = vmul.f32 %v4222_v0, %v4287_v5  ;;  %v1588_v36 = vmul.f32 %v4228_v2, %v1399_v50 }
 0x517   : > { %v1589_v31 = vmul.f32 %v4233_v18, %v1401_v52  ;;  %v1519_v42 = vsel %vm1516_vm14, %v1517_v13, %v1518_v14  ;;  %v1522_v44 = vsel %vm1516_vm14, %v1520_v17, %v1521_v25  ;;  %v1526_v51 = vrot.slane %v1495_v11, 1 }
 0x518   : > { %v1527_v53 = vrot.slane %v4299_v12, 1  ;;  %v1525_v55 = vsel %vm1516_vm14, %v1523_v23, %v1524_v28  ;;  %v1529_v63 = vrot.slane %v4305_v27, 1  ;;  %v1586_v48 = vmul.f32 %v4236_v19, %v1428_v47 }
 0x519   : > { %v1590_v0 = vmul.f32 %v4236_v19, %v1403_v56  ;;  %v1609_v57 = vrot.slane %v1584_v33, 2  ;;  %v1610_v58 = vrot.slane %v1588_v36, 2  ;;  %v1612_v50 = vrot.slane %v1585_v38, 2 }
 0x51a   : > { %v1613_v59 = vrot.slane %v1589_v31, 2  ;;  %v1549_v52 = vadd.f32 %v1519_v42, %v1457_v7  ;;  %v1550_v60 = vadd.f32 %v1522_v44, %v1458_v8  ;;  %v1587_v3 = vmul.f32 %v4239_v20, %v1429_v54 }
 0x51b   : > { %v4332_v4 = vmul.f32 %v4239_v20, %v4265_v39  ;;  %v4336_v11 = vmul.f32 %v4225_v1, %v4290_v6  ;;  %v1528_v47 = vsel %vm1516_vm14, %v1526_v51, %v1527_v53  ;;  %v1531_v56 = vrot.slane %v4314_v30, 1 }
 0x51c   : > { %v1533_v12 = vrot.slane %v4318_v41, 1  ;;  %v1530_v13 = vsel %vm1516_vm14, %v1518_v14, %v1529_v63  ;;  %v1592_v7 = vmul.f32 %v4228_v2, %v4277_v61  ;;  %v1615_v54 = vrot.slane %v1586_v48, 2 }
 0x51d   : > { %v1616_v8 = vrot.slane %v1590_v0, 2  ;;  %v1551_v17 = vadd.f32 %v1525_v55, %v1459_v9  ;;  %v1593_v27 = vmul.f32 %v4233_v18, %v4280_v62  ;;  %v1611_v1 = vsel %vm1608_vm15, %v1609_v57, %v1610_v58 }
 0x51e   : > { %v1614_v23 = vsel %vm1608_vm15, %v1612_v50, %v1613_v59  ;;  %v1618_v33 = vrot.slane %v1587_v3, 2  ;;  %v1619_v38 = vrot.slane %v4332_v4, 2  ;;  %v1641_v30 = vadd.f32 %v1611_v1, %v1549_v52 }
 0x51f   : > { %v1642_v41 = vadd.f32 %v1614_v23, %v1550_v60  ;;  %v1464_v14 = vmul.f32 %v4213_v40, %v4265_v39  ;;  %v1535_v2 = vrot.slane %v4336_v11, 1  ;;  %v1552_v36 = vadd.f32 %v1528_v47, %v1460_v10 }
 0x520   : > { %v1594_v9 = vmul.f32 %v4236_v19, %v4287_v5  ;;  %v1532_v18 = vsel %vm1516_vm14, %v1521_v25, %v1531_v56  ;;  %v1534_v31 = vsel %vm1516_vm14, %v1524_v28, %v1533_v12  ;;  %v1617_v42 = vsel %vm1608_vm15, %v1615_v54, %v1616_v8 }
 0x521   : > { %v1621_v44 = vrot.slane %v1592_v7, 2  ;;  %v1553_v51 = vadd.f32 %v1530_v13, %v1461_v26  ;;  %v1595_v55 = vmul.f32 %v4239_v20, %v4290_v6  ;;  %v1623_v48 = vrot.slane %v1593_v27, 2 }
 0x522   : > { %v1643_v0 = vadd.f32 %v1617_v42, %v1551_v17  ;;  %v1465_v39 = vmul.f32 %v4196_v37, %v4277_v61  ;;  %v1620_v10 = vsel %vm1608_vm15, %v1618_v33, %v1619_v38  ;;  %v1675_v19 = vadd.f32 %v4242_v21, %v1641_v30 }
 0x523   : > { %v1676_v25 = vadd.f32 %v4245_v43, %v1642_v41  ;;  %v1466_v28 = vmul.f32 %v4207_v34, %v4280_v62  ;;  %v1554_v57 = vadd.f32 %v1532_v18, %v1462_v29  ;;  %v1625_v50 = vrot.slane %v1594_v9, 2 }
 0x524   : > { %v1644_v26 = vadd.f32 %v1620_v10, %v1552_v36  ;;  %v1536_v52 = vsel %vm1516_vm14, %v1527_v53, %v1535_v2  ;;  %v1555_v20 = vadd.f32 %v1534_v31, %v1463_v32  ;;  %v1557_v60 = vadd.f32 %v1529_v63, %v1465_v39 }
 0x525   : > { %v1622_v3 = vsel %vm1608_vm15, %v1610_v58, %v1621_v44  ;;  %v1624_v37 = vsel %vm1608_vm15, %v1613_v59, %v1623_v48  ;;  %v1627_v61 = vrot.slane %v1595_v55, 2  ;;  %v1677_v11 = vadd.f32 %v4248_v45, %v1643_v0 }
 0x526   : > { %v1645_v4 = vadd.f32 %v1622_v3, %v1553_v51  ;;  %vm1687_vm0 = vcmp.gt.f32.partialorder %v1675_v19, 0.0  ;;  %vm1688_vm1 = vcmp.gt.f32.partialorder %v1676_v25, 0.0  ;;  %v1701_v47 = vmul.f32 %v4254_v49, %v1675_v19 }
 0x527   : > { %v1702_v34 = vmul.f32 %v4254_v49, %v1676_v25  ;;  %v1556_v62 = vadd.f32 %v1536_v52, %v1464_v14  ;;  %v1626_v29 = vsel %vm1608_vm15, %v1616_v8, %v1625_v50  ;;  %v1646_v53 = vadd.f32 %v1624_v37, %v1554_v57 }
 0x528   : > { %v1678_v32 = vadd.f32 %v4251_v46, %v1644_v26  ;;  %v1467_v63 = vmul.f32 %v4210_v35, %v4287_v5  ;;  %v1468_v58 = vmul.f32 %v4213_v40, %v4290_v6  ;;  %v1558_v59 = vadd.f32 %v1531_v56, %v1466_v28 }
 0x529   : > { %v1647_v13 = vadd.f32 %v1626_v29, %v1555_v20  ;;  %v1679_v7 = vadd.f32 %v4242_v21, %v1645_v4  ;;  %v1703_v54 = vmul.f32 %v4254_v49, %v1677_v11  ;;  %v4380_v17 = vsel %vm1687_vm0, %v1675_v19, %v1701_v47 }
 0x52a   : > { %v4382_v27 = vsel %vm1688_vm1, %v1676_v25, %v1702_v34  ;;  %v1559_v8 = vadd.f32 %v1533_v12, %v1467_v63  ;;  %v1628_v1 = vsel %vm1608_vm15, %v1619_v38, %v1627_v61  ;;  %v1649_v23 = vadd.f32 %v1621_v44, %v1557_v60 }
 0x52b   : > { %vm1689_vm2 = vcmp.gt.f32.partialorder %v1677_v11, 0.0  ;;  %v1648_v33 = vadd.f32 %v1628_v1, %v1556_v62  ;;  %v1680_v35 = vadd.f32 %v4245_v43, %v1646_v53  ;;  %v1704_v40 = vmul.f32 %v4254_v49, %v1678_v32 }
 0x52c   : > { %v1560_v5 = vadd.f32 %v1535_v2, %v1468_v58  ;;  %v1650_v6 = vadd.f32 %v1623_v48, %v1558_v59  ;;  %vm1690_vm3 = vcmp.gt.f32.partialorder %v1678_v32, 0.0  ;;  %v1725_v56 = vadd.f32 %v4382_v27, %v4380_v17 }
 0x52d   : > { %v1681_v30 = vadd.f32 %v4248_v45, %v1647_v13  ;;  %v1705_v41 = vmul.f32 %v4254_v49, %v1679_v7  ;;  %v1715_v12 = vsel %vm1689_vm2, %v1677_v11, %v1703_v54  ;;  %v1651_v14 = vadd.f32 %v1625_v50, %v1559_v8 }
 0x52e   : > { %v1683_v38 = vadd.f32 %v4242_v21, %v1649_v23  ;;  %vm1691_vm4 = vcmp.gt.f32.partialorder %v1679_v7, 0.0  ;;  %v1726_v36 = vadd.f32 %v1725_v56, %v1715_v12  ;;  %v1682_v9 = vadd.f32 %v4251_v46, %v1648_v33 }
 0x52f   : > { %v1706_v18 = vmul.f32 %v4254_v49, %v1680_v35  ;;  %v1716_v2 = vsel %vm1690_vm3, %v1678_v32, %v1704_v40  ;;  %v1652_v31 = vadd.f32 %v1627_v61, %v1560_v5  ;;  %v1684_v42 = vadd.f32 %v4245_v43, %v1650_v6 }
 0x530   : > { %vm1692_vm5 = vcmp.gt.f32.partialorder %v1680_v35, 0.0  ;;  %v1727_v44 = vadd.f32 %v1726_v36, %v1716_v2  ;;  %v1707_v51 = vmul.f32 %v4254_v49, %v1681_v30  ;;  %v1717_v55 = vsel %vm1691_vm4, %v1679_v7, %v1705_v41 }
 0x531   : > { %v1685_v48 = vadd.f32 %v4248_v45, %v1651_v14  ;;  %vm1693_vm6 = vcmp.gt.f32.partialorder %v1681_v30, 0.0  ;;  %v1709_v21 = vmul.f32 %v4254_v49, %v1683_v38  ;;  %vm1695_vm7 = vcmp.gt.f32.partialorder %v1683_v38, 0.0 }
 0x532   : > { %v1728_v0 = vadd.f32 %v1727_v44, %v1717_v55  ;;  %v1708_v39 = vmul.f32 %v4254_v49, %v1682_v9  ;;  %v1718_v10 = vsel %vm1692_vm5, %v1680_v35, %v1706_v18  ;;  %v1686_v19 = vadd.f32 %v4251_v46, %v1652_v31 }
 0x533   : > { %vm1694_vm8 = vcmp.gt.f32.partialorder %v1682_v9, 0.0  ;;  %v1710_v43 = vmul.f32 %v4254_v49, %v1684_v42  ;;  %vm1696_vm9 = vcmp.gt.f32.partialorder %v1684_v42, 0.0  ;;  %v1719_v28 = vsel %vm1693_vm6, %v1681_v30, %v1707_v51 }
 0x534   : > { %v1729_v25 = vadd.f32 %v1728_v0, %v1718_v10  ;;  %v1711_v57 = vmul.f32 %v4254_v49, %v1685_v48  ;;  %v1721_v50 = vsel %vm1695_vm7, %v1683_v38, %v1709_v21  ;;  %vm1697_vm11 = vcmp.gt.f32.partialorder %v1685_v48, 0.0 }
 0x535   : > { %v1720_v26 = vsel %vm1694_vm8, %v1682_v9, %v1708_v39  ;;  %v1712_v52 = vmul.f32 %v4254_v49, %v1686_v19  ;;  %v1722_v20 = vsel %vm1696_vm9, %v1684_v42, %v1710_v43  ;;  %vm1698_vm12 = vcmp.gt.f32.partialorder %v1686_v19, 0.0 }
 0x536   : > { %v1730_v45 = vadd.f32 %v1729_v25, %v1719_v28  ;;  %v1732_v3 = vsel %vm1228_vm10, %v1721_v50, 0.0  ;;  %v1723_v46 = vsel %vm1697_vm11, %v1685_v48, %v1711_v57  ;;  %v1734_v61 = vsel %vm1228_vm10, %v1722_v20, 0.0 }
 0x537   : > { %v1724_v4 = vsel %vm1698_vm12, %v1686_v19, %v1712_v52  ;;  %v1736_v47 = vsel %vm1228_vm10, %v1723_v46, 0.0  ;;  %v3075_v52 = vld [vmem:[#allocation21 + $0x4] ss:$8 sps:$4 sm:$0xff]  }
 0x538   : > { %v1731_v60 = vadd.f32 %v1730_v45, %v1720_v26  ;;  %v1738_v62 = vsel %vm1228_vm10, %v1724_v4, 0.0  ;;  %2289 = vmatprep.subr.bf16.mxu0 %v3075_v52 }
 0x53a   : > { %v1733_v37 = vadd.f32 %v1732_v3, %v1731_v60  ;;  %v3078_v60 = vld [vmem:[#allocation21 + $0x14] ss:$8 sps:$4 sm:$0xff]   ;;  %v3080_v3 = vld [vmem:[#allocation21 + $0x10] ss:$8 sps:$4 sm:$0xff]  }
 0x53c   : > { %v1735_v11 = vadd.f32 %v1734_v61, %v1733_v37  ;;  %v3083_v37 = vld [vmem:[#allocation21 + $0x20] ss:$8 sps:$4 sm:$0xff]   ;;  %v3084_v61 = vld [vmem:[#allocation21 + $0x34] ss:$8 sps:$4 sm:$0xff]  }
 0x53e   : > { %v1737_v34 = vadd.f32 %v1736_v47, %v1735_v11  ;;  %v3087_v11 = vld [vmem:[#allocation21 + $0x44] ss:$8 sps:$4 sm:$0xff]   ;;  %v3089_v47 = vld [vmem:[#allocation21 + $0x40] ss:$8 sps:$4 sm:$0xff]  }
 0x540   : > { %v1739_v29 = vadd.f32 %v1738_v62, %v1737_v34  ;;  %v3090_v34 = vld [vmem:[#allocation21 + $0x54] ss:$8 sps:$4 sm:$0xff]   ;;  %v3092_v62 = vld [vmem:[#allocation21 + $0x50] ss:$8 sps:$4 sm:$0xff]  }
 0x542   : > { %1740 = vadd.xlane.f32.xlu1 %v1739_v29  ;;  %v3093_v29 = vld [vmem:[#allocation21 + $0x64] ss:$8 sps:$4 sm:$0xff]  }
 0x5cf   : > { %v1741_v53 = vpop.xlane.xlu1 %1740 }
 0x5d0   : > { %v1742_v49 = vrot.slane %v1741_v53, 4 }
 0x5d2   : > { %v1743_v32 = vadd.f32 %v1742_v49, %v1741_v53  ;;  %v3095_v53 = vld [vmem:[#allocation21 + $0x60] ss:$8 sps:$4 sm:$0xff]   ;;  %v3096_v49 = vld [vmem:[#allocation21 + $0x74] ss:$8 sps:$4 sm:$0xff]  }
 0x5d4   : > { %v1744_v63 = vrot.slane %v1743_v32, 2 }
 0x5d6   : > { %v1745_v58 = vadd.f32 %v1744_v63, %v1743_v32  ;;  %v3098_v32 = vld [vmem:[#allocation21 + $0x70] ss:$8 sps:$4 sm:$0xff]   ;;  %v3099_v63 = vld [vmem:[#allocation21 + $0x84] ss:$8 sps:$4 sm:$0xff]  }
 0x5d8   : > { %v1746_v59 = vrot.slane %v1745_v58, 1 }
 0x5da   : > { %v1747_v13 = vadd.f32 %v1746_v59, %v1745_v58  ;;  %v3101_v58 = vld [vmem:[#allocation21 + $0x80] ss:$8 sps:$4 sm:$0xff]   ;;  %v3102_v59 = vld [vmem:[#allocation21 + $0x94] ss:$8 sps:$4 sm:$0xff]  }
 0x5dc   : > { %2809 = vpush %v1747_v13  ;;  %v3104_v13 = vld [vmem:[#allocation21 + $0x90] ss:$8 sps:$4 sm:$0xff]  }
 0x60d   : > { %s2810_s15 = spop %2809 }
 0x60e   : > { %s1749_s11 = smul.f32 0.000114889706, %s2810_s15  ;;  %s3521_s15 = scalar_lea.vmem %s3520_s20, 1536 }
 0x610   : > { %v1750_v7 = vstv %s1749_s11 }
 0x611   : > { %v4408_v54 = vsub.f32 %v4380_v17, %v1750_v7  ;;  %v4411_v8 = vsub.f32 %v4382_v27, %v1750_v7  ;;  %v4413_v1 = vsub.f32 %v1715_v12, %v1750_v7  ;;  %v4419_v35 = vsub.f32 %v1716_v2, %v1750_v7 }
 0x612   : > { %v4421_v40 = vsub.f32 %v1717_v55, %v1750_v7  ;;  %v4425_v6 = vsub.f32 %v1718_v10, %v1750_v7  ;;  %v4429_v30 = vsub.f32 %v1719_v28, %v1750_v7  ;;  %v4433_v14 = vsub.f32 %v1721_v50, %v1750_v7 }
 0x613   : > { %v1763_v23 = vmul.f32 %v4408_v54, %v4408_v54  ;;  %v1764_v33 = vmul.f32 %v4411_v8, %v4411_v8  ;;  %v1765_v5 = vmul.f32 %v4413_v1, %v4413_v1  ;;  %v1766_v27 = vmul.f32 %v4419_v35, %v4419_v35 }
 0x614   : > { %v1767_v41 = vmul.f32 %v4421_v40, %v4421_v40  ;;  %v4435_v38 = vsub.f32 %v1720_v26, %v1750_v7  ;;  %v1768_v36 = vmul.f32 %v4425_v6, %v4425_v6  ;;  %v4439_v18 = vsub.f32 %v1722_v20, %v1750_v7  ;;  %v3077_v20 = vld [vmem:[#allocation21] ss:$8 sps:$4 sm:$0xff]  }
 0x615   : > { %v1775_v17 = vadd.f32 %v1764_v33, %v1763_v23  ;;  %v1769_v2 = vmul.f32 %v4429_v30, %v4429_v30  ;;  %v4443_v42 = vsub.f32 %v1723_v46, %v1750_v7  ;;  %v1771_v44 = vmul.f32 %v4433_v14, %v4433_v14  ;;  %2290 = vmatpush1.bf16.msra.mxu0 %v3077_v20  ;;  %v3081_v46 = vld [vmem:[#allocation21 + $0x24] ss:$8 sps:$4 sm:$0xff]   ;;  %v3107_v23 = vld [vmem:[#allocation21 + $0xa0] ss:$8 sps:$4 sm:$0xff]   ;;  %v3108_v33 = vld [vmem:[#allocation21 + $0xb4] ss:$8 sps:$4 sm:$0xff]  }
 0x616   : > { %v1770_v51 = vmul.f32 %v4435_v38, %v4435_v38  ;;  %v4449_v48 = vsub.f32 %v1724_v4, %v1750_v7  ;;  %v1772_v21 = vmul.f32 %v4439_v18, %v4439_v18  ;;  %2291 = vmatprep.subr.bf16.mxu0 %v3078_v60  ;;  %v3086_v4 = vld [vmem:[#allocation21 + $0x30] ss:$8 sps:$4 sm:$0xff]   ;;  %v3105_v7 = vld [vmem:[#allocation21 + $0xa4] ss:$8 sps:$4 sm:$0xff]  }
 0x617   : > { %v1776_v56 = vadd.f32 %v1775_v17, %v1765_v5  ;;  %v1773_v39 = vmul.f32 %v4443_v42, %v4443_v42  ;;  %v1782_v10 = vsel %vm1228_vm10, %v1771_v44, 0.0  ;;  %v3110_v5 = vld [vmem:[#allocation21 + $0xb0] ss:$8 sps:$4 sm:$0xff]   ;;  %v3111_v17 = vld [vmem:[#allocation21 + $0xc4] ss:$8 sps:$4 sm:$0xff]  }
 0x618   : > { %v1774_v43 = vmul.f32 %v4449_v48, %v4449_v48  ;;  %v1784_v25 = vsel %vm1228_vm10, %v1772_v21, 0.0 }
 0x619   : > { %v1777_v12 = vadd.f32 %v1776_v56, %v1766_v27  ;;  %v1786_v57 = vsel %vm1228_vm10, %v1773_v39, 0.0  ;;  %2292 = vmatpush1.bf16.msra.mxu0 %v3080_v3  ;;  %v3113_v27 = vld [vmem:[#allocation21 + $0xc0] ss:$8 sps:$4 sm:$0xff]   ;;  %v3114_v56 = vld [vmem:[#allocation21 + $0xd4] ss:$8 sps:$4 sm:$0xff]  }
 0x61a   : > { %v1788_v45 = vsel %vm1228_vm10, %v1774_v43, 0.0  ;;  %2293 = vmatprep.subr.bf16.mxu0 %v3081_v46  ;;  %v3125_v39 = vld [vmem:[#allocation21 + $0x104] ss:$8 sps:$4 sm:$0xff]  }
 0x61b   : > { %v1778_v9 = vadd.f32 %v1777_v12, %v1767_v41  ;;  %v3116_v41 = vld [vmem:[#allocation21 + $0xd0] ss:$8 sps:$4 sm:$0xff]  }
 0x61d   : > { %v1779_v31 = vadd.f32 %v1778_v9, %v1768_v36  ;;  %2294 = vmatpush1.bf16.msra.mxu0 %v3083_v37  ;;  %v3117_v9 = vld [vmem:[#allocation21 + $0xe4] ss:$8 sps:$4 sm:$0xff]  }
 0x61e   : > { %2295 = vmatprep.subr.bf16.mxu0 %v3084_v61 }
 0x61f   : > { %v1780_v55 = vadd.f32 %v1779_v31, %v1769_v2  ;;  %v3119_v2 = vld [vmem:[#allocation21 + $0xe0] ss:$8 sps:$4 sm:$0xff]   ;;  %v3120_v31 = vld [vmem:[#allocation21 + $0xf4] ss:$8 sps:$4 sm:$0xff]  }
 0x621   : > { %v1781_v0 = vadd.f32 %v1780_v55, %v1770_v51  ;;  %2296 = vmatpush1.bf16.msra.mxu0 %v3086_v4  ;;  %v3122_v51 = vld [vmem:[#allocation21 + $0xf0] ss:$8 sps:$4 sm:$0xff]  }
 0x622   : > { %2297 = vmatprep.subr.bf16.mxu0 %v3087_v11 }
 0x623   : > { %v1783_v19 = vadd.f32 %v1782_v10, %v1781_v0 }
 0x625   : > { %v1785_v28 = vadd.f32 %v1784_v25, %v1783_v19  ;;  %2298 = vmatpush1.bf16.msra.mxu0 %v3089_v47  ;;  %v1817_v25 = vld [vmem:[#allocation18] sm:$0xf] }
 0x626   : > { %2299 = vmatprep.subr.bf16.mxu0 %v3090_v34  ;;  %v1830_v37 = vrot.slane %v1817_v25, %v4129_v22  ;;  %v4479_v4 = vrot.slane %v1817_v25, %v4131_v24 }
 0x627   : > { %v1787_v50 = vadd.f32 %v1786_v57, %v1785_v28  ;;  %v1851_v28 = vld [vmem:[#allocation19] sm:$0xf]  ;;  %v1826_v57 = vrot.slane %v1817_v25, %v4125_v16 }
 0x628   : > { %v1856_v52 = vrot.slane %v1851_v28, %v4123_v15 }
 0x629   : > { %v1789_v26 = vadd.f32 %v1788_v45, %v1787_v50  ;;  %2300 = vmatpush1.bf16.msra.mxu0 %v3092_v62  ;;  %v1822_v50 = vrot.slane %v1817_v25, %v4123_v15  ;;  %v3143_v25 = vld [vmem:[#allocation21 + $0x164] ss:$8 sps:$4 sm:$0xff]  }
 0x62a   : > { %2301 = vmatprep.subr.bf16.mxu0 %v3093_v29 }
 0x62b   : > { %1790 = vadd.xlane.f32.xlu1 %v1789_v26  ;;  %v1860_v26 = vrot.slane %v1851_v28, %v4125_v16 }
 0x62d   : > { %2302 = vmatpush1.bf16.msra.mxu0 %v3095_v53 }
 0x62e   : > { %2303 = vmatprep.subr.bf16.mxu0 %v3096_v49 }
 0x631   : > { %2304 = vmatpush1.bf16.msra.mxu0 %v3098_v32  ;;  %v1864_v32 = vrot.slane %v1851_v28, %v4129_v22 }
 0x632   : > { %2305 = vmatprep.subr.bf16.mxu0 %v3099_v63 }
 0x635   : > { %2306 = vmatpush1.bf16.msra.mxu0 %v3101_v58 }
 0x636   : > { %2307 = vmatprep.subr.bf16.mxu0 %v3102_v59  ;;  %v3123_v59 = vld [vmem:[#allocation21 + $0x100] ss:$8 sps:$4 sm:$0xff]  }
 0x639   : > { %2308 = vmatpush1.bf16.msra.mxu0 %v3104_v13 }
 0x63a   : > { %2309 = vmatprep.subr.bf16.mxu0 %v3105_v7 }
 0x63d   : > { %2310 = vmatpush1.bf16.msra.mxu0 %v3107_v23 }
 0x63e   : > { %2311 = vmatprep.subr.bf16.mxu0 %v3108_v33 }
 0x641   : > { %2312 = vmatpush1.bf16.msra.mxu0 %v3110_v5  ;;  %v4495_v5 = vrot.slane %v1851_v28, %v4131_v24  ;;  %v3141_v28 = vld [vmem:[#allocation21 + $0x160] ss:$8 sps:$4 sm:$0xff]  }
 0x642   : > { %2313 = vmatprep.subr.bf16.mxu0 %v3111_v17 }
 0x645   : > { %2314 = vmatpush1.bf16.msra.mxu0 %v3113_v27 }
 0x646   : > { %2315 = vmatprep.subr.bf16.mxu0 %v3114_v56 }
 0x649   : > { %2316 = vmatpush1.bf16.msra.mxu0 %v3116_v41 }
 0x64a   : > { %2317 = vmatprep.subr.bf16.mxu0 %v3117_v9 }
 0x64d   : > { %2318 = vmatpush1.bf16.msra.mxu0 %v3119_v2 }
 0x64e   : > { %2319 = vmatprep.subr.bf16.mxu0 %v3120_v31 }
 0x651   : > { %2320 = vmatpush1.bf16.msra.mxu0 %v3122_v51 }
 0x652   : > { %2340 = vmatprep.subr.bf16.mxu0 %v3125_v39  ;;  %v3137_v39 = vld [vmem:[#allocation21 + $0x144] ss:$8 sps:$4 sm:$0xff]  }
 0x6b8   : > { %v1791_v12 = vpop.xlane.xlu1 %1790 }
 0x6b9   : > { %v1792_v36 = vrot.slane %v1791_v12, 4 }
 0x6bb   : > { %v1793_v44 = vadd.f32 %v1792_v36, %v1791_v12  ;;  %v3131_v36 = vld [vmem:[#allocation21 + $0x124] ss:$8 sps:$4 sm:$0xff]  }
 0x6bd   : > { %v1794_v55 = vrot.slane %v1793_v44, 2 }
 0x6bf   : > { %v1795_v21 = vadd.f32 %v1794_v55, %v1793_v44  ;;  %v3129_v44 = vld [vmem:[#allocation21 + $0x120] ss:$8 sps:$4 sm:$0xff]   ;;  %v3134_v55 = vld [vmem:[#allocation21 + $0x134] ss:$8 sps:$4 sm:$0xff]  }
 0x6c1   : > { %v1796_v0 = vrot.slane %v1795_v21, 1 }
 0x6c3   : > { %v1797_v10 = vadd.f32 %v1796_v0, %v1795_v21  ;;  %v3132_v0 = vld [vmem:[#allocation21 + $0x130] ss:$8 sps:$4 sm:$0xff]  }
 0x6c5   : > { %2811 = vpush %v1797_v10  ;;  %v3135_v10 = vld [vmem:[#allocation21 + $0x140] ss:$8 sps:$4 sm:$0xff]  }
 0x6f6   : > { %s2812_s0 = spop %2811 }
 0x6f7   : > { %s1799_s30 = smul.f32 0.000114889706, %s2812_s0 }
 0x6f9   : > { %s1800_s2 = sadd.f32 1e-08, %s1799_s30 }
 0x6fb   : > { %v1801_v19 = vstv %s1800_s2 }
 0x6fc   : > { %3173 = vrsqrt.f32 %v1801_v19  ;;  %v3140_v19 = vld [vmem:[#allocation21 + $0x154] ss:$8 sps:$4 sm:$0xff]  }
 0x706   : > { %v3174_v43 = vpop.eup %3173 }
 0x707   : > { %2813 = vpush %v3174_v43  ;;  %v3138_v43 = vld [vmem:[#allocation21 + $0x150] ss:$8 sps:$4 sm:$0xff]  }
 0x738   : > { %s2814_s7 = spop %2813 }
 0x739   : > { %v4463_v45 = vstv %s2814_s7 }
 0x73a   : > { %v1806_v20 = vmul.f32 %v4463_v45, %v4411_v8  ;;  %v1810_v60 = vmul.f32 %v4463_v45, %v4425_v6  ;;  %v1805_v3 = vmul.f32 %v4463_v45, %v4408_v54  ;;  %v1809_v46 = vmul.f32 %v4463_v45, %v4421_v40 }
 0x73b   : > { %v1814_v61 = vmul.f32 %v4463_v45, %v4439_v18  ;;  %v1813_v6 = vmul.f32 %v4463_v45, %v4433_v14  ;;  %v1808_v54 = vmul.f32 %v4463_v45, %v4419_v35  ;;  %v1812_v40 = vmul.f32 %v4463_v45, %v4435_v38  ;;  %v3128_v35 = vld [vmem:[#allocation21 + $0x114] ss:$8 sps:$4 sm:$0xff]  }
 0x73c   : > { %v1840_v11 = vmul.f32 %v1826_v57, %v1806_v20  ;;  %v1844_v47 = vmul.f32 %v1826_v57, %v1810_v60  ;;  %v1839_v8 = vmul.f32 %v1822_v50, %v1805_v3  ;;  %v1843_v34 = vmul.f32 %v1822_v50, %v1809_v46  ;;  %v3152_v20 = vld [vmem:[#allocation21 + $0x194] ss:$8 sps:$4 sm:$0xff]   ;;  %v3150_v60 = vld [vmem:[#allocation21 + $0x190] ss:$8 sps:$4 sm:$0xff]   ;;  %v3155_v3 = vld [vmem:[#allocation21 + $0x1a4] ss:$8 sps:$4 sm:$0xff]  }
 0x73d   : > { %v1848_v62 = vmul.f32 %v1826_v57, %v1814_v61  ;;  %v1807_v7 = vmul.f32 %v4463_v45, %v4413_v1  ;;  %v1811_v14 = vmul.f32 %v4463_v45, %v4429_v30  ;;  %v1847_v23 = vmul.f32 %v1822_v50, %v1813_v6  ;;  %v3126_v1 = vld [vmem:[#allocation21 + $0x110] ss:$8 sps:$4 sm:$0xff]   ;;  %v3146_v57 = vld [vmem:[#allocation21 + $0x174] ss:$8 sps:$4 sm:$0xff]   ;;  %v3153_v46 = vld [vmem:[#allocation21 + $0x1a0] ss:$8 sps:$4 sm:$0xff]  }
 0x73e   : > { %v1874_v29 = vadd.f32 %v1860_v26, %v1840_v11  ;;  %v1878_v53 = vadd.f32 %v1860_v26, %v1844_v47  ;;  %v1873_v18 = vadd.f32 %v1856_v52, %v1839_v8  ;;  %v1877_v49 = vadd.f32 %v1856_v52, %v1843_v34  ;;  %v3144_v50 = vld [vmem:[#allocation21 + $0x170] ss:$8 sps:$4 sm:$0xff]   ;;  %v3161_v11 = vld [vmem:[#allocation21 + $0x1c4] ss:$8 sps:$4 sm:$0xff]   ;;  %v3159_v47 = vld [vmem:[#allocation21 + $0x1c0] ss:$8 sps:$4 sm:$0xff]  }
 0x73f   : > { %v1882_v63 = vadd.f32 %v1860_v26, %v1848_v62  ;;  %v1842_v38 = vmul.f32 %v4479_v4, %v1808_v54  ;;  %v1846_v33 = vmul.f32 %v4479_v4, %v1812_v40  ;;  %v1841_v17 = vmul.f32 %v1830_v37, %v1807_v7  ;;  %v3149_v26 = vld [vmem:[#allocation21 + $0x184] ss:$8 sps:$4 sm:$0xff]   ;;  %v3156_v61 = vld [vmem:[#allocation21 + $0x1b0] ss:$8 sps:$4 sm:$0xff]   ;;  %v3164_v8 = vld [vmem:[#allocation21 + $0x1d4] ss:$8 sps:$4 sm:$0xff]  }
 0x740   : > { %v1886_v58 = vpack.c.bf16 %v1878_v53, %v1874_v29  ;;  %v1885_v13 = vpack.c.bf16 %v1877_v49, %v1873_v18  ;;  %v1845_v27 = vmul.f32 %v1830_v37, %v1811_v14  ;;  %v1815_v56 = vmul.f32 %v4463_v45, %v4443_v42  ;;  %v3162_v34 = vld [vmem:[#allocation21 + $0x1d0] ss:$8 sps:$4 sm:$0xff]   ;;  %v3167_v62 = vld [vmem:[#allocation21 + $0x1e4] ss:$8 sps:$4 sm:$0xff]   ;;  %v3165_v54 = vld [vmem:[#allocation21 + $0x1e0] ss:$8 sps:$4 sm:$0xff]  }
 0x741   : > { %v1890_v22 = vpack.c.bf16 %v1882_v63, %v1882_v63  ;;  %v4499_v30 = vadd.f32 %v1864_v32, %v1841_v17  ;;  %v1881_v24 = vadd.f32 %v1856_v52, %v1847_v23  ;;  %v1876_v9 = vadd.f32 %v4495_v5, %v1842_v38  ;;  %v3147_v52 = vld [vmem:[#allocation21 + $0x180] ss:$8 sps:$4 sm:$0xff]   ;;  %v3170_v40 = vld [vmem:[#allocation21 + $0x1f4] ss:$8 sps:$4 sm:$0xff]   ;;  %v3168_v53 = vld [vmem:[#allocation21 + $0x1f0] ss:$8 sps:$4 sm:$0xff]  }
 0x742   : > { %2321 = vmatprep.mubr.bf16.mxu0 %v1886_v58  ;;  %v4501_v41 = vadd.f32 %v1864_v32, %v1845_v27  ;;  %v1849_v12 = vmul.f32 %v1830_v37, %v1815_v56  ;;  %v1880_v2 = vadd.f32 %v4495_v5, %v1846_v33  ;;  %v3158_v37 = vld [vmem:[#allocation21 + $0x1b4] ss:$8 sps:$4 sm:$0xff]   ;;  %v1816_v6 = vmul.f32 %v4463_v45, %v4449_v48  ;;  %v1957_v45 = vld [vmem:[#allocation22] sm:$0x3] }
 0x743   : > { %2322 = vmatmul.mubr.bf16.vlgmr.msra.gmra.mrb[0].mxu0 %v1885_v13  ;;  %v1889_v51 = vpack.c.bf16 %v1881_v24, %v1881_v24  ;;  %v1966_v63 = vrot.slane %v1957_v45, %v4125_v16 }
 0x744   : > { %2341 = vmatpush1.bf16.msra.mxu0 %v3123_v59  ;;  %2331 = vmatprep.mubr.bf16.mxu0 %v1890_v22  ;;  %v1887_v31 = vpack.c.bf16 %v4501_v41, %v4499_v30  ;;  %v4507_v42 = vadd.f32 %v1864_v32, %v1849_v12  ;;  %v1888_v21 = vpack.c.bf16 %v1880_v2, %v1876_v9  ;;  %v2391_v32 = vld [vmem:[%s4082_s5] sm:$0x3]  ;;  %s2429_s5 = sshll.u32 %s654_s27, 4  ;;  %s4525_s5 = int_to_ptr.vmem [resolvable:$true] %s2429_s5 }
 0x745   : > { %2342 = vmatprep.subr.bf16.mxu0 %v3128_v35  ;;  %v1850_v29 = vmul.f32 %v4479_v4, %v1816_v6  ;;  %v1962_v4 = vrot.slane %v1957_v45, %v4123_v15  ;;  %v2396_v58 = vrot.slane %v2391_v32, %v4123_v15  ;;  %v2400_v13 = vrot.slane %v2391_v32, %v4125_v16  ;;  %s3515_s6 = scalar_lea.vmem %s4525_s5, 768  ;;  %p3522_p9 = scmp.lt.s32.totalorder %s4525_s5, %s3520_s20 }
 0x746   : > { %v1891_v48 = vpack.c.bf16 %v4507_v42, %v4507_v42  ;;  %p3516_p0 = scmp.ne.s32.totalorder %s4525_s5, %s3515_s6  ;;  %p3523_p12 = scmp.lt.s32.totalorder %s3521_s15, %s3515_s6 }
 0x747   : > { %v1884_v18 = vadd.f32 %v4495_v5, %v1850_v29 }
 0x748   : > { %2343 = vmatpush1.bf16.msra.mxu0 %v3126_v1  ;;  %p3517_p11 = pnand %p3516_p0, %p4648_p5  ;;  %p3524_p13 = por %p3523_p12, %p3522_p9 }
 0x749   : > { %2344 = vmatprep.subr.bf16.mxu0 %v3131_v36  ;;  %v1892_v49 = vpack.c.bf16 %v1884_v18, %v1884_v18 }
 0x74a   : > { %p3518_p8 = pneg %p3517_p11 }
 0x74b   : > { %2332 = vmatmul.mubr.bf16.gmra.mrb[4].mxu0 %v1889_v51 }
 0x74c   : > { %2345 = vmatpush1.bf16.msra.mxu0 %v3129_v44  ;;  %2372 = vmatprep.mubr.bf16.mxu0 %v1888_v21  ;;  %p3525_p1 = pnand %p3524_p13, %p3518_p8 }
 0x74d   : > { %2346 = vmatprep.subr.bf16.mxu0 %v3134_v55 }
 0x750   : > { %2347 = vmatpush1.bf16.msra.mxu0 %v3132_v0 }
 0x751   : > { %2348 = vmatprep.subr.bf16.mxu0 %v3137_v39 }
 0x754   : > { %2349 = vmatpush1.bf16.msra.mxu0 %v3135_v10 }
 0x755   : > { %2350 = vmatprep.subr.bf16.mxu0 %v3140_v19 }
 0x758   : > { %2351 = vmatpush1.bf16.msra.mxu0 %v3138_v43 }
 0x759   : > { %2352 = vmatprep.subr.bf16.mxu0 %v3143_v25 }
 0x75c   : > { %2353 = vmatpush1.bf16.msra.mxu0 %v3141_v28 }
 0x75d   : > { %2354 = vmatprep.subr.bf16.mxu0 %v3146_v57 }
 0x760   : > { %2355 = vmatpush1.bf16.msra.mxu0 %v3144_v50 }
 0x761   : > { %2356 = vmatprep.subr.bf16.mxu0 %v3149_v26 }
 0x764   : > { %2357 = vmatpush1.bf16.msra.mxu0 %v3147_v52 }
 0x765   : > { %2358 = vmatprep.subr.bf16.mxu0 %v3152_v20 }
 0x768   : > { %2359 = vmatpush1.bf16.msra.mxu0 %v3150_v60 }
 0x769   : > { %2360 = vmatprep.subr.bf16.mxu0 %v3155_v3 }
 0x76c   : > { %2361 = vmatpush1.bf16.msra.mxu0 %v3153_v46 }
 0x76d   : > { %2362 = vmatprep.subr.bf16.mxu0 %v3158_v37 }
 0x770   : > { %2363 = vmatpush1.bf16.msra.mxu0 %v3156_v61 }
 0x771   : > { %2364 = vmatprep.subr.bf16.mxu0 %v3161_v11 }
 0x774   : > { %2365 = vmatpush1.bf16.msra.mxu0 %v3159_v47 }
 0x775   : > { %2366 = vmatprep.subr.bf16.mxu0 %v3164_v8 }
 0x778   : > { %2367 = vmatpush1.bf16.msra.mxu0 %v3162_v34 }
 0x779   : > { %2368 = vmatprep.subr.bf16.mxu0 %v3167_v62 }
 0x77c   : > { %2369 = vmatpush1.bf16.msra.mxu0 %v3165_v54 }
 0x77d   : > { %2370 = vmatprep.subr.bf16.mxu0 %v3170_v40 }
 0x780   : > { %2371 = vmatpush1.bf16.msra.mxu0 %v3168_v53 }
 0x783   : > { %2373 = vmatmul.mubr.bf16.vlgmr.msra.gmra.mrb[0].mxu0 %v1887_v31 }
 0x784   : > { %2382 = vmatprep.mubr.bf16.mxu0 %v1892_v49 }
 0x78b   : > { %2383 = vmatmul.mubr.bf16.gmra.mrb[4].mxu0 %v1891_v48 }
 0x856   : > { %v2374_v59 = vpop.f32.mrb[0].mxu0 }
 0x857   : > { %v2785_v7 = vadd.f32 %v2374_v59, %v1962_v4  ;;  %v2376_v14 = vpop.f32.mrb[1].mxu0 }
 0x858   : > { %v2786_v35 = vadd.f32 %v2376_v14, %v1966_v63  ;;  %v2378_v23 = vpop.f32.mrb[2].mxu0 }
 0x859   : > { %v2403_v38 = vmul.f32 %v2785_v7, %v2396_v58  ;;  %v2787_v33 = vadd.f32 %v2378_v23, %v1962_v4  ;;  %v2380_v5 = vpop.f32.mrb[3].mxu0 }
 0x85a   : > { %v2404_v22 = vmul.f32 %v2786_v35, %v2400_v13  ;;  %v2788_v17 = vadd.f32 %v2380_v5, %v1966_v63 }
 0x85b   : > { %2409 = vst [vmem:[%s654_s27] sm:$0xff] %v2403_v38  ;;  %v2405_v27 = vmul.f32 %v2787_v33, %v2396_v58 }
 0x85c   : > { %2410 = vst [vmem:[%s654_s27 + $0x8] sm:$0xff] %v2404_v22  ;;  %v2406_v56 = vmul.f32 %v2788_v17, %v2400_v13 }
 0x85d   : > { %2411 = vst [vmem:[%s654_s27 + $0x10] sm:$0xff] %v2405_v27 }
 0x85e   : > { %2412 = vst [vmem:[%s654_s27 + $0x18] sm:$0xff] %v2406_v56  ;;  %v2384_v15 = vpop.f32.mrb[4].mxu0 }
 0x85f   : > { %v2789_v16 = vadd.f32 %v2384_v15, %v1962_v4  ;;  %v2386_v1 = vpop.f32.mrb[5].mxu0 }
 0x860   : > { %v2790_v30 = vadd.f32 %v2386_v1, %v1966_v63  ;;  %v2388_v41 = vpop.f32.mrb[6].mxu0 }
 0x861   : > { %v2407_v12 = vmul.f32 %v2789_v16, %v2396_v58  ;;  %v2389_v36 = vpop.f32.mrb[7].mxu0 }
 0x862   : > { %v2408_v24 = vmul.f32 %v2790_v30, %v2400_v13 }
 0x863   : > { %2413 = vst [vmem:[%s654_s27 + $0x20] sm:$0x1] %v2407_v12 }
 0x864   : > { %2414 = vst [vmem:[%s654_s27 + $0x28] sm:$0x1] %v2408_v24 }
 0x865   : > { %3528 = shalt.err (!%p3525_p1)
}
 0x866   : > { %s3529_s11 = scalar_lea.hbm %s4530_s3, 768  ;;  %s3533_s2 = scalar_lea.hbm %s4647_s24, 1536 }
 0x867   : > { %p3530_p3 = scmp.ne.s32.totalorder %s4530_s3, %s3529_s11  ;;  %p3534_p10 = scmp.lt.u32.totalorder %s4530_s3, %s4647_s24 }
 0x868   : > { %p3535_p6 = scmp.lt.u32.totalorder %s3533_s2, %s3529_s11  ;;  %p3537_p0 = scmp.lt.u32.totalorder %s3529_s11, %s4530_s3 }
 0x869   : > { %p3531_p2 = pnand %p3530_p3, %p4648_p5 }
 0x86a   : > { %p3536_p7 = por %p3535_p6, %p3534_p10 }
 0x86b   : > { %p3532_p4 = pneg %p3531_p2 }
 0x86c   : > { %p3538_p11 = por %p3537_p0, %p3536_p7 }
 0x86e   : > { %p3539_p8 = pnand %p3538_p11, %p3532_p4 }
 0x870   : > { %3542 = shalt.err (!%p3539_p8)
}
 0x871   : > { %s3628_s27 = smov 256   ;;  %s3629_s1 = smov 16  }
 0x872   : > { %2860 = dma.vmem_to_hbm [thread:$0]  (%p4648_p5), %s4525_s5, 768, %s4530_s3, %s2416_s21, %s3628_s27, %s3628_s27, %s3629_s1  }
 0x873 PF: > { %s2444_s16 = sand.u32 1, %s3597_s17   ;;  %p4649_p9 = scmp.ne.s32.totalorder %s4625_s29, 0 }
 0x874   : > { %p4650_p12 = scmp.ge.s32.totalorder %s3609_s19, 2  ;;  %s2445_s14 = scalar_lea.sflag [#allocation6], %s2444_s16 }
 0x876   : > { %p2901_p13 = pnand %p4650_p12, %p4649_p9 }
 0x878   : > { %3592 = dma.done.wait (!%p2901_p13), %s2445_s14, 768  }
 0x879   : > { %3594 = vsyncadd (!%p2901_p13), %s2445_s14, 4294966528  ;;  %p37_p1 = scmp.ge.s32.totalorder %s3962_s25, 4   ;;  %s4651_s17 = smov %s3601_s18 }
 0x87a   : > { %s4652_s18 = smov %s3605_s4  ;;  %s4653_s4 = smov %s3973_s28 }
 0x87b   : > { %s4654_s19 = smov %s3962_s25  ;;  %39 = sbr.rel (!%p37_p1) target bundleno = 26 (0x1a), region = 176 }
 0x882   :  { %2450 = vsyncpa [#allocation5], 1 }
 0x883   :  { %2452 = vsyncpa [#allocation5 + $0x1], 1 }
 0x884   :  { %2453 = vsyncpa [#allocation8], 1 }
 0x885   :  { %2455 = vsyncpa [#allocation8 + $0x1], 1 }
 0x886   :  { %2456 = vsyncpa [#allocation11], 1 }
 0x887   :  { %2457 = vsyncpa [#allocation14], 1 }
 0x888   :  { %2458 = vsyncpa [#allocation17], 1 }
 0x889   :  { %2459 = vsyncpa [#allocation20], 1 }
 0x88a   :  { %2460 = vsyncpa [#allocation23], 1 }
 0x88b   :  { %2461 = vsyncpa [#allocation6], 1 }
 0x88c   :  { %2463 = vsyncpa [#allocation6 + $0x1], 1 }

// kernel: model_forward.7
= control target key start
LH: loop header
LB: loop body
LE: loop exit
PB: predicated region body
PF: predicated region fallthrough
CT: control target
= control target key end

     0   :  { %s5474_s0 = inlined_call_operand.hbm [shape: f32[2,17,256], index: 0, kind: input, shape index: {}]   ;;  %s5475_s1 = inlined_call_operand.hbm [shape: bf16[256,512], index: 1, kind: input, shape index: {}]   ;;  %s5476_s2 = inlined_call_operand.hbm [shape: f32[1,512], index: 2, kind: input, shape index: {}]   ;;  %s5477_s3 = inlined_call_operand.<no memory space> [shape: f32[1,1], index: 3, kind: input, shape index: {}]   ;;  %s5478_s4 = inlined_call_operand.hbm [shape: f32[1,512], index: 4, kind: input, shape index: {}]   ;;  %s5479_s5 = inlined_call_operand.hbm [shape: f32[1,512], index: 5, kind: input, shape index: {}]   ;;  %s5480_s6 = inlined_call_operand.hbm [shape: f32[3,512], index: 6, kind: input, shape index: {}]   ;;  %s5481_s7 = inlined_call_operand.hbm [shape: f32[1,512], index: 7, kind: input, shape index: {}]   ;;  %s5482_s8 = inlined_call_operand.<no memory space> [shape: f32[1,1], index: 8, kind: input, shape index: {}]   ;;  %s5483_s9 = inlined_call_operand.hbm [shape: f32[1,512], index: 9, kind: input, shape index: {}]   ;;  %s5484_s10 = inlined_call_operand.hbm [shape: f32[1,512], index: 10, kind: input, shape index: {}]   ;;  %s5485_s11 = inlined_call_operand.hbm [shape: bf16[512,256], index: 11, kind: input, shape index: {}]   ;;  %s5486_s12 = inlined_call_operand.hbm [shape: f32[1,256], index: 12, kind: input, shape index: {}]   ;;  %s5487_s13 = inlined_call_operand.hbm [shape: bf16[512,256], index: 13, kind: input, shape index: {}]   ;;  %s5488_s14 = inlined_call_operand.hbm [shape: f32[1,256], index: 14, kind: input, shape index: {}]   ;;  %s5489_s15 = inlined_call_operand.hbm [shape: f32[2,17,256], index: 15, kind: output, shape index: {0}]   ;;  %s5490_s16 = inlined_call_operand.hbm [shape: f32[2,17,256], index: 16, kind: output, shape index: {1}]  }
   0x1   :  { %5503 = sst [smem:[#allocation40_spill]] %s5474_s0 }
   0x2   :  { %5504 = sst [smem:[#allocation41_spill]] %s5475_s1 }
   0x3   :  { %5505 = sst [smem:[#allocation42_spill]] %s5476_s2 }
   0x4   :  { %5506 = sst [smem:[#allocation43_spill]] %s5478_s4 }
   0x5   :  { %5507 = sst [smem:[#allocation44_spill]] %s5479_s5 }
   0x6   :  { %5508 = sst [smem:[#allocation45_spill]] %s5480_s6 }
   0x7   :  { %5509 = sst [smem:[#allocation46_spill]] %s5481_s7 }
   0x8   :  { %5510 = sst [smem:[#allocation47_spill]] %s5483_s9 }
   0x9   :  { %5511 = sst [smem:[#allocation48_spill]] %s5489_s15 }
   0xa   :  { %5512 = sst [smem:[#allocation49_spill]] %s5490_s16 }
   0xb   :  { %22 = sst [smem:[#allocation2]] %s5477_s3 }
   0xc   :  { %23 = sst [smem:[#allocation3]] %s5482_s8 }
   0xd   :  { %24 = vsyncpa [#allocation5], 0 }
   0xe   :  { %26 = vsyncpa [#allocation5 + $0x1], 0 }
   0xf   :  { %27 = vsyncpa [#allocation8], 0 }
  0x10   :  { %28 = vsyncpa [#allocation11], 0 }
  0x11   :  { %29 = vsyncpa [#allocation14], 0 }
  0x12   :  { %30 = vsyncpa [#allocation17], 0 }
  0x13   :  { %31 = vsyncpa [#allocation20], 0 }
  0x14   :  { %32 = vsyncpa [#allocation23], 0 }
  0x15   :  { %33 = vsyncpa [#allocation6], 0 }
  0x16   :  { %35 = vsyncpa [#allocation6 + $0x1], 0 }
  0x17   :  { %36 = vsyncpa [#allocation27], 0 }
  0x18   :  { %38 = vsyncpa [#allocation27 + $0x1], 0  ;;  %s4547_s25 = smov 0   ;;  %s4549_s26 = smov 0  }
  0x19   :  { %s4551_s3 = smov 0   ;;  %s4553_s27 = smov 0  }
  0x1a LB: > { %5513 = sst [smem:[#allocation37_spill]] %s4421_s25  ;;  %s4435_s8 = smov [#allocation7]   ;;  %s4433_s27 = sphi %s4553_s27, %s5560_s27   ;;  %s4429_s3 = sphi %s4551_s3, %s5559_s3   ;;  %s4425_s26 = sphi %s4549_s26, %s5558_s26   ;;  %s4421_s25 = sphi %s4547_s25, %s5557_s25  }
  0x1b   : > { %s433_s28 = sshll.u32 %s4435_s8, 4  ;;  %s4568_s29 = sadd.s32 4294967295, %s4433_s27   ;;  %s4573_s28 = int_to_ptr.vmem [resolvable:$true] %s433_s28 }
  0x1c   : > { %5514 = sst [smem:[#allocation38_spill]] %s4568_s29  ;;  %p3206_p0 = scmp.ge.s32.totalorder %s4433_s27, 1 }
  0x1d   : > { %p5499_p1 = scmp.eq.s32.totalorder %s4568_s29, 0  ;;  %p421_p2 = scmp.lt.s32.totalorder %s4433_s27, 3 }
  0x1e   : > { %s4436_s0 = smov [#allocation10]   ;;  %s4437_s19 = smov [#allocation13]  }
  0x1f   : > { %p4575_p3 = pnand %p3206_p0, %p421_p2  ;;  %s461_s17 = sshll.u32 %s4436_s0, 4  ;;  %s4588_s17 = int_to_ptr.vmem [resolvable:$true] %s461_s17 }
  0x20   : > { %s483_s20 = sshll.u32 %s4437_s19, 4  ;;  %s5518_s1 = sld [smem:[#allocation41_spill]]  ;;  %s4590_s20 = int_to_ptr.vmem [resolvable:$true] %s483_s20 }
  0x21   : > { %s5515_s30 = scalar_select %p4575_p3, 1, 0 }
  0x22   : > { %p3523_p5 = pneg %p4575_p3 }
  0x23   : > { %5516 = sst [smem:[#allocation39_spill]] %s5515_s30 }
  0x24   : > { %p4584_p6 = pnand %p3523_p5, %p5499_p1 }
  0x26   : > { %s3945_s23 = scalar_lea.hbm %s5518_s1, 8192  ;;  %p4600_p8 = pneg %p4584_p6 }
  0x27   : > { %p3946_p7 = scmp.ne.s32.totalorder %s5518_s1, %s3945_s23  ;;  %p3952_p11 = scmp.lt.u32.totalorder %s3945_s23, %s5518_s1 }
  0x29   : > { %p3948_p9 = pnand %p4600_p8, %p3946_p7 }
  0x2b   : > { %p3949_p10 = pneg %p3948_p9 }
  0x2d   : > { %p3954_p12 = pnand %p3952_p11, %p3949_p10 }
  0x2f   : > { %3957 = shalt.err (!%p3954_p12)
}
  0x30   : > { %s3958_s21 = scalar_lea.vmem %s4573_s28, 8192  ;;  %p3966_p5 = scmp.lt.s32.totalorder %s4573_s28, %s4573_s28 }
  0x31   : > { %p3959_p13 = scmp.ne.s32.totalorder %s4573_s28, %s3958_s21  ;;  %p3967_p4 = scmp.lt.s32.totalorder %s3958_s21, %s3958_s21 }
  0x33   : > { %p3961_p0 = pnand %p3959_p13, %p4600_p8  ;;  %p3968_p7 = por %p3967_p4, %p3966_p5 }
  0x35   : > { %p3962_p2 = pneg %p3961_p0 }
  0x37   : > { %p3969_p9 = pnand %p3968_p7, %p3962_p2 }
  0x39   : > { %3972 = shalt.err (!%p3969_p9)
}
  0x3a   : > { %s5498_s22 = smov 256   ;;  %s5501_s15 = smov 16  }
  0x3b   : > { %3526 = dma.hbm_to_vmem [thread:$0]  (!%p4584_p6), %s5518_s1, 8192, %s4573_s28, [#allocation8], %s5498_s22, %s5498_s22, %s5501_s15  }
  0x3c   : > { %s5520_s4 = sld [smem:[#allocation43_spill]] }
  0x42   : > { %s3973_s21 = scalar_lea.hbm %s5520_s4, 64 }
  0x43   : > { %p3974_p4 = scmp.ne.s32.totalorder %s5520_s4, %s3973_s21  ;;  %p3980_p12 = scmp.lt.u32.totalorder %s3973_s21, %s5520_s4 }
  0x45   : > { %p3976_p10 = pnand %p3974_p4, %p4600_p8 }
  0x47   : > { %p3977_p11 = pneg %p3976_p10 }
  0x49   : > { %p3982_p13 = pnand %p3980_p12, %p3977_p11 }
  0x4b   : > { %3985 = shalt.err (!%p3982_p13)
}
  0x4c   : > { %s3986_s28 = scalar_lea.vmem %s4588_s17, 64  ;;  %p3994_p7 = scmp.lt.s32.totalorder %s4588_s17, %s4588_s17 }
  0x4d   : > { %p3987_p0 = scmp.ne.s32.totalorder %s4588_s17, %s3986_s28  ;;  %p3995_p9 = scmp.lt.s32.totalorder %s3986_s28, %s3986_s28 }
  0x4f   : > { %p3989_p2 = pnand %p3987_p0, %p4600_p8  ;;  %p3996_p4 = por %p3995_p9, %p3994_p7 }
  0x51   : > { %p3990_p5 = pneg %p3989_p2 }
  0x53   : > { %p3997_p10 = pnand %p3996_p4, %p3990_p5 }
  0x55   : > { %4000 = shalt.err (!%p3997_p10)
}
  0x56   : > { %3532 = dma.hbm_to_vmem [thread:$0]  (!%p4584_p6), %s5520_s4, 64, %s4588_s17, [#allocation11]  }
  0x57   : > { %s5521_s6 = sld [smem:[#allocation45_spill]] }
  0x5d   : > { %s4001_s23 = scalar_lea.hbm %s5521_s6, 256 }
  0x5e   : > { %p4002_p11 = scmp.ne.s32.totalorder %s5521_s6, %s4001_s23  ;;  %p4008_p0 = scmp.lt.u32.totalorder %s4001_s23, %s5521_s6 }
  0x60   : > { %p4004_p12 = pnand %p4002_p11, %p4600_p8 }
  0x62   : > { %p4005_p13 = pneg %p4004_p12 }
  0x64   : > { %p4010_p2 = pnand %p4008_p0, %p4005_p13 }
  0x66   : > { %4013 = shalt.err (!%p4010_p2)
}
  0x67   : > { %s4014_s17 = scalar_lea.vmem %s4590_s20, 256  ;;  %p4022_p4 = scmp.lt.s32.totalorder %s4590_s20, %s4590_s20 }
  0x68   : > { %p4015_p5 = scmp.ne.s32.totalorder %s4590_s20, %s4014_s17  ;;  %p4023_p10 = scmp.lt.s32.totalorder %s4014_s17, %s4014_s17 }
  0x6a   : > { %p4017_p7 = pnand %p4015_p5, %p4600_p8  ;;  %p4024_p11 = por %p4023_p10, %p4022_p4 }
  0x6c   : > { %p4018_p9 = pneg %p4017_p7 }
  0x6e   : > { %p4025_p12 = pnand %p4024_p11, %p4018_p9 }
  0x70   : > { %4028 = shalt.err (!%p4025_p12)
}
  0x71   : > { %3538 = dma.hbm_to_vmem [thread:$0]  (!%p4584_p6), %s5521_s6, 256, %s4590_s20, [#allocation14]  }
  0x72   : > { %s4440_s25 = smov [#allocation16]   ;;  %s4441_s30 = smov [#allocation19]  }
  0x73   : > { %s508_s29 = sshll.u32 %s4440_s25, 4  ;;  %s529_s23 = sshll.u32 %s4441_s30, 4  ;;  %s509_s29 = int_to_ptr.vmem [resolvable:$true] %s508_s29  ;;  %s530_s23 = int_to_ptr.vmem [resolvable:$true] %s529_s23 }
  0x74   : > { %s5522_s9 = sld [smem:[#allocation47_spill]] }
  0x7a   : > { %s4029_s19 = scalar_lea.hbm %s5522_s9, 64 }
  0x7b   : > { %p4030_p13 = scmp.ne.s32.totalorder %s5522_s9, %s4029_s19  ;;  %p4036_p5 = scmp.lt.u32.totalorder %s4029_s19, %s5522_s9 }
  0x7d   : > { %p4032_p0 = pnand %p4030_p13, %p4600_p8 }
  0x7f   : > { %p4033_p2 = pneg %p4032_p0 }
  0x81   : > { %p4038_p7 = pnand %p4036_p5, %p4033_p2 }
  0x83   : > { %4041 = shalt.err (!%p4038_p7)
}
  0x84   : > { %s4042_s20 = scalar_lea.vmem %s509_s29, 64  ;;  %p4050_p11 = scmp.lt.s32.totalorder %s509_s29, %s509_s29 }
  0x85   : > { %p4043_p9 = scmp.ne.s32.totalorder %s509_s29, %s4042_s20  ;;  %p4051_p12 = scmp.lt.s32.totalorder %s4042_s20, %s4042_s20 }
  0x87   : > { %p4045_p4 = pnand %p4043_p9, %p4600_p8  ;;  %p4052_p1 = por %p4051_p12, %p4050_p11 }
  0x89   : > { %p4046_p10 = pneg %p4045_p4 }
  0x8b   : > { %p4053_p3 = pnand %p4052_p1, %p4046_p10 }
  0x8d   : > { %4056 = shalt.err (!%p4053_p3)
}
  0x8e   : > { %3544 = dma.hbm_to_vmem [thread:$0]  (!%p4584_p6), %s5522_s9, 64, %s509_s29, [#allocation17]  }
  0x8f   : > { %s4057_s24 = scalar_lea.hbm %s5485_s11, 8192 }
  0x90   : > { %p4058_p13 = scmp.ne.s32.totalorder %s5485_s11, %s4057_s24  ;;  %p4064_p3 = scmp.lt.u32.totalorder %s4057_s24, %s5485_s11 }
  0x92   : > { %p4060_p0 = pnand %p4058_p13, %p4600_p8 }
  0x94   : > { %p4061_p1 = pneg %p4060_p0 }
  0x96   : > { %p4066_p2 = pnand %p4064_p3, %p4061_p1 }
  0x98   : > { %4069 = shalt.err (!%p4066_p2)
}
  0x99   : > { %s4070_s28 = scalar_lea.vmem %s530_s23, 8192  ;;  %p4078_p4 = scmp.lt.s32.totalorder %s530_s23, %s530_s23 }
  0x9a   : > { %p4071_p5 = scmp.ne.s32.totalorder %s530_s23, %s4070_s28  ;;  %p4079_p10 = scmp.lt.s32.totalorder %s4070_s28, %s4070_s28 }
  0x9c   : > { %p4073_p7 = pnand %p4071_p5, %p4600_p8  ;;  %p4080_p11 = por %p4079_p10, %p4078_p4 }
  0x9e   : > { %p4074_p9 = pneg %p4073_p7 }
  0xa0   : > { %p4081_p12 = pnand %p4080_p11, %p4074_p9 }
  0xa2   : > { %4084 = shalt.err (!%p4081_p12)
}
  0xa3   : > { %s4442_s29 = smov 128   ;;  %s4443_s20 = smov 8  }
  0xa4   : > { %3550 = dma.hbm_to_vmem [thread:$0]  (!%p4584_p6), %s5485_s11, 8192, %s530_s23, [#allocation20], %s4442_s29, %s4442_s29, %s4443_s20  }
  0xa5   : > { %s4444_s22 = smov [#allocation22]   ;;  %s4445_s24 = smov [#allocation9]  }
  0xa6   : > { %s553_s30 = sshll.u32 %s4444_s22, 4  ;;  %s447_s8 = sshll.u32 %s4445_s24, 4  ;;  %s554_s30 = int_to_ptr.vmem [resolvable:$true] %s553_s30  ;;  %s448_s8 = int_to_ptr.vmem [resolvable:$true] %s447_s8 }
  0xa7   : > { %s4085_s17 = scalar_lea.hbm %s5487_s13, 8192 }
  0xa8   : > { %p4086_p13 = scmp.ne.s32.totalorder %s5487_s13, %s4085_s17  ;;  %p4092_p3 = scmp.lt.u32.totalorder %s4085_s17, %s5487_s13 }
  0xaa   : > { %p4088_p0 = pnand %p4086_p13, %p4600_p8 }
  0xac   : > { %p4089_p1 = pneg %p4088_p0 }
  0xae   : > { %p4094_p2 = pnand %p4092_p3, %p4089_p1 }
  0xb0   : > { %4097 = shalt.err (!%p4094_p2)
}
  0xb1   : > { %s4098_s23 = scalar_lea.vmem %s554_s30, 8192  ;;  %p4106_p4 = scmp.lt.s32.totalorder %s554_s30, %s554_s30 }
  0xb2   : > { %p4099_p5 = scmp.ne.s32.totalorder %s554_s30, %s4098_s23  ;;  %p4107_p10 = scmp.lt.s32.totalorder %s4098_s23, %s4098_s23 }
  0xb4   : > { %p4101_p7 = pnand %p4099_p5, %p4600_p8  ;;  %p4108_p11 = por %p4107_p10, %p4106_p4 }
  0xb6   : > { %p4102_p9 = pneg %p4101_p7 }
  0xb8   : > { %p4109_p12 = pnand %p4108_p11, %p4102_p9 }
  0xba   : > { %4112 = shalt.err (!%p4109_p12)
}
  0xbb   : > { %3556 = dma.hbm_to_vmem [thread:$0]  (!%p4584_p6), %s5487_s13, 8192, %s554_s30, [#allocation23], %s4442_s29, %s4442_s29, %s4443_s20  }
  0xbc   : > { %s5523_s2 = sld [smem:[#allocation42_spill]] }
  0xc2   : > { %s4113_s25 = scalar_lea.hbm %s5523_s2, 64 }
  0xc3   : > { %p4114_p13 = scmp.ne.s32.totalorder %s5523_s2, %s4113_s25  ;;  %p4120_p3 = scmp.lt.u32.totalorder %s4113_s25, %s5523_s2 }
  0xc5   : > { %p4116_p0 = pnand %p4114_p13, %p4600_p8 }
  0xc7   : > { %p4117_p1 = pneg %p4116_p0 }
  0xc9   : > { %p4122_p2 = pnand %p4120_p3, %p4117_p1 }
  0xcb   : > { %4125 = shalt.err (!%p4122_p2)
}
  0xcc   : > { %s4126_s17 = scalar_lea.vmem %s448_s8, 64  ;;  %p4134_p4 = scmp.lt.s32.totalorder %s448_s8, %s448_s8 }
  0xcd   : > { %p4127_p5 = scmp.ne.s32.totalorder %s448_s8, %s4126_s17  ;;  %p4135_p10 = scmp.lt.s32.totalorder %s4126_s17, %s4126_s17 }
  0xcf   : > { %p4129_p7 = pnand %p4127_p5, %p4600_p8  ;;  %p4136_p11 = por %p4135_p10, %p4134_p4 }
  0xd1   : > { %p4130_p9 = pneg %p4129_p7 }
  0xd3   : > { %p4137_p12 = pnand %p4136_p11, %p4130_p9 }
  0xd5   : > { %4140 = shalt.err (!%p4137_p12)
}
  0xd6   : > { %3529 = dma.hbm_to_vmem [thread:$0]  (!%p4584_p6), %s5523_s2, 64, %s448_s8, [#allocation8]  }
  0xd7   : > { %s4446_s30 = smov [#allocation12]   ;;  %s4447_s23 = smov [#allocation15]  }
  0xd8   : > { %s472_s28 = sshll.u32 %s4446_s30, 4  ;;  %s494_s15 = sshll.u32 %s4447_s23, 4  ;;  %s473_s28 = int_to_ptr.vmem [resolvable:$true] %s472_s28  ;;  %s495_s15 = int_to_ptr.vmem [resolvable:$true] %s494_s15 }
  0xd9   : > { %s5524_s5 = sld [smem:[#allocation44_spill]] }
  0xdf   : > { %s4141_s4 = scalar_lea.hbm %s5524_s5, 64 }
  0xe0   : > { %p4142_p13 = scmp.ne.s32.totalorder %s5524_s5, %s4141_s4  ;;  %p4148_p3 = scmp.lt.u32.totalorder %s4141_s4, %s5524_s5 }
  0xe2   : > { %p4144_p0 = pnand %p4142_p13, %p4600_p8 }
  0xe4   : > { %p4145_p1 = pneg %p4144_p0 }
  0xe6   : > { %p4150_p2 = pnand %p4148_p3, %p4145_p1 }
  0xe8   : > { %4153 = shalt.err (!%p4150_p2)
}
  0xe9   : > { %s4154_s8 = scalar_lea.vmem %s473_s28, 64  ;;  %p4162_p4 = scmp.lt.s32.totalorder %s473_s28, %s473_s28 }
  0xea   : > { %p4155_p5 = scmp.ne.s32.totalorder %s473_s28, %s4154_s8  ;;  %p4163_p10 = scmp.lt.s32.totalorder %s4154_s8, %s4154_s8 }
  0xec   : > { %p4157_p7 = pnand %p4155_p5, %p4600_p8  ;;  %p4164_p11 = por %p4163_p10, %p4162_p4 }
  0xee   : > { %p4158_p9 = pneg %p4157_p7 }
  0xf0   : > { %p4165_p12 = pnand %p4164_p11, %p4158_p9 }
  0xf2   : > { %4168 = shalt.err (!%p4165_p12)
}
  0xf3   : > { %3535 = dma.hbm_to_vmem [thread:$0]  (!%p4584_p6), %s5524_s5, 64, %s473_s28, [#allocation11]  }
  0xf4   : > { %s5525_s7 = sld [smem:[#allocation46_spill]] }
  0xfa   : > { %s4169_s30 = scalar_lea.hbm %s5525_s7, 64 }
  0xfb   : > { %p4170_p13 = scmp.ne.s32.totalorder %s5525_s7, %s4169_s30  ;;  %p4176_p3 = scmp.lt.u32.totalorder %s4169_s30, %s5525_s7 }
  0xfd   : > { %p4172_p0 = pnand %p4170_p13, %p4600_p8 }
  0xff   : > { %p4173_p1 = pneg %p4172_p0 }
 0x101   : > { %p4178_p2 = pnand %p4176_p3, %p4173_p1 }
 0x103   : > { %4181 = shalt.err (!%p4178_p2)
}
 0x104   : > { %s4182_s25 = scalar_lea.vmem %s495_s15, 64  ;;  %p4190_p4 = scmp.lt.s32.totalorder %s495_s15, %s495_s15 }
 0x105   : > { %p4183_p5 = scmp.ne.s32.totalorder %s495_s15, %s4182_s25  ;;  %p4191_p10 = scmp.lt.s32.totalorder %s4182_s25, %s4182_s25 }
 0x107   : > { %p4185_p7 = pnand %p4183_p5, %p4600_p8  ;;  %p4192_p11 = por %p4191_p10, %p4190_p4 }
 0x109   : > { %p4186_p9 = pneg %p4185_p7 }
 0x10b   : > { %p4193_p12 = pnand %p4192_p11, %p4186_p9 }
 0x10d   : > { %4196 = shalt.err (!%p4193_p12)
}
 0x10e   : > { %3541 = dma.hbm_to_vmem [thread:$0]  (!%p4584_p6), %s5525_s7, 64, %s495_s15, [#allocation14]  }
 0x10f   : > { %s4448_s24 = smov [#allocation18]   ;;  %s4449_s8 = smov [#allocation21]  }
 0x110   : > { %s519_s19 = sshll.u32 %s4448_s24, 4  ;;  %s543_s21 = sshll.u32 %s4449_s8, 4  ;;  %s520_s19 = int_to_ptr.vmem [resolvable:$true] %s519_s19  ;;  %s544_s21 = int_to_ptr.vmem [resolvable:$true] %s543_s21 }
 0x111   : > { %s4197_s20 = scalar_lea.hbm %s5484_s10, 64 }
 0x112   : > { %p4198_p13 = scmp.ne.s32.totalorder %s5484_s10, %s4197_s20  ;;  %p4204_p3 = scmp.lt.u32.totalorder %s4197_s20, %s5484_s10 }
 0x114   : > { %p4200_p0 = pnand %p4198_p13, %p4600_p8 }
 0x116   : > { %p4201_p1 = pneg %p4200_p0 }
 0x118   : > { %p4206_p2 = pnand %p4204_p3, %p4201_p1 }
 0x11a   : > { %4209 = shalt.err (!%p4206_p2)
}
 0x11b   : > { %s4210_s15 = scalar_lea.vmem %s520_s19, 64  ;;  %p4218_p4 = scmp.lt.s32.totalorder %s520_s19, %s520_s19 }
 0x11c   : > { %p4211_p5 = scmp.ne.s32.totalorder %s520_s19, %s4210_s15  ;;  %p4219_p10 = scmp.lt.s32.totalorder %s4210_s15, %s4210_s15 }
 0x11e   : > { %p4213_p7 = pnand %p4211_p5, %p4600_p8  ;;  %p4220_p11 = por %p4219_p10, %p4218_p4 }
 0x120   : > { %p4214_p9 = pneg %p4213_p7 }
 0x122   : > { %p4221_p12 = pnand %p4220_p11, %p4214_p9 }
 0x124   : > { %4224 = shalt.err (!%p4221_p12)
}
 0x125   : > { %3547 = dma.hbm_to_vmem [thread:$0]  (!%p4584_p6), %s5484_s10, 64, %s520_s19, [#allocation17]  }
 0x126   : > { %s4225_s24 = scalar_lea.hbm %s5486_s12, 32 }
 0x127   : > { %p4226_p13 = scmp.ne.s32.totalorder %s5486_s12, %s4225_s24  ;;  %p4232_p3 = scmp.lt.u32.totalorder %s4225_s24, %s5486_s12 }
 0x129   : > { %p4228_p0 = pnand %p4226_p13, %p4600_p8 }
 0x12b   : > { %p4229_p1 = pneg %p4228_p0 }
 0x12d   : > { %p4234_p2 = pnand %p4232_p3, %p4229_p1 }
 0x12f   : > { %4237 = shalt.err (!%p4234_p2)
}
 0x130   : > { %s4238_s30 = scalar_lea.vmem %s544_s21, 32  ;;  %p4246_p4 = scmp.lt.s32.totalorder %s544_s21, %s544_s21 }
 0x131   : > { %p4239_p5 = scmp.ne.s32.totalorder %s544_s21, %s4238_s30  ;;  %p4247_p10 = scmp.lt.s32.totalorder %s4238_s30, %s4238_s30 }
 0x133   : > { %p4241_p7 = pnand %p4239_p5, %p4600_p8  ;;  %p4248_p11 = por %p4247_p10, %p4246_p4 }
 0x135   : > { %p4242_p9 = pneg %p4241_p7 }
 0x137   : > { %p4249_p12 = pnand %p4248_p11, %p4242_p9 }
 0x139   : > { %4252 = shalt.err (!%p4249_p12)
}
 0x13a   : > { %3553 = dma.hbm_to_vmem [thread:$0]  (!%p4584_p6), %s5486_s12, 32, %s544_s21, [#allocation20]  }
 0x13b   : > { %s4450_s16 = smov [#allocation24]   ;;  %s4253_s25 = scalar_lea.hbm %s5488_s14, 32 }
 0x13c   : > { %s567_s1 = sshll.u32 %s4450_s16, 4  ;;  %p4254_p13 = scmp.ne.s32.totalorder %s5488_s14, %s4253_s25  ;;  %s568_s1 = int_to_ptr.vmem [resolvable:$true] %s567_s1 }
 0x13d   : > { %p4260_p3 = scmp.lt.u32.totalorder %s4253_s25, %s5488_s14 }
 0x13e   : > { %p4256_p0 = pnand %p4254_p13, %p4600_p8 }
 0x140   : > { %p4257_p1 = pneg %p4256_p0 }
 0x142   : > { %p4262_p2 = pnand %p4260_p3, %p4257_p1 }
 0x144   : > { %4265 = shalt.err (!%p4262_p2)
}
 0x145   : > { %s4266_s21 = scalar_lea.vmem %s568_s1, 32  ;;  %p4274_p4 = scmp.lt.s32.totalorder %s568_s1, %s568_s1 }
 0x146   : > { %p4267_p5 = scmp.ne.s32.totalorder %s568_s1, %s4266_s21  ;;  %p4275_p10 = scmp.lt.s32.totalorder %s4266_s21, %s4266_s21 }
 0x148   : > { %p4269_p7 = pnand %p4267_p5, %p4600_p8  ;;  %p4276_p11 = por %p4275_p10, %p4274_p4 }
 0x14a   : > { %p4270_p9 = pneg %p4269_p7 }
 0x14c   : > { %p4277_p12 = pnand %p4276_p11, %p4270_p9 }
 0x14e   : > { %4280 = shalt.err (!%p4277_p12)
}
 0x14f   : > { %s5526_s0 = sld [smem:[#allocation37_spill]]  ;;  %s5527_s20 = sld [smem:[#allocation38_spill]] }
 0x150   : > { %3559 = dma.hbm_to_vmem [thread:$0]  (!%p4584_p6), %s5488_s14, 32, %s568_s1, [#allocation23]  }
 0x151   : > { %s3205_s30 = sadd.s32 4294967294, %s4433_s27   ;;  %s4834_s18 = sadd.s32 1, %s4433_s27  }
 0x152   : > { %s48_s19 = ssub.s32 %s4433_s27, %s4834_s18  ;;  %s51_s23 = sadd.s32 1, %s4429_s3 }
 0x153   : > { %p49_p8 = scmp.eq.s32.totalorder %s48_s19, 0  ;;  %p58_p13 = scmp.ne.s32.totalorder %s4429_s3, %s4425_s26 }
 0x154   : > { %p59_p0 = scmp.eq.s32.totalorder %s4433_s27, 0  ;;  %p388_p7 = scmp.eq.s32.totalorder %s3205_s30, 1 }
 0x155   : > { %p64_p1 = scmp.ne.s32.totalorder %s4425_s26, %s5526_s0  ;;  %p5528_p2 = scmp.eq.s32.totalorder %s5527_s20, 0 }
 0x156   : > { %s4845_s16 = scalar_select %p49_p8, %s4429_s3, %s51_s23  }
 0x157   : > { %p60_p3 = por %p59_p0, %p58_p13  ;;  %p4849_p5 = por %p5528_p2, %p64_p1 }
 0x158   : > { %p382_p6 = scmp.eq.s32.totalorder %s5527_s20, 1  ;;  %p3583_p9 = scmp.lt.s32.totalorder %s4433_s27, 2 }
 0x159   : > { %s578_s1 = sand.u32 1, %s4429_s3   ;;  %p4860_p10 = por %p388_p7, %p64_p1 }
 0x15a   : > { %p4856_p4 = por %p382_p6, %p58_p13  ;;  %s3452_s28 = smul.u32 48, %s578_s1 }
 0x15b   : > { %s5531_s25 = scalar_select %p4860_p10, 1, 0 }
 0x15c   : > { %s5530_s4 = scalar_select %p4856_p4, 1, 0 }
 0x15d   : > { %s3453_s22 = smul.u32 768, %s4433_s27  ;;  %p4865_p11 = pnand %p3583_p9, %p60_p3 }
 0x15e   : > { %s5533_s17 = sld [smem:[#allocation40_spill]]  ;;  %s582_s0 = scalar_lea.vmem [#allocation4], %s3452_s28 }
 0x15f   : > { %s589_s20 = sshll.u32 %s582_s0, 4  ;;  %s4876_s30 = scalar_lea.sflag [#allocation5], %s578_s1  ;;  %s4874_s20 = int_to_ptr.vmem [resolvable:$true] %s589_s20 }
 0x160   : > { %p4283_p8 = pneg %p4865_p11 }
 0x164   : > { %s4872_s29 = scalar_lea.hbm %s5533_s17, %s3453_s22  ;;  %s4286_s8 = scalar_lea.hbm %s5533_s17, 1536 }
 0x165   : > { %s4281_s19 = scalar_lea.hbm %s4872_s29, 768  ;;  %p4287_p1 = scmp.lt.u32.totalorder %s4872_s29, %s5533_s17 }
 0x166   : > { %p4282_p12 = scmp.ne.s32.totalorder %s4872_s29, %s4281_s19  ;;  %p4288_p3 = scmp.lt.u32.totalorder %s4286_s8, %s4281_s19 }
 0x167   : > { %p4290_p6 = scmp.lt.u32.totalorder %s4281_s19, %s4872_s29 }
 0x168   : > { %p4284_p13 = pnand %p4283_p8, %p4282_p12  ;;  %p4289_p2 = por %p4288_p3, %p4287_p1 }
 0x16a   : > { %p4285_p0 = pneg %p4284_p13  ;;  %p4291_p7 = por %p4290_p6, %p4289_p2 }
 0x16c   : > { %p4292_p9 = pnand %p4291_p7, %p4285_p0 }
 0x16e   : > { %4295 = shalt.err (!%p4292_p9)
}
 0x16f   : > { %s4296_s1 = scalar_lea.vmem %s4874_s20, 768  ;;  %s4451_s28 = smov [#allocation4]  }
 0x170   : > { %p4297_p12 = scmp.ne.s32.totalorder %s4874_s20, %s4296_s1  ;;  %s4301_s0 = sshll.u32 %s4451_s28, 4  ;;  %s4302_s0 = int_to_ptr.vmem [resolvable:$false] %s4301_s0 }
 0x171   : > { %s4303_s2 = scalar_lea.vmem %s4302_s0, 1536  ;;  %p4304_p4 = scmp.lt.s32.totalorder %s4874_s20, %s4302_s0 }
 0x172   : > { %p4299_p13 = pnand %p4297_p12, %p4283_p8  ;;  %p4305_p1 = scmp.lt.s32.totalorder %s4303_s2, %s4296_s1 }
 0x174   : > { %p4300_p10 = pneg %p4299_p13  ;;  %p4306_p3 = por %p4305_p1, %p4304_p4 }
 0x176   : > { %p4307_p2 = pnand %p4306_p3, %p4300_p10 }
 0x178   : > { %4310 = shalt.err (!%p4307_p2)
}
 0x179   : > { %s5534_s19 = smov 16   ;;  %s5535_s23 = smov 256  }
 0x17a   : > { %3563 = dma.hbm_to_vmem [thread:$0]  (!%p4865_p11), %s4872_s29, 768, %s4874_s20, %s4876_s30, %s5535_s23, %s5535_s23, %s5534_s19  }
 0x17b   : > { %s5536_s22 = sld [smem:[#allocation39_spill]] }
 0x181   : > { %p5537_p8 = scmp.ne.s32.totalorder %s5536_s22, 0 }
 0x182   : > { %s4910_s8 = sand.u32 (!%p5537_p8), 1, %s4425_s26  }
 0x183   : > { %601 = sbr.rel (%p5537_p8) target bundleno = 2137 (0x859), region = 80  ;;  %s604_s24 = scalar_lea.sflag (!%p5537_p8), [#allocation5], %s4910_s8 }
 0x184   : > { %s4913_s21 = smul.u32 (!%p5537_p8), 48, %s4910_s8 }
 0x186   : > { %s4917_s1 = scalar_lea.vmem (!%p5537_p8), [#allocation4], %s4913_s21 }
 0x18a   : > { %4384 = dma.done.wait (%p4849_p5), %s604_s24, 768  }
 0x18b   : > { %4386 = vsyncadd (%p4849_p5), %s604_s24, 4294966528  ;;  %s5538_s29 = sld [smem:[#allocation38_spill]] }
 0x191   : > { %p5539_p4 = scmp.eq.s32.totalorder %s5538_s29, 0 }
 0x193   : > { %4388 = dma.done.wait (%p5539_p4), [#allocation8], 8256   ;;  %p5540_p10 = pmov %p5539_p4 }
 0x194   : > { %p5541_p11 = pmov %p5539_p4 }
 0x195   : > { %4390 = vsyncadd (%p5540_p10), [#allocation8], 4294959040 }
 0x196   : > { %4392 = dma.done.wait (%p5541_p11), [#allocation11], 128   ;;  %p5542_p0 = pmov %p5539_p4 }
 0x198   : > { %4394 = vsyncadd (%p5542_p0), [#allocation11], 4294967168  ;;  %p5543_p6 = pmov %p5542_p0 }
 0x199   : > { %p5544_p7 = pmov %p5542_p0 }
 0x19a   : > { %4396 = dma.done.wait (%p5543_p6), [#allocation14], 320  }
 0x19b   : > { %4398 = vsyncadd (%p5544_p7), [#allocation14], 4294966976  ;;  %p5545_p5 = pmov %p5542_p0 }
 0x19c   : > { %p5546_p9 = pmov %p5542_p0 }
 0x19d   : > { %4400 = dma.done.wait (%p5545_p5), [#allocation17], 128  }
 0x19e   : > { %4402 = vsyncadd (%p5546_p9), [#allocation17], 4294967168  ;;  %p5547_p12 = pmov %p5542_p0 }
 0x19f   : > { %p5548_p13 = pmov %p5542_p0 }
 0x1a0   : > { %4404 = dma.done.wait (%p5547_p12), [#allocation20], 8224  }
 0x1a1   : > { %4406 = vsyncadd (%p5548_p13), [#allocation20], 4294959072  ;;  %p5549_p1 = pmov %p5542_p0 }
 0x1a2   : > { %p5550_p3 = pmov %p5542_p0 }
 0x1a3   : > { %4408 = dma.done.wait (%p5549_p1), [#allocation23], 8224  }
 0x1a4   : > { %4410 = vsyncadd (%p5550_p3), [#allocation23], 4294959072  ;;  %v3647_v0 = vld [vmem:[#allocation7 + $0x4] ss:$16 sps:$4 sm:$0xff]   ;;  %v3649_v1 = vld [vmem:[#allocation7 + $0xc] ss:$16 sps:$4 sm:$0xff]  }
 0x1a5   : > { %1125 = vmatprep.subr.bf16.mxu0 %v3647_v0  ;;  %v3651_v2 = vld [vmem:[#allocation7] ss:$16 sps:$4 sm:$0xff]   ;;  %v3652_v3 = vld [vmem:[#allocation7 + $0x8] ss:$16 sps:$4 sm:$0xff]   ;;  %1176 = vmatprep.subr.bf16.mxu1 %v3649_v1  ;;  %v3653_v4 = vld [vmem:[#allocation7 + $0x24] ss:$16 sps:$4 sm:$0xff]  }
 0x1a6   : > { %1126 = vmatpush1.bf16.msra.mxu0 %v3651_v2  ;;  %1177 = vmatpush1.bf16.msra.mxu1 %v3652_v3  ;;  %v3655_v5 = vld [vmem:[#allocation7 + $0x2c] ss:$16 sps:$4 sm:$0xff]   ;;  %v3657_v6 = vld [vmem:[#allocation7 + $0x20] ss:$16 sps:$4 sm:$0xff]   ;;  %v3658_v7 = vld [vmem:[#allocation7 + $0x28] ss:$16 sps:$4 sm:$0xff]  }
 0x1a7   : > { %1127 = vmatprep.subr.bf16.mxu0 %v3653_v4  ;;  %1178 = vmatprep.subr.bf16.mxu1 %v3655_v5  ;;  %v3659_v8 = vld [vmem:[#allocation7 + $0x44] ss:$16 sps:$4 sm:$0xff]   ;;  %v3661_v9 = vld [vmem:[#allocation7 + $0x4c] ss:$16 sps:$4 sm:$0xff]   ;;  %v3663_v10 = vld [vmem:[#allocation7 + $0x40] ss:$16 sps:$4 sm:$0xff]  }
 0x1a8   : > { %v3664_v11 = vld [vmem:[#allocation7 + $0x48] ss:$16 sps:$4 sm:$0xff]   ;;  %v3665_v12 = vld [vmem:[#allocation7 + $0x64] ss:$16 sps:$4 sm:$0xff]   ;;  %v3667_v13 = vld [vmem:[#allocation7 + $0x6c] ss:$16 sps:$4 sm:$0xff]  }
 0x1a9   : > { %v3669_v14 = vld [vmem:[#allocation7 + $0x60] ss:$16 sps:$4 sm:$0xff]   ;;  %v3670_v15 = vld [vmem:[#allocation7 + $0x68] ss:$16 sps:$4 sm:$0xff]   ;;  %v3671_v16 = vld [vmem:[#allocation7 + $0x84] ss:$16 sps:$4 sm:$0xff]  }
 0x1aa   : > { %1128 = vmatpush1.bf16.msra.mxu0 %v3657_v6  ;;  %1179 = vmatpush1.bf16.msra.mxu1 %v3658_v7  ;;  %v3673_v17 = vld [vmem:[#allocation7 + $0x8c] ss:$16 sps:$4 sm:$0xff]   ;;  %v3675_v18 = vld [vmem:[#allocation7 + $0x80] ss:$16 sps:$4 sm:$0xff]   ;;  %v3676_v19 = vld [vmem:[#allocation7 + $0x88] ss:$16 sps:$4 sm:$0xff]  }
 0x1ab   : > { %1129 = vmatprep.subr.bf16.mxu0 %v3659_v8  ;;  %1180 = vmatprep.subr.bf16.mxu1 %v3661_v9  ;;  %v3677_v20 = vld [vmem:[#allocation7 + $0xa4] ss:$16 sps:$4 sm:$0xff]   ;;  %v3679_v21 = vld [vmem:[#allocation7 + $0xac] ss:$16 sps:$4 sm:$0xff]   ;;  %v3681_v22 = vld [vmem:[#allocation7 + $0xa0] ss:$16 sps:$4 sm:$0xff]  }
 0x1ac   : > { %v3682_v23 = vld [vmem:[#allocation7 + $0xa8] ss:$16 sps:$4 sm:$0xff]   ;;  %v3683_v24 = vld [vmem:[#allocation7 + $0xc4] ss:$16 sps:$4 sm:$0xff]   ;;  %v3685_v25 = vld [vmem:[#allocation7 + $0xcc] ss:$16 sps:$4 sm:$0xff]  }
 0x1ad   : > { %v3687_v26 = vld [vmem:[#allocation7 + $0xc0] ss:$16 sps:$4 sm:$0xff]   ;;  %v3688_v27 = vld [vmem:[#allocation7 + $0xc8] ss:$16 sps:$4 sm:$0xff]   ;;  %v3689_v28 = vld [vmem:[#allocation7 + $0xe4] ss:$16 sps:$4 sm:$0xff]  }
 0x1ae   : > { %1130 = vmatpush1.bf16.msra.mxu0 %v3663_v10  ;;  %1181 = vmatpush1.bf16.msra.mxu1 %v3664_v11  ;;  %v3691_v29 = vld [vmem:[#allocation7 + $0xec] ss:$16 sps:$4 sm:$0xff]   ;;  %v3693_v30 = vld [vmem:[#allocation7 + $0xe0] ss:$16 sps:$4 sm:$0xff]   ;;  %v3694_v31 = vld [vmem:[#allocation7 + $0xe8] ss:$16 sps:$4 sm:$0xff]   ;;  %v785_v10 = vlaneseq }
 0x1af   : > { %1131 = vmatprep.subr.bf16.mxu0 %v3665_v12  ;;  %1182 = vmatprep.subr.bf16.mxu1 %v3667_v13  ;;  %v3695_v32 = vld [vmem:[#allocation7 + $0x104] ss:$16 sps:$4 sm:$0xff]   ;;  %v3697_v33 = vld [vmem:[#allocation7 + $0x10c] ss:$16 sps:$4 sm:$0xff]   ;;  %v3699_v34 = vld [vmem:[#allocation7 + $0x100] ss:$16 sps:$4 sm:$0xff]  }
 0x1b0   : > { %v3700_v35 = vld [vmem:[#allocation7 + $0x108] ss:$16 sps:$4 sm:$0xff]   ;;  %v3701_v36 = vld [vmem:[#allocation7 + $0x124] ss:$16 sps:$4 sm:$0xff]   ;;  %v3703_v37 = vld [vmem:[#allocation7 + $0x12c] ss:$16 sps:$4 sm:$0xff]  }
 0x1b1   : > { %v3705_v38 = vld [vmem:[#allocation7 + $0x120] ss:$16 sps:$4 sm:$0xff]   ;;  %v3706_v39 = vld [vmem:[#allocation7 + $0x128] ss:$16 sps:$4 sm:$0xff]   ;;  %v3707_v40 = vld [vmem:[#allocation7 + $0x144] ss:$16 sps:$4 sm:$0xff]  }
 0x1b2   : > { %1132 = vmatpush1.bf16.msra.mxu0 %v3669_v14  ;;  %1183 = vmatpush1.bf16.msra.mxu1 %v3670_v15  ;;  %v3709_v41 = vld [vmem:[#allocation7 + $0x14c] ss:$16 sps:$4 sm:$0xff]   ;;  %v3711_v42 = vld [vmem:[#allocation7 + $0x140] ss:$16 sps:$4 sm:$0xff]   ;;  %v3712_v43 = vld [vmem:[#allocation7 + $0x148] ss:$16 sps:$4 sm:$0xff]  }
 0x1b3   : > { %1133 = vmatprep.subr.bf16.mxu0 %v3671_v16  ;;  %1184 = vmatprep.subr.bf16.mxu1 %v3673_v17  ;;  %v3713_v44 = vld [vmem:[#allocation7 + $0x164] ss:$16 sps:$4 sm:$0xff]   ;;  %v3715_v45 = vld [vmem:[#allocation7 + $0x16c] ss:$16 sps:$4 sm:$0xff]   ;;  %v3717_v47 = vld [vmem:[#allocation7 + $0x160] ss:$16 sps:$4 sm:$0xff]  }
 0x1b4   : > { %v710_v46 = vld [vmem:[%s4917_s1 + $0x8] sm:$0xff]  ;;  %v712_v48 = vld [vmem:[%s4917_s1 + $0x18] sm:$0xff]  ;;  %v3719_v50 = vld [vmem:[#allocation7 + $0x184] ss:$16 sps:$4 sm:$0xff]   ;;  %v786_v11 = vshrl.u32 %v785_v10, 7  ;;  %s1239_s15 = sld [smem:[#allocation2]] }
 0x1b5   : > { %v3718_v49 = vld [vmem:[#allocation7 + $0x168] ss:$16 sps:$4 sm:$0xff]   ;;  %v3721_v51 = vld [vmem:[#allocation7 + $0x18c] ss:$16 sps:$4 sm:$0xff]   ;;  %v716_v52 = vpack.c.bf16 %v712_v48, %v710_v46  ;;  %v3723_v53 = vld [vmem:[#allocation7 + $0x180] ss:$16 sps:$4 sm:$0xff]  }
 0x1b6   : > { %1134 = vmatpush1.bf16.msra.mxu0 %v3675_v18  ;;  %1185 = vmatpush1.bf16.msra.mxu1 %v3676_v19  ;;  %v3724_v54 = vld [vmem:[#allocation7 + $0x188] ss:$16 sps:$4 sm:$0xff]   ;;  %v3725_v55 = vld [vmem:[#allocation7 + $0x1a4] ss:$16 sps:$4 sm:$0xff]   ;;  %v3727_v56 = vld [vmem:[#allocation7 + $0x1ac] ss:$16 sps:$4 sm:$0xff]  }
 0x1b7   : > { %1135 = vmatprep.subr.bf16.mxu0 %v3677_v20  ;;  %1186 = vmatprep.subr.bf16.mxu1 %v3679_v21  ;;  %v3729_v57 = vld [vmem:[#allocation7 + $0x1a0] ss:$16 sps:$4 sm:$0xff]   ;;  %v3730_v58 = vld [vmem:[#allocation7 + $0x1a8] ss:$16 sps:$4 sm:$0xff]   ;;  %v3731_v59 = vld [vmem:[#allocation7 + $0x1c4] ss:$16 sps:$4 sm:$0xff]  }
 0x1b8   : > { %1157 = vmatprep.mubr.bf16.mxu0 %v716_v52  ;;  %1208 = vmatprep.mubr.bf16.mxu1 %v716_v52  ;;  %v3733_v60 = vld [vmem:[#allocation7 + $0x1cc] ss:$16 sps:$4 sm:$0xff]   ;;  %v3735_v61 = vld [vmem:[#allocation7 + $0x1c0] ss:$16 sps:$4 sm:$0xff]   ;;  %v3736_v62 = vld [vmem:[#allocation7 + $0x1c8] ss:$16 sps:$4 sm:$0xff]  }
 0x1b9   : > { %v3737_v63 = vld [vmem:[#allocation7 + $0x1e4] ss:$16 sps:$4 sm:$0xff]   ;;  %v3739_v0 = vld [vmem:[#allocation7 + $0x1ec] ss:$16 sps:$4 sm:$0xff]   ;;  %v3741_v1 = vld [vmem:[#allocation7 + $0x1e0] ss:$16 sps:$4 sm:$0xff]  }
 0x1ba   : > { %1136 = vmatpush1.bf16.msra.mxu0 %v3681_v22  ;;  %1187 = vmatpush1.bf16.msra.mxu1 %v3682_v23  ;;  %v3742_v2 = vld [vmem:[#allocation7 + $0x1e8] ss:$16 sps:$4 sm:$0xff]   ;;  %v709_v3 = vld [vmem:[%s4917_s1] sm:$0xff]  ;;  %v711_v4 = vld [vmem:[%s4917_s1 + $0x10] sm:$0xff]  ;;  %v4953_v12 = vsub.s32 0, %v786_v11  ;;  %v4955_v13 = vsub.s32 2, %v786_v11  ;;  %v4965_v22 = vstv %s1239_s15 }
 0x1bb   : > { %1137 = vmatprep.subr.bf16.mxu0 %v3683_v24  ;;  %1188 = vmatprep.subr.bf16.mxu1 %v3685_v25  ;;  %v714_v5 = vld [vmem:[%s4917_s1 + $0x28] sm:$0x1]  ;;  %v715_v6 = vpack.c.bf16 %v711_v4, %v709_v3  ;;  %v713_v8 = vld [vmem:[%s4917_s1 + $0x20] sm:$0x1]  ;;  %v4957_v15 = vsub.s32 1, %v786_v11  ;;  %v4959_v16 = vsub.s32 3, %v786_v11 }
 0x1bc   : > { %v718_v7 = vpack.c.bf16 %v714_v5, %v714_v5  ;;  %v717_v9 = vpack.c.bf16 %v713_v8, %v713_v8  ;;  %v783_v14 = vld [vmem:[#allocation9] sm:$0xf]  ;;  %vm1272_vm10 = vcmask 1040384   ;;  %s5074_s23 = sld [smem:[#allocation3]]  ;;  %vm1474_vm13 = vcmask 1041408   ;;  %p5553_p8 = scmp.ne.s32.totalorder %s5530_s4, 0 }
 0x1bd   : > { %v788_v17 = vrot.slane %v783_v14, %v4953_v12  ;;  %v796_v18 = vrot.slane %v783_v14, %v4955_v13  ;;  %v792_v19 = vrot.slane %v783_v14, %v4957_v15  ;;  %v800_v20 = vrot.slane %v783_v14, %v4959_v16  ;;  %s4452_s6 = smov [#allocation26]  }
 0x1be   : > { %1138 = vmatpush1.bf16.msra.mxu0 %v3687_v26  ;;  %1189 = vmatpush1.bf16.msra.mxu1 %v3688_v27  ;;  %vm1560_vm14 = vcmask 1046528   ;;  %vm1652_vm15 = vcmask 1045504   ;;  %s4315_s7 = sshll.u32 %s4452_s6, 4  ;;  %s4316_s7 = int_to_ptr.vmem [resolvable:$false] %s4315_s7 }
 0x1bf   : > { %1139 = vmatprep.subr.bf16.mxu0 %v3689_v28  ;;  %1190 = vmatprep.subr.bf16.mxu1 %v3691_v29  ;;  %s4317_s9 = scalar_lea.vmem %s4316_s7, 1536 }
 0x1c2   : > { %1140 = vmatpush1.bf16.msra.mxu0 %v3693_v30  ;;  %1191 = vmatpush1.bf16.msra.mxu1 %v3694_v31 }
 0x1c3   : > { %1141 = vmatprep.subr.bf16.mxu0 %v3695_v32  ;;  %1192 = vmatprep.subr.bf16.mxu1 %v3697_v33 }
 0x1c6   : > { %1142 = vmatpush1.bf16.msra.mxu0 %v3699_v34  ;;  %1193 = vmatpush1.bf16.msra.mxu1 %v3700_v35 }
 0x1c7   : > { %1143 = vmatprep.subr.bf16.mxu0 %v3701_v36  ;;  %1194 = vmatprep.subr.bf16.mxu1 %v3703_v37 }
 0x1ca   : > { %1144 = vmatpush1.bf16.msra.mxu0 %v3705_v38  ;;  %1195 = vmatpush1.bf16.msra.mxu1 %v3706_v39 }
 0x1cb   : > { %1145 = vmatprep.subr.bf16.mxu0 %v3707_v40  ;;  %1196 = vmatprep.subr.bf16.mxu1 %v3709_v41 }
 0x1ce   : > { %1146 = vmatpush1.bf16.msra.mxu0 %v3711_v42  ;;  %1197 = vmatpush1.bf16.msra.mxu1 %v3712_v43 }
 0x1cf   : > { %1147 = vmatprep.subr.bf16.mxu0 %v3713_v44  ;;  %1198 = vmatprep.subr.bf16.mxu1 %v3715_v45 }
 0x1d2   : > { %1148 = vmatpush1.bf16.msra.mxu0 %v3717_v47  ;;  %1199 = vmatpush1.bf16.msra.mxu1 %v3718_v49 }
 0x1d3   : > { %1149 = vmatprep.subr.bf16.mxu0 %v3719_v50  ;;  %1200 = vmatprep.subr.bf16.mxu1 %v3721_v51 }
 0x1d6   : > { %1150 = vmatpush1.bf16.msra.mxu0 %v3723_v53  ;;  %1201 = vmatpush1.bf16.msra.mxu1 %v3724_v54 }
 0x1d7   : > { %1151 = vmatprep.subr.bf16.mxu0 %v3725_v55  ;;  %1202 = vmatprep.subr.bf16.mxu1 %v3727_v56 }
 0x1da   : > { %1152 = vmatpush1.bf16.msra.mxu0 %v3729_v57  ;;  %1203 = vmatpush1.bf16.msra.mxu1 %v3730_v58 }
 0x1db   : > { %1153 = vmatprep.subr.bf16.mxu0 %v3731_v59  ;;  %1204 = vmatprep.subr.bf16.mxu1 %v3733_v60 }
 0x1de   : > { %1154 = vmatpush1.bf16.msra.mxu0 %v3735_v61  ;;  %1205 = vmatpush1.bf16.msra.mxu1 %v3736_v62 }
 0x1df   : > { %1155 = vmatprep.subr.bf16.mxu0 %v3737_v63  ;;  %1206 = vmatprep.subr.bf16.mxu1 %v3739_v0 }
 0x1e2   : > { %1156 = vmatpush1.bf16.msra.mxu0 %v3741_v1  ;;  %1207 = vmatpush1.bf16.msra.mxu1 %v3742_v2 }
 0x1e5   : > { %1158 = vmatmul.mubr.bf16.vlgmr.msra.gmra.mrb[0].mxu0 %v715_v6  ;;  %1209 = vmatmul.mubr.bf16.vlgmr.msra.gmra.mrb[0].mxu1 %v715_v6 }
 0x1e6   : > { %1167 = vmatprep.mubr.bf16.mxu0 %v718_v7  ;;  %1218 = vmatprep.mubr.bf16.mxu1 %v718_v7 }
 0x1ed   : > { %1168 = vmatmul.mubr.bf16.gmra.mrb[4].mxu0 %v717_v9  ;;  %1219 = vmatmul.mubr.bf16.gmra.mrb[4].mxu1 %v717_v9 }
 0x2b8   : > { %v1159_v21 = vpop.f32.mrb[0].mxu0  ;;  %v1210_v23 = vpop.f32.mrb[0].mxu1 }
 0x2b9   : > { %v1160_v24 = vadd.f32 %v1159_v21, %v788_v17  ;;  %v1211_v25 = vadd.f32 %v1210_v23, %v796_v18  ;;  %v1161_v26 = vpop.f32.mrb[1].mxu0  ;;  %v1212_v27 = vpop.f32.mrb[1].mxu1 }
 0x2ba   : > { %v1162_v28 = vadd.f32 %v1161_v26, %v792_v19  ;;  %v1213_v29 = vadd.f32 %v1212_v27, %v800_v20  ;;  %v1163_v30 = vpop.f32.mrb[2].mxu0  ;;  %v1214_v31 = vpop.f32.mrb[2].mxu1 }
 0x2bb   : > { %vm1227_vm0 = vcmp.gt.f32.partialorder %v1160_v24, 0.0  ;;  %v1241_v32 = vmul.f32 %v4965_v22, %v1160_v24  ;;  %v1165_v33 = vpop.f32.mrb[3].mxu0  ;;  %v1216_v34 = vpop.f32.mrb[3].mxu1  ;;  %v1243_v35 = vmul.f32 %v4965_v22, %v1211_v25  ;;  %vm1229_vm2 = vcmp.gt.f32.partialorder %v1211_v25, 0.0 }
 0x2bc   : > { %vm1228_vm1 = vcmp.gt.f32.partialorder %v1162_v28, 0.0  ;;  %v1242_v36 = vmul.f32 %v4965_v22, %v1162_v28  ;;  %v1164_v38 = vadd.f32 %v1163_v30, %v788_v17  ;;  %v1244_v40 = vmul.f32 %v4965_v22, %v1213_v29 }
 0x2bd   : > { %v4970_v37 = vsel %vm1227_vm0, %v1160_v24, %v1241_v32  ;;  %v1166_v41 = vadd.f32 %v1165_v33, %v792_v19  ;;  %vm1230_vm3 = vcmp.gt.f32.partialorder %v1213_v29, 0.0  ;;  %v4977_v43 = vsel %vm1229_vm2, %v1211_v25, %v1243_v35 }
 0x2be   : > { %v4972_v39 = vsel %vm1228_vm1, %v1162_v28, %v1242_v36  ;;  %v1245_v44 = vmul.f32 %v4965_v22, %v1164_v38  ;;  %v1215_v45 = vadd.f32 %v1214_v31, %v796_v18  ;;  %vm1231_vm4 = vcmp.gt.f32.partialorder %v1164_v38, 0.0 }
 0x2bf   : > { %v1265_v42 = vadd.f32 %v4972_v39, %v4970_v37  ;;  %v1256_v52 = vsel %vm1230_vm3, %v1213_v29, %v1244_v40  ;;  %v1246_v53 = vmul.f32 %v4965_v22, %v1166_v41  ;;  %v1217_v54 = vadd.f32 %v1216_v34, %v800_v20 }
 0x2c0   : > { %v1169_v46 = vpop.f32.mrb[4].mxu0  ;;  %v1220_v47 = vpop.f32.mrb[4].mxu1  ;;  %vm1232_vm5 = vcmp.gt.f32.partialorder %v1166_v41, 0.0  ;;  %v1257_v61 = vsel %vm1231_vm4, %v1164_v38, %v1245_v44  ;;  %v1247_v62 = vmul.f32 %v4965_v22, %v1215_v45  ;;  %vm1233_vm6 = vcmp.gt.f32.partialorder %v1215_v45, 0.0 }
 0x2c1   : > { %v1266_v48 = vadd.f32 %v1265_v42, %v4977_v43  ;;  %v1170_v49 = vadd.f32 %v1169_v46, %v788_v17  ;;  %v1171_v50 = vpop.f32.mrb[5].mxu0  ;;  %v1222_v51 = vpop.f32.mrb[5].mxu1  ;;  %v1221_v1 = vadd.f32 %v1220_v47, %v796_v18  ;;  %v1258_v2 = vsel %vm1232_vm5, %v1166_v41, %v1246_v53 }
 0x2c2   : > { %v1173_v55 = vpop.f32.mrb[6].mxu0  ;;  %v1224_v56 = vpop.f32.mrb[6].mxu1  ;;  %v1172_v58 = vadd.f32 %v1171_v50, %v792_v19  ;;  %v1248_v3 = vmul.f32 %v4965_v22, %v1217_v54  ;;  %vm1234_vm8 = vcmp.gt.f32.partialorder %v1217_v54, 0.0  ;;  %v1223_v6 = vadd.f32 %v1222_v51, %v800_v20 }
 0x2c3   : > { %v1267_v57 = vadd.f32 %v1266_v48, %v1256_v52  ;;  %v1174_v59 = vpop.f32.mrb[7].mxu0  ;;  %v1225_v60 = vpop.f32.mrb[7].mxu1  ;;  %v1249_v0 = vmul.f32 %v4965_v22, %v1170_v49  ;;  %vm1235_vm7 = vcmp.gt.f32.partialorder %v1170_v49, 0.0  ;;  %v1259_v7 = vsel %vm1233_vm6, %v1215_v45, %v1247_v62 }
 0x2c4   : > { %v1250_v5 = vmul.f32 %v4965_v22, %v1172_v58  ;;  %vm1236_vm9 = vcmp.gt.f32.partialorder %v1172_v58, 0.0  ;;  %v1251_v10 = vmul.f32 %v4965_v22, %v1221_v1  ;;  %v1260_v11 = vsel %vm1234_vm8, %v1217_v54, %v1248_v3 }
 0x2c5   : > { %v1268_v63 = vadd.f32 %v1267_v57, %v1257_v61  ;;  %v1261_v9 = vsel %vm1235_vm7, %v1170_v49, %v1249_v0  ;;  %vm1237_vm11 = vcmp.gt.f32.partialorder %v1221_v1, 0.0  ;;  %v1252_v18 = vmul.f32 %v4965_v22, %v1223_v6 }
 0x2c6   : > { %v1262_v17 = vsel %vm1236_vm9, %v1172_v58, %v1250_v5  ;;  %v1273_v19 = vsel %vm1272_vm10, %v1261_v9, 0.0  ;;  %vm1238_vm12 = vcmp.gt.f32.partialorder %v1223_v6, 0.0  ;;  %v1263_v21 = vsel %vm1237_vm11, %v1221_v1, %v1251_v10 }
 0x2c7   : > { %v1269_v4 = vadd.f32 %v1268_v63, %v1258_v2  ;;  %v1275_v20 = vsel %vm1272_vm10, %v1262_v17, 0.0  ;;  %v1264_v24 = vsel %vm1238_vm12, %v1223_v6, %v1252_v18  ;;  %v1277_v26 = vsel %vm1272_vm10, %v1263_v21, 0.0 }
 0x2c8   : > { %v1279_v28 = vsel %vm1272_vm10, %v1264_v24, 0.0 }
 0x2c9   : > { %v1270_v8 = vadd.f32 %v1269_v4, %v1259_v7 }
 0x2cb   : > { %v1271_v14 = vadd.f32 %v1270_v8, %v1260_v11 }
 0x2cd   : > { %v1274_v23 = vadd.f32 %v1273_v19, %v1271_v14 }
 0x2cf   : > { %v1276_v25 = vadd.f32 %v1275_v20, %v1274_v23 }
 0x2d1   : > { %v1278_v27 = vadd.f32 %v1277_v26, %v1276_v25  ;;  %v1358_v26 = vld [vmem:[#allocation10] sm:$0xf] }
 0x2d3   : > { %v1280_v29 = vadd.f32 %v1279_v28, %v1278_v27  ;;  %v1392_v27 = vld [vmem:[#allocation12] sm:$0xf]  ;;  %v1479_v28 = vld [vmem:[#allocation13] ss:$4 sm:$0xf] }
 0x2d5   : > { %1281 = vadd.xlane.f32.xlu0 %v1280_v29 }
 0x362   : > { %v1282_v30 = vpop.xlane.xlu0 %1281 }
 0x363   : > { %v1283_v31 = vrot.slane %v1282_v30, 4 }
 0x365   : > { %v1284_v32 = vadd.f32 %v1283_v31, %v1282_v30  ;;  %v1363_v30 = vrot.slane %v1358_v26, %v4953_v12  ;;  %v1367_v31 = vrot.slane %v1358_v26, %v4957_v15 }
 0x367   : > { %v1285_v22 = vrot.slane %v1284_v32, 2 }
 0x369   : > { %v1286_v33 = vadd.f32 %v1285_v22, %v1284_v32  ;;  %v1371_v32 = vrot.slane %v1358_v26, %v4955_v13  ;;  %v1375_v22 = vrot.slane %v1358_v26, %v4959_v16 }
 0x36b   : > { %v1287_v34 = vrot.slane %v1286_v33, 1 }
 0x36d   : > { %v1288_v35 = vadd.f32 %v1287_v34, %v1286_v33  ;;  %v1397_v33 = vrot.slane %v1392_v27, %v4953_v12  ;;  %v1401_v34 = vrot.slane %v1392_v27, %v4957_v15 }
 0x36f   : > { %3455 = vpush %v1288_v35  ;;  %v1405_v35 = vrot.slane %v1392_v27, %v4955_v13 }
 0x3a0   : > { %s3456_s20 = spop %3455 }
 0x3a1   : > { %s1290_s30 = smul.f32 0.000114889706, %s3456_s20 }
 0x3a3   : > { %v1291_v36 = vstv %s1290_s30 }
 0x3a4   : > { %v4993_v38 = vsub.f32 %v4970_v37, %v1291_v36  ;;  %v4996_v40 = vsub.f32 %v4972_v39, %v1291_v36  ;;  %v4999_v41 = vsub.f32 %v4977_v43, %v1291_v36  ;;  %v5005_v45 = vsub.f32 %v1256_v52, %v1291_v36 }
 0x3a5   : > { %v5007_v46 = vsub.f32 %v1257_v61, %v1291_v36  ;;  %v5011_v48 = vsub.f32 %v1258_v2, %v1291_v36  ;;  %v5015_v49 = vsub.f32 %v1259_v7, %v1291_v36  ;;  %v1300_v52 = vsub.f32 %v1261_v9, %v1291_v36 }
 0x3a6   : > { %v1304_v42 = vmul.f32 %v4993_v38, %v4993_v38  ;;  %v1305_v44 = vmul.f32 %v4996_v40, %v4996_v40  ;;  %v1306_v37 = vmul.f32 %v4999_v41, %v4999_v41  ;;  %v1307_v39 = vmul.f32 %v5005_v45, %v5005_v45 }
 0x3a7   : > { %v1308_v50 = vmul.f32 %v5007_v46, %v5007_v46  ;;  %v5019_v53 = vsub.f32 %v1260_v11, %v1291_v36  ;;  %v1309_v54 = vmul.f32 %v5011_v48, %v5011_v48  ;;  %v1301_v56 = vsub.f32 %v1262_v17, %v1291_v36 }
 0x3a8   : > { %v1316_v47 = vadd.f32 %v1305_v44, %v1304_v42  ;;  %v1310_v57 = vmul.f32 %v5015_v49, %v5015_v49  ;;  %v1302_v59 = vsub.f32 %v1263_v21, %v1291_v36  ;;  %v1312_v60 = vmul.f32 %v1300_v52, %v1300_v52 }
 0x3a9   : > { %v1311_v61 = vmul.f32 %v5019_v53, %v5019_v53  ;;  %v1303_v63 = vsub.f32 %v1264_v24, %v1291_v36  ;;  %v1313_v0 = vmul.f32 %v1301_v56, %v1301_v56  ;;  %v1409_v36 = vrot.slane %v1392_v27, %v4959_v16 }
 0x3aa   : > { %v1317_v43 = vadd.f32 %v1316_v47, %v1306_v37  ;;  %v1314_v2 = vmul.f32 %v1302_v59, %v1302_v59  ;;  %v1323_v3 = vsel %vm1272_vm10, %v1312_v60, 0.0  ;;  %v5040_v42 = vrot.slane %v1479_v28, %v4953_v12 }
 0x3ab   : > { %v1315_v5 = vmul.f32 %v1303_v63, %v1303_v63  ;;  %v1325_v6 = vsel %vm1272_vm10, %v1313_v0, 0.0 }
 0x3ac   : > { %v1318_v51 = vadd.f32 %v1317_v43, %v1307_v39  ;;  %v1327_v8 = vsel %vm1272_vm10, %v1314_v2, 0.0  ;;  %v1514_v43 = vld [vmem:[#allocation13 + $0x1] ss:$4 sm:$0xf] }
 0x3ad   : > { %v1329_v10 = vsel %vm1272_vm10, %v1315_v5, 0.0  ;;  %v5066_v5 = vrot.slane %v1514_v43, %v4955_v13 }
 0x3ae   : > { %v1319_v55 = vadd.f32 %v1318_v51, %v1308_v50 }
 0x3b0   : > { %v1320_v58 = vadd.f32 %v1319_v55, %v1309_v54 }
 0x3b2   : > { %v1321_v62 = vadd.f32 %v1320_v58, %v1310_v57 }
 0x3b4   : > { %v1322_v1 = vadd.f32 %v1321_v62, %v1311_v61 }
 0x3b6   : > { %v1324_v4 = vadd.f32 %v1323_v3, %v1322_v1 }
 0x3b8   : > { %v1326_v7 = vadd.f32 %v1325_v6, %v1324_v4  ;;  %v5063_v4 = vrot.slane %v1514_v43, %v4957_v15  ;;  %v5069_v6 = vrot.slane %v1514_v43, %v4959_v16 }
 0x3ba   : > { %v1328_v9 = vadd.f32 %v1327_v8, %v1326_v7 }
 0x3bc   : > { %v1330_v11 = vadd.f32 %v1329_v10, %v1328_v9 }
 0x3be   : > { %1331 = vadd.xlane.f32.xlu0 %v1330_v11 }
 0x44b   : > { %v1332_v14 = vpop.xlane.xlu0 %1331 }
 0x44c   : > { %v1333_v17 = vrot.slane %v1332_v14, 4 }
 0x44e   : > { %v1334_v18 = vadd.f32 %v1333_v17, %v1332_v14  ;;  %v1697_v14 = vld [vmem:[#allocation15] sm:$0xf] }
 0x450   : > { %v1335_v19 = vrot.slane %v1334_v18, 2 }
 0x452   : > { %v1336_v21 = vadd.f32 %v1335_v19, %v1334_v18 }
 0x454   : > { %v1337_v23 = vrot.slane %v1336_v21, 1 }
 0x456   : > { %v1338_v20 = vadd.f32 %v1337_v23, %v1336_v21 }
 0x458   : > { %3457 = vpush %v1338_v20 }
 0x489   : > { %s3458_s28 = spop %3457 }
 0x48a   : > { %s1340_s0 = smul.f32 0.000114889706, %s3458_s28 }
 0x48c   : > { %s1341_s2 = sadd.f32 1e-08, %s1340_s0  ;;  %s5362_s0 = scalar_lea.vmem [#allocation26], %s4913_s21 }
 0x48e   : > { %v1342_v24 = vstv %s1341_s2  ;;  %s2986_s2 = sshll.u32 %s5362_s0, 4  ;;  %s5380_s2 = int_to_ptr.vmem [resolvable:$true] %s2986_s2 }
 0x48f   : > { %3935 = vrsqrt.f32 %v1342_v24  ;;  %p4318_p11 = scmp.lt.s32.totalorder %s5380_s2, %s4316_s7 }
 0x499   : > { %v3936_v25 = vpop.eup %3935 }
 0x49a   : > { %3459 = vpush %v3936_v25 }
 0x4cb   : > { %s3460_s19 = spop %3459 }
 0x4cc   : > { %v1345_v29 = vstv %s3460_s19  ;;  %s5370_s19 = scalar_lea.vmem [#allocation25], %s4913_s21 }
 0x4cd   : > { %v1346_v44 = vmul.f32 %v1345_v29, %v4993_v38  ;;  %v1347_v37 = vmul.f32 %v1345_v29, %v4996_v40  ;;  %v1350_v47 = vmul.f32 %v1345_v29, %v5007_v46  ;;  %v1351_v39 = vmul.f32 %v1345_v29, %v5011_v48  ;;  %s2970_s21 = sshll.u32 %s5370_s19, 4  ;;  %s5389_s21 = int_to_ptr.vmem [resolvable:$true] %s2970_s21 }
 0x4ce   : > { %v1348_v50 = vmul.f32 %v1345_v29, %v4999_v41  ;;  %v1352_v51 = vmul.f32 %v1345_v29, %v5015_v49  ;;  %v1354_v54 = vmul.f32 %v1345_v29, %v1300_v52  ;;  %v1355_v55 = vmul.f32 %v1345_v29, %v1301_v56  ;;  %v1606_v56 = vld [vmem:[#allocation13 + $0x2] ss:$4 sm:$0xf] }
 0x4cf   : > { %v1349_v57 = vmul.f32 %v1345_v29, %v5005_v45  ;;  %v1353_v58 = vmul.f32 %v1345_v29, %v5019_v53  ;;  %v1356_v60 = vmul.f32 %v1345_v29, %v1302_v59  ;;  %v1357_v61 = vmul.f32 %v1345_v29, %v1303_v63 }
 0x4d0   : > { %v5051_v38 = vrot.slane %v1479_v28, %v4957_v15  ;;  %v5054_v40 = vrot.slane %v1479_v28, %v4955_v13  ;;  %v5057_v46 = vrot.slane %v1479_v28, %v4959_v16  ;;  %v5060_v41 = vrot.slane %v1514_v43, %v4953_v12 }
 0x4d1   : > { %v1380_v48 = vmul.f32 %v1363_v30, %v1346_v44  ;;  %v1381_v49 = vmul.f32 %v1367_v31, %v1347_v37  ;;  %v1384_v52 = vmul.f32 %v1363_v30, %v1350_v47  ;;  %v1385_v45 = vmul.f32 %v1367_v31, %v1351_v39 }
 0x4d2   : > { %v1382_v53 = vmul.f32 %v1371_v32, %v1348_v50  ;;  %v1386_v59 = vmul.f32 %v1371_v32, %v1352_v51  ;;  %v1388_v62 = vmul.f32 %v1363_v30, %v1354_v54  ;;  %v1389_v63 = vmul.f32 %v1367_v31, %v1355_v55 }
 0x4d3   : > { %v1383_v0 = vmul.f32 %v1375_v22, %v1349_v57  ;;  %v1387_v1 = vmul.f32 %v1375_v22, %v1353_v58  ;;  %v1390_v2 = vmul.f32 %v1371_v32, %v1356_v60  ;;  %v1391_v3 = vmul.f32 %v1375_v22, %v1357_v61 }
 0x4d4   : > { %v5072_v7 = vrot.slane %v1606_v56, %v4953_v12  ;;  %v1414_v8 = vadd.f32 %v1397_v33, %v1380_v48  ;;  %v1415_v9 = vadd.f32 %v1401_v34, %v1381_v49  ;;  %v1418_v10 = vadd.f32 %v1397_v33, %v1384_v52 }
 0x4d5   : > { %v1419_v11 = vadd.f32 %v1401_v34, %v1385_v45  ;;  %v1416_v17 = vadd.f32 %v1405_v35, %v1382_v53  ;;  %v1420_v18 = vadd.f32 %v1405_v35, %v1386_v59  ;;  %v1422_v19 = vadd.f32 %v1397_v33, %v1388_v62 }
 0x4d6   : > { %v1423_v21 = vadd.f32 %v1401_v34, %v1389_v63  ;;  %v1417_v23 = vadd.f32 %v1409_v36, %v1383_v0  ;;  %v1421_v20 = vadd.f32 %v1409_v36, %v1387_v1  ;;  %v1424_v24 = vadd.f32 %v1405_v35, %v1390_v2 }
 0x4d7   : > { %v1425_v25 = vadd.f32 %v1409_v36, %v1391_v3  ;;  %v5077_v26 = vrot.slane %v1606_v56, %v4957_v15  ;;  %v5080_v27 = vrot.slane %v1606_v56, %v4955_v13  ;;  %v5083_v28 = vrot.slane %v1606_v56, %v4959_v16 }
 0x4d8   : > { %v5086_v29 = vrot.slane %v1697_v14, %v4953_v12  ;;  %v1438_v30 = vrot.slane %v1414_v8, 7  ;;  %v1439_v31 = vrot.slane %v1415_v9, 7  ;;  %v1442_v32 = vrot.slane %v1418_v10, 7 }
 0x4d9   : > { %v1444_v22 = vrot.slane %v1419_v11, 7  ;;  %v1440_v33 = vrot.slane %v1416_v17, 7  ;;  %v1446_v34 = vrot.slane %v1420_v18, 7  ;;  %v1450_v35 = vrot.slane %v1422_v19, 7 }
 0x4da   : > { %v1452_v36 = vrot.slane %v1423_v21, 7  ;;  %v1441_v44 = vrot.slane %v1417_v23, 7  ;;  %v1448_v37 = vrot.slane %v1421_v20, 7  ;;  %v1454_v47 = vrot.slane %v1424_v24, 7 }
 0x4db   : > { %v1456_v39 = vrot.slane %v1425_v25, 7  ;;  %v5089_v43 = vrot.slane %v1697_v14, %v4957_v15  ;;  %v5092_v50 = vrot.slane %v1697_v14, %v4955_v13  ;;  %v5095_v51 = vrot.slane %v1697_v14, %v4959_v16 }
 0x4dc   : > { %v5098_v54 = vstv %s5074_s23  ;;  %v1443_v55 = vsel %vm1272_vm10, %v1438_v30, %v1442_v32  ;;  %v1445_v57 = vsel %vm1272_vm10, %v1439_v31, %v1444_v22  ;;  %v1470_v58 = vsel %vm1272_vm10, 0.0, %v1438_v30  ;;  %s3467_s23 = smul.u32 768, %s5538_s29  ;;  %s2957_s29 = scalar_lea.sflag [#allocation27], %s4910_s8 }
 0x4dd   : > { %v1471_v60 = vsel %vm1272_vm10, 0.0, %v1439_v31  ;;  %v1447_v61 = vsel %vm1272_vm10, %v1440_v33, %v1446_v34  ;;  %v1451_v48 = vsel %vm1272_vm10, %v1442_v32, %v1450_v35  ;;  %v1453_v49 = vsel %vm1272_vm10, %v1444_v22, %v1452_v36 }
 0x4de   : > { %v1472_v52 = vsel %vm1272_vm10, 0.0, %v1440_v33  ;;  %v5109_v45 = vsel %vm1272_vm10, %v1441_v44, %v1448_v37  ;;  %v1455_v56 = vsel %vm1272_vm10, %v1446_v34, %v1454_v47  ;;  %v1457_v53 = vsel %vm1272_vm10, %v1448_v37, %v1456_v39 }
 0x4df   : > { %v1473_v59 = vsel %vm1272_vm10, 0.0, %v1441_v44  ;;  %v1536_v62 = vmul.f32 %v5060_v41, %v1470_v58  ;;  %v1537_v63 = vmul.f32 %v5063_v4, %v1471_v60  ;;  %v1540_v0 = vmul.f32 %v5060_v41, %v1443_v55 }
 0x4e0   : > { %v5118_v1 = vmul.f32 %v5063_v4, %v1445_v57  ;;  %v5121_v2 = vsel %vm1474_vm13, %v1451_v48, 0.0  ;;  %v5124_v3 = vsel %vm1474_vm13, %v1453_v49, 0.0  ;;  %v1538_v8 = vmul.f32 %v5066_v5, %v1472_v52 }
 0x4e1   : > { %v5128_v9 = vmul.f32 %v5066_v5, %v1447_v61  ;;  %v5131_v10 = vsel %vm1474_vm13, %v1455_v56, 0.0  ;;  %v5134_v11 = vsel %vm1474_vm13, %v1457_v53, 0.0  ;;  %v1501_v14 = vmul.f32 %v5040_v42, %v1470_v58 }
 0x4e2   : > { %v1502_v17 = vmul.f32 %v5051_v38, %v1471_v60  ;;  %v1503_v18 = vmul.f32 %v5054_v40, %v1472_v52  ;;  %v1504_v19 = vmul.f32 %v5057_v46, %v1473_v59  ;;  %v1539_v21 = vmul.f32 %v5069_v6, %v1473_v59 }
 0x4e3   : > { %v5143_v23 = vmul.f32 %v5069_v6, %v5109_v45  ;;  %v1561_v20 = vrot.slane %v1536_v62, 1  ;;  %v1562_v24 = vrot.slane %v1540_v0, 1  ;;  %v1564_v25 = vrot.slane %v1537_v63, 1 }
 0x4e4   : > { %v1565_v30 = vrot.slane %v5118_v1, 1  ;;  %v1505_v31 = vmul.f32 %v5040_v42, %v1443_v55  ;;  %v5149_v32 = vmul.f32 %v5060_v41, %v5121_v2  ;;  %v1567_v22 = vrot.slane %v1538_v8, 1 }
 0x4e5   : > { %v1568_v33 = vrot.slane %v5128_v9, 1  ;;  %v1506_v34 = vmul.f32 %v5051_v38, %v1445_v57  ;;  %v1507_v35 = vmul.f32 %v5054_v40, %v1447_v61  ;;  %v1628_v36 = vmul.f32 %v5072_v7, %v1470_v58 }
 0x4e6   : > { %v1629_v44 = vmul.f32 %v5077_v26, %v1471_v60  ;;  %v5158_v37 = vmul.f32 %v5063_v4, %v5124_v3  ;;  %v5162_v47 = vmul.f32 %v5066_v5, %v5131_v10  ;;  %v1632_v41 = vmul.f32 %v5072_v7, %v1443_v55 }
 0x4e7   : > { %v1633_v39 = vmul.f32 %v5077_v26, %v1445_v57  ;;  %v1563_v48 = vsel %vm1560_vm14, %v1561_v20, %v1562_v24  ;;  %v1566_v49 = vsel %vm1560_vm14, %v1564_v25, %v1565_v30  ;;  %v1570_v56 = vrot.slane %v1539_v21, 1 }
 0x4e8   : > { %v1571_v58 = vrot.slane %v5143_v23, 1  ;;  %v1569_v60 = vsel %vm1560_vm14, %v1567_v22, %v1568_v33  ;;  %v1573_v4 = vrot.slane %v5149_v32, 1  ;;  %v1630_v53 = vmul.f32 %v5080_v27, %v1472_v52 }
 0x4e9   : > { %v1634_v5 = vmul.f32 %v5080_v27, %v1447_v61  ;;  %v1653_v62 = vrot.slane %v1628_v36, 2  ;;  %v1654_v63 = vrot.slane %v1632_v41, 2  ;;  %v1656_v55 = vrot.slane %v1629_v44, 2 }
 0x4ea   : > { %v1657_v0 = vrot.slane %v1633_v39, 2  ;;  %v1593_v57 = vadd.f32 %v1563_v48, %v1501_v14  ;;  %v1594_v1 = vadd.f32 %v1566_v49, %v1502_v17  ;;  %v1631_v8 = vmul.f32 %v5083_v28, %v1473_v59 }
 0x4eb   : > { %v5176_v9 = vmul.f32 %v5083_v28, %v5109_v45  ;;  %v5180_v21 = vmul.f32 %v5069_v6, %v5134_v11  ;;  %v1572_v52 = vsel %vm1560_vm14, %v1570_v56, %v1571_v58  ;;  %v1575_v61 = vrot.slane %v5158_v37, 1 }
 0x4ec   : > { %v1577_v23 = vrot.slane %v5162_v47, 1  ;;  %v1574_v20 = vsel %vm1560_vm14, %v1562_v24, %v1573_v4  ;;  %v1636_v14 = vmul.f32 %v5072_v7, %v5121_v2  ;;  %v1659_v59 = vrot.slane %v1630_v53, 2 }
 0x4ed   : > { %v1660_v17 = vrot.slane %v1634_v5, 2  ;;  %v1595_v25 = vadd.f32 %v1569_v60, %v1503_v18  ;;  %v1637_v32 = vmul.f32 %v5077_v26, %v5124_v3  ;;  %v1655_v6 = vsel %vm1652_vm15, %v1653_v62, %v1654_v63 }
 0x4ee   : > { %v1658_v22 = vsel %vm1652_vm15, %v1656_v55, %v1657_v0  ;;  %v1662_v36 = vrot.slane %v1631_v8, 2  ;;  %v1663_v44 = vrot.slane %v5176_v9, 2  ;;  %v1685_v37 = vadd.f32 %v1655_v6, %v1593_v57 }
 0x4ef   : > { %v1686_v47 = vadd.f32 %v1658_v22, %v1594_v1  ;;  %v1508_v24 = vmul.f32 %v5057_v46, %v5109_v45  ;;  %v1579_v7 = vrot.slane %v5180_v21, 1  ;;  %v1596_v41 = vadd.f32 %v1572_v52, %v1504_v19 }
 0x4f0   : > { %v1638_v18 = vmul.f32 %v5080_v27, %v5131_v10  ;;  %v1576_v26 = vsel %vm1560_vm14, %v1565_v30, %v1575_v61  ;;  %v1578_v39 = vsel %vm1560_vm14, %v1568_v33, %v1577_v23  ;;  %v1661_v48 = vsel %vm1652_vm15, %v1659_v59, %v1660_v17 }
 0x4f1   : > { %v1665_v49 = vrot.slane %v1636_v14, 2  ;;  %v1597_v56 = vadd.f32 %v1574_v20, %v1505_v31  ;;  %v1639_v60 = vmul.f32 %v5083_v28, %v5134_v11  ;;  %v1667_v53 = vrot.slane %v1637_v32, 2 }
 0x4f2   : > { %v1687_v5 = vadd.f32 %v1661_v48, %v1595_v25  ;;  %v1509_v45 = vmul.f32 %v5040_v42, %v5121_v2  ;;  %v1664_v19 = vsel %vm1652_vm15, %v1662_v36, %v1663_v44  ;;  %v1719_v27 = vadd.f32 %v5086_v29, %v1685_v37 }
 0x4f3   : > { %v1720_v30 = vadd.f32 %v5089_v43, %v1686_v47  ;;  %v1510_v33 = vmul.f32 %v5051_v38, %v5124_v3  ;;  %v1598_v62 = vadd.f32 %v1576_v26, %v1506_v34  ;;  %v1669_v55 = vrot.slane %v1638_v18, 2 }
 0x4f4   : > { %v1688_v31 = vadd.f32 %v1664_v19, %v1596_v41  ;;  %v1580_v57 = vsel %vm1560_vm14, %v1571_v58, %v1579_v7  ;;  %v1599_v28 = vadd.f32 %v1578_v39, %v1507_v35  ;;  %v1601_v1 = vadd.f32 %v1573_v4, %v1509_v45 }
 0x4f5   : > { %v1666_v8 = vsel %vm1652_vm15, %v1654_v63, %v1665_v49  ;;  %v1668_v42 = vsel %vm1652_vm15, %v1657_v0, %v1667_v53  ;;  %v1671_v2 = vrot.slane %v1639_v60, 2  ;;  %v1721_v21 = vadd.f32 %v5092_v50, %v1687_v5 }
 0x4f6   : > { %v1689_v9 = vadd.f32 %v1666_v8, %v1597_v56  ;;  %vm1731_vm0 = vcmp.gt.f32.partialorder %v1719_v27, 0.0  ;;  %vm1732_vm1 = vcmp.gt.f32.partialorder %v1720_v30, 0.0  ;;  %v1745_v52 = vmul.f32 %v5098_v54, %v1719_v27 }
 0x4f7   : > { %v1746_v38 = vmul.f32 %v5098_v54, %v1720_v30  ;;  %v1600_v3 = vadd.f32 %v1580_v57, %v1508_v24  ;;  %v1670_v34 = vsel %vm1652_vm15, %v1660_v17, %v1669_v55  ;;  %v1690_v58 = vadd.f32 %v1668_v42, %v1598_v62 }
 0x4f8   : > { %v1722_v35 = vadd.f32 %v5095_v51, %v1688_v31  ;;  %v1511_v4 = vmul.f32 %v5054_v40, %v5131_v10  ;;  %v1512_v63 = vmul.f32 %v5057_v46, %v5134_v11  ;;  %v1602_v0 = vadd.f32 %v1575_v61, %v1510_v33 }
 0x4f9   : > { %v1691_v20 = vadd.f32 %v1670_v34, %v1599_v28  ;;  %v1723_v14 = vadd.f32 %v5086_v29, %v1689_v9  ;;  %v1747_v59 = vmul.f32 %v5098_v54, %v1721_v21  ;;  %v5224_v25 = vsel %vm1731_vm0, %v1719_v27, %v1745_v52 }
 0x4fa   : > { %v5226_v32 = vsel %vm1732_vm1, %v1720_v30, %v1746_v38  ;;  %v1603_v17 = vadd.f32 %v1577_v23, %v1511_v4  ;;  %v1672_v6 = vsel %vm1652_vm15, %v1663_v44, %v1671_v2  ;;  %v1693_v22 = vadd.f32 %v1665_v49, %v1601_v1 }
 0x4fb   : > { %vm1733_vm2 = vcmp.gt.f32.partialorder %v1721_v21, 0.0  ;;  %v1692_v36 = vadd.f32 %v1672_v6, %v1600_v3  ;;  %v1724_v40 = vadd.f32 %v5089_v43, %v1690_v58  ;;  %v1748_v46 = vmul.f32 %v5098_v54, %v1722_v35 }
 0x4fc   : > { %v1604_v10 = vadd.f32 %v1579_v7, %v1512_v63  ;;  %v1694_v11 = vadd.f32 %v1667_v53, %v1602_v0  ;;  %vm1734_vm3 = vcmp.gt.f32.partialorder %v1722_v35, 0.0  ;;  %v1769_v61 = vadd.f32 %v5226_v32, %v5224_v25 }
 0x4fd   : > { %v1725_v37 = vadd.f32 %v5092_v50, %v1691_v20  ;;  %v1749_v47 = vmul.f32 %v5098_v54, %v1723_v14  ;;  %v1759_v23 = vsel %vm1733_vm2, %v1721_v21, %v1747_v59  ;;  %v1695_v24 = vadd.f32 %v1669_v55, %v1603_v17 }
 0x4fe   : > { %v1727_v44 = vadd.f32 %v5086_v29, %v1693_v22  ;;  %vm1735_vm4 = vcmp.gt.f32.partialorder %v1723_v14, 0.0  ;;  %v1770_v41 = vadd.f32 %v1769_v61, %v1759_v23  ;;  %v1726_v18 = vadd.f32 %v5095_v51, %v1692_v36 }
 0x4ff   : > { %v1750_v26 = vmul.f32 %v5098_v54, %v1724_v40  ;;  %v1760_v7 = vsel %vm1734_vm3, %v1722_v35, %v1748_v46  ;;  %v1696_v39 = vadd.f32 %v1671_v2, %v1604_v10  ;;  %v1728_v48 = vadd.f32 %v5089_v43, %v1694_v11 }
 0x500   : > { %vm1736_vm5 = vcmp.gt.f32.partialorder %v1724_v40, 0.0  ;;  %v1771_v49 = vadd.f32 %v1770_v41, %v1760_v7  ;;  %v1751_v56 = vmul.f32 %v5098_v54, %v1725_v37  ;;  %v1761_v60 = vsel %vm1735_vm4, %v1723_v14, %v1749_v47 }
 0x501   : > { %v1729_v53 = vadd.f32 %v5092_v50, %v1695_v24  ;;  %vm1737_vm6 = vcmp.gt.f32.partialorder %v1725_v37, 0.0  ;;  %v1753_v29 = vmul.f32 %v5098_v54, %v1727_v44  ;;  %vm1739_vm7 = vcmp.gt.f32.partialorder %v1727_v44, 0.0 }
 0x502   : > { %v1772_v5 = vadd.f32 %v1771_v49, %v1761_v60  ;;  %v1752_v45 = vmul.f32 %v5098_v54, %v1726_v18  ;;  %v1762_v19 = vsel %vm1736_vm5, %v1724_v40, %v1750_v26  ;;  %v1730_v27 = vadd.f32 %v5095_v51, %v1696_v39 }
 0x503   : > { %vm1738_vm8 = vcmp.gt.f32.partialorder %v1726_v18, 0.0  ;;  %v1754_v43 = vmul.f32 %v5098_v54, %v1728_v48  ;;  %vm1740_vm9 = vcmp.gt.f32.partialorder %v1728_v48, 0.0  ;;  %v1763_v33 = vsel %vm1737_vm6, %v1725_v37, %v1751_v56 }
 0x504   : > { %v1773_v30 = vadd.f32 %v1772_v5, %v1762_v19  ;;  %v1755_v62 = vmul.f32 %v5098_v54, %v1729_v53  ;;  %v1765_v55 = vsel %vm1739_vm7, %v1727_v44, %v1753_v29  ;;  %vm1741_vm11 = vcmp.gt.f32.partialorder %v1729_v53, 0.0 }
 0x505   : > { %v1764_v31 = vsel %vm1738_vm8, %v1726_v18, %v1752_v45  ;;  %v1756_v57 = vmul.f32 %v5098_v54, %v1730_v27  ;;  %v1766_v28 = vsel %vm1740_vm9, %v1728_v48, %v1754_v43  ;;  %vm1742_vm12 = vcmp.gt.f32.partialorder %v1730_v27, 0.0 }
 0x506   : > { %v1774_v50 = vadd.f32 %v1773_v30, %v1763_v33  ;;  %v1776_v8 = vsel %vm1272_vm10, %v1765_v55, 0.0  ;;  %v1767_v51 = vsel %vm1741_vm11, %v1729_v53, %v1755_v62  ;;  %v1778_v2 = vsel %vm1272_vm10, %v1766_v28, 0.0 }
 0x507   : > { %v1768_v9 = vsel %vm1742_vm12, %v1730_v27, %v1756_v57  ;;  %v1780_v52 = vsel %vm1272_vm10, %v1767_v51, 0.0  ;;  %v3743_v57 = vld [vmem:[#allocation19] ss:$8 sps:$4 sm:$0xff]  }
 0x508   : > { %v1775_v1 = vadd.f32 %v1774_v50, %v1764_v31  ;;  %v1782_v3 = vsel %vm1272_vm10, %v1768_v9, 0.0 }
 0x50a   : > { %v1777_v42 = vadd.f32 %v1776_v8, %v1775_v1  ;;  %v3746_v1 = vld [vmem:[#allocation22] ss:$8 sps:$4 sm:$0xff]   ;;  %v3748_v8 = vld [vmem:[#allocation22 + $0x4] ss:$8 sps:$4 sm:$0xff]  }
 0x50b   : > { %2837 = vmatprep.subr.bf16.mxu1 %v3748_v8  ;;  %v3818_v8 = vld [vmem:[#allocation22 + $0xc0] ss:$8 sps:$4 sm:$0xff]  }
 0x50c   : > { %v1779_v21 = vadd.f32 %v1778_v2, %v1777_v42  ;;  %v3754_v42 = vld [vmem:[#allocation22 + $0x14] ss:$8 sps:$4 sm:$0xff]   ;;  %2838 = vmatpush1.bf16.msra.mxu1 %v3746_v1 }
 0x50d   : > { %v3749_v2 = vld [vmem:[#allocation19 + $0x10] ss:$8 sps:$4 sm:$0xff]   ;;  %2839 = vmatprep.subr.bf16.mxu1 %v3754_v42  ;;  %v3815_v1 = vld [vmem:[#allocation19 + $0xc0] ss:$8 sps:$4 sm:$0xff]  }
 0x50e   : > { %v1781_v38 = vadd.f32 %v1780_v52, %v1779_v21  ;;  %v3755_v21 = vld [vmem:[#allocation19 + $0x20] ss:$8 sps:$4 sm:$0xff]   ;;  %v3757_v52 = vld [vmem:[#allocation19 + $0x24] ss:$8 sps:$4 sm:$0xff]  }
 0x50f   : > { %v3826_v42 = vld [vmem:[#allocation22 + $0xd4] ss:$8 sps:$4 sm:$0xff]  }
 0x510   : > { %v1783_v34 = vadd.f32 %v1782_v3, %v1781_v38  ;;  %v3758_v38 = vld [vmem:[#allocation22 + $0x20] ss:$8 sps:$4 sm:$0xff]   ;;  %v3760_v3 = vld [vmem:[#allocation22 + $0x24] ss:$8 sps:$4 sm:$0xff]  }
 0x512   : > { %1784 = vadd.xlane.f32.xlu1 %v1783_v34  ;;  %v3763_v34 = vld [vmem:[#allocation19 + $0x34] ss:$8 sps:$4 sm:$0xff]  }
 0x59f   : > { %v1785_v58 = vpop.xlane.xlu1 %1784 }
 0x5a0   : > { %v1786_v54 = vrot.slane %v1785_v58, 4 }
 0x5a2   : > { %v1787_v35 = vadd.f32 %v1786_v54, %v1785_v58  ;;  %v3766_v58 = vld [vmem:[#allocation22 + $0x34] ss:$8 sps:$4 sm:$0xff]  }
 0x5a3   : > { %v3761_v54 = vld [vmem:[#allocation19 + $0x30] ss:$8 sps:$4 sm:$0xff]  }
 0x5a4   : > { %v1788_v4 = vrot.slane %v1787_v35, 2 }
 0x5a6   : > { %v1789_v63 = vadd.f32 %v1788_v4, %v1787_v35  ;;  %v3764_v35 = vld [vmem:[#allocation22 + $0x30] ss:$8 sps:$4 sm:$0xff]   ;;  %v3769_v4 = vld [vmem:[#allocation19 + $0x44] ss:$8 sps:$4 sm:$0xff]  }
 0x5a8   : > { %v1790_v0 = vrot.slane %v1789_v63, 1 }
 0x5aa   : > { %v1791_v20 = vadd.f32 %v1790_v0, %v1789_v63  ;;  %v3772_v63 = vld [vmem:[#allocation22 + $0x44] ss:$8 sps:$4 sm:$0xff]  }
 0x5ab   : > { %v3767_v0 = vld [vmem:[#allocation19 + $0x40] ss:$8 sps:$4 sm:$0xff]  }
 0x5ac   : > { %3461 = vpush %v1791_v20  ;;  %v3770_v20 = vld [vmem:[#allocation22 + $0x40] ss:$8 sps:$4 sm:$0xff]  }
 0x5dd   : > { %s3462_s22 = spop %3461 }
 0x5de   : > { %s1793_s24 = smul.f32 0.000114889706, %s3462_s22  ;;  %s4311_s22 = scalar_lea.vmem %s5380_s2, 768 }
 0x5df   : > { %p4312_p2 = scmp.ne.s32.totalorder %s5380_s2, %s4311_s22  ;;  %p4319_p0 = scmp.lt.s32.totalorder %s4317_s9, %s4311_s22 }
 0x5e0   : > { %v1794_v14 = vstv %s1793_s24  ;;  %s5551_s24 = sld [smem:[#allocation49_spill]] }
 0x5e1   : > { %v5252_v59 = vsub.f32 %v5224_v25, %v1794_v14  ;;  %v5255_v17 = vsub.f32 %v5226_v32, %v1794_v14  ;;  %v5257_v6 = vsub.f32 %v1759_v23, %v1794_v14  ;;  %v5263_v40 = vsub.f32 %v1760_v7, %v1794_v14  ;;  %p4313_p4 = pnand %p4312_p2, %p5553_p8  ;;  %p4320_p6 = por %p4319_p0, %p4318_p11 }
 0x5e2   : > { %v5265_v46 = vsub.f32 %v1761_v60, %v1794_v14  ;;  %v5269_v11 = vsub.f32 %v1762_v19, %v1794_v14  ;;  %v5273_v37 = vsub.f32 %v1763_v33, %v1794_v14  ;;  %v5277_v24 = vsub.f32 %v1765_v55, %v1794_v14 }
 0x5e3   : > { %v1807_v22 = vmul.f32 %v5252_v59, %v5252_v59  ;;  %v1808_v36 = vmul.f32 %v5255_v17, %v5255_v17  ;;  %v1809_v10 = vmul.f32 %v5257_v6, %v5257_v6  ;;  %v1810_v32 = vmul.f32 %v5263_v40, %v5263_v40  ;;  %p4314_p10 = pneg %p4313_p4 }
 0x5e4   : > { %v1811_v47 = vmul.f32 %v5265_v46, %v5265_v46  ;;  %v5279_v44 = vsub.f32 %v1764_v31, %v1794_v14  ;;  %v1812_v41 = vmul.f32 %v5269_v11, %v5269_v11  ;;  %v5283_v26 = vsub.f32 %v1766_v28, %v1794_v14  ;;  %v3745_v28 = vld [vmem:[#allocation19 + $0x4] ss:$8 sps:$4 sm:$0xff]  }
 0x5e5   : > { %v1819_v25 = vadd.f32 %v1808_v36, %v1807_v22  ;;  %v1813_v7 = vmul.f32 %v5273_v37, %v5273_v37  ;;  %v5287_v48 = vsub.f32 %v1767_v51, %v1794_v14  ;;  %v1815_v49 = vmul.f32 %v5277_v24, %v5277_v24  ;;  %v3751_v51 = vld [vmem:[#allocation19 + $0x14] ss:$8 sps:$4 sm:$0xff]   ;;  %2333 = vmatprep.subr.bf16.mxu0 %v3745_v28  ;;  %v3773_v36 = vld [vmem:[#allocation19 + $0x50] ss:$8 sps:$4 sm:$0xff]   ;;  %p4321_p7 = pnand %p4320_p6, %p4314_p10 }
 0x5e6   : > { %v1814_v56 = vmul.f32 %v5279_v44, %v5279_v44  ;;  %v5293_v53 = vsub.f32 %v1768_v9, %v1794_v14  ;;  %v1816_v29 = vmul.f32 %v5283_v26, %v5283_v26  ;;  %2334 = vmatpush1.bf16.msra.mxu0 %v3743_v57  ;;  %v3752_v9 = vld [vmem:[#allocation22 + $0x10] ss:$8 sps:$4 sm:$0xff]   ;;  %v3778_v22 = vld [vmem:[#allocation22 + $0x54] ss:$8 sps:$4 sm:$0xff]   ;;  %v3817_v57 = vld [vmem:[#allocation19 + $0xc4] ss:$8 sps:$4 sm:$0xff]  }
 0x5e7   : > { %v1820_v61 = vadd.f32 %v1819_v25, %v1809_v10  ;;  %v1817_v45 = vmul.f32 %v5287_v48, %v5287_v48  ;;  %v1826_v19 = vsel %vm1272_vm10, %v1815_v49, 0.0  ;;  %2335 = vmatprep.subr.bf16.mxu0 %v3751_v51  ;;  %2840 = vmatpush1.bf16.msra.mxu1 %v3752_v9  ;;  %v3775_v14 = vld [vmem:[#allocation19 + $0x54] ss:$8 sps:$4 sm:$0xff]   ;;  %v3781_v25 = vld [vmem:[#allocation19 + $0x64] ss:$8 sps:$4 sm:$0xff]  }
 0x5e8   : > { %v1818_v43 = vmul.f32 %v5293_v53, %v5293_v53  ;;  %v1828_v30 = vsel %vm1272_vm10, %v1816_v29, 0.0  ;;  %2841 = vmatprep.subr.bf16.mxu1 %v3760_v3  ;;  %v3776_v10 = vld [vmem:[#allocation22 + $0x50] ss:$8 sps:$4 sm:$0xff]   ;;  %v3796_v49 = vld [vmem:[#allocation22 + $0x84] ss:$8 sps:$4 sm:$0xff]  }
 0x5e9   : > { %v1821_v23 = vadd.f32 %v1820_v61, %v1810_v32  ;;  %v1830_v62 = vsel %vm1272_vm10, %v1817_v45, 0.0  ;;  %v3784_v32 = vld [vmem:[#allocation22 + $0x64] ss:$8 sps:$4 sm:$0xff]   ;;  %v3799_v29 = vld [vmem:[#allocation19 + $0x94] ss:$8 sps:$4 sm:$0xff]  }
 0x5ea   : > { %v1832_v50 = vsel %vm1272_vm10, %v1818_v43, 0.0  ;;  %2336 = vmatpush1.bf16.msra.mxu0 %v3749_v2  ;;  %v3779_v61 = vld [vmem:[#allocation19 + $0x60] ss:$8 sps:$4 sm:$0xff]   ;;  %v3797_v45 = vld [vmem:[#allocation19 + $0x90] ss:$8 sps:$4 sm:$0xff]  }
 0x5eb   : > { %v1822_v18 = vadd.f32 %v1821_v23, %v1811_v47  ;;  %2337 = vmatprep.subr.bf16.mxu0 %v3757_v52  ;;  %2842 = vmatpush1.bf16.msra.mxu1 %v3758_v38  ;;  %v3782_v47 = vld [vmem:[#allocation22 + $0x60] ss:$8 sps:$4 sm:$0xff]   ;;  %v3787_v23 = vld [vmem:[#allocation19 + $0x74] ss:$8 sps:$4 sm:$0xff]   ;;  %v3808_v43 = vld [vmem:[#allocation22 + $0xa4] ss:$8 sps:$4 sm:$0xff]  }
 0x5ec   : > { %2843 = vmatprep.subr.bf16.mxu1 %v3766_v58  ;;  %v3820_v28 = vld [vmem:[#allocation22 + $0xc4] ss:$8 sps:$4 sm:$0xff]   ;;  %v3823_v51 = vld [vmem:[#allocation19 + $0xd4] ss:$8 sps:$4 sm:$0xff]  }
 0x5ed   : > { %v1823_v39 = vadd.f32 %v1822_v18, %v1812_v41  ;;  %v3790_v41 = vld [vmem:[#allocation22 + $0x74] ss:$8 sps:$4 sm:$0xff]   ;;  %v3824_v9 = vld [vmem:[#allocation22 + $0xd0] ss:$8 sps:$4 sm:$0xff]   ;;  %v3829_v3 = vld [vmem:[#allocation19 + $0xe4] ss:$8 sps:$4 sm:$0xff]  }
 0x5ee   : > { %2338 = vmatpush1.bf16.msra.mxu0 %v3755_v21  ;;  %v3785_v18 = vld [vmem:[#allocation19 + $0x70] ss:$8 sps:$4 sm:$0xff]   ;;  %v3827_v38 = vld [vmem:[#allocation19 + $0xe0] ss:$8 sps:$4 sm:$0xff]  }
 0x5ef   : > { %v1824_v60 = vadd.f32 %v1823_v39, %v1813_v7  ;;  %2339 = vmatprep.subr.bf16.mxu0 %v3763_v34  ;;  %2844 = vmatpush1.bf16.msra.mxu1 %v3764_v35  ;;  %v3788_v7 = vld [vmem:[#allocation22 + $0x70] ss:$8 sps:$4 sm:$0xff]   ;;  %v3793_v39 = vld [vmem:[#allocation19 + $0x84] ss:$8 sps:$4 sm:$0xff]  }
 0x5f0   : > { %2845 = vmatprep.subr.bf16.mxu1 %v3772_v63  ;;  %v3821_v2 = vld [vmem:[#allocation19 + $0xd0] ss:$8 sps:$4 sm:$0xff]   ;;  %v3830_v34 = vld [vmem:[#allocation22 + $0xe0] ss:$8 sps:$4 sm:$0xff]   ;;  %v3835_v35 = vld [vmem:[#allocation19 + $0xf4] ss:$8 sps:$4 sm:$0xff]  }
 0x5f1   : > { %v1825_v5 = vadd.f32 %v1824_v60, %v1814_v56  ;;  %v3791_v56 = vld [vmem:[#allocation19 + $0x80] ss:$8 sps:$4 sm:$0xff]   ;;  %v3833_v63 = vld [vmem:[#allocation19 + $0xf0] ss:$8 sps:$4 sm:$0xff]  }
 0x5f2   : > { %2340 = vmatpush1.bf16.msra.mxu0 %v3761_v54  ;;  %v3794_v60 = vld [vmem:[#allocation22 + $0x80] ss:$8 sps:$4 sm:$0xff]   ;;  %v3832_v58 = vld [vmem:[#allocation22 + $0xe4] ss:$8 sps:$4 sm:$0xff]  }
 0x5f3   : > { %v1827_v27 = vadd.f32 %v1826_v19, %v1825_v5  ;;  %2341 = vmatprep.subr.bf16.mxu0 %v3769_v4  ;;  %2846 = vmatpush1.bf16.msra.mxu1 %v3770_v20  ;;  %v3802_v5 = vld [vmem:[#allocation22 + $0x94] ss:$8 sps:$4 sm:$0xff]   ;;  %v3800_v19 = vld [vmem:[#allocation22 + $0x90] ss:$8 sps:$4 sm:$0xff]  }
 0x5f4   : > { %2847 = vmatprep.subr.bf16.mxu1 %v3778_v22  ;;  %v3838_v4 = vld [vmem:[#allocation22 + $0xf4] ss:$8 sps:$4 sm:$0xff]   ;;  %v3836_v20 = vld [vmem:[#allocation22 + $0xf0] ss:$8 sps:$4 sm:$0xff]  }
 0x5f5   : > { %v1829_v33 = vadd.f32 %v1828_v30, %v1827_v27  ;;  %v3805_v27 = vld [vmem:[#allocation19 + $0xa4] ss:$8 sps:$4 sm:$0xff]   ;;  %v3803_v30 = vld [vmem:[#allocation19 + $0xa0] ss:$8 sps:$4 sm:$0xff]  }
 0x5f6   : > { %2342 = vmatpush1.bf16.msra.mxu0 %v3767_v0 }
 0x5f7   : > { %v1831_v55 = vadd.f32 %v1830_v62, %v1829_v33  ;;  %2343 = vmatprep.subr.bf16.mxu0 %v3775_v14  ;;  %2848 = vmatpush1.bf16.msra.mxu1 %v3776_v10  ;;  %v3806_v33 = vld [vmem:[#allocation22 + $0xa0] ss:$8 sps:$4 sm:$0xff]   ;;  %v3811_v62 = vld [vmem:[#allocation19 + $0xb4] ss:$8 sps:$4 sm:$0xff]   ;;  %v3844_v10 = vld [vmem:[#allocation22 + $0x104] ss:$8 sps:$4 sm:$0xff]  }
 0x5f8   : > { %2849 = vmatprep.subr.bf16.mxu1 %v3784_v32 }
 0x5f9   : > { %v1833_v31 = vadd.f32 %v1832_v50, %v1831_v55  ;;  %v3814_v55 = vld [vmem:[#allocation22 + $0xb4] ss:$8 sps:$4 sm:$0xff]  }
 0x5fa   : > { %2344 = vmatpush1.bf16.msra.mxu0 %v3773_v36  ;;  %v3809_v50 = vld [vmem:[#allocation19 + $0xb0] ss:$8 sps:$4 sm:$0xff]   ;;  %v3841_v36 = vld [vmem:[#allocation19 + $0x104] ss:$8 sps:$4 sm:$0xff]  }
 0x5fb   : > { %1834 = vadd.xlane.f32.xlu1 %v1833_v31  ;;  %2345 = vmatprep.subr.bf16.mxu0 %v3781_v25  ;;  %v3812_v31 = vld [vmem:[#allocation22 + $0xb0] ss:$8 sps:$4 sm:$0xff]  }
 0x5fc   : > { %2850 = vmatpush1.bf16.msra.mxu1 %v3782_v47  ;;  %v1861_v47 = vld [vmem:[#allocation16] sm:$0xf] }
 0x5fd   : > { %2851 = vmatprep.subr.bf16.mxu1 %v3790_v41  ;;  %v1870_v41 = vrot.slane %v1861_v47, %v4957_v15 }
 0x5fe   : > { %2346 = vmatpush1.bf16.msra.mxu0 %v3779_v61 }
 0x5ff   : > { %2347 = vmatprep.subr.bf16.mxu0 %v3787_v23  ;;  %v1895_v23 = vld [vmem:[#allocation18] sm:$0xf] }
 0x600   : > { %2852 = vmatpush1.bf16.msra.mxu1 %v3788_v7 }
 0x601   : > { %2853 = vmatprep.subr.bf16.mxu1 %v3796_v49  ;;  %v1900_v49 = vrot.slane %v1895_v23, %v4953_v12 }
 0x602   : > { %2348 = vmatpush1.bf16.msra.mxu0 %v3785_v18  ;;  %v1866_v18 = vrot.slane %v1861_v47, %v4953_v12 }
 0x603   : > { %2349 = vmatprep.subr.bf16.mxu0 %v3793_v39  ;;  %v1904_v39 = vrot.slane %v1895_v23, %v4957_v15 }
 0x604   : > { %2854 = vmatpush1.bf16.msra.mxu1 %v3794_v60 }
 0x605   : > { %2855 = vmatprep.subr.bf16.mxu1 %v3802_v5 }
 0x606   : > { %2350 = vmatpush1.bf16.msra.mxu0 %v3791_v56 }
 0x607   : > { %2351 = vmatprep.subr.bf16.mxu0 %v3799_v29 }
 0x608   : > { %2856 = vmatpush1.bf16.msra.mxu1 %v3800_v19 }
 0x609   : > { %2857 = vmatprep.subr.bf16.mxu1 %v3808_v43 }
 0x60a   : > { %2352 = vmatpush1.bf16.msra.mxu0 %v3797_v45 }
 0x60b   : > { %2353 = vmatprep.subr.bf16.mxu0 %v3805_v27 }
 0x60c   : > { %2858 = vmatpush1.bf16.msra.mxu1 %v3806_v33 }
 0x60d   : > { %2859 = vmatprep.subr.bf16.mxu1 %v3814_v55 }
 0x60e   : > { %2354 = vmatpush1.bf16.msra.mxu0 %v3803_v30 }
 0x60f   : > { %2355 = vmatprep.subr.bf16.mxu0 %v3811_v62  ;;  %v5324_v62 = vrot.slane %v1861_v47, %v4959_v16 }
 0x610   : > { %2860 = vmatpush1.bf16.msra.mxu1 %v3812_v31 }
 0x611   : > { %2861 = vmatprep.subr.bf16.mxu1 %v3820_v28  ;;  %v1908_v28 = vrot.slane %v1895_v23, %v4955_v13 }
 0x612   : > { %2356 = vmatpush1.bf16.msra.mxu0 %v3809_v50 }
 0x613   : > { %2357 = vmatprep.subr.bf16.mxu0 %v3817_v57 }
 0x614   : > { %2862 = vmatpush1.bf16.msra.mxu1 %v3818_v8  ;;  %v3842_v8 = vld [vmem:[#allocation22 + $0x100] ss:$8 sps:$4 sm:$0xff]  }
 0x615   : > { %2863 = vmatprep.subr.bf16.mxu1 %v3826_v42 }
 0x616   : > { %2358 = vmatpush1.bf16.msra.mxu0 %v3815_v1 }
 0x617   : > { %2359 = vmatprep.subr.bf16.mxu0 %v3823_v51 }
 0x618   : > { %2864 = vmatpush1.bf16.msra.mxu1 %v3824_v9 }
 0x619   : > { %2865 = vmatprep.subr.bf16.mxu1 %v3832_v58 }
 0x61a   : > { %2360 = vmatpush1.bf16.msra.mxu0 %v3821_v2 }
 0x61b   : > { %2361 = vmatprep.subr.bf16.mxu0 %v3829_v3 }
 0x61c   : > { %2866 = vmatpush1.bf16.msra.mxu1 %v3830_v34  ;;  %v3848_v34 = vld [vmem:[#allocation22 + $0x110] ss:$8 sps:$4 sm:$0xff]  }
 0x61d   : > { %2867 = vmatprep.subr.bf16.mxu1 %v3838_v4  ;;  %v3853_v4 = vld [vmem:[#allocation19 + $0x124] ss:$8 sps:$4 sm:$0xff]  }
 0x61e   : > { %2362 = vmatpush1.bf16.msra.mxu0 %v3827_v38 }
 0x61f   : > { %2363 = vmatprep.subr.bf16.mxu0 %v3835_v35 }
 0x620   : > { %2868 = vmatpush1.bf16.msra.mxu1 %v3836_v20 }
 0x621   : > { %2888 = vmatprep.subr.bf16.mxu1 %v3844_v10  ;;  %v3854_v10 = vld [vmem:[#allocation22 + $0x120] ss:$8 sps:$4 sm:$0xff]  }
 0x622   : > { %2364 = vmatpush1.bf16.msra.mxu0 %v3833_v63  ;;  %v3856_v63 = vld [vmem:[#allocation22 + $0x124] ss:$8 sps:$4 sm:$0xff]  }
 0x623   : > { %2384 = vmatprep.subr.bf16.mxu0 %v3841_v36  ;;  %v3851_v36 = vld [vmem:[#allocation19 + $0x120] ss:$8 sps:$4 sm:$0xff]  }
 0x688   : > { %v1835_v21 = vpop.xlane.xlu1 %1834 }
 0x689   : > { %v1836_v52 = vrot.slane %v1835_v21, 4 }
 0x68b   : > { %v1837_v54 = vadd.f32 %v1836_v52, %v1835_v21  ;;  %v5337_v21 = vrot.slane %v1895_v23, %v4959_v16  ;;  %v3845_v16 = vld [vmem:[#allocation19 + $0x110] ss:$8 sps:$4 sm:$0xff]  }
 0x68c   : > { %v3857_v23 = vld [vmem:[#allocation19 + $0x130] ss:$8 sps:$4 sm:$0xff]  }
 0x68d   : > { %v1838_v0 = vrot.slane %v1837_v54, 2 }
 0x68f   : > { %v1839_v14 = vadd.f32 %v1838_v0, %v1837_v54 }
 0x691   : > { %v1840_v22 = vrot.slane %v1839_v14, 1 }
 0x693   : > { %v1841_v25 = vadd.f32 %v1840_v22, %v1839_v14 }
 0x695   : > { %3463 = vpush %v1841_v25 }
 0x6c6   : > { %s3464_s15 = spop %3463 }
 0x6c7   : > { %s1843_s20 = smul.f32 0.000114889706, %s3464_s15  ;;  %s5387_s15 = scalar_lea.hbm %s5551_s24, %s3467_s23 }
 0x6c9   : > { %s1844_s30 = sadd.f32 1e-08, %s1843_s20 }
 0x6cb   : > { %v1845_v32 = vstv %s1844_s30 }
 0x6cc   : > { %3937 = vrsqrt.f32 %v1845_v32  ;;  %v3859_v32 = vld [vmem:[#allocation19 + $0x134] ss:$8 sps:$4 sm:$0xff]  }
 0x6d6   : > { %v3938_v61 = vpop.eup %3937 }
 0x6d7   : > { %3465 = vpush %v3938_v61  ;;  %v3862_v61 = vld [vmem:[#allocation22 + $0x134] ss:$8 sps:$4 sm:$0xff]  }
 0x708   : > { %s3466_s28 = spop %3465 }
 0x709   : > { %v5307_v7 = vstv %s3466_s28  ;;  %s5552_s28 = sld [smem:[#allocation48_spill]] }
 0x70a   : > { %v1850_v56 = vmul.f32 %v5307_v7, %v5255_v17  ;;  %v1854_v60 = vmul.f32 %v5307_v7, %v5269_v11  ;;  %v1849_v29 = vmul.f32 %v5307_v7, %v5252_v59  ;;  %v1853_v5 = vmul.f32 %v5307_v7, %v5265_v46 }
 0x70b   : > { %v1858_v45 = vmul.f32 %v5307_v7, %v5283_v26  ;;  %v1857_v17 = vmul.f32 %v5307_v7, %v5277_v24  ;;  %v1874_v11 = vrot.slane %v1861_v47, %v4955_v13  ;;  %v1852_v26 = vmul.f32 %v5307_v7, %v5263_v40  ;;  %v3839_v24 = vld [vmem:[#allocation19 + $0x100] ss:$8 sps:$4 sm:$0xff]   ;;  %v3847_v40 = vld [vmem:[#allocation19 + $0x114] ss:$8 sps:$4 sm:$0xff]  }
 0x70c   : > { %v1884_v19 = vmul.f32 %v1870_v41, %v1850_v56  ;;  %v1888_v27 = vmul.f32 %v1870_v41, %v1854_v60  ;;  %v1883_v43 = vmul.f32 %v1866_v18, %v1849_v29  ;;  %v1887_v30 = vmul.f32 %v1866_v18, %v1853_v5  ;;  %v3866_v56 = vld [vmem:[#allocation22 + $0x140] ss:$8 sps:$4 sm:$0xff]   ;;  %v3871_v60 = vld [vmem:[#allocation19 + $0x154] ss:$8 sps:$4 sm:$0xff]   ;;  %v3869_v5 = vld [vmem:[#allocation19 + $0x150] ss:$8 sps:$4 sm:$0xff]  }
 0x70d   : > { %v1892_v33 = vmul.f32 %v1870_v41, %v1858_v45  ;;  %v1856_v57 = vmul.f32 %v5307_v7, %v5279_v44  ;;  %v1851_v42 = vmul.f32 %v5307_v7, %v5257_v6  ;;  %v1855_v2 = vmul.f32 %v5307_v7, %v5273_v37  ;;  %v3850_v44 = vld [vmem:[#allocation22 + $0x114] ss:$8 sps:$4 sm:$0xff]   ;;  %v3860_v41 = vld [vmem:[#allocation22 + $0x130] ss:$8 sps:$4 sm:$0xff]  }
 0x70e   : > { %v1918_v59 = vadd.f32 %v1904_v39, %v1884_v19  ;;  %v1922_v55 = vadd.f32 %v1904_v39, %v1888_v27  ;;  %v1917_v50 = vadd.f32 %v1900_v49, %v1883_v43  ;;  %v1921_v46 = vadd.f32 %v1900_v49, %v1887_v30  ;;  %v3874_v29 = vld [vmem:[#allocation22 + $0x154] ss:$8 sps:$4 sm:$0xff]   ;;  %v3872_v45 = vld [vmem:[#allocation22 + $0x150] ss:$8 sps:$4 sm:$0xff]   ;;  %v3877_v19 = vld [vmem:[#allocation19 + $0x164] ss:$8 sps:$4 sm:$0xff]  }
 0x70f   : > { %v1926_v31 = vadd.f32 %v1904_v39, %v1892_v33  ;;  %v1891_v9 = vmul.f32 %v1866_v18, %v1857_v17  ;;  %v1885_v52 = vmul.f32 %v1874_v11, %v1851_v42  ;;  %v1889_v13 = vmul.f32 %v1874_v11, %v1855_v2  ;;  %v3865_v18 = vld [vmem:[#allocation19 + $0x144] ss:$8 sps:$4 sm:$0xff]   ;;  %v3875_v43 = vld [vmem:[#allocation19 + $0x160] ss:$8 sps:$4 sm:$0xff]   ;;  %v3883_v33 = vld [vmem:[#allocation19 + $0x174] ss:$8 sps:$4 sm:$0xff]   ;;  %s5398_s5 = scalar_lea.hbm %s5552_s28, %s3467_s23 }
 0x710   : > { %v1930_v1 = vpack.c.bf16 %v1922_v55, %v1918_v59  ;;  %v1929_v51 = vpack.c.bf16 %v1921_v46, %v1917_v50  ;;  %v1859_v38 = vmul.f32 %v5307_v7, %v5287_v48  ;;  %v1886_v6 = vmul.f32 %v5324_v62, %v1852_v26  ;;  %v3868_v39 = vld [vmem:[#allocation22 + $0x144] ss:$8 sps:$4 sm:$0xff]   ;;  %v3878_v30 = vld [vmem:[#allocation22 + $0x160] ss:$8 sps:$4 sm:$0xff]   ;;  %v3886_v17 = vld [vmem:[#allocation22 + $0x174] ss:$8 sps:$4 sm:$0xff]  }
 0x711   : > { %v1934_v3 = vpack.c.bf16 %v1926_v31, %v1926_v31  ;;  %v1890_v37 = vmul.f32 %v5324_v62, %v1856_v57  ;;  %v1919_v58 = vadd.f32 %v1908_v28, %v1885_v52  ;;  %v1923_v54 = vadd.f32 %v1908_v28, %v1889_v13  ;;  %v3880_v27 = vld [vmem:[#allocation22 + $0x164] ss:$8 sps:$4 sm:$0xff]   ;;  %v3884_v59 = vld [vmem:[#allocation22 + $0x170] ss:$8 sps:$4 sm:$0xff]   ;;  %v3890_v31 = vld [vmem:[#allocation22 + $0x180] ss:$8 sps:$4 sm:$0xff]  }
 0x712   : > { %2365 = vmatprep.mubr.bf16.mxu0 %v1930_v1  ;;  %2869 = vmatprep.mubr.bf16.mxu1 %v1930_v1  ;;  %v1893_v35 = vmul.f32 %v1874_v11, %v1859_v38  ;;  %v1925_v0 = vadd.f32 %v1900_v49, %v1891_v9  ;;  %v1920_v14 = vadd.f32 %v5337_v21, %v1886_v6  ;;  %v3863_v49 = vld [vmem:[#allocation19 + $0x140] ss:$8 sps:$4 sm:$0xff]   ;;  %v3881_v11 = vld [vmem:[#allocation19 + $0x170] ss:$8 sps:$4 sm:$0xff]   ;;  %v3889_v55 = vld [vmem:[#allocation19 + $0x184] ss:$8 sps:$4 sm:$0xff]  }
 0x713   : > { %2366 = vmatmul.mubr.bf16.vlgmr.msra.gmra.mrb[8].mxu0 %v1929_v51  ;;  %2870 = vmatmul.mubr.bf16.vlgmr.msra.gmra.mrb[8].mxu1 %v1929_v51  ;;  %v5343_v48 = vpack.c.bf16 %v1923_v54, %v1919_v58  ;;  %v1924_v22 = vadd.f32 %v5337_v21, %v1890_v37  ;;  %v3892_v50 = vld [vmem:[#allocation22 + $0x184] ss:$8 sps:$4 sm:$0xff]   ;;  %v3895_v26 = vld [vmem:[#allocation19 + $0x194] ss:$8 sps:$4 sm:$0xff]   ;;  %v3902_v42 = vld [vmem:[#allocation22 + $0x1a0] ss:$8 sps:$4 sm:$0xff]  }
 0x714   : > { %2385 = vmatpush1.bf16.msra.mxu0 %v3839_v24  ;;  %2889 = vmatpush1.bf16.msra.mxu1 %v3842_v8  ;;  %v5345_v20 = vadd.f32 %v1908_v28, %v1893_v35  ;;  %v1933_v25 = vpack.c.bf16 %v1925_v0, %v1925_v0  ;;  %v3887_v46 = vld [vmem:[#allocation19 + $0x180] ss:$8 sps:$4 sm:$0xff]   ;;  %v3893_v28 = vld [vmem:[#allocation19 + $0x190] ss:$8 sps:$4 sm:$0xff]   ;;  %v3901_v24 = vld [vmem:[#allocation19 + $0x1a4] ss:$8 sps:$4 sm:$0xff]   ;;  %v1860_v35 = vmul.f32 %v5307_v7, %v5293_v53 }
 0x715   : > { %2375 = vmatprep.mubr.bf16.mxu0 %v1934_v3  ;;  %2879 = vmatprep.mubr.bf16.mxu1 %v1934_v3  ;;  %v1932_v47 = vpack.c.bf16 %v1924_v22, %v1920_v14  ;;  %v3898_v57 = vld [vmem:[#allocation22 + $0x194] ss:$8 sps:$4 sm:$0xff]   ;;  %v3896_v1 = vld [vmem:[#allocation22 + $0x190] ss:$8 sps:$4 sm:$0xff]   ;;  %v3904_v8 = vld [vmem:[#allocation22 + $0x1a4] ss:$8 sps:$4 sm:$0xff]  }
 0x716   : > { %2386 = vmatprep.subr.bf16.mxu0 %v3847_v40  ;;  %2890 = vmatprep.subr.bf16.mxu1 %v3850_v44  ;;  %v3899_v51 = vld [vmem:[#allocation19 + $0x1a0] ss:$8 sps:$4 sm:$0xff]   ;;  %v3907_v2 = vld [vmem:[#allocation19 + $0x1b4] ss:$8 sps:$4 sm:$0xff]   ;;  %v3905_v40 = vld [vmem:[#allocation19 + $0x1b0] ss:$8 sps:$4 sm:$0xff]   ;;  %v1894_v22 = vmul.f32 %v5324_v62, %v1860_v35  ;;  %v1935_v7 = vpack.c.bf16 %v5345_v20, %v5345_v20 }
 0x717   : > { %v3910_v9 = vld [vmem:[#allocation22 + $0x1b4] ss:$8 sps:$4 sm:$0xff]   ;;  %v3908_v44 = vld [vmem:[#allocation22 + $0x1b0] ss:$8 sps:$4 sm:$0xff]   ;;  %v3913_v52 = vld [vmem:[#allocation19 + $0x1c4] ss:$8 sps:$4 sm:$0xff]  }
 0x718   : > { %2387 = vmatpush1.bf16.msra.mxu0 %v3845_v16  ;;  %2891 = vmatpush1.bf16.msra.mxu1 %v3848_v34  ;;  %v3916_v13 = vld [vmem:[#allocation22 + $0x1c4] ss:$8 sps:$4 sm:$0xff]   ;;  %v3914_v3 = vld [vmem:[#allocation22 + $0x1c0] ss:$8 sps:$4 sm:$0xff]   ;;  %v3919_v6 = vld [vmem:[#allocation19 + $0x1d4] ss:$8 sps:$4 sm:$0xff]  }
 0x719   : > { %2388 = vmatprep.subr.bf16.mxu0 %v3853_v4  ;;  %2892 = vmatprep.subr.bf16.mxu1 %v3856_v63  ;;  %v3911_v38 = vld [vmem:[#allocation19 + $0x1c0] ss:$8 sps:$4 sm:$0xff]   ;;  %v3917_v16 = vld [vmem:[#allocation19 + $0x1d0] ss:$8 sps:$4 sm:$0xff]   ;;  %v3925_v58 = vld [vmem:[#allocation19 + $0x1e4] ss:$8 sps:$4 sm:$0xff]  }
 0x71a   : > { %v3922_v37 = vld [vmem:[#allocation22 + $0x1d4] ss:$8 sps:$4 sm:$0xff]   ;;  %v3920_v34 = vld [vmem:[#allocation22 + $0x1d0] ss:$8 sps:$4 sm:$0xff]   ;;  %v3928_v54 = vld [vmem:[#allocation22 + $0x1e4] ss:$8 sps:$4 sm:$0xff]  }
 0x71b   : > { %2376 = vmatmul.mubr.bf16.gmra.mrb[12].mxu0 %v1933_v25  ;;  %2880 = vmatmul.mubr.bf16.gmra.mrb[12].mxu1 %v1933_v25  ;;  %v3923_v4 = vld [vmem:[#allocation19 + $0x1e0] ss:$8 sps:$4 sm:$0xff]   ;;  %v3931_v0 = vld [vmem:[#allocation19 + $0x1f4] ss:$8 sps:$4 sm:$0xff]   ;;  %v1928_v25 = vadd.f32 %v5337_v21, %v1894_v22 }
 0x71c   : > { %2389 = vmatpush1.bf16.msra.mxu0 %v3851_v36  ;;  %2893 = vmatpush1.bf16.msra.mxu1 %v3854_v10  ;;  %v3926_v63 = vld [vmem:[#allocation22 + $0x1e0] ss:$8 sps:$4 sm:$0xff]   ;;  %v3934_v14 = vld [vmem:[#allocation22 + $0x1f4] ss:$8 sps:$4 sm:$0xff]   ;;  %v3932_v10 = vld [vmem:[#allocation22 + $0x1f0] ss:$8 sps:$4 sm:$0xff]  }
 0x71d   : > { %2416 = vmatprep.mubr.bf16.mxu0 %v1932_v47  ;;  %2920 = vmatprep.mubr.bf16.mxu1 %v1932_v47  ;;  %v3929_v36 = vld [vmem:[#allocation19 + $0x1f0] ss:$8 sps:$4 sm:$0xff]   ;;  %v1936_v53 = vpack.c.bf16 %v1928_v25, %v1928_v25  ;;  %v2505_v21 = vld [vmem:[#allocation24] sm:$0x3] }
 0x71e   : > { %2390 = vmatprep.subr.bf16.mxu0 %v3859_v32  ;;  %2894 = vmatprep.subr.bf16.mxu1 %v3862_v61 }
 0x720   : > { %2391 = vmatpush1.bf16.msra.mxu0 %v3857_v23  ;;  %2895 = vmatpush1.bf16.msra.mxu1 %v3860_v41  ;;  %v2001_v23 = vld [vmem:[#allocation21] sm:$0x3] }
 0x721   : > { %2392 = vmatprep.subr.bf16.mxu0 %v3865_v18  ;;  %2896 = vmatprep.subr.bf16.mxu1 %v3868_v39  ;;  %v2006_v41 = vrot.slane %v2001_v23, %v4953_v12  ;;  %v2010_v18 = vrot.slane %v2001_v23, %v4957_v15  ;;  %v2514_v39 = vrot.slane %v2505_v21, %v4957_v15 }
 0x724   : > { %2393 = vmatpush1.bf16.msra.mxu0 %v3863_v49  ;;  %2897 = vmatpush1.bf16.msra.mxu1 %v3866_v56 }
 0x725   : > { %2394 = vmatprep.subr.bf16.mxu0 %v3871_v60  ;;  %2898 = vmatprep.subr.bf16.mxu1 %v3874_v29 }
 0x728   : > { %2395 = vmatpush1.bf16.msra.mxu0 %v3869_v5  ;;  %2899 = vmatpush1.bf16.msra.mxu1 %v3872_v45 }
 0x729   : > { %2396 = vmatprep.subr.bf16.mxu0 %v3877_v19  ;;  %2900 = vmatprep.subr.bf16.mxu1 %v3880_v27 }
 0x72c   : > { %2397 = vmatpush1.bf16.msra.mxu0 %v3875_v43  ;;  %2901 = vmatpush1.bf16.msra.mxu1 %v3878_v30 }
 0x72d   : > { %2398 = vmatprep.subr.bf16.mxu0 %v3883_v33  ;;  %2902 = vmatprep.subr.bf16.mxu1 %v3886_v17 }
 0x730   : > { %2399 = vmatpush1.bf16.msra.mxu0 %v3881_v11  ;;  %2903 = vmatpush1.bf16.msra.mxu1 %v3884_v59  ;;  %v3940_v59 = vld [vmem:[%s4917_s1 + $0x8] sm:$0xff] }
 0x731   : > { %2400 = vmatprep.subr.bf16.mxu0 %v3889_v55  ;;  %2904 = vmatprep.subr.bf16.mxu1 %v3892_v50 }
 0x734   : > { %2401 = vmatpush1.bf16.msra.mxu0 %v3887_v46  ;;  %2905 = vmatpush1.bf16.msra.mxu1 %v3890_v31  ;;  %v3941_v31 = vld [vmem:[%s4917_s1 + $0x10] sm:$0xff] }
 0x735   : > { %2402 = vmatprep.subr.bf16.mxu0 %v3895_v26  ;;  %2906 = vmatprep.subr.bf16.mxu1 %v3898_v57  ;;  %v3942_v57 = vld [vmem:[%s4917_s1 + $0x18] sm:$0xff] }
 0x738   : > { %2403 = vmatpush1.bf16.msra.mxu0 %v3893_v28  ;;  %2907 = vmatpush1.bf16.msra.mxu1 %v3896_v1 }
 0x739   : > { %2404 = vmatprep.subr.bf16.mxu0 %v3901_v24  ;;  %2908 = vmatprep.subr.bf16.mxu1 %v3904_v8 }
 0x73c   : > { %2405 = vmatpush1.bf16.msra.mxu0 %v3899_v51  ;;  %2909 = vmatpush1.bf16.msra.mxu1 %v3902_v42 }
 0x73d   : > { %2406 = vmatprep.subr.bf16.mxu0 %v3907_v2  ;;  %2910 = vmatprep.subr.bf16.mxu1 %v3910_v9 }
 0x740   : > { %2407 = vmatpush1.bf16.msra.mxu0 %v3905_v40  ;;  %2911 = vmatpush1.bf16.msra.mxu1 %v3908_v44 }
 0x741   : > { %2408 = vmatprep.subr.bf16.mxu0 %v3913_v52  ;;  %2912 = vmatprep.subr.bf16.mxu1 %v3916_v13 }
 0x744   : > { %2409 = vmatpush1.bf16.msra.mxu0 %v3911_v38  ;;  %2913 = vmatpush1.bf16.msra.mxu1 %v3914_v3  ;;  %v3943_v3 = vld [vmem:[%s4917_s1 + $0x20] sm:$0x1] }
 0x745   : > { %2410 = vmatprep.subr.bf16.mxu0 %v3919_v6  ;;  %2914 = vmatprep.subr.bf16.mxu1 %v3922_v37 }
 0x748   : > { %2411 = vmatpush1.bf16.msra.mxu0 %v3917_v16  ;;  %2915 = vmatpush1.bf16.msra.mxu1 %v3920_v34  ;;  %v3944_v34 = vld [vmem:[%s4917_s1 + $0x28] sm:$0x1] }
 0x749   : > { %2412 = vmatprep.subr.bf16.mxu0 %v3925_v58  ;;  %2916 = vmatprep.subr.bf16.mxu1 %v3928_v54 }
 0x74c   : > { %2413 = vmatpush1.bf16.msra.mxu0 %v3923_v4  ;;  %2917 = vmatpush1.bf16.msra.mxu1 %v3926_v63 }
 0x74d   : > { %2414 = vmatprep.subr.bf16.mxu0 %v3931_v0  ;;  %2918 = vmatprep.subr.bf16.mxu1 %v3934_v14 }
 0x750   : > { %2415 = vmatpush1.bf16.msra.mxu0 %v3929_v36  ;;  %2919 = vmatpush1.bf16.msra.mxu1 %v3932_v10 }
 0x753   : > { %2417 = vmatmul.mubr.bf16.vlgmr.msra.gmra.mrb[8].mxu0 %v5343_v48  ;;  %2921 = vmatmul.mubr.bf16.vlgmr.msra.gmra.mrb[8].mxu1 %v5343_v48  ;;  %v2510_v48 = vrot.slane %v2505_v21, %v4953_v12  ;;  %v3939_v12 = vld [vmem:[%s4917_s1] sm:$0xff] }
 0x754   : > { %2426 = vmatprep.mubr.bf16.mxu0 %v1936_v53  ;;  %2930 = vmatprep.mubr.bf16.mxu1 %v1936_v53 }
 0x75b   : > { %2427 = vmatmul.mubr.bf16.gmra.mrb[12].mxu0 %v1935_v7  ;;  %2931 = vmatmul.mubr.bf16.gmra.mrb[16].mxu1 %v1935_v7 }
 0x7ee   : > { %v2881_v62 = vpop.f32.mrb[12].mxu1 }
 0x7ef   : > { %v2883_v32 = vpop.f32.mrb[13].mxu1  ;;  %v2882_v1 = vadd.f32 %v2881_v62, %v2510_v48 }
 0x7f0   : > { %v2885_v61 = vpop.f32.mrb[14].mxu1  ;;  %v2884_v24 = vadd.f32 %v2883_v32, %v2514_v39 }
 0x7f1   : > { %v2886_v47 = vpop.f32.mrb[15].mxu1 }
 0x826   : > { %v2418_v49 = vpop.f32.mrb[8].mxu0  ;;  %v2922_v20 = vpop.f32.mrb[8].mxu1 }
 0x827   : > { %v3430_v56 = vadd.f32 %v2418_v49, %v2006_v41  ;;  %v3436_v60 = vadd.f32 %v2922_v20, %v2510_v48  ;;  %v2420_v29 = vpop.f32.mrb[9].mxu0  ;;  %v2924_v5 = vpop.f32.mrb[9].mxu1 }
 0x828   : > { %v3431_v45 = vadd.f32 %v2420_v29, %v2010_v18  ;;  %v3437_v19 = vadd.f32 %v2924_v5, %v2514_v39  ;;  %v2422_v27 = vpop.f32.mrb[10].mxu0  ;;  %v2926_v43 = vpop.f32.mrb[10].mxu1 }
 0x829   : > { %2435 = vst [vmem:[%s5362_s0] sm:$0xff] %v3430_v56  ;;  %v2939_v15 = vadd.f32 %v3939_v12, %v3436_v60  ;;  %v3432_v30 = vadd.f32 %v2422_v27, %v2006_v41  ;;  %v3438_v33 = vadd.f32 %v2926_v43, %v2510_v48  ;;  %v2424_v17 = vpop.f32.mrb[11].mxu0  ;;  %v2928_v11 = vpop.f32.mrb[11].mxu1 }
 0x82a   : > { %2436 = vst [vmem:[%s5362_s0 + $0x8] sm:$0xff] %v3431_v45  ;;  %v2940_v55 = vadd.f32 %v3940_v59, %v3437_v19  ;;  %v3433_v50 = vadd.f32 %v2424_v17, %v2010_v18  ;;  %v3439_v46 = vadd.f32 %v2928_v11, %v2514_v39 }
 0x82b   : > { %2945 = vst [vmem:[%s5370_s19] sm:$0xff] %v2939_v15  ;;  %2437 = vst [vmem:[%s5362_s0 + $0x10] sm:$0xff] %v3432_v30  ;;  %v2941_v26 = vadd.f32 %v3941_v31, %v3438_v33 }
 0x82c   : > { %2946 = vst [vmem:[%s5370_s19 + $0x8] sm:$0xff] %v2940_v55  ;;  %2438 = vst [vmem:[%s5362_s0 + $0x18] sm:$0xff] %v3433_v50  ;;  %v2942_v28 = vadd.f32 %v3942_v57, %v3439_v46 }
 0x82d   : > { %2947 = vst [vmem:[%s5370_s19 + $0x10] sm:$0xff] %v2941_v26 }
 0x82e   : > { %2948 = vst [vmem:[%s5370_s19 + $0x18] sm:$0xff] %v2942_v28  ;;  %v2428_v8 = vpop.f32.mrb[12].mxu0  ;;  %v2932_v51 = vpop.f32.mrb[16].mxu1 }
 0x82f   : > { %v3434_v42 = vadd.f32 %v2428_v8, %v2006_v41  ;;  %v2933_v2 = vadd.f32 %v2932_v51, %v2882_v1  ;;  %v2430_v9 = vpop.f32.mrb[13].mxu0  ;;  %v2934_v40 = vpop.f32.mrb[17].mxu1 }
 0x830   : > { %v3435_v44 = vadd.f32 %v2430_v9, %v2010_v18  ;;  %v2935_v52 = vadd.f32 %v2934_v40, %v2884_v24  ;;  %v2432_v13 = vpop.f32.mrb[14].mxu0  ;;  %v2936_v38 = vpop.f32.mrb[18].mxu1 }
 0x831   : > { %2439 = vst [vmem:[%s5362_s0 + $0x20] sm:$0x1] %v3434_v42  ;;  %v2943_v6 = vadd.f32 %v3943_v3, %v2933_v2  ;;  %v2433_v37 = vpop.f32.mrb[15].mxu0  ;;  %v2937_v16 = vpop.f32.mrb[19].mxu1 }
 0x832   : > { %2440 = vst [vmem:[%s5362_s0 + $0x28] sm:$0x1] %v3435_v44  ;;  %v2944_v58 = vadd.f32 %v3944_v34, %v2935_v52 }
 0x833   : > { %2949 = vst [vmem:[%s5370_s19 + $0x20] sm:$0x1] %v2943_v6 }
 0x834   : > { %4324 = shalt.err (!%p4321_p7)
}
 0x835   : > { %s4325_s1 = scalar_lea.hbm %s5387_s15, 768  ;;  %s4329_s6 = scalar_lea.hbm %s5551_s24, 1536 }
 0x836   : > { %p4326_p5 = scmp.ne.s32.totalorder %s5387_s15, %s4325_s1  ;;  %p4330_p13 = scmp.lt.u32.totalorder %s5387_s15, %s5551_s24 }
 0x837   : > { %p4331_p1 = scmp.lt.u32.totalorder %s4329_s6, %s4325_s1  ;;  %p4333_p2 = scmp.lt.u32.totalorder %s4325_s1, %s5387_s15 }
 0x838   : > { %p4327_p9 = pnand %p4326_p5, %p5553_p8 }
 0x839   : > { %p4332_p3 = por %p4331_p1, %p4330_p13 }
 0x83a   : > { %p4328_p12 = pneg %p4327_p9 }
 0x83b   : > { %p4334_p4 = por %p4333_p2, %p4332_p3 }
 0x83d   : > { %p4335_p10 = pnand %p4334_p4, %p4328_p12 }
 0x83f   : > { %4338 = shalt.err (!%p4335_p10)
}
 0x840   : > { %s4453_s9 = smov 256   ;;  %s4454_s30 = smov 16   ;;  %2950 = vst [vmem:[%s5370_s19 + $0x28] sm:$0x1] %v2944_v58 }
 0x841   : > { %3520 = dma.vmem_to_hbm [thread:$0]  (%p5553_p8), %s5380_s2, 768, %s5387_s15, %s2957_s29, %s4453_s9, %s4453_s9, %s4454_s30  }
 0x842   : > { %s2952_s22 = scalar_lea.sflag [#allocation6], %s4910_s8  ;;  %s4339_s1 = scalar_lea.vmem %s5389_s21, 768 }
 0x843   : > { %p4340_p11 = scmp.ne.s32.totalorder %s5389_s21, %s4339_s1  ;;  %s4455_s0 = smov [#allocation25]  }
 0x844   : > { %s4343_s23 = sshll.u32 %s4455_s0, 4  ;;  %s4344_s23 = int_to_ptr.vmem [resolvable:$false] %s4343_s23 }
 0x845   : > { %p4341_p0 = pnand %p4340_p11, %p5553_p8  ;;  %s4345_s6 = scalar_lea.vmem %s4344_s23, 1536 }
 0x846   : > { %p4346_p7 = scmp.lt.s32.totalorder %s5389_s21, %s4344_s23  ;;  %p4347_p5 = scmp.lt.s32.totalorder %s4345_s6, %s4339_s1 }
 0x847   : > { %p4342_p6 = pneg %p4341_p0 }
 0x848   : > { %p4348_p9 = por %p4347_p5, %p4346_p7 }
 0x84a   : > { %p4349_p12 = pnand %p4348_p9, %p4342_p6 }
 0x84c   : > { %4352 = shalt.err (!%p4349_p12)
}
 0x84d   : > { %s4353_s2 = scalar_lea.hbm %s5398_s5, 768  ;;  %s4357_s29 = scalar_lea.hbm %s5552_s28, 1536 }
 0x84e   : > { %p4354_p13 = scmp.ne.s32.totalorder %s5398_s5, %s4353_s2  ;;  %p4358_p2 = scmp.lt.u32.totalorder %s5398_s5, %s5552_s28 }
 0x84f   : > { %p4359_p4 = scmp.lt.u32.totalorder %s4357_s29, %s4353_s2  ;;  %p4361_p11 = scmp.lt.u32.totalorder %s4353_s2, %s5398_s5 }
 0x850   : > { %p4355_p1 = pnand %p4354_p13, %p5553_p8 }
 0x851   : > { %p4360_p10 = por %p4359_p4, %p4358_p2 }
 0x852   : > { %p4356_p3 = pneg %p4355_p1 }
 0x853   : > { %p4362_p0 = por %p4361_p11, %p4360_p10 }
 0x855   : > { %p4363_p6 = pnand %p4362_p0, %p4356_p3 }
 0x857   : > { %4366 = shalt.err (!%p4363_p6)
}
 0x858   : > { %3519 = dma.vmem_to_hbm [thread:$0]  (%p5553_p8), %s5389_s21, 768, %s5398_s5, %s2952_s22, %s4453_s9, %s4453_s9, %s4454_s30  }
 0x859 PF: > { %s5554_s1 = sld [smem:[#allocation37_spill]]  ;;  %p5555_p7 = scmp.ne.s32.totalorder %s5531_s25, 0 }
 0x85a   : > { %p5556_p5 = scmp.ge.s32.totalorder %s4433_s27, 2 }
 0x85c   : > { %p3565_p9 = pnand %p5556_p5, %p5555_p7 }
 0x85f   : > { %s3001_s0 = sand.u32 1, %s5554_s1  }
 0x860   : > { %s3002_s23 = scalar_lea.sflag [#allocation6], %s3001_s0 }
 0x861   : > { %4412 = dma.done.wait (!%p3565_p9), %s3002_s23, 768  }
 0x862   : > { %4414 = vsyncadd (!%p3565_p9), %s3002_s23, 4294966528  ;;  %s3011_s4 = scalar_lea.sflag [#allocation27], %s3001_s0 }
 0x863   : > { %4416 = dma.done.wait (!%p3565_p9), %s3011_s4, 768  }
 0x864   : > { %4418 = vsyncadd (!%p3565_p9), %s3011_s4, 4294966528  ;;  %p41_p8 = scmp.ge.s32.totalorder %s4834_s18, 4   ;;  %s5557_s25 = smov %s4425_s26 }
 0x865   : > { %s5558_s26 = smov %s4429_s3  ;;  %s5559_s3 = smov %s4845_s16 }
 0x866   : > { %s5560_s27 = smov %s4834_s18  ;;  %43 = sbr.rel (!%p41_p8) target bundleno = 26 (0x1a), region = 192 }
 0x86d   :  { %3016 = vsyncpa [#allocation5], 1 }
 0x86e   :  { %3018 = vsyncpa [#allocation5 + $0x1], 1 }
 0x86f   :  { %3019 = vsyncpa [#allocation8], 1 }
 0x870   :  { %3020 = vsyncpa [#allocation11], 1 }
 0x871   :  { %3021 = vsyncpa [#allocation14], 1 }
 0x872   :  { %3022 = vsyncpa [#allocation17], 1 }
 0x873   :  { %3023 = vsyncpa [#allocation20], 1 }
 0x874   :  { %3024 = vsyncpa [#allocation23], 1 }
 0x875   :  { %3025 = vsyncpa [#allocation6], 1 }
 0x876   :  { %3027 = vsyncpa [#allocation6 + $0x1], 1 }
 0x877   :  { %3028 = vsyncpa [#allocation27], 1 }
 0x878   :  { %3030 = vsyncpa [#allocation27 + $0x1], 1 }

// kernel: model_forward.8
= control target key start
LH: loop header
LB: loop body
LE: loop exit
PB: predicated region body
PF: predicated region fallthrough
CT: control target
= control target key end

     0   :  { %s5694_s0 = inlined_call_operand.hbm [shape: f32[2,17,256], index: 0, kind: input, shape index: {}]   ;;  %s5695_s1 = inlined_call_operand.hbm [shape: f32[2,17,256], index: 1, kind: input, shape index: {}]   ;;  %s5696_s2 = inlined_call_operand.hbm [shape: bf16[256,512], index: 2, kind: input, shape index: {}]   ;;  %s5697_s3 = inlined_call_operand.hbm [shape: f32[1,512], index: 3, kind: input, shape index: {}]   ;;  %s5698_s4 = inlined_call_operand.<no memory space> [shape: f32[1,1], index: 4, kind: input, shape index: {}]   ;;  %s5699_s5 = inlined_call_operand.hbm [shape: f32[1,512], index: 5, kind: input, shape index: {}]   ;;  %s5700_s6 = inlined_call_operand.hbm [shape: f32[1,512], index: 6, kind: input, shape index: {}]   ;;  %s5701_s7 = inlined_call_operand.hbm [shape: f32[3,512], index: 7, kind: input, shape index: {}]   ;;  %s5702_s8 = inlined_call_operand.hbm [shape: f32[1,512], index: 8, kind: input, shape index: {}]   ;;  %s5703_s9 = inlined_call_operand.<no memory space> [shape: f32[1,1], index: 9, kind: input, shape index: {}]   ;;  %s5704_s10 = inlined_call_operand.hbm [shape: f32[1,512], index: 10, kind: input, shape index: {}]   ;;  %s5705_s11 = inlined_call_operand.hbm [shape: f32[1,512], index: 11, kind: input, shape index: {}]   ;;  %s5706_s12 = inlined_call_operand.hbm [shape: bf16[512,256], index: 12, kind: input, shape index: {}]   ;;  %s5707_s13 = inlined_call_operand.hbm [shape: f32[1,256], index: 13, kind: input, shape index: {}]   ;;  %s5708_s14 = inlined_call_operand.hbm [shape: bf16[512,256], index: 14, kind: input, shape index: {}]   ;;  %s5709_s15 = inlined_call_operand.hbm [shape: f32[1,256], index: 15, kind: input, shape index: {}]   ;;  %s5710_s16 = inlined_call_operand.hbm [shape: f32[2,17,256], index: 16, kind: output, shape index: {0}]   ;;  %s5711_s17 = inlined_call_operand.hbm [shape: f32[2,17,256], index: 17, kind: output, shape index: {1}]  }
   0x1   :  { %5728 = sst [smem:[#allocation44_spill]] %s5694_s0 }
   0x2   :  { %5729 = sst [smem:[#allocation45_spill]] %s5695_s1 }
   0x3   :  { %5730 = sst [smem:[#allocation46_spill]] %s5696_s2 }
   0x4   :  { %5731 = sst [smem:[#allocation47_spill]] %s5697_s3 }
   0x5   :  { %5732 = sst [smem:[#allocation48_spill]] %s5699_s5 }
   0x6   :  { %5733 = sst [smem:[#allocation49_spill]] %s5700_s6 }
   0x7   :  { %5734 = sst [smem:[#allocation50_spill]] %s5701_s7 }
   0x8   :  { %5735 = sst [smem:[#allocation51_spill]] %s5702_s8 }
   0x9   :  { %5736 = sst [smem:[#allocation52_spill]] %s5704_s10 }
   0xa   :  { %5737 = sst [smem:[#allocation53_spill]] %s5710_s16 }
   0xb   :  { %5738 = sst [smem:[#allocation54_spill]] %s5711_s17 }
   0xc   :  { %23 = sst [smem:[#allocation2]] %s5698_s4 }
   0xd   :  { %24 = sst [smem:[#allocation3]] %s5703_s9 }
   0xe   :  { %25 = vsyncpa [#allocation5], 0 }
   0xf   :  { %27 = vsyncpa [#allocation5 + $0x1], 0 }
  0x10   :  { %28 = vsyncpa [#allocation8], 0 }
  0x11   :  { %30 = vsyncpa [#allocation8 + $0x1], 0 }
  0x12   :  { %31 = vsyncpa [#allocation11], 0 }
  0x13   :  { %32 = vsyncpa [#allocation14], 0 }
  0x14   :  { %33 = vsyncpa [#allocation17], 0 }
  0x15   :  { %34 = vsyncpa [#allocation20], 0 }
  0x16   :  { %35 = vsyncpa [#allocation23], 0 }
  0x17   :  { %36 = vsyncpa [#allocation26], 0 }
  0x18   :  { %37 = vsyncpa [#allocation6], 0 }
  0x19   :  { %39 = vsyncpa [#allocation6 + $0x1], 0 }
  0x1a   :  { %40 = vsyncpa [#allocation29], 0 }
  0x1b   :  { %42 = vsyncpa [#allocation29 + $0x1], 0  ;;  %s4695_s28 = smov 0   ;;  %s4697_s4 = smov 0  }
  0x1c   :  { %s4699_s29 = smov 0   ;;  %s4701_s9 = smov 0  }
  0x1d LB: > { %5739 = sst [smem:[#allocation41_spill]] %s4563_s28  ;;  %s4577_s0 = smov [#allocation9]   ;;  %s4575_s9 = sphi %s4701_s9, %s5791_s9   ;;  %s4571_s29 = sphi %s4699_s29, %s5790_s29   ;;  %s4567_s4 = sphi %s4697_s4, %s5789_s4   ;;  %s4563_s28 = sphi %s4695_s28, %s5788_s28  }
  0x1e   : > { %s463_s30 = sshll.u32 %s4577_s0, 4  ;;  %s4716_s18 = sadd.s32 4294967295, %s4575_s9   ;;  %s4721_s30 = int_to_ptr.vmem [resolvable:$true] %s463_s30 }
  0x1f   : > { %5740 = sst [smem:[#allocation42_spill]] %s4716_s18  ;;  %p3308_p0 = scmp.ge.s32.totalorder %s4575_s9, 1 }
  0x20   : > { %p5722_p1 = scmp.eq.s32.totalorder %s4716_s18, 0  ;;  %p451_p2 = scmp.lt.s32.totalorder %s4575_s9, 3 }
  0x21   : > { %s4578_s1 = smov [#allocation10]   ;;  %s4579_s22 = smov [#allocation13]  }
  0x22   : > { %p4723_p3 = pnand %p3308_p0, %p451_p2  ;;  %s477_s20 = sshll.u32 %s4578_s1, 4  ;;  %s4736_s20 = int_to_ptr.vmem [resolvable:$true] %s477_s20 }
  0x23   : > { %s502_s23 = sshll.u32 %s4579_s22, 4  ;;  %s5744_s2 = sld [smem:[#allocation46_spill]]  ;;  %s4738_s23 = int_to_ptr.vmem [resolvable:$true] %s502_s23 }
  0x24   : > { %s5741_s19 = scalar_select %p4723_p3, 1, 0 }
  0x25   : > { %p3624_p5 = pneg %p4723_p3 }
  0x26   : > { %5742 = sst [smem:[#allocation43_spill]] %s5741_s19 }
  0x27   : > { %p4732_p6 = pnand %p3624_p5, %p5722_p1 }
  0x29   : > { %s4049_s26 = scalar_lea.hbm %s5744_s2, 8192  ;;  %p4748_p8 = pneg %p4732_p6 }
  0x2a   : > { %p4050_p7 = scmp.ne.s32.totalorder %s5744_s2, %s4049_s26  ;;  %p4056_p11 = scmp.lt.u32.totalorder %s4049_s26, %s5744_s2 }
  0x2c   : > { %p4052_p9 = pnand %p4748_p8, %p4050_p7 }
  0x2e   : > { %p4053_p10 = pneg %p4052_p9 }
  0x30   : > { %p4058_p12 = pnand %p4056_p11, %p4053_p10 }
  0x32   : > { %4061 = shalt.err (!%p4058_p12)
}
  0x33   : > { %s4062_s24 = scalar_lea.vmem %s4721_s30, 8192  ;;  %p4070_p5 = scmp.lt.s32.totalorder %s4721_s30, %s4721_s30 }
  0x34   : > { %p4063_p13 = scmp.ne.s32.totalorder %s4721_s30, %s4062_s24  ;;  %p4071_p4 = scmp.lt.s32.totalorder %s4062_s24, %s4062_s24 }
  0x36   : > { %p4065_p0 = pnand %p4063_p13, %p4748_p8  ;;  %p4072_p7 = por %p4071_p4, %p4070_p5 }
  0x38   : > { %p4066_p2 = pneg %p4065_p0 }
  0x3a   : > { %p4073_p9 = pnand %p4072_p7, %p4066_p2 }
  0x3c   : > { %4076 = shalt.err (!%p4073_p9)
}
  0x3d   : > { %s5720_s25 = smov 256   ;;  %s5724_s17 = smov 16  }
  0x3e   : > { %3627 = dma.hbm_to_vmem [thread:$0]  (!%p4732_p6), %s5744_s2, 8192, %s4721_s30, [#allocation8], %s5720_s25, %s5720_s25, %s5724_s17  }
  0x3f   : > { %s5746_s3 = sld [smem:[#allocation47_spill]] }
  0x45   : > { %s4077_s24 = scalar_lea.hbm %s5746_s3, 64 }
  0x46   : > { %p4078_p4 = scmp.ne.s32.totalorder %s5746_s3, %s4077_s24  ;;  %p4084_p12 = scmp.lt.u32.totalorder %s4077_s24, %s5746_s3 }
  0x48   : > { %p4080_p10 = pnand %p4078_p4, %p4748_p8 }
  0x4a   : > { %p4081_p11 = pneg %p4080_p10 }
  0x4c   : > { %p4086_p13 = pnand %p4084_p12, %p4081_p11 }
  0x4e   : > { %4089 = shalt.err (!%p4086_p13)
}
  0x4f   : > { %s4090_s30 = scalar_lea.vmem %s4736_s20, 64  ;;  %p4098_p7 = scmp.lt.s32.totalorder %s4736_s20, %s4736_s20 }
  0x50   : > { %p4091_p0 = scmp.ne.s32.totalorder %s4736_s20, %s4090_s30  ;;  %p4099_p9 = scmp.lt.s32.totalorder %s4090_s30, %s4090_s30 }
  0x52   : > { %p4093_p2 = pnand %p4091_p0, %p4748_p8  ;;  %p4100_p4 = por %p4099_p9, %p4098_p7 }
  0x54   : > { %p4094_p5 = pneg %p4093_p2 }
  0x56   : > { %p4101_p10 = pnand %p4100_p4, %p4094_p5 }
  0x58   : > { %4104 = shalt.err (!%p4101_p10)
}
  0x59   : > { %3630 = dma.hbm_to_vmem [thread:$0]  (!%p4732_p6), %s5746_s3, 64, %s4736_s20, [#allocation11]  }
  0x5a   : > { %s5747_s6 = sld [smem:[#allocation49_spill]] }
  0x60   : > { %s4105_s26 = scalar_lea.hbm %s5747_s6, 64 }
  0x61   : > { %p4106_p11 = scmp.ne.s32.totalorder %s5747_s6, %s4105_s26  ;;  %p4112_p0 = scmp.lt.u32.totalorder %s4105_s26, %s5747_s6 }
  0x63   : > { %p4108_p12 = pnand %p4106_p11, %p4748_p8 }
  0x65   : > { %p4109_p13 = pneg %p4108_p12 }
  0x67   : > { %p4114_p2 = pnand %p4112_p0, %p4109_p13 }
  0x69   : > { %4117 = shalt.err (!%p4114_p2)
}
  0x6a   : > { %s4118_s20 = scalar_lea.vmem %s4738_s23, 64  ;;  %p4126_p4 = scmp.lt.s32.totalorder %s4738_s23, %s4738_s23 }
  0x6b   : > { %p4119_p5 = scmp.ne.s32.totalorder %s4738_s23, %s4118_s20  ;;  %p4127_p10 = scmp.lt.s32.totalorder %s4118_s20, %s4118_s20 }
  0x6d   : > { %p4121_p7 = pnand %p4119_p5, %p4748_p8  ;;  %p4128_p11 = por %p4127_p10, %p4126_p4 }
  0x6f   : > { %p4122_p9 = pneg %p4121_p7 }
  0x71   : > { %p4129_p12 = pnand %p4128_p11, %p4122_p9 }
  0x73   : > { %4132 = shalt.err (!%p4129_p12)
}
  0x74   : > { %3636 = dma.hbm_to_vmem [thread:$0]  (!%p4732_p6), %s5747_s6, 64, %s4738_s23, [#allocation14]  }
  0x75   : > { %s4582_s28 = smov [#allocation16]   ;;  %s4583_s19 = smov [#allocation19]  }
  0x76   : > { %s524_s18 = sshll.u32 %s4582_s28, 4  ;;  %s549_s26 = sshll.u32 %s4583_s19, 4  ;;  %s525_s18 = int_to_ptr.vmem [resolvable:$true] %s524_s18  ;;  %s550_s26 = int_to_ptr.vmem [resolvable:$true] %s549_s26 }
  0x77   : > { %s5748_s8 = sld [smem:[#allocation51_spill]] }
  0x7d   : > { %s4133_s22 = scalar_lea.hbm %s5748_s8, 64 }
  0x7e   : > { %p4134_p13 = scmp.ne.s32.totalorder %s5748_s8, %s4133_s22  ;;  %p4140_p5 = scmp.lt.u32.totalorder %s4133_s22, %s5748_s8 }
  0x80   : > { %p4136_p0 = pnand %p4134_p13, %p4748_p8 }
  0x82   : > { %p4137_p2 = pneg %p4136_p0 }
  0x84   : > { %p4142_p7 = pnand %p4140_p5, %p4137_p2 }
  0x86   : > { %4145 = shalt.err (!%p4142_p7)
}
  0x87   : > { %s4146_s23 = scalar_lea.vmem %s525_s18, 64  ;;  %p4154_p11 = scmp.lt.s32.totalorder %s525_s18, %s525_s18 }
  0x88   : > { %p4147_p9 = scmp.ne.s32.totalorder %s525_s18, %s4146_s23  ;;  %p4155_p12 = scmp.lt.s32.totalorder %s4146_s23, %s4146_s23 }
  0x8a   : > { %p4149_p4 = pnand %p4147_p9, %p4748_p8  ;;  %p4156_p1 = por %p4155_p12, %p4154_p11 }
  0x8c   : > { %p4150_p10 = pneg %p4149_p4 }
  0x8e   : > { %p4157_p3 = pnand %p4156_p1, %p4150_p10 }
  0x90   : > { %4160 = shalt.err (!%p4157_p3)
}
  0x91   : > { %3642 = dma.hbm_to_vmem [thread:$0]  (!%p4732_p6), %s5748_s8, 64, %s525_s18, [#allocation17]  }
  0x92   : > { %s4161_s27 = scalar_lea.hbm %s5705_s11, 64 }
  0x93   : > { %p4162_p13 = scmp.ne.s32.totalorder %s5705_s11, %s4161_s27  ;;  %p4168_p3 = scmp.lt.u32.totalorder %s4161_s27, %s5705_s11 }
  0x95   : > { %p4164_p0 = pnand %p4162_p13, %p4748_p8 }
  0x97   : > { %p4165_p1 = pneg %p4164_p0 }
  0x99   : > { %p4170_p2 = pnand %p4168_p3, %p4165_p1 }
  0x9b   : > { %4173 = shalt.err (!%p4170_p2)
}
  0x9c   : > { %s4174_s30 = scalar_lea.vmem %s550_s26, 64  ;;  %p4182_p4 = scmp.lt.s32.totalorder %s550_s26, %s550_s26 }
  0x9d   : > { %p4175_p5 = scmp.ne.s32.totalorder %s550_s26, %s4174_s30  ;;  %p4183_p10 = scmp.lt.s32.totalorder %s4174_s30, %s4174_s30 }
  0x9f   : > { %p4177_p7 = pnand %p4175_p5, %p4748_p8  ;;  %p4184_p11 = por %p4183_p10, %p4182_p4 }
  0xa1   : > { %p4178_p9 = pneg %p4177_p7 }
  0xa3   : > { %p4185_p12 = pnand %p4184_p11, %p4178_p9 }
  0xa5   : > { %4188 = shalt.err (!%p4185_p12)
}
  0xa6   : > { %3648 = dma.hbm_to_vmem [thread:$0]  (!%p4732_p6), %s5705_s11, 64, %s550_s26, [#allocation20]  }
  0xa7   : > { %s4584_s16 = smov [#allocation22]   ;;  %s4585_s25 = smov [#allocation12]  }
  0xa8   : > { %s573_s28 = sshll.u32 %s4584_s16, 4  ;;  %s491_s19 = sshll.u32 %s4585_s25, 4  ;;  %s574_s28 = int_to_ptr.vmem [resolvable:$true] %s573_s28  ;;  %s492_s19 = int_to_ptr.vmem [resolvable:$true] %s491_s19 }
  0xa9   : > { %s4189_s22 = scalar_lea.hbm %s5707_s13, 32 }
  0xaa   : > { %p4190_p13 = scmp.ne.s32.totalorder %s5707_s13, %s4189_s22  ;;  %p4196_p3 = scmp.lt.u32.totalorder %s4189_s22, %s5707_s13 }
  0xac   : > { %p4192_p0 = pnand %p4190_p13, %p4748_p8 }
  0xae   : > { %p4193_p1 = pneg %p4192_p0 }
  0xb0   : > { %p4198_p2 = pnand %p4196_p3, %p4193_p1 }
  0xb2   : > { %4201 = shalt.err (!%p4198_p2)
}
  0xb3   : > { %s4202_s26 = scalar_lea.vmem %s574_s28, 32  ;;  %p4210_p4 = scmp.lt.s32.totalorder %s574_s28, %s574_s28 }
  0xb4   : > { %p4203_p5 = scmp.ne.s32.totalorder %s574_s28, %s4202_s26  ;;  %p4211_p10 = scmp.lt.s32.totalorder %s4202_s26, %s4202_s26 }
  0xb6   : > { %p4205_p7 = pnand %p4203_p5, %p4748_p8  ;;  %p4212_p11 = por %p4211_p10, %p4210_p4 }
  0xb8   : > { %p4206_p9 = pneg %p4205_p7 }
  0xba   : > { %p4213_p12 = pnand %p4212_p11, %p4206_p9 }
  0xbc   : > { %4216 = shalt.err (!%p4213_p12)
}
  0xbd   : > { %3654 = dma.hbm_to_vmem [thread:$0]  (!%p4732_p6), %s5707_s13, 32, %s574_s28, [#allocation23]  }
  0xbe   : > { %s5749_s5 = sld [smem:[#allocation48_spill]] }
  0xc4   : > { %s4217_s0 = scalar_lea.hbm %s5749_s5, 64 }
  0xc5   : > { %p4218_p13 = scmp.ne.s32.totalorder %s5749_s5, %s4217_s0  ;;  %p4224_p3 = scmp.lt.u32.totalorder %s4217_s0, %s5749_s5 }
  0xc7   : > { %p4220_p0 = pnand %p4218_p13, %p4748_p8 }
  0xc9   : > { %p4221_p1 = pneg %p4220_p0 }
  0xcb   : > { %p4226_p2 = pnand %p4224_p3, %p4221_p1 }
  0xcd   : > { %4229 = shalt.err (!%p4226_p2)
}
  0xce   : > { %s4230_s18 = scalar_lea.vmem %s492_s19, 64  ;;  %p4238_p4 = scmp.lt.s32.totalorder %s492_s19, %s492_s19 }
  0xcf   : > { %p4231_p5 = scmp.ne.s32.totalorder %s492_s19, %s4230_s18  ;;  %p4239_p10 = scmp.lt.s32.totalorder %s4230_s18, %s4230_s18 }
  0xd1   : > { %p4233_p7 = pnand %p4231_p5, %p4748_p8  ;;  %p4240_p11 = por %p4239_p10, %p4238_p4 }
  0xd3   : > { %p4234_p9 = pneg %p4233_p7 }
  0xd5   : > { %p4241_p12 = pnand %p4240_p11, %p4234_p9 }
  0xd7   : > { %4244 = shalt.err (!%p4241_p12)
}
  0xd8   : > { %3633 = dma.hbm_to_vmem [thread:$0]  (!%p4732_p6), %s5749_s5, 64, %s492_s19, [#allocation11]  }
  0xd9   : > { %s4586_s23 = smov [#allocation15]   ;;  %s4587_s25 = smov [#allocation18]  }
  0xda   : > { %s513_s16 = sshll.u32 %s4586_s23, 4  ;;  %s538_s27 = sshll.u32 %s4587_s25, 4  ;;  %s514_s16 = int_to_ptr.vmem [resolvable:$true] %s513_s16  ;;  %s539_s27 = int_to_ptr.vmem [resolvable:$true] %s538_s27 }
  0xdb   : > { %s5750_s7 = sld [smem:[#allocation50_spill]] }
  0xe1   : > { %s4245_s24 = scalar_lea.hbm %s5750_s7, 256 }
  0xe2   : > { %p4246_p13 = scmp.ne.s32.totalorder %s5750_s7, %s4245_s24  ;;  %p4252_p3 = scmp.lt.u32.totalorder %s4245_s24, %s5750_s7 }
  0xe4   : > { %p4248_p0 = pnand %p4246_p13, %p4748_p8 }
  0xe6   : > { %p4249_p1 = pneg %p4248_p0 }
  0xe8   : > { %p4254_p2 = pnand %p4252_p3, %p4249_p1 }
  0xea   : > { %4257 = shalt.err (!%p4254_p2)
}
  0xeb   : > { %s4258_s19 = scalar_lea.vmem %s514_s16, 256  ;;  %p4266_p4 = scmp.lt.s32.totalorder %s514_s16, %s514_s16 }
  0xec   : > { %p4259_p5 = scmp.ne.s32.totalorder %s514_s16, %s4258_s19  ;;  %p4267_p10 = scmp.lt.s32.totalorder %s4258_s19, %s4258_s19 }
  0xee   : > { %p4261_p7 = pnand %p4259_p5, %p4748_p8  ;;  %p4268_p11 = por %p4267_p10, %p4266_p4 }
  0xf0   : > { %p4262_p9 = pneg %p4261_p7 }
  0xf2   : > { %p4269_p12 = pnand %p4268_p11, %p4262_p9 }
  0xf4   : > { %4272 = shalt.err (!%p4269_p12)
}
  0xf5   : > { %3639 = dma.hbm_to_vmem [thread:$0]  (!%p4732_p6), %s5750_s7, 256, %s514_s16, [#allocation14]  }
  0xf6   : > { %s5751_s10 = sld [smem:[#allocation52_spill]] }
  0xfc   : > { %s4273_s22 = scalar_lea.hbm %s5751_s10, 64 }
  0xfd   : > { %p4274_p13 = scmp.ne.s32.totalorder %s5751_s10, %s4273_s22  ;;  %p4280_p3 = scmp.lt.u32.totalorder %s4273_s22, %s5751_s10 }
  0xff   : > { %p4276_p0 = pnand %p4274_p13, %p4748_p8 }
 0x101   : > { %p4277_p1 = pneg %p4276_p0 }
 0x103   : > { %p4282_p2 = pnand %p4280_p3, %p4277_p1 }
 0x105   : > { %4285 = shalt.err (!%p4282_p2)
}
 0x106   : > { %s4286_s28 = scalar_lea.vmem %s539_s27, 64  ;;  %p4294_p4 = scmp.lt.s32.totalorder %s539_s27, %s539_s27 }
 0x107   : > { %p4287_p5 = scmp.ne.s32.totalorder %s539_s27, %s4286_s28  ;;  %p4295_p10 = scmp.lt.s32.totalorder %s4286_s28, %s4286_s28 }
 0x109   : > { %p4289_p7 = pnand %p4287_p5, %p4748_p8  ;;  %p4296_p11 = por %p4295_p10, %p4294_p4 }
 0x10b   : > { %p4290_p9 = pneg %p4289_p7 }
 0x10d   : > { %p4297_p12 = pnand %p4296_p11, %p4290_p9 }
 0x10f   : > { %4300 = shalt.err (!%p4297_p12)
}
 0x110   : > { %3645 = dma.hbm_to_vmem [thread:$0]  (!%p4732_p6), %s5751_s10, 64, %s539_s27, [#allocation17]  }
 0x111   : > { %s4588_s26 = smov [#allocation21]   ;;  %s4301_s22 = scalar_lea.hbm %s5706_s12, 8192 }
 0x112   : > { %s559_s23 = sshll.u32 %s4588_s26, 4  ;;  %p4302_p13 = scmp.ne.s32.totalorder %s5706_s12, %s4301_s22  ;;  %s560_s23 = int_to_ptr.vmem [resolvable:$true] %s559_s23 }
 0x113   : > { %p4308_p3 = scmp.lt.u32.totalorder %s4301_s22, %s5706_s12 }
 0x114   : > { %p4304_p0 = pnand %p4302_p13, %p4748_p8 }
 0x116   : > { %p4305_p1 = pneg %p4304_p0 }
 0x118   : > { %p4310_p2 = pnand %p4308_p3, %p4305_p1 }
 0x11a   : > { %4313 = shalt.err (!%p4310_p2)
}
 0x11b   : > { %s4314_s27 = scalar_lea.vmem %s560_s23, 8192  ;;  %p4322_p4 = scmp.lt.s32.totalorder %s560_s23, %s560_s23 }
 0x11c   : > { %p4315_p5 = scmp.ne.s32.totalorder %s560_s23, %s4314_s27  ;;  %p4323_p10 = scmp.lt.s32.totalorder %s4314_s27, %s4314_s27 }
 0x11e   : > { %p4317_p7 = pnand %p4315_p5, %p4748_p8  ;;  %p4324_p11 = por %p4323_p10, %p4322_p4 }
 0x120   : > { %p4318_p9 = pneg %p4317_p7 }
 0x122   : > { %p4325_p12 = pnand %p4324_p11, %p4318_p9 }
 0x124   : > { %4328 = shalt.err (!%p4325_p12)
}
 0x125   : > { %s4589_s28 = smov 128   ;;  %s4590_s16 = smov 8  }
 0x126   : > { %3651 = dma.hbm_to_vmem [thread:$0]  (!%p4732_p6), %s5706_s12, 8192, %s560_s23, [#allocation20], %s4589_s28, %s4589_s28, %s4590_s16  }
 0x127   : > { %s4591_s25 = smov [#allocation24]   ;;  %s4592_s22 = smov [#allocation25]  }
 0x128   : > { %s583_s0 = sshll.u32 %s4591_s25, 4  ;;  %s597_s24 = sshll.u32 %s4592_s22, 4  ;;  %s584_s0 = int_to_ptr.vmem [resolvable:$true] %s583_s0  ;;  %s4944_s24 = int_to_ptr.vmem [resolvable:$true] %s597_s24 }
 0x129   : > { %s4329_s18 = scalar_lea.hbm %s5708_s14, 8192 }
 0x12a   : > { %p4330_p13 = scmp.ne.s32.totalorder %s5708_s14, %s4329_s18  ;;  %p4336_p3 = scmp.lt.u32.totalorder %s4329_s18, %s5708_s14 }
 0x12c   : > { %p4332_p0 = pnand %p4330_p13, %p4748_p8 }
 0x12e   : > { %p4333_p1 = pneg %p4332_p0 }
 0x130   : > { %p4338_p2 = pnand %p4336_p3, %p4333_p1 }
 0x132   : > { %4341 = shalt.err (!%p4338_p2)
}
 0x133   : > { %s4342_s26 = scalar_lea.vmem %s584_s0, 8192  ;;  %p4350_p4 = scmp.lt.s32.totalorder %s584_s0, %s584_s0 }
 0x134   : > { %p4343_p5 = scmp.ne.s32.totalorder %s584_s0, %s4342_s26  ;;  %p4351_p10 = scmp.lt.s32.totalorder %s4342_s26, %s4342_s26 }
 0x136   : > { %p4345_p7 = pnand %p4343_p5, %p4748_p8  ;;  %p4352_p11 = por %p4351_p10, %p4350_p4 }
 0x138   : > { %p4346_p9 = pneg %p4345_p7 }
 0x13a   : > { %p4353_p12 = pnand %p4352_p11, %p4346_p9 }
 0x13c   : > { %4356 = shalt.err (!%p4353_p12)
}
 0x13d   : > { %3657 = dma.hbm_to_vmem [thread:$0]  (!%p4732_p6), %s5708_s14, 8192, %s584_s0, [#allocation23], %s4589_s28, %s4589_s28, %s4590_s16  }
 0x13e   : > { %s4357_s30 = scalar_lea.hbm %s5709_s15, 32 }
 0x13f   : > { %p4358_p13 = scmp.ne.s32.totalorder %s5709_s15, %s4357_s30  ;;  %p4364_p3 = scmp.lt.u32.totalorder %s4357_s30, %s5709_s15 }
 0x141   : > { %p4360_p0 = pnand %p4358_p13, %p4748_p8 }
 0x143   : > { %p4361_p1 = pneg %p4360_p0 }
 0x145   : > { %p4366_p2 = pnand %p4364_p3, %p4361_p1 }
 0x147   : > { %4369 = shalt.err (!%p4366_p2)
}
 0x148   : > { %s4370_s28 = scalar_lea.vmem %s4944_s24, 32  ;;  %p4378_p4 = scmp.lt.s32.totalorder %s4944_s24, %s4944_s24 }
 0x149   : > { %p4371_p5 = scmp.ne.s32.totalorder %s4944_s24, %s4370_s28  ;;  %p4379_p10 = scmp.lt.s32.totalorder %s4370_s28, %s4370_s28 }
 0x14b   : > { %p4373_p7 = pnand %p4371_p5, %p4748_p8  ;;  %p4380_p11 = por %p4379_p10, %p4378_p4 }
 0x14d   : > { %p4374_p9 = pneg %p4373_p7 }
 0x14f   : > { %p4381_p12 = pnand %p4380_p11, %p4374_p9 }
 0x151   : > { %4384 = shalt.err (!%p4381_p12)
}
 0x152   : > { %s5752_s1 = sld [smem:[#allocation41_spill]]  ;;  %s5753_s26 = sld [smem:[#allocation42_spill]] }
 0x153   : > { %3660 = dma.hbm_to_vmem [thread:$0]  (!%p4732_p6), %s5709_s15, 32, %s4944_s24, [#allocation26]  }
 0x154   : > { %s3307_s21 = sadd.s32 4294967294, %s4575_s9   ;;  %s4989_s17 = sadd.s32 1, %s4575_s9  }
 0x155   : > { %s52_s25 = ssub.s32 %s4575_s9, %s4989_s17  ;;  %s55_s22 = sadd.s32 1, %s4571_s29 }
 0x156   : > { %p53_p8 = scmp.eq.s32.totalorder %s52_s25, 0  ;;  %p62_p13 = scmp.ne.s32.totalorder %s4571_s29, %s4567_s4 }
 0x157   : > { %p63_p0 = scmp.eq.s32.totalorder %s4575_s9, 0  ;;  %p418_p7 = scmp.eq.s32.totalorder %s3307_s21, 1 }
 0x158   : > { %p68_p1 = scmp.ne.s32.totalorder %s4567_s4, %s5752_s1  ;;  %p5754_p2 = scmp.eq.s32.totalorder %s5753_s26, 0 }
 0x159   : > { %s5000_s20 = scalar_select %p53_p8, %s4571_s29, %s55_s22  }
 0x15a   : > { %p64_p3 = por %p63_p0, %p62_p13  ;;  %p5004_p5 = por %p5754_p2, %p68_p1 }
 0x15b   : > { %p412_p6 = scmp.eq.s32.totalorder %s5753_s26, 1  ;;  %p3687_p9 = scmp.lt.s32.totalorder %s4575_s9, 2 }
 0x15c   : > { %s608_s24 = sand.u32 1, %s4571_s29   ;;  %p5015_p10 = por %p418_p7, %p68_p1 }
 0x15d   : > { %p5011_p4 = por %p412_p6, %p62_p13  ;;  %s5019_s19 = smul.u32 48, %s608_s24 }
 0x15e   : > { %s5757_s27 = scalar_select %p5015_p10, 1, 0 }
 0x15f   : > { %s5756_s18 = scalar_select %p5011_p4, 1, 0 }
 0x160   : > { %s5726_s23 = smul.u32 768, %s4575_s9  ;;  %p5022_p11 = pnand %p3687_p9, %p64_p3 }
 0x161   : > { %s5759_s26 = sld [smem:[#allocation44_spill]]  ;;  %s612_s25 = scalar_lea.vmem [#allocation4], %s5019_s19 }
 0x162   : > { %s619_s22 = sshll.u32 %s612_s25, 4  ;;  %s5037_s2 = scalar_lea.sflag [#allocation5], %s608_s24  ;;  %s5035_s22 = int_to_ptr.vmem [resolvable:$true] %s619_s22 }
 0x163   : > { %p4387_p8 = pneg %p5022_p11 }
 0x167   : > { %s5032_s21 = scalar_lea.hbm %s5759_s26, %s5726_s23  ;;  %s4390_s16 = scalar_lea.hbm %s5759_s26, 1536 }
 0x168   : > { %s4385_s3 = scalar_lea.hbm %s5032_s21, 768  ;;  %p4391_p1 = scmp.lt.u32.totalorder %s5032_s21, %s5759_s26 }
 0x169   : > { %p4386_p12 = scmp.ne.s32.totalorder %s5032_s21, %s4385_s3  ;;  %p4392_p3 = scmp.lt.u32.totalorder %s4390_s16, %s4385_s3 }
 0x16a   : > { %p4394_p6 = scmp.lt.u32.totalorder %s4385_s3, %s5032_s21 }
 0x16b   : > { %p4388_p13 = pnand %p4387_p8, %p4386_p12  ;;  %p4393_p2 = por %p4392_p3, %p4391_p1 }
 0x16d   : > { %p4389_p0 = pneg %p4388_p13  ;;  %p4395_p7 = por %p4394_p6, %p4393_p2 }
 0x16f   : > { %p4396_p9 = pnand %p4395_p7, %p4389_p0 }
 0x171   : > { %4399 = shalt.err (!%p4396_p9)
}
 0x172   : > { %s4400_s24 = scalar_lea.vmem %s5035_s22, 768  ;;  %s4593_s25 = smov [#allocation4]  }
 0x173   : > { %p4401_p12 = scmp.ne.s32.totalorder %s5035_s22, %s4400_s24  ;;  %s4405_s0 = sshll.u32 %s4593_s25, 4  ;;  %s4406_s0 = int_to_ptr.vmem [resolvable:$false] %s4405_s0 }
 0x174   : > { %s4407_s5 = scalar_lea.vmem %s4406_s0, 1536  ;;  %p4408_p4 = scmp.lt.s32.totalorder %s5035_s22, %s4406_s0 }
 0x175   : > { %p4403_p13 = pnand %p4401_p12, %p4387_p8  ;;  %p4409_p1 = scmp.lt.s32.totalorder %s4407_s5, %s4400_s24 }
 0x177   : > { %p4404_p10 = pneg %p4403_p13  ;;  %p4410_p3 = por %p4409_p1, %p4408_p4 }
 0x179   : > { %p4411_p2 = pnand %p4410_p3, %p4404_p10 }
 0x17b   : > { %4414 = shalt.err (!%p4411_p2)
}
 0x17c   : > { %s5760_s3 = smov 16   ;;  %s5761_s23 = smov 256  }
 0x17d   : > { %3664 = dma.hbm_to_vmem [thread:$0]  (!%p5022_p11), %s5032_s21, 768, %s5035_s22, %s5037_s2, %s5761_s23, %s5761_s23, %s5760_s3  }
 0x17e   : > { %s5762_s16 = smul.u32 768, %s4575_s9  ;;  %s5763_s24 = sld [smem:[#allocation45_spill]] }
 0x17f   : > { %s633_s5 = scalar_lea.vmem [#allocation7], %s5019_s19  ;;  %s5764_s7 = sand.u32 1, %s4575_s9  }
 0x180   : > { %s640_s6 = sshll.u32 %s633_s5, 4  ;;  %s5080_s8 = scalar_lea.sflag [#allocation8], %s5764_s7  ;;  %s5076_s6 = int_to_ptr.vmem [resolvable:$true] %s640_s6 }
 0x184   : > { %s5073_s0 = scalar_lea.hbm %s5763_s24, %s5762_s16  ;;  %s4420_s22 = scalar_lea.hbm %s5763_s24, 1536 }
 0x185   : > { %s4415_s10 = scalar_lea.hbm %s5073_s0, 768  ;;  %p4421_p6 = scmp.lt.u32.totalorder %s5073_s0, %s5763_s24 }
 0x186   : > { %p4416_p4 = scmp.ne.s32.totalorder %s5073_s0, %s4415_s10  ;;  %p4422_p7 = scmp.lt.u32.totalorder %s4420_s22, %s4415_s10 }
 0x187   : > { %p4424_p12 = scmp.lt.u32.totalorder %s4415_s10, %s5073_s0 }
 0x188   : > { %p4418_p10 = pnand %p4416_p4, %p4387_p8  ;;  %p4423_p9 = por %p4422_p7, %p4421_p6 }
 0x18a   : > { %p4419_p0 = pneg %p4418_p10  ;;  %p4425_p13 = por %p4424_p12, %p4423_p9 }
 0x18c   : > { %p4426_p1 = pnand %p4425_p13, %p4419_p0 }
 0x18e   : > { %4429 = shalt.err (!%p4426_p1)
}
 0x18f   : > { %s4430_s7 = scalar_lea.vmem %s5076_s6, 768  ;;  %s4594_s19 = smov [#allocation7]  }
 0x190   : > { %p4431_p3 = scmp.ne.s32.totalorder %s5076_s6, %s4430_s7  ;;  %s4435_s25 = sshll.u32 %s4594_s19, 4  ;;  %s4436_s25 = int_to_ptr.vmem [resolvable:$false] %s4435_s25 }
 0x191   : > { %s4437_s5 = scalar_lea.vmem %s4436_s25, 1536  ;;  %p4438_p10 = scmp.lt.s32.totalorder %s5076_s6, %s4436_s25 }
 0x192   : > { %p4433_p2 = pnand %p4431_p3, %p4387_p8  ;;  %p4439_p6 = scmp.lt.s32.totalorder %s4437_s5, %s4430_s7 }
 0x194   : > { %p4434_p4 = pneg %p4433_p2  ;;  %p4440_p7 = por %p4439_p6, %p4438_p10 }
 0x196   : > { %p4441_p9 = pnand %p4440_p7, %p4434_p4 }
 0x198   : > { %4444 = shalt.err (!%p4441_p9)
}
 0x199   : > { %3667 = dma.hbm_to_vmem [thread:$0]  (!%p5022_p11), %s5073_s0, 768, %s5076_s6, %s5080_s8, %s5761_s23, %s5761_s23, %s5760_s3  }
 0x19a   : > { %s5765_s10 = sld [smem:[#allocation43_spill]] }
 0x1a0   : > { %p5766_p8 = scmp.ne.s32.totalorder %s5765_s10, 0 }
 0x1a1   : > { %s5112_s2 = sand.u32 (!%p5766_p8), 1, %s4567_s4  }
 0x1a2   : > { %652 = sbr.rel (%p5766_p8) target bundleno = 2175 (0x87f), region = 84  ;;  %s655_s28 = scalar_lea.sflag (!%p5766_p8), [#allocation5], %s5112_s2 }
 0x1a3   : > { %s5115_s21 = smul.u32 (!%p5766_p8), 48, %s5112_s2 }
 0x1a5   : > { %s5119_s22 = scalar_lea.vmem (!%p5766_p8), [#allocation4], %s5115_s21 }
 0x1a9   : > { %4518 = dma.done.wait (%p5004_p5), %s655_s28, 768  }
 0x1aa   : > { %4520 = vsyncadd (%p5004_p5), %s655_s28, 4294966528  ;;  %s5767_s6 = sld [smem:[#allocation42_spill]]  ;;  %s5127_s23 = scalar_lea.vmem [#allocation7], %s5115_s21 }
 0x1b0   : > { %s663_s8 = sand.u32 1, %s5767_s6  }
 0x1b1   : > { %s664_s3 = scalar_lea.sflag [#allocation8], %s663_s8 }
 0x1b2   : > { %4522 = dma.done.wait (%p5004_p5), %s664_s3, 768  }
 0x1b3   : > { %4524 = vsyncadd (%p5004_p5), %s664_s3, 4294966528  ;;  %p5768_p11 = scmp.eq.s32.totalorder %s5767_s6, 0 }
 0x1b5   : > { %4526 = dma.done.wait (%p5768_p11), [#allocation8], 8192   ;;  %p5769_p0 = pmov %p5768_p11 }
 0x1b7   : > { %4528 = vsyncadd (%p5769_p0), [#allocation8], 4294959104  ;;  %p5770_p12 = pmov %p5769_p0 }
 0x1b8   : > { %p5771_p13 = pmov %p5769_p0 }
 0x1b9   : > { %4530 = dma.done.wait (%p5770_p12), [#allocation11], 128  }
 0x1ba   : > { %4532 = vsyncadd (%p5771_p13), [#allocation11], 4294967168  ;;  %p5772_p1 = pmov %p5769_p0 }
 0x1bb   : > { %p5773_p3 = pmov %p5769_p0 }
 0x1bc   : > { %4534 = dma.done.wait (%p5772_p1), [#allocation14], 320  }
 0x1bd   : > { %4536 = vsyncadd (%p5773_p3), [#allocation14], 4294966976  ;;  %p5774_p5 = pmov %p5769_p0 }
 0x1be   : > { %p5775_p2 = pmov %p5769_p0 }
 0x1bf   : > { %4538 = dma.done.wait (%p5774_p5), [#allocation17], 128  }
 0x1c0   : > { %4540 = vsyncadd (%p5775_p2), [#allocation17], 4294967168  ;;  %p5776_p4 = pmov %p5769_p0 }
 0x1c1   : > { %p5777_p10 = pmov %p5769_p0 }
 0x1c2   : > { %4542 = dma.done.wait (%p5776_p4), [#allocation20], 8256  }
 0x1c3   : > { %4544 = vsyncadd (%p5777_p10), [#allocation20], 4294959040  ;;  %p5778_p6 = pmov %p5769_p0 }
 0x1c4   : > { %p5779_p7 = pmov %p5769_p0 }
 0x1c5   : > { %4546 = dma.done.wait (%p5778_p6), [#allocation23], 8224  }
 0x1c6   : > { %4548 = vsyncadd (%p5779_p7), [#allocation23], 4294959072  ;;  %p5780_p9 = pmov %p5769_p0 }
 0x1c7   : > { %p5781_p8 = pmov %p5769_p0 }
 0x1c8   : > { %4550 = dma.done.wait (%p5780_p9), [#allocation26], 32  }
 0x1c9   : > { %4552 = vsyncadd (%p5781_p8), [#allocation26], 4294967264  ;;  %v3751_v0 = vld [vmem:[#allocation9 + $0x4] ss:$16 sps:$4 sm:$0xff]   ;;  %v3753_v1 = vld [vmem:[#allocation9 + $0xc] ss:$16 sps:$4 sm:$0xff]  }
 0x1ca   : > { %1192 = vmatprep.subr.bf16.mxu0 %v3751_v0  ;;  %v3755_v2 = vld [vmem:[#allocation9] ss:$16 sps:$4 sm:$0xff]   ;;  %v3756_v3 = vld [vmem:[#allocation9 + $0x8] ss:$16 sps:$4 sm:$0xff]   ;;  %1243 = vmatprep.subr.bf16.mxu1 %v3753_v1  ;;  %v3757_v4 = vld [vmem:[#allocation9 + $0x24] ss:$16 sps:$4 sm:$0xff]  }
 0x1cb   : > { %1193 = vmatpush1.bf16.msra.mxu0 %v3755_v2  ;;  %1244 = vmatpush1.bf16.msra.mxu1 %v3756_v3  ;;  %v3759_v5 = vld [vmem:[#allocation9 + $0x2c] ss:$16 sps:$4 sm:$0xff]   ;;  %v3761_v6 = vld [vmem:[#allocation9 + $0x20] ss:$16 sps:$4 sm:$0xff]   ;;  %v3762_v7 = vld [vmem:[#allocation9 + $0x28] ss:$16 sps:$4 sm:$0xff]  }
 0x1cc   : > { %1194 = vmatprep.subr.bf16.mxu0 %v3757_v4  ;;  %1245 = vmatprep.subr.bf16.mxu1 %v3759_v5  ;;  %v3763_v8 = vld [vmem:[#allocation9 + $0x44] ss:$16 sps:$4 sm:$0xff]   ;;  %v3765_v9 = vld [vmem:[#allocation9 + $0x4c] ss:$16 sps:$4 sm:$0xff]   ;;  %v3767_v10 = vld [vmem:[#allocation9 + $0x40] ss:$16 sps:$4 sm:$0xff]  }
 0x1cd   : > { %v3768_v11 = vld [vmem:[#allocation9 + $0x48] ss:$16 sps:$4 sm:$0xff]   ;;  %v3769_v12 = vld [vmem:[#allocation9 + $0x64] ss:$16 sps:$4 sm:$0xff]   ;;  %v3771_v13 = vld [vmem:[#allocation9 + $0x6c] ss:$16 sps:$4 sm:$0xff]  }
 0x1ce   : > { %v3773_v14 = vld [vmem:[#allocation9 + $0x60] ss:$16 sps:$4 sm:$0xff]   ;;  %v3774_v15 = vld [vmem:[#allocation9 + $0x68] ss:$16 sps:$4 sm:$0xff]   ;;  %v3775_v16 = vld [vmem:[#allocation9 + $0x84] ss:$16 sps:$4 sm:$0xff]  }
 0x1cf   : > { %1195 = vmatpush1.bf16.msra.mxu0 %v3761_v6  ;;  %1246 = vmatpush1.bf16.msra.mxu1 %v3762_v7  ;;  %v3777_v17 = vld [vmem:[#allocation9 + $0x8c] ss:$16 sps:$4 sm:$0xff]   ;;  %v3779_v18 = vld [vmem:[#allocation9 + $0x80] ss:$16 sps:$4 sm:$0xff]   ;;  %v3780_v19 = vld [vmem:[#allocation9 + $0x88] ss:$16 sps:$4 sm:$0xff]  }
 0x1d0   : > { %1196 = vmatprep.subr.bf16.mxu0 %v3763_v8  ;;  %1247 = vmatprep.subr.bf16.mxu1 %v3765_v9  ;;  %v3781_v20 = vld [vmem:[#allocation9 + $0xa4] ss:$16 sps:$4 sm:$0xff]   ;;  %v3783_v21 = vld [vmem:[#allocation9 + $0xac] ss:$16 sps:$4 sm:$0xff]   ;;  %v3785_v22 = vld [vmem:[#allocation9 + $0xa0] ss:$16 sps:$4 sm:$0xff]  }
 0x1d1   : > { %v3786_v23 = vld [vmem:[#allocation9 + $0xa8] ss:$16 sps:$4 sm:$0xff]   ;;  %v3787_v24 = vld [vmem:[#allocation9 + $0xc4] ss:$16 sps:$4 sm:$0xff]   ;;  %v3789_v25 = vld [vmem:[#allocation9 + $0xcc] ss:$16 sps:$4 sm:$0xff]  }
 0x1d2   : > { %v3791_v26 = vld [vmem:[#allocation9 + $0xc0] ss:$16 sps:$4 sm:$0xff]   ;;  %v3792_v27 = vld [vmem:[#allocation9 + $0xc8] ss:$16 sps:$4 sm:$0xff]   ;;  %v3793_v28 = vld [vmem:[#allocation9 + $0xe4] ss:$16 sps:$4 sm:$0xff]  }
 0x1d3   : > { %1197 = vmatpush1.bf16.msra.mxu0 %v3767_v10  ;;  %1248 = vmatpush1.bf16.msra.mxu1 %v3768_v11  ;;  %v3795_v29 = vld [vmem:[#allocation9 + $0xec] ss:$16 sps:$4 sm:$0xff]   ;;  %v3797_v30 = vld [vmem:[#allocation9 + $0xe0] ss:$16 sps:$4 sm:$0xff]   ;;  %v3798_v31 = vld [vmem:[#allocation9 + $0xe8] ss:$16 sps:$4 sm:$0xff]   ;;  %v852_v10 = vlaneseq }
 0x1d4   : > { %1198 = vmatprep.subr.bf16.mxu0 %v3769_v12  ;;  %1249 = vmatprep.subr.bf16.mxu1 %v3771_v13  ;;  %v3799_v32 = vld [vmem:[#allocation9 + $0x104] ss:$16 sps:$4 sm:$0xff]   ;;  %v3801_v33 = vld [vmem:[#allocation9 + $0x10c] ss:$16 sps:$4 sm:$0xff]   ;;  %v3803_v34 = vld [vmem:[#allocation9 + $0x100] ss:$16 sps:$4 sm:$0xff]  }
 0x1d5   : > { %v3804_v35 = vld [vmem:[#allocation9 + $0x108] ss:$16 sps:$4 sm:$0xff]   ;;  %v3805_v36 = vld [vmem:[#allocation9 + $0x124] ss:$16 sps:$4 sm:$0xff]   ;;  %v3807_v37 = vld [vmem:[#allocation9 + $0x12c] ss:$16 sps:$4 sm:$0xff]  }
 0x1d6   : > { %v3809_v38 = vld [vmem:[#allocation9 + $0x120] ss:$16 sps:$4 sm:$0xff]   ;;  %v3810_v39 = vld [vmem:[#allocation9 + $0x128] ss:$16 sps:$4 sm:$0xff]   ;;  %v3811_v40 = vld [vmem:[#allocation9 + $0x144] ss:$16 sps:$4 sm:$0xff]  }
 0x1d7   : > { %1199 = vmatpush1.bf16.msra.mxu0 %v3773_v14  ;;  %1250 = vmatpush1.bf16.msra.mxu1 %v3774_v15  ;;  %v3813_v41 = vld [vmem:[#allocation9 + $0x14c] ss:$16 sps:$4 sm:$0xff]   ;;  %v3815_v42 = vld [vmem:[#allocation9 + $0x140] ss:$16 sps:$4 sm:$0xff]   ;;  %v3816_v43 = vld [vmem:[#allocation9 + $0x148] ss:$16 sps:$4 sm:$0xff]  }
 0x1d8   : > { %1200 = vmatprep.subr.bf16.mxu0 %v3775_v16  ;;  %1251 = vmatprep.subr.bf16.mxu1 %v3777_v17  ;;  %v3817_v44 = vld [vmem:[#allocation9 + $0x164] ss:$16 sps:$4 sm:$0xff]   ;;  %v3819_v45 = vld [vmem:[#allocation9 + $0x16c] ss:$16 sps:$4 sm:$0xff]   ;;  %v3821_v47 = vld [vmem:[#allocation9 + $0x160] ss:$16 sps:$4 sm:$0xff]  }
 0x1d9   : > { %v777_v46 = vld [vmem:[%s5119_s22 + $0x8] sm:$0xff]  ;;  %v779_v48 = vld [vmem:[%s5119_s22 + $0x18] sm:$0xff]  ;;  %v3823_v50 = vld [vmem:[#allocation9 + $0x184] ss:$16 sps:$4 sm:$0xff]   ;;  %v853_v11 = vshrl.u32 %v852_v10, 7  ;;  %s1306_s30 = sld [smem:[#allocation2]] }
 0x1da   : > { %v3822_v49 = vld [vmem:[#allocation9 + $0x168] ss:$16 sps:$4 sm:$0xff]   ;;  %v3825_v51 = vld [vmem:[#allocation9 + $0x18c] ss:$16 sps:$4 sm:$0xff]   ;;  %v783_v52 = vpack.c.bf16 %v779_v48, %v777_v46  ;;  %v3827_v53 = vld [vmem:[#allocation9 + $0x180] ss:$16 sps:$4 sm:$0xff]  }
 0x1db   : > { %1201 = vmatpush1.bf16.msra.mxu0 %v3779_v18  ;;  %1252 = vmatpush1.bf16.msra.mxu1 %v3780_v19  ;;  %v3828_v54 = vld [vmem:[#allocation9 + $0x188] ss:$16 sps:$4 sm:$0xff]   ;;  %v3829_v55 = vld [vmem:[#allocation9 + $0x1a4] ss:$16 sps:$4 sm:$0xff]   ;;  %v3831_v56 = vld [vmem:[#allocation9 + $0x1ac] ss:$16 sps:$4 sm:$0xff]  }
 0x1dc   : > { %1202 = vmatprep.subr.bf16.mxu0 %v3781_v20  ;;  %1253 = vmatprep.subr.bf16.mxu1 %v3783_v21  ;;  %v3833_v57 = vld [vmem:[#allocation9 + $0x1a0] ss:$16 sps:$4 sm:$0xff]   ;;  %v3834_v58 = vld [vmem:[#allocation9 + $0x1a8] ss:$16 sps:$4 sm:$0xff]   ;;  %v3835_v59 = vld [vmem:[#allocation9 + $0x1c4] ss:$16 sps:$4 sm:$0xff]  }
 0x1dd   : > { %1224 = vmatprep.mubr.bf16.mxu0 %v783_v52  ;;  %1275 = vmatprep.mubr.bf16.mxu1 %v783_v52  ;;  %v3837_v60 = vld [vmem:[#allocation9 + $0x1cc] ss:$16 sps:$4 sm:$0xff]   ;;  %v3839_v61 = vld [vmem:[#allocation9 + $0x1c0] ss:$16 sps:$4 sm:$0xff]   ;;  %v3840_v62 = vld [vmem:[#allocation9 + $0x1c8] ss:$16 sps:$4 sm:$0xff]  }
 0x1de   : > { %v3841_v63 = vld [vmem:[#allocation9 + $0x1e4] ss:$16 sps:$4 sm:$0xff]   ;;  %v3843_v0 = vld [vmem:[#allocation9 + $0x1ec] ss:$16 sps:$4 sm:$0xff]   ;;  %v3845_v1 = vld [vmem:[#allocation9 + $0x1e0] ss:$16 sps:$4 sm:$0xff]  }
 0x1df   : > { %1203 = vmatpush1.bf16.msra.mxu0 %v3785_v22  ;;  %1254 = vmatpush1.bf16.msra.mxu1 %v3786_v23  ;;  %v3846_v2 = vld [vmem:[#allocation9 + $0x1e8] ss:$16 sps:$4 sm:$0xff]   ;;  %v776_v3 = vld [vmem:[%s5119_s22] sm:$0xff]  ;;  %v778_v4 = vld [vmem:[%s5119_s22 + $0x10] sm:$0xff]  ;;  %v5167_v12 = vsub.s32 0, %v853_v11  ;;  %v5169_v13 = vsub.s32 2, %v853_v11  ;;  %v5179_v22 = vstv %s1306_s30 }
 0x1e0   : > { %1204 = vmatprep.subr.bf16.mxu0 %v3787_v24  ;;  %1255 = vmatprep.subr.bf16.mxu1 %v3789_v25  ;;  %v781_v5 = vld [vmem:[%s5119_s22 + $0x28] sm:$0x1]  ;;  %v782_v6 = vpack.c.bf16 %v778_v4, %v776_v3  ;;  %v780_v8 = vld [vmem:[%s5119_s22 + $0x20] sm:$0x1]  ;;  %v5171_v15 = vsub.s32 1, %v853_v11  ;;  %v5173_v16 = vsub.s32 3, %v853_v11 }
 0x1e1   : > { %v785_v7 = vpack.c.bf16 %v781_v5, %v781_v5  ;;  %v784_v9 = vpack.c.bf16 %v780_v8, %v780_v8  ;;  %v850_v14 = vld [vmem:[#allocation10] sm:$0xf]  ;;  %vm1339_vm10 = vcmask 1040384   ;;  %s5288_s5 = sld [smem:[#allocation3]]  ;;  %vm1541_vm13 = vcmask 1041408   ;;  %p5784_p0 = scmp.ne.s32.totalorder %s5756_s18, 0 }
 0x1e2   : > { %v855_v17 = vrot.slane %v850_v14, %v5167_v12  ;;  %v863_v18 = vrot.slane %v850_v14, %v5169_v13  ;;  %v859_v19 = vrot.slane %v850_v14, %v5171_v15  ;;  %v867_v20 = vrot.slane %v850_v14, %v5173_v16 }
 0x1e3   : > { %1205 = vmatpush1.bf16.msra.mxu0 %v3791_v26  ;;  %1256 = vmatpush1.bf16.msra.mxu1 %v3792_v27  ;;  %vm1627_vm14 = vcmask 1046528   ;;  %vm1719_vm15 = vcmask 1045504  }
 0x1e4   : > { %1206 = vmatprep.subr.bf16.mxu0 %v3793_v28  ;;  %1257 = vmatprep.subr.bf16.mxu1 %v3795_v29 }
 0x1e7   : > { %1207 = vmatpush1.bf16.msra.mxu0 %v3797_v30  ;;  %1258 = vmatpush1.bf16.msra.mxu1 %v3798_v31 }
 0x1e8   : > { %1208 = vmatprep.subr.bf16.mxu0 %v3799_v32  ;;  %1259 = vmatprep.subr.bf16.mxu1 %v3801_v33 }
 0x1eb   : > { %1209 = vmatpush1.bf16.msra.mxu0 %v3803_v34  ;;  %1260 = vmatpush1.bf16.msra.mxu1 %v3804_v35 }
 0x1ec   : > { %1210 = vmatprep.subr.bf16.mxu0 %v3805_v36  ;;  %1261 = vmatprep.subr.bf16.mxu1 %v3807_v37 }
 0x1ef   : > { %1211 = vmatpush1.bf16.msra.mxu0 %v3809_v38  ;;  %1262 = vmatpush1.bf16.msra.mxu1 %v3810_v39 }
 0x1f0   : > { %1212 = vmatprep.subr.bf16.mxu0 %v3811_v40  ;;  %1263 = vmatprep.subr.bf16.mxu1 %v3813_v41 }
 0x1f3   : > { %1213 = vmatpush1.bf16.msra.mxu0 %v3815_v42  ;;  %1264 = vmatpush1.bf16.msra.mxu1 %v3816_v43 }
 0x1f4   : > { %1214 = vmatprep.subr.bf16.mxu0 %v3817_v44  ;;  %1265 = vmatprep.subr.bf16.mxu1 %v3819_v45 }
 0x1f7   : > { %1215 = vmatpush1.bf16.msra.mxu0 %v3821_v47  ;;  %1266 = vmatpush1.bf16.msra.mxu1 %v3822_v49 }
 0x1f8   : > { %1216 = vmatprep.subr.bf16.mxu0 %v3823_v50  ;;  %1267 = vmatprep.subr.bf16.mxu1 %v3825_v51 }
 0x1fb   : > { %1217 = vmatpush1.bf16.msra.mxu0 %v3827_v53  ;;  %1268 = vmatpush1.bf16.msra.mxu1 %v3828_v54 }
 0x1fc   : > { %1218 = vmatprep.subr.bf16.mxu0 %v3829_v55  ;;  %1269 = vmatprep.subr.bf16.mxu1 %v3831_v56 }
 0x1ff   : > { %1219 = vmatpush1.bf16.msra.mxu0 %v3833_v57  ;;  %1270 = vmatpush1.bf16.msra.mxu1 %v3834_v58 }
 0x200   : > { %1220 = vmatprep.subr.bf16.mxu0 %v3835_v59  ;;  %1271 = vmatprep.subr.bf16.mxu1 %v3837_v60 }
 0x203   : > { %1221 = vmatpush1.bf16.msra.mxu0 %v3839_v61  ;;  %1272 = vmatpush1.bf16.msra.mxu1 %v3840_v62 }
 0x204   : > { %1222 = vmatprep.subr.bf16.mxu0 %v3841_v63  ;;  %1273 = vmatprep.subr.bf16.mxu1 %v3843_v0 }
 0x207   : > { %1223 = vmatpush1.bf16.msra.mxu0 %v3845_v1  ;;  %1274 = vmatpush1.bf16.msra.mxu1 %v3846_v2 }
 0x20a   : > { %1225 = vmatmul.mubr.bf16.vlgmr.msra.gmra.mrb[0].mxu0 %v782_v6  ;;  %1276 = vmatmul.mubr.bf16.vlgmr.msra.gmra.mrb[0].mxu1 %v782_v6 }
 0x20b   : > { %1234 = vmatprep.mubr.bf16.mxu0 %v785_v7  ;;  %1285 = vmatprep.mubr.bf16.mxu1 %v785_v7 }
 0x212   : > { %1235 = vmatmul.mubr.bf16.gmra.mrb[4].mxu0 %v784_v9  ;;  %1286 = vmatmul.mubr.bf16.gmra.mrb[4].mxu1 %v784_v9 }
 0x2dd   : > { %v1226_v21 = vpop.f32.mrb[0].mxu0  ;;  %v1277_v23 = vpop.f32.mrb[0].mxu1 }
 0x2de   : > { %v1227_v24 = vadd.f32 %v1226_v21, %v855_v17  ;;  %v1278_v25 = vadd.f32 %v1277_v23, %v863_v18  ;;  %v1228_v26 = vpop.f32.mrb[1].mxu0  ;;  %v1279_v27 = vpop.f32.mrb[1].mxu1 }
 0x2df   : > { %v1229_v28 = vadd.f32 %v1228_v26, %v859_v19  ;;  %v1280_v29 = vadd.f32 %v1279_v27, %v867_v20  ;;  %v1230_v30 = vpop.f32.mrb[2].mxu0  ;;  %v1281_v31 = vpop.f32.mrb[2].mxu1 }
 0x2e0   : > { %vm1294_vm0 = vcmp.gt.f32.partialorder %v1227_v24, 0.0  ;;  %v1308_v32 = vmul.f32 %v5179_v22, %v1227_v24  ;;  %v1232_v33 = vpop.f32.mrb[3].mxu0  ;;  %v1283_v34 = vpop.f32.mrb[3].mxu1  ;;  %v1310_v35 = vmul.f32 %v5179_v22, %v1278_v25  ;;  %vm1296_vm2 = vcmp.gt.f32.partialorder %v1278_v25, 0.0 }
 0x2e1   : > { %vm1295_vm1 = vcmp.gt.f32.partialorder %v1229_v28, 0.0  ;;  %v1309_v36 = vmul.f32 %v5179_v22, %v1229_v28  ;;  %v1231_v38 = vadd.f32 %v1230_v30, %v855_v17  ;;  %v1311_v40 = vmul.f32 %v5179_v22, %v1280_v29 }
 0x2e2   : > { %v5184_v37 = vsel %vm1294_vm0, %v1227_v24, %v1308_v32  ;;  %v1233_v41 = vadd.f32 %v1232_v33, %v859_v19  ;;  %vm1297_vm3 = vcmp.gt.f32.partialorder %v1280_v29, 0.0  ;;  %v5191_v43 = vsel %vm1296_vm2, %v1278_v25, %v1310_v35 }
 0x2e3   : > { %v5186_v39 = vsel %vm1295_vm1, %v1229_v28, %v1309_v36  ;;  %v1312_v44 = vmul.f32 %v5179_v22, %v1231_v38  ;;  %v1282_v45 = vadd.f32 %v1281_v31, %v863_v18  ;;  %vm1298_vm4 = vcmp.gt.f32.partialorder %v1231_v38, 0.0 }
 0x2e4   : > { %v1332_v42 = vadd.f32 %v5186_v39, %v5184_v37  ;;  %v1323_v52 = vsel %vm1297_vm3, %v1280_v29, %v1311_v40  ;;  %v1313_v53 = vmul.f32 %v5179_v22, %v1233_v41  ;;  %v1284_v54 = vadd.f32 %v1283_v34, %v867_v20 }
 0x2e5   : > { %v1236_v46 = vpop.f32.mrb[4].mxu0  ;;  %v1287_v47 = vpop.f32.mrb[4].mxu1  ;;  %vm1299_vm5 = vcmp.gt.f32.partialorder %v1233_v41, 0.0  ;;  %v1324_v61 = vsel %vm1298_vm4, %v1231_v38, %v1312_v44  ;;  %v1314_v62 = vmul.f32 %v5179_v22, %v1282_v45  ;;  %vm1300_vm6 = vcmp.gt.f32.partialorder %v1282_v45, 0.0 }
 0x2e6   : > { %v1333_v48 = vadd.f32 %v1332_v42, %v5191_v43  ;;  %v1237_v49 = vadd.f32 %v1236_v46, %v855_v17  ;;  %v1238_v50 = vpop.f32.mrb[5].mxu0  ;;  %v1289_v51 = vpop.f32.mrb[5].mxu1  ;;  %v1288_v1 = vadd.f32 %v1287_v47, %v863_v18  ;;  %v1325_v2 = vsel %vm1299_vm5, %v1233_v41, %v1313_v53 }
 0x2e7   : > { %v1240_v55 = vpop.f32.mrb[6].mxu0  ;;  %v1291_v56 = vpop.f32.mrb[6].mxu1  ;;  %v1239_v58 = vadd.f32 %v1238_v50, %v859_v19  ;;  %v1315_v3 = vmul.f32 %v5179_v22, %v1284_v54  ;;  %vm1301_vm8 = vcmp.gt.f32.partialorder %v1284_v54, 0.0  ;;  %v1290_v6 = vadd.f32 %v1289_v51, %v867_v20 }
 0x2e8   : > { %v1334_v57 = vadd.f32 %v1333_v48, %v1323_v52  ;;  %v1241_v59 = vpop.f32.mrb[7].mxu0  ;;  %v1292_v60 = vpop.f32.mrb[7].mxu1  ;;  %v1316_v0 = vmul.f32 %v5179_v22, %v1237_v49  ;;  %vm1302_vm7 = vcmp.gt.f32.partialorder %v1237_v49, 0.0  ;;  %v1326_v7 = vsel %vm1300_vm6, %v1282_v45, %v1314_v62 }
 0x2e9   : > { %v1317_v5 = vmul.f32 %v5179_v22, %v1239_v58  ;;  %vm1303_vm9 = vcmp.gt.f32.partialorder %v1239_v58, 0.0  ;;  %v1318_v10 = vmul.f32 %v5179_v22, %v1288_v1  ;;  %v1327_v11 = vsel %vm1301_vm8, %v1284_v54, %v1315_v3 }
 0x2ea   : > { %v1335_v63 = vadd.f32 %v1334_v57, %v1324_v61  ;;  %v1328_v9 = vsel %vm1302_vm7, %v1237_v49, %v1316_v0  ;;  %vm1304_vm11 = vcmp.gt.f32.partialorder %v1288_v1, 0.0  ;;  %v1319_v18 = vmul.f32 %v5179_v22, %v1290_v6 }
 0x2eb   : > { %v1329_v17 = vsel %vm1303_vm9, %v1239_v58, %v1317_v5  ;;  %v1340_v19 = vsel %vm1339_vm10, %v1328_v9, 0.0  ;;  %vm1305_vm12 = vcmp.gt.f32.partialorder %v1290_v6, 0.0  ;;  %v1330_v21 = vsel %vm1304_vm11, %v1288_v1, %v1318_v10 }
 0x2ec   : > { %v1336_v4 = vadd.f32 %v1335_v63, %v1325_v2  ;;  %v1342_v20 = vsel %vm1339_vm10, %v1329_v17, 0.0  ;;  %v1331_v24 = vsel %vm1305_vm12, %v1290_v6, %v1319_v18  ;;  %v1344_v26 = vsel %vm1339_vm10, %v1330_v21, 0.0 }
 0x2ed   : > { %v1346_v28 = vsel %vm1339_vm10, %v1331_v24, 0.0 }
 0x2ee   : > { %v1337_v8 = vadd.f32 %v1336_v4, %v1326_v7 }
 0x2f0   : > { %v1338_v14 = vadd.f32 %v1337_v8, %v1327_v11 }
 0x2f2   : > { %v1341_v23 = vadd.f32 %v1340_v19, %v1338_v14 }
 0x2f4   : > { %v1343_v25 = vadd.f32 %v1342_v20, %v1341_v23 }
 0x2f6   : > { %v1345_v27 = vadd.f32 %v1344_v26, %v1343_v25  ;;  %v1425_v26 = vld [vmem:[#allocation12] sm:$0xf] }
 0x2f8   : > { %v1347_v29 = vadd.f32 %v1346_v28, %v1345_v27  ;;  %v1459_v27 = vld [vmem:[#allocation13] sm:$0xf]  ;;  %v1546_v28 = vld [vmem:[#allocation15] ss:$4 sm:$0xf] }
 0x2fa   : > { %1348 = vadd.xlane.f32.xlu0 %v1347_v29 }
 0x387   : > { %v1349_v30 = vpop.xlane.xlu0 %1348 }
 0x388   : > { %v1350_v31 = vrot.slane %v1349_v30, 4 }
 0x38a   : > { %v1351_v32 = vadd.f32 %v1350_v31, %v1349_v30  ;;  %v1430_v30 = vrot.slane %v1425_v26, %v5167_v12  ;;  %v1434_v31 = vrot.slane %v1425_v26, %v5171_v15 }
 0x38c   : > { %v1352_v22 = vrot.slane %v1351_v32, 2 }
 0x38e   : > { %v1353_v33 = vadd.f32 %v1352_v22, %v1351_v32  ;;  %v1438_v32 = vrot.slane %v1425_v26, %v5169_v13  ;;  %v1442_v22 = vrot.slane %v1425_v26, %v5173_v16 }
 0x390   : > { %v1354_v34 = vrot.slane %v1353_v33, 1 }
 0x392   : > { %v1355_v35 = vadd.f32 %v1354_v34, %v1353_v33  ;;  %v1464_v33 = vrot.slane %v1459_v27, %v5167_v12  ;;  %v1468_v34 = vrot.slane %v1459_v27, %v5171_v15 }
 0x394   : > { %3554 = vpush %v1355_v35  ;;  %v1472_v35 = vrot.slane %v1459_v27, %v5169_v13 }
 0x3c5   : > { %s3555_s0 = spop %3554 }
 0x3c6   : > { %s1357_s16 = smul.f32 0.000114889706, %s3555_s0 }
 0x3c8   : > { %v1358_v36 = vstv %s1357_s16  ;;  %s5582_s16 = scalar_lea.vmem [#allocation28], %s5115_s21 }
 0x3c9   : > { %v5207_v38 = vsub.f32 %v5184_v37, %v1358_v36  ;;  %v5210_v40 = vsub.f32 %v5186_v39, %v1358_v36  ;;  %v5213_v41 = vsub.f32 %v5191_v43, %v1358_v36  ;;  %v5219_v45 = vsub.f32 %v1323_v52, %v1358_v36 }
 0x3ca   : > { %v5221_v46 = vsub.f32 %v1324_v61, %v1358_v36  ;;  %v5225_v48 = vsub.f32 %v1325_v2, %v1358_v36  ;;  %v5229_v49 = vsub.f32 %v1326_v7, %v1358_v36  ;;  %v1367_v52 = vsub.f32 %v1328_v9, %v1358_v36 }
 0x3cb   : > { %v1371_v42 = vmul.f32 %v5207_v38, %v5207_v38  ;;  %v1372_v44 = vmul.f32 %v5210_v40, %v5210_v40  ;;  %v1373_v37 = vmul.f32 %v5213_v41, %v5213_v41  ;;  %v1374_v39 = vmul.f32 %v5219_v45, %v5219_v45 }
 0x3cc   : > { %v1375_v50 = vmul.f32 %v5221_v46, %v5221_v46  ;;  %v5233_v53 = vsub.f32 %v1327_v11, %v1358_v36  ;;  %v1376_v54 = vmul.f32 %v5225_v48, %v5225_v48  ;;  %v1368_v56 = vsub.f32 %v1329_v17, %v1358_v36 }
 0x3cd   : > { %v1383_v47 = vadd.f32 %v1372_v44, %v1371_v42  ;;  %v1377_v57 = vmul.f32 %v5229_v49, %v5229_v49  ;;  %v1369_v59 = vsub.f32 %v1330_v21, %v1358_v36  ;;  %v1379_v60 = vmul.f32 %v1367_v52, %v1367_v52 }
 0x3ce   : > { %v1378_v61 = vmul.f32 %v5233_v53, %v5233_v53  ;;  %v1370_v63 = vsub.f32 %v1331_v24, %v1358_v36  ;;  %v1380_v0 = vmul.f32 %v1368_v56, %v1368_v56  ;;  %v1476_v36 = vrot.slane %v1459_v27, %v5173_v16 }
 0x3cf   : > { %v1384_v43 = vadd.f32 %v1383_v47, %v1373_v37  ;;  %v1381_v2 = vmul.f32 %v1369_v59, %v1369_v59  ;;  %v1390_v3 = vsel %vm1339_vm10, %v1379_v60, 0.0  ;;  %v5254_v42 = vrot.slane %v1546_v28, %v5167_v12 }
 0x3d0   : > { %v1382_v5 = vmul.f32 %v1370_v63, %v1370_v63  ;;  %v1392_v6 = vsel %vm1339_vm10, %v1380_v0, 0.0 }
 0x3d1   : > { %v1385_v51 = vadd.f32 %v1384_v43, %v1374_v39  ;;  %v1394_v8 = vsel %vm1339_vm10, %v1381_v2, 0.0  ;;  %v1581_v43 = vld [vmem:[#allocation15 + $0x1] ss:$4 sm:$0xf] }
 0x3d2   : > { %v1396_v10 = vsel %vm1339_vm10, %v1382_v5, 0.0  ;;  %v5280_v5 = vrot.slane %v1581_v43, %v5169_v13 }
 0x3d3   : > { %v1386_v55 = vadd.f32 %v1385_v51, %v1375_v50 }
 0x3d5   : > { %v1387_v58 = vadd.f32 %v1386_v55, %v1376_v54 }
 0x3d7   : > { %v1388_v62 = vadd.f32 %v1387_v58, %v1377_v57 }
 0x3d9   : > { %v1389_v1 = vadd.f32 %v1388_v62, %v1378_v61 }
 0x3db   : > { %v1391_v4 = vadd.f32 %v1390_v3, %v1389_v1 }
 0x3dd   : > { %v1393_v7 = vadd.f32 %v1392_v6, %v1391_v4  ;;  %v5277_v4 = vrot.slane %v1581_v43, %v5171_v15  ;;  %v5283_v6 = vrot.slane %v1581_v43, %v5173_v16 }
 0x3df   : > { %v1395_v9 = vadd.f32 %v1394_v8, %v1393_v7 }
 0x3e1   : > { %v1397_v11 = vadd.f32 %v1396_v10, %v1395_v9 }
 0x3e3   : > { %1398 = vadd.xlane.f32.xlu0 %v1397_v11 }
 0x470   : > { %v1399_v14 = vpop.xlane.xlu0 %1398 }
 0x471   : > { %v1400_v17 = vrot.slane %v1399_v14, 4 }
 0x473   : > { %v1401_v18 = vadd.f32 %v1400_v17, %v1399_v14  ;;  %v1764_v14 = vld [vmem:[#allocation16] sm:$0xf] }
 0x475   : > { %v1402_v19 = vrot.slane %v1401_v18, 2 }
 0x477   : > { %v1403_v21 = vadd.f32 %v1402_v19, %v1401_v18 }
 0x479   : > { %v1404_v23 = vrot.slane %v1403_v21, 1 }
 0x47b   : > { %v1405_v20 = vadd.f32 %v1404_v23, %v1403_v21 }
 0x47d   : > { %3556 = vpush %v1405_v20 }
 0x4ae   : > { %s3557_s1 = spop %3556 }
 0x4af   : > { %s1407_s7 = smul.f32 0.000114889706, %s3557_s1  ;;  %s5586_s1 = scalar_lea.vmem [#allocation27], %s5115_s21 }
 0x4b0   : > { %s3065_s21 = sshll.u32 %s5582_s16, 4  ;;  %s5602_s21 = int_to_ptr.vmem [resolvable:$true] %s3065_s21 }
 0x4b1   : > { %s1408_s19 = sadd.f32 1e-08, %s1407_s7  ;;  %s3049_s7 = sshll.u32 %s5586_s1, 4  ;;  %s5604_s7 = int_to_ptr.vmem [resolvable:$true] %s3049_s7 }
 0x4b3   : > { %v1409_v24 = vstv %s1408_s19  ;;  %s3566_s19 = smul.u32 768, %s5767_s6 }
 0x4b4   : > { %4039 = vrsqrt.f32 %v1409_v24 }
 0x4be   : > { %v4040_v25 = vpop.eup %4039 }
 0x4bf   : > { %3558 = vpush %v4040_v25 }
 0x4f0   : > { %s3559_s25 = spop %3558 }
 0x4f1   : > { %v1412_v29 = vstv %s3559_s25  ;;  %s5782_s25 = sld [smem:[#allocation53_spill]] }
 0x4f2   : > { %v1413_v44 = vmul.f32 %v1412_v29, %v5207_v38  ;;  %v1414_v37 = vmul.f32 %v1412_v29, %v5210_v40  ;;  %v1417_v47 = vmul.f32 %v1412_v29, %v5221_v46  ;;  %v1418_v39 = vmul.f32 %v1412_v29, %v5225_v48 }
 0x4f3   : > { %v1415_v50 = vmul.f32 %v1412_v29, %v5213_v41  ;;  %v1419_v51 = vmul.f32 %v1412_v29, %v5229_v49  ;;  %v1421_v54 = vmul.f32 %v1412_v29, %v1367_v52  ;;  %v1422_v55 = vmul.f32 %v1412_v29, %v1368_v56  ;;  %v1673_v56 = vld [vmem:[#allocation15 + $0x2] ss:$4 sm:$0xf] }
 0x4f4   : > { %v1416_v57 = vmul.f32 %v1412_v29, %v5219_v45  ;;  %v1420_v58 = vmul.f32 %v1412_v29, %v5233_v53  ;;  %v1423_v60 = vmul.f32 %v1412_v29, %v1369_v59  ;;  %v1424_v61 = vmul.f32 %v1412_v29, %v1370_v63 }
 0x4f5   : > { %v5265_v38 = vrot.slane %v1546_v28, %v5171_v15  ;;  %v5268_v40 = vrot.slane %v1546_v28, %v5169_v13  ;;  %v5271_v46 = vrot.slane %v1546_v28, %v5173_v16  ;;  %v5274_v41 = vrot.slane %v1581_v43, %v5167_v12 }
 0x4f6   : > { %v1447_v48 = vmul.f32 %v1430_v30, %v1413_v44  ;;  %v1448_v49 = vmul.f32 %v1434_v31, %v1414_v37  ;;  %v1451_v52 = vmul.f32 %v1430_v30, %v1417_v47  ;;  %v1452_v45 = vmul.f32 %v1434_v31, %v1418_v39 }
 0x4f7   : > { %v1449_v53 = vmul.f32 %v1438_v32, %v1415_v50  ;;  %v1453_v59 = vmul.f32 %v1438_v32, %v1419_v51  ;;  %v1455_v62 = vmul.f32 %v1430_v30, %v1421_v54  ;;  %v1456_v63 = vmul.f32 %v1434_v31, %v1422_v55 }
 0x4f8   : > { %v1450_v0 = vmul.f32 %v1442_v22, %v1416_v57  ;;  %v1454_v1 = vmul.f32 %v1442_v22, %v1420_v58  ;;  %v1457_v2 = vmul.f32 %v1438_v32, %v1423_v60  ;;  %v1458_v3 = vmul.f32 %v1442_v22, %v1424_v61 }
 0x4f9   : > { %v5286_v7 = vrot.slane %v1673_v56, %v5167_v12  ;;  %v1481_v8 = vadd.f32 %v1464_v33, %v1447_v48  ;;  %v1482_v9 = vadd.f32 %v1468_v34, %v1448_v49  ;;  %v1485_v10 = vadd.f32 %v1464_v33, %v1451_v52 }
 0x4fa   : > { %v1486_v11 = vadd.f32 %v1468_v34, %v1452_v45  ;;  %v1483_v17 = vadd.f32 %v1472_v35, %v1449_v53  ;;  %v1487_v18 = vadd.f32 %v1472_v35, %v1453_v59  ;;  %v1489_v19 = vadd.f32 %v1464_v33, %v1455_v62 }
 0x4fb   : > { %v1490_v21 = vadd.f32 %v1468_v34, %v1456_v63  ;;  %v1484_v23 = vadd.f32 %v1476_v36, %v1450_v0  ;;  %v1488_v20 = vadd.f32 %v1476_v36, %v1454_v1  ;;  %v1491_v24 = vadd.f32 %v1472_v35, %v1457_v2 }
 0x4fc   : > { %v1492_v25 = vadd.f32 %v1476_v36, %v1458_v3  ;;  %v5291_v26 = vrot.slane %v1673_v56, %v5171_v15  ;;  %v5294_v27 = vrot.slane %v1673_v56, %v5169_v13  ;;  %v5297_v28 = vrot.slane %v1673_v56, %v5173_v16 }
 0x4fd   : > { %v5300_v29 = vrot.slane %v1764_v14, %v5167_v12  ;;  %v1505_v30 = vrot.slane %v1481_v8, 7  ;;  %v1506_v31 = vrot.slane %v1482_v9, 7  ;;  %v1509_v32 = vrot.slane %v1485_v10, 7 }
 0x4fe   : > { %v1511_v22 = vrot.slane %v1486_v11, 7  ;;  %v1507_v33 = vrot.slane %v1483_v17, 7  ;;  %v1513_v34 = vrot.slane %v1487_v18, 7  ;;  %v1517_v35 = vrot.slane %v1489_v19, 7 }
 0x4ff   : > { %v1519_v36 = vrot.slane %v1490_v21, 7  ;;  %v1508_v44 = vrot.slane %v1484_v23, 7  ;;  %v1515_v37 = vrot.slane %v1488_v20, 7  ;;  %v1521_v47 = vrot.slane %v1491_v24, 7 }
 0x500   : > { %v1523_v39 = vrot.slane %v1492_v25, 7  ;;  %v5303_v43 = vrot.slane %v1764_v14, %v5171_v15  ;;  %v5306_v50 = vrot.slane %v1764_v14, %v5169_v13  ;;  %v5309_v51 = vrot.slane %v1764_v14, %v5173_v16 }
 0x501   : > { %v5312_v54 = vstv %s5288_s5  ;;  %v1510_v55 = vsel %vm1339_vm10, %v1505_v30, %v1509_v32  ;;  %v1512_v57 = vsel %vm1339_vm10, %v1506_v31, %v1511_v22  ;;  %v1537_v58 = vsel %vm1339_vm10, 0.0, %v1505_v30  ;;  %s5611_s5 = scalar_lea.hbm %s5782_s25, %s3566_s19 }
 0x502   : > { %v1538_v60 = vsel %vm1339_vm10, 0.0, %v1506_v31  ;;  %v1514_v61 = vsel %vm1339_vm10, %v1507_v33, %v1513_v34  ;;  %v1518_v48 = vsel %vm1339_vm10, %v1509_v32, %v1517_v35  ;;  %v1520_v49 = vsel %vm1339_vm10, %v1511_v22, %v1519_v36 }
 0x503   : > { %v1539_v52 = vsel %vm1339_vm10, 0.0, %v1507_v33  ;;  %v5323_v45 = vsel %vm1339_vm10, %v1508_v44, %v1515_v37  ;;  %v1522_v56 = vsel %vm1339_vm10, %v1513_v34, %v1521_v47  ;;  %v1524_v53 = vsel %vm1339_vm10, %v1515_v37, %v1523_v39 }
 0x504   : > { %v1540_v59 = vsel %vm1339_vm10, 0.0, %v1508_v44  ;;  %v1603_v62 = vmul.f32 %v5274_v41, %v1537_v58  ;;  %v1604_v63 = vmul.f32 %v5277_v4, %v1538_v60  ;;  %v1607_v0 = vmul.f32 %v5274_v41, %v1510_v55 }
 0x505   : > { %v5332_v1 = vmul.f32 %v5277_v4, %v1512_v57  ;;  %v5335_v2 = vsel %vm1541_vm13, %v1518_v48, 0.0  ;;  %v5338_v3 = vsel %vm1541_vm13, %v1520_v49, 0.0  ;;  %v1605_v8 = vmul.f32 %v5280_v5, %v1539_v52 }
 0x506   : > { %v5342_v9 = vmul.f32 %v5280_v5, %v1514_v61  ;;  %v5345_v10 = vsel %vm1541_vm13, %v1522_v56, 0.0  ;;  %v5348_v11 = vsel %vm1541_vm13, %v1524_v53, 0.0  ;;  %v1568_v14 = vmul.f32 %v5254_v42, %v1537_v58 }
 0x507   : > { %v1569_v17 = vmul.f32 %v5265_v38, %v1538_v60  ;;  %v1570_v18 = vmul.f32 %v5268_v40, %v1539_v52  ;;  %v1571_v19 = vmul.f32 %v5271_v46, %v1540_v59  ;;  %v1606_v21 = vmul.f32 %v5283_v6, %v1540_v59 }
 0x508   : > { %v5357_v23 = vmul.f32 %v5283_v6, %v5323_v45  ;;  %v1628_v20 = vrot.slane %v1603_v62, 1  ;;  %v1629_v24 = vrot.slane %v1607_v0, 1  ;;  %v1631_v25 = vrot.slane %v1604_v63, 1 }
 0x509   : > { %v1632_v30 = vrot.slane %v5332_v1, 1  ;;  %v1572_v31 = vmul.f32 %v5254_v42, %v1510_v55  ;;  %v5363_v32 = vmul.f32 %v5274_v41, %v5335_v2  ;;  %v1634_v22 = vrot.slane %v1605_v8, 1 }
 0x50a   : > { %v1635_v33 = vrot.slane %v5342_v9, 1  ;;  %v1573_v34 = vmul.f32 %v5265_v38, %v1512_v57  ;;  %v1574_v35 = vmul.f32 %v5268_v40, %v1514_v61  ;;  %v1695_v36 = vmul.f32 %v5286_v7, %v1537_v58 }
 0x50b   : > { %v1696_v44 = vmul.f32 %v5291_v26, %v1538_v60  ;;  %v5372_v37 = vmul.f32 %v5277_v4, %v5338_v3  ;;  %v5376_v47 = vmul.f32 %v5280_v5, %v5345_v10  ;;  %v1699_v41 = vmul.f32 %v5286_v7, %v1510_v55 }
 0x50c   : > { %v1700_v39 = vmul.f32 %v5291_v26, %v1512_v57  ;;  %v1630_v48 = vsel %vm1627_vm14, %v1628_v20, %v1629_v24  ;;  %v1633_v49 = vsel %vm1627_vm14, %v1631_v25, %v1632_v30  ;;  %v1637_v56 = vrot.slane %v1606_v21, 1 }
 0x50d   : > { %v1638_v58 = vrot.slane %v5357_v23, 1  ;;  %v1636_v60 = vsel %vm1627_vm14, %v1634_v22, %v1635_v33  ;;  %v1640_v4 = vrot.slane %v5363_v32, 1  ;;  %v1697_v53 = vmul.f32 %v5294_v27, %v1539_v52 }
 0x50e   : > { %v1701_v5 = vmul.f32 %v5294_v27, %v1514_v61  ;;  %v1720_v62 = vrot.slane %v1695_v36, 2  ;;  %v1721_v63 = vrot.slane %v1699_v41, 2  ;;  %v1723_v55 = vrot.slane %v1696_v44, 2 }
 0x50f   : > { %v1724_v0 = vrot.slane %v1700_v39, 2  ;;  %v1660_v57 = vadd.f32 %v1630_v48, %v1568_v14  ;;  %v1661_v1 = vadd.f32 %v1633_v49, %v1569_v17  ;;  %v1698_v8 = vmul.f32 %v5297_v28, %v1540_v59 }
 0x510   : > { %v5390_v9 = vmul.f32 %v5297_v28, %v5323_v45  ;;  %v5394_v21 = vmul.f32 %v5283_v6, %v5348_v11  ;;  %v1639_v52 = vsel %vm1627_vm14, %v1637_v56, %v1638_v58  ;;  %v1642_v61 = vrot.slane %v5372_v37, 1 }
 0x511   : > { %v1644_v23 = vrot.slane %v5376_v47, 1  ;;  %v1641_v20 = vsel %vm1627_vm14, %v1629_v24, %v1640_v4  ;;  %v1703_v14 = vmul.f32 %v5286_v7, %v5335_v2  ;;  %v1726_v59 = vrot.slane %v1697_v53, 2 }
 0x512   : > { %v1727_v17 = vrot.slane %v1701_v5, 2  ;;  %v1662_v25 = vadd.f32 %v1636_v60, %v1570_v18  ;;  %v1704_v32 = vmul.f32 %v5291_v26, %v5338_v3  ;;  %v1722_v6 = vsel %vm1719_vm15, %v1720_v62, %v1721_v63 }
 0x513   : > { %v1725_v22 = vsel %vm1719_vm15, %v1723_v55, %v1724_v0  ;;  %v1729_v36 = vrot.slane %v1698_v8, 2  ;;  %v1730_v44 = vrot.slane %v5390_v9, 2  ;;  %v1752_v37 = vadd.f32 %v1722_v6, %v1660_v57 }
 0x514   : > { %v1753_v47 = vadd.f32 %v1725_v22, %v1661_v1  ;;  %v1575_v24 = vmul.f32 %v5271_v46, %v5323_v45  ;;  %v1646_v7 = vrot.slane %v5394_v21, 1  ;;  %v1663_v41 = vadd.f32 %v1639_v52, %v1571_v19 }
 0x515   : > { %v1705_v18 = vmul.f32 %v5294_v27, %v5345_v10  ;;  %v1643_v26 = vsel %vm1627_vm14, %v1632_v30, %v1642_v61  ;;  %v1645_v39 = vsel %vm1627_vm14, %v1635_v33, %v1644_v23  ;;  %v1728_v48 = vsel %vm1719_vm15, %v1726_v59, %v1727_v17 }
 0x516   : > { %v1732_v49 = vrot.slane %v1703_v14, 2  ;;  %v1664_v56 = vadd.f32 %v1641_v20, %v1572_v31  ;;  %v1706_v60 = vmul.f32 %v5297_v28, %v5348_v11  ;;  %v1734_v53 = vrot.slane %v1704_v32, 2 }
 0x517   : > { %v1754_v5 = vadd.f32 %v1728_v48, %v1662_v25  ;;  %v1576_v45 = vmul.f32 %v5254_v42, %v5335_v2  ;;  %v1731_v19 = vsel %vm1719_vm15, %v1729_v36, %v1730_v44  ;;  %v1786_v27 = vadd.f32 %v5300_v29, %v1752_v37 }
 0x518   : > { %v1787_v30 = vadd.f32 %v5303_v43, %v1753_v47  ;;  %v1577_v33 = vmul.f32 %v5265_v38, %v5338_v3  ;;  %v1665_v62 = vadd.f32 %v1643_v26, %v1573_v34  ;;  %v1736_v55 = vrot.slane %v1705_v18, 2 }
 0x519   : > { %v1755_v31 = vadd.f32 %v1731_v19, %v1663_v41  ;;  %v1647_v57 = vsel %vm1627_vm14, %v1638_v58, %v1646_v7  ;;  %v1666_v28 = vadd.f32 %v1645_v39, %v1574_v35  ;;  %v1668_v1 = vadd.f32 %v1640_v4, %v1576_v45 }
 0x51a   : > { %v1733_v8 = vsel %vm1719_vm15, %v1721_v63, %v1732_v49  ;;  %v1735_v42 = vsel %vm1719_vm15, %v1724_v0, %v1734_v53  ;;  %v1738_v2 = vrot.slane %v1706_v60, 2  ;;  %v1788_v21 = vadd.f32 %v5306_v50, %v1754_v5 }
 0x51b   : > { %v1756_v9 = vadd.f32 %v1733_v8, %v1664_v56  ;;  %vm1798_vm0 = vcmp.gt.f32.partialorder %v1786_v27, 0.0  ;;  %vm1799_vm1 = vcmp.gt.f32.partialorder %v1787_v30, 0.0  ;;  %v1812_v52 = vmul.f32 %v5312_v54, %v1786_v27 }
 0x51c   : > { %v1813_v38 = vmul.f32 %v5312_v54, %v1787_v30  ;;  %v1667_v3 = vadd.f32 %v1647_v57, %v1575_v24  ;;  %v1737_v34 = vsel %vm1719_vm15, %v1727_v17, %v1736_v55  ;;  %v1757_v58 = vadd.f32 %v1735_v42, %v1665_v62 }
 0x51d   : > { %v1789_v35 = vadd.f32 %v5309_v51, %v1755_v31  ;;  %v1578_v4 = vmul.f32 %v5268_v40, %v5345_v10  ;;  %v1579_v63 = vmul.f32 %v5271_v46, %v5348_v11  ;;  %v1669_v0 = vadd.f32 %v1642_v61, %v1577_v33 }
 0x51e   : > { %v1758_v20 = vadd.f32 %v1737_v34, %v1666_v28  ;;  %v1790_v14 = vadd.f32 %v5300_v29, %v1756_v9  ;;  %v1814_v59 = vmul.f32 %v5312_v54, %v1788_v21  ;;  %v5438_v25 = vsel %vm1798_vm0, %v1786_v27, %v1812_v52 }
 0x51f   : > { %v5440_v32 = vsel %vm1799_vm1, %v1787_v30, %v1813_v38  ;;  %v1670_v17 = vadd.f32 %v1644_v23, %v1578_v4  ;;  %v1739_v6 = vsel %vm1719_vm15, %v1730_v44, %v1738_v2  ;;  %v1760_v22 = vadd.f32 %v1732_v49, %v1668_v1 }
 0x520   : > { %vm1800_vm2 = vcmp.gt.f32.partialorder %v1788_v21, 0.0  ;;  %v1759_v36 = vadd.f32 %v1739_v6, %v1667_v3  ;;  %v1791_v40 = vadd.f32 %v5303_v43, %v1757_v58  ;;  %v1815_v46 = vmul.f32 %v5312_v54, %v1789_v35 }
 0x521   : > { %v1671_v10 = vadd.f32 %v1646_v7, %v1579_v63  ;;  %v1761_v11 = vadd.f32 %v1734_v53, %v1669_v0  ;;  %vm1801_vm3 = vcmp.gt.f32.partialorder %v1789_v35, 0.0  ;;  %v1836_v61 = vadd.f32 %v5440_v32, %v5438_v25 }
 0x522   : > { %v1792_v37 = vadd.f32 %v5306_v50, %v1758_v20  ;;  %v1816_v47 = vmul.f32 %v5312_v54, %v1790_v14  ;;  %v1826_v23 = vsel %vm1800_vm2, %v1788_v21, %v1814_v59  ;;  %v1762_v24 = vadd.f32 %v1736_v55, %v1670_v17 }
 0x523   : > { %v1794_v44 = vadd.f32 %v5300_v29, %v1760_v22  ;;  %vm1802_vm4 = vcmp.gt.f32.partialorder %v1790_v14, 0.0  ;;  %v1837_v41 = vadd.f32 %v1836_v61, %v1826_v23  ;;  %v1793_v18 = vadd.f32 %v5309_v51, %v1759_v36 }
 0x524   : > { %v1817_v26 = vmul.f32 %v5312_v54, %v1791_v40  ;;  %v1827_v7 = vsel %vm1801_vm3, %v1789_v35, %v1815_v46  ;;  %v1763_v39 = vadd.f32 %v1738_v2, %v1671_v10  ;;  %v1795_v48 = vadd.f32 %v5303_v43, %v1761_v11 }
 0x525   : > { %vm1803_vm5 = vcmp.gt.f32.partialorder %v1791_v40, 0.0  ;;  %v1838_v49 = vadd.f32 %v1837_v41, %v1827_v7  ;;  %v1818_v56 = vmul.f32 %v5312_v54, %v1792_v37  ;;  %v1828_v60 = vsel %vm1802_vm4, %v1790_v14, %v1816_v47 }
 0x526   : > { %v1796_v53 = vadd.f32 %v5306_v50, %v1762_v24  ;;  %vm1804_vm6 = vcmp.gt.f32.partialorder %v1792_v37, 0.0  ;;  %v1820_v29 = vmul.f32 %v5312_v54, %v1794_v44  ;;  %vm1806_vm7 = vcmp.gt.f32.partialorder %v1794_v44, 0.0 }
 0x527   : > { %v1839_v5 = vadd.f32 %v1838_v49, %v1828_v60  ;;  %v1819_v45 = vmul.f32 %v5312_v54, %v1793_v18  ;;  %v1829_v19 = vsel %vm1803_vm5, %v1791_v40, %v1817_v26  ;;  %v1797_v27 = vadd.f32 %v5309_v51, %v1763_v39 }
 0x528   : > { %vm1805_vm8 = vcmp.gt.f32.partialorder %v1793_v18, 0.0  ;;  %v1821_v43 = vmul.f32 %v5312_v54, %v1795_v48  ;;  %vm1807_vm9 = vcmp.gt.f32.partialorder %v1795_v48, 0.0  ;;  %v1830_v33 = vsel %vm1804_vm6, %v1792_v37, %v1818_v56 }
 0x529   : > { %v1840_v30 = vadd.f32 %v1839_v5, %v1829_v19  ;;  %v1822_v62 = vmul.f32 %v5312_v54, %v1796_v53  ;;  %v1832_v55 = vsel %vm1806_vm7, %v1794_v44, %v1820_v29  ;;  %vm1808_vm11 = vcmp.gt.f32.partialorder %v1796_v53, 0.0 }
 0x52a   : > { %v1831_v31 = vsel %vm1805_vm8, %v1793_v18, %v1819_v45  ;;  %v1823_v57 = vmul.f32 %v5312_v54, %v1797_v27  ;;  %v1833_v28 = vsel %vm1807_vm9, %v1795_v48, %v1821_v43  ;;  %vm1809_vm12 = vcmp.gt.f32.partialorder %v1797_v27, 0.0 }
 0x52b   : > { %v1841_v50 = vadd.f32 %v1840_v30, %v1830_v33  ;;  %v1843_v8 = vsel %vm1339_vm10, %v1832_v55, 0.0  ;;  %v1834_v51 = vsel %vm1808_vm11, %v1796_v53, %v1822_v62  ;;  %v1845_v2 = vsel %vm1339_vm10, %v1833_v28, 0.0 }
 0x52c   : > { %v1835_v9 = vsel %vm1809_vm12, %v1797_v27, %v1823_v57  ;;  %v1847_v52 = vsel %vm1339_vm10, %v1834_v51, 0.0  ;;  %v3847_v57 = vld [vmem:[#allocation21] ss:$8 sps:$4 sm:$0xff]  }
 0x52d   : > { %v1842_v1 = vadd.f32 %v1841_v50, %v1831_v31  ;;  %v1849_v3 = vsel %vm1339_vm10, %v1835_v9, 0.0 }
 0x52f   : > { %v1844_v42 = vadd.f32 %v1843_v8, %v1842_v1  ;;  %v3850_v1 = vld [vmem:[#allocation24] ss:$8 sps:$4 sm:$0xff]   ;;  %v3852_v8 = vld [vmem:[#allocation24 + $0x4] ss:$8 sps:$4 sm:$0xff]  }
 0x530   : > { %2916 = vmatprep.subr.bf16.mxu1 %v3852_v8  ;;  %v3922_v8 = vld [vmem:[#allocation24 + $0xc0] ss:$8 sps:$4 sm:$0xff]  }
 0x531   : > { %v1846_v21 = vadd.f32 %v1845_v2, %v1844_v42  ;;  %v3858_v42 = vld [vmem:[#allocation24 + $0x14] ss:$8 sps:$4 sm:$0xff]   ;;  %2917 = vmatpush1.bf16.msra.mxu1 %v3850_v1 }
 0x532   : > { %v3853_v2 = vld [vmem:[#allocation21 + $0x10] ss:$8 sps:$4 sm:$0xff]   ;;  %2918 = vmatprep.subr.bf16.mxu1 %v3858_v42  ;;  %v3919_v1 = vld [vmem:[#allocation21 + $0xc0] ss:$8 sps:$4 sm:$0xff]  }
 0x533   : > { %v1848_v38 = vadd.f32 %v1847_v52, %v1846_v21  ;;  %v3859_v21 = vld [vmem:[#allocation21 + $0x20] ss:$8 sps:$4 sm:$0xff]   ;;  %v3861_v52 = vld [vmem:[#allocation21 + $0x24] ss:$8 sps:$4 sm:$0xff]  }
 0x534   : > { %v3930_v42 = vld [vmem:[#allocation24 + $0xd4] ss:$8 sps:$4 sm:$0xff]  }
 0x535   : > { %v1850_v34 = vadd.f32 %v1849_v3, %v1848_v38  ;;  %v3862_v38 = vld [vmem:[#allocation24 + $0x20] ss:$8 sps:$4 sm:$0xff]   ;;  %v3864_v3 = vld [vmem:[#allocation24 + $0x24] ss:$8 sps:$4 sm:$0xff]  }
 0x537   : > { %1851 = vadd.xlane.f32.xlu1 %v1850_v34  ;;  %v3867_v34 = vld [vmem:[#allocation21 + $0x34] ss:$8 sps:$4 sm:$0xff]  }
 0x5c4   : > { %v1852_v58 = vpop.xlane.xlu1 %1851 }
 0x5c5   : > { %v1853_v54 = vrot.slane %v1852_v58, 4 }
 0x5c7   : > { %v1854_v35 = vadd.f32 %v1853_v54, %v1852_v58  ;;  %v3870_v58 = vld [vmem:[#allocation24 + $0x34] ss:$8 sps:$4 sm:$0xff]  }
 0x5c8   : > { %v3865_v54 = vld [vmem:[#allocation21 + $0x30] ss:$8 sps:$4 sm:$0xff]  }
 0x5c9   : > { %v1855_v4 = vrot.slane %v1854_v35, 2 }
 0x5cb   : > { %v1856_v63 = vadd.f32 %v1855_v4, %v1854_v35  ;;  %v3868_v35 = vld [vmem:[#allocation24 + $0x30] ss:$8 sps:$4 sm:$0xff]   ;;  %v3873_v4 = vld [vmem:[#allocation21 + $0x44] ss:$8 sps:$4 sm:$0xff]  }
 0x5cd   : > { %v1857_v0 = vrot.slane %v1856_v63, 1 }
 0x5cf   : > { %v1858_v20 = vadd.f32 %v1857_v0, %v1856_v63  ;;  %v3876_v63 = vld [vmem:[#allocation24 + $0x44] ss:$8 sps:$4 sm:$0xff]  }
 0x5d0   : > { %v3871_v0 = vld [vmem:[#allocation21 + $0x40] ss:$8 sps:$4 sm:$0xff]  }
 0x5d1   : > { %3560 = vpush %v1858_v20  ;;  %v3874_v20 = vld [vmem:[#allocation24 + $0x40] ss:$8 sps:$4 sm:$0xff]  }
 0x602   : > { %s3561_s10 = spop %3560 }
 0x603   : > { %s1860_s28 = smul.f32 0.000114889706, %s3561_s10 }
 0x605   : > { %v1861_v14 = vstv %s1860_s28 }
 0x606   : > { %v5466_v59 = vsub.f32 %v5438_v25, %v1861_v14  ;;  %v5469_v17 = vsub.f32 %v5440_v32, %v1861_v14  ;;  %v5471_v6 = vsub.f32 %v1826_v23, %v1861_v14  ;;  %v5477_v40 = vsub.f32 %v1827_v7, %v1861_v14 }
 0x607   : > { %v5479_v46 = vsub.f32 %v1828_v60, %v1861_v14  ;;  %v5483_v11 = vsub.f32 %v1829_v19, %v1861_v14  ;;  %v5487_v37 = vsub.f32 %v1830_v33, %v1861_v14  ;;  %v5491_v24 = vsub.f32 %v1832_v55, %v1861_v14 }
 0x608   : > { %v1874_v22 = vmul.f32 %v5466_v59, %v5466_v59  ;;  %v1875_v36 = vmul.f32 %v5469_v17, %v5469_v17  ;;  %v1876_v10 = vmul.f32 %v5471_v6, %v5471_v6  ;;  %v1877_v32 = vmul.f32 %v5477_v40, %v5477_v40 }
 0x609   : > { %v1878_v47 = vmul.f32 %v5479_v46, %v5479_v46  ;;  %v5493_v44 = vsub.f32 %v1831_v31, %v1861_v14  ;;  %v1879_v41 = vmul.f32 %v5483_v11, %v5483_v11  ;;  %v5497_v26 = vsub.f32 %v1833_v28, %v1861_v14  ;;  %v3849_v28 = vld [vmem:[#allocation21 + $0x4] ss:$8 sps:$4 sm:$0xff]  }
 0x60a   : > { %v1886_v25 = vadd.f32 %v1875_v36, %v1874_v22  ;;  %v1880_v7 = vmul.f32 %v5487_v37, %v5487_v37  ;;  %v5501_v48 = vsub.f32 %v1834_v51, %v1861_v14  ;;  %v1882_v49 = vmul.f32 %v5491_v24, %v5491_v24  ;;  %v3855_v51 = vld [vmem:[#allocation21 + $0x14] ss:$8 sps:$4 sm:$0xff]   ;;  %2400 = vmatprep.subr.bf16.mxu0 %v3849_v28  ;;  %v3877_v36 = vld [vmem:[#allocation21 + $0x50] ss:$8 sps:$4 sm:$0xff]  }
 0x60b   : > { %v1881_v56 = vmul.f32 %v5493_v44, %v5493_v44  ;;  %v5507_v53 = vsub.f32 %v1835_v9, %v1861_v14  ;;  %v1883_v29 = vmul.f32 %v5497_v26, %v5497_v26  ;;  %2401 = vmatpush1.bf16.msra.mxu0 %v3847_v57  ;;  %v3856_v9 = vld [vmem:[#allocation24 + $0x10] ss:$8 sps:$4 sm:$0xff]   ;;  %v3882_v22 = vld [vmem:[#allocation24 + $0x54] ss:$8 sps:$4 sm:$0xff]   ;;  %v3921_v57 = vld [vmem:[#allocation21 + $0xc4] ss:$8 sps:$4 sm:$0xff]  }
 0x60c   : > { %v1887_v61 = vadd.f32 %v1886_v25, %v1876_v10  ;;  %v1884_v45 = vmul.f32 %v5501_v48, %v5501_v48  ;;  %v1893_v19 = vsel %vm1339_vm10, %v1882_v49, 0.0  ;;  %2402 = vmatprep.subr.bf16.mxu0 %v3855_v51  ;;  %2919 = vmatpush1.bf16.msra.mxu1 %v3856_v9  ;;  %v3879_v14 = vld [vmem:[#allocation21 + $0x54] ss:$8 sps:$4 sm:$0xff]   ;;  %v3885_v25 = vld [vmem:[#allocation21 + $0x64] ss:$8 sps:$4 sm:$0xff]  }
 0x60d   : > { %v1885_v43 = vmul.f32 %v5507_v53, %v5507_v53  ;;  %v1895_v30 = vsel %vm1339_vm10, %v1883_v29, 0.0  ;;  %2920 = vmatprep.subr.bf16.mxu1 %v3864_v3  ;;  %v3880_v10 = vld [vmem:[#allocation24 + $0x50] ss:$8 sps:$4 sm:$0xff]   ;;  %v3900_v49 = vld [vmem:[#allocation24 + $0x84] ss:$8 sps:$4 sm:$0xff]  }
 0x60e   : > { %v1888_v23 = vadd.f32 %v1887_v61, %v1877_v32  ;;  %v1897_v62 = vsel %vm1339_vm10, %v1884_v45, 0.0  ;;  %v3888_v32 = vld [vmem:[#allocation24 + $0x64] ss:$8 sps:$4 sm:$0xff]   ;;  %v3903_v29 = vld [vmem:[#allocation21 + $0x94] ss:$8 sps:$4 sm:$0xff]  }
 0x60f   : > { %v1899_v50 = vsel %vm1339_vm10, %v1885_v43, 0.0  ;;  %2403 = vmatpush1.bf16.msra.mxu0 %v3853_v2  ;;  %v3883_v61 = vld [vmem:[#allocation21 + $0x60] ss:$8 sps:$4 sm:$0xff]   ;;  %v3901_v45 = vld [vmem:[#allocation21 + $0x90] ss:$8 sps:$4 sm:$0xff]  }
 0x610   : > { %v1889_v18 = vadd.f32 %v1888_v23, %v1878_v47  ;;  %2404 = vmatprep.subr.bf16.mxu0 %v3861_v52  ;;  %2921 = vmatpush1.bf16.msra.mxu1 %v3862_v38  ;;  %v3886_v47 = vld [vmem:[#allocation24 + $0x60] ss:$8 sps:$4 sm:$0xff]   ;;  %v3891_v23 = vld [vmem:[#allocation21 + $0x74] ss:$8 sps:$4 sm:$0xff]   ;;  %v3912_v43 = vld [vmem:[#allocation24 + $0xa4] ss:$8 sps:$4 sm:$0xff]  }
 0x611   : > { %2922 = vmatprep.subr.bf16.mxu1 %v3870_v58  ;;  %v3924_v28 = vld [vmem:[#allocation24 + $0xc4] ss:$8 sps:$4 sm:$0xff]   ;;  %v3927_v51 = vld [vmem:[#allocation21 + $0xd4] ss:$8 sps:$4 sm:$0xff]  }
 0x612   : > { %v1890_v39 = vadd.f32 %v1889_v18, %v1879_v41  ;;  %v3894_v41 = vld [vmem:[#allocation24 + $0x74] ss:$8 sps:$4 sm:$0xff]   ;;  %v3928_v9 = vld [vmem:[#allocation24 + $0xd0] ss:$8 sps:$4 sm:$0xff]   ;;  %v3933_v3 = vld [vmem:[#allocation21 + $0xe4] ss:$8 sps:$4 sm:$0xff]  }
 0x613   : > { %2405 = vmatpush1.bf16.msra.mxu0 %v3859_v21  ;;  %v3889_v18 = vld [vmem:[#allocation21 + $0x70] ss:$8 sps:$4 sm:$0xff]   ;;  %v3931_v38 = vld [vmem:[#allocation21 + $0xe0] ss:$8 sps:$4 sm:$0xff]  }
 0x614   : > { %v1891_v60 = vadd.f32 %v1890_v39, %v1880_v7  ;;  %2406 = vmatprep.subr.bf16.mxu0 %v3867_v34  ;;  %2923 = vmatpush1.bf16.msra.mxu1 %v3868_v35  ;;  %v3892_v7 = vld [vmem:[#allocation24 + $0x70] ss:$8 sps:$4 sm:$0xff]   ;;  %v3897_v39 = vld [vmem:[#allocation21 + $0x84] ss:$8 sps:$4 sm:$0xff]  }
 0x615   : > { %2924 = vmatprep.subr.bf16.mxu1 %v3876_v63  ;;  %v3925_v2 = vld [vmem:[#allocation21 + $0xd0] ss:$8 sps:$4 sm:$0xff]   ;;  %v3934_v34 = vld [vmem:[#allocation24 + $0xe0] ss:$8 sps:$4 sm:$0xff]   ;;  %v3939_v35 = vld [vmem:[#allocation21 + $0xf4] ss:$8 sps:$4 sm:$0xff]  }
 0x616   : > { %v1892_v5 = vadd.f32 %v1891_v60, %v1881_v56  ;;  %v3895_v56 = vld [vmem:[#allocation21 + $0x80] ss:$8 sps:$4 sm:$0xff]   ;;  %v3937_v63 = vld [vmem:[#allocation21 + $0xf0] ss:$8 sps:$4 sm:$0xff]  }
 0x617   : > { %2407 = vmatpush1.bf16.msra.mxu0 %v3865_v54  ;;  %v3898_v60 = vld [vmem:[#allocation24 + $0x80] ss:$8 sps:$4 sm:$0xff]   ;;  %v3936_v58 = vld [vmem:[#allocation24 + $0xe4] ss:$8 sps:$4 sm:$0xff]  }
 0x618   : > { %v1894_v27 = vadd.f32 %v1893_v19, %v1892_v5  ;;  %2408 = vmatprep.subr.bf16.mxu0 %v3873_v4  ;;  %2925 = vmatpush1.bf16.msra.mxu1 %v3874_v20  ;;  %v3906_v5 = vld [vmem:[#allocation24 + $0x94] ss:$8 sps:$4 sm:$0xff]   ;;  %v3904_v19 = vld [vmem:[#allocation24 + $0x90] ss:$8 sps:$4 sm:$0xff]  }
 0x619   : > { %2926 = vmatprep.subr.bf16.mxu1 %v3882_v22  ;;  %v3942_v4 = vld [vmem:[#allocation24 + $0xf4] ss:$8 sps:$4 sm:$0xff]   ;;  %v3940_v20 = vld [vmem:[#allocation24 + $0xf0] ss:$8 sps:$4 sm:$0xff]  }
 0x61a   : > { %v1896_v33 = vadd.f32 %v1895_v30, %v1894_v27  ;;  %v3909_v27 = vld [vmem:[#allocation21 + $0xa4] ss:$8 sps:$4 sm:$0xff]   ;;  %v3907_v30 = vld [vmem:[#allocation21 + $0xa0] ss:$8 sps:$4 sm:$0xff]  }
 0x61b   : > { %2409 = vmatpush1.bf16.msra.mxu0 %v3871_v0 }
 0x61c   : > { %v1898_v55 = vadd.f32 %v1897_v62, %v1896_v33  ;;  %2410 = vmatprep.subr.bf16.mxu0 %v3879_v14  ;;  %2927 = vmatpush1.bf16.msra.mxu1 %v3880_v10  ;;  %v3910_v33 = vld [vmem:[#allocation24 + $0xa0] ss:$8 sps:$4 sm:$0xff]   ;;  %v3915_v62 = vld [vmem:[#allocation21 + $0xb4] ss:$8 sps:$4 sm:$0xff]   ;;  %v3948_v10 = vld [vmem:[#allocation24 + $0x104] ss:$8 sps:$4 sm:$0xff]  }
 0x61d   : > { %2928 = vmatprep.subr.bf16.mxu1 %v3888_v32 }
 0x61e   : > { %v1900_v31 = vadd.f32 %v1899_v50, %v1898_v55  ;;  %v3918_v55 = vld [vmem:[#allocation24 + $0xb4] ss:$8 sps:$4 sm:$0xff]  }
 0x61f   : > { %2411 = vmatpush1.bf16.msra.mxu0 %v3877_v36  ;;  %v3913_v50 = vld [vmem:[#allocation21 + $0xb0] ss:$8 sps:$4 sm:$0xff]   ;;  %v3945_v36 = vld [vmem:[#allocation21 + $0x104] ss:$8 sps:$4 sm:$0xff]  }
 0x620   : > { %1901 = vadd.xlane.f32.xlu1 %v1900_v31  ;;  %2412 = vmatprep.subr.bf16.mxu0 %v3885_v25  ;;  %v3916_v31 = vld [vmem:[#allocation24 + $0xb0] ss:$8 sps:$4 sm:$0xff]  }
 0x621   : > { %2929 = vmatpush1.bf16.msra.mxu1 %v3886_v47  ;;  %v1928_v47 = vld [vmem:[#allocation18] sm:$0xf] }
 0x622   : > { %2930 = vmatprep.subr.bf16.mxu1 %v3894_v41  ;;  %v1937_v41 = vrot.slane %v1928_v47, %v5171_v15 }
 0x623   : > { %2413 = vmatpush1.bf16.msra.mxu0 %v3883_v61 }
 0x624   : > { %2414 = vmatprep.subr.bf16.mxu0 %v3891_v23  ;;  %v1962_v23 = vld [vmem:[#allocation19] sm:$0xf] }
 0x625   : > { %2931 = vmatpush1.bf16.msra.mxu1 %v3892_v7 }
 0x626   : > { %2932 = vmatprep.subr.bf16.mxu1 %v3900_v49  ;;  %v1967_v49 = vrot.slane %v1962_v23, %v5167_v12 }
 0x627   : > { %2415 = vmatpush1.bf16.msra.mxu0 %v3889_v18  ;;  %v1933_v18 = vrot.slane %v1928_v47, %v5167_v12 }
 0x628   : > { %2416 = vmatprep.subr.bf16.mxu0 %v3897_v39  ;;  %v1971_v39 = vrot.slane %v1962_v23, %v5171_v15 }
 0x629   : > { %2933 = vmatpush1.bf16.msra.mxu1 %v3898_v60 }
 0x62a   : > { %2934 = vmatprep.subr.bf16.mxu1 %v3906_v5 }
 0x62b   : > { %2417 = vmatpush1.bf16.msra.mxu0 %v3895_v56 }
 0x62c   : > { %2418 = vmatprep.subr.bf16.mxu0 %v3903_v29 }
 0x62d   : > { %2935 = vmatpush1.bf16.msra.mxu1 %v3904_v19 }
 0x62e   : > { %2936 = vmatprep.subr.bf16.mxu1 %v3912_v43 }
 0x62f   : > { %2419 = vmatpush1.bf16.msra.mxu0 %v3901_v45 }
 0x630   : > { %2420 = vmatprep.subr.bf16.mxu0 %v3909_v27 }
 0x631   : > { %2937 = vmatpush1.bf16.msra.mxu1 %v3910_v33 }
 0x632   : > { %2938 = vmatprep.subr.bf16.mxu1 %v3918_v55 }
 0x633   : > { %2421 = vmatpush1.bf16.msra.mxu0 %v3907_v30 }
 0x634   : > { %2422 = vmatprep.subr.bf16.mxu0 %v3915_v62  ;;  %v5538_v62 = vrot.slane %v1928_v47, %v5173_v16 }
 0x635   : > { %2939 = vmatpush1.bf16.msra.mxu1 %v3916_v31 }
 0x636   : > { %2940 = vmatprep.subr.bf16.mxu1 %v3924_v28  ;;  %v1975_v28 = vrot.slane %v1962_v23, %v5169_v13 }
 0x637   : > { %2423 = vmatpush1.bf16.msra.mxu0 %v3913_v50 }
 0x638   : > { %2424 = vmatprep.subr.bf16.mxu0 %v3921_v57 }
 0x639   : > { %2941 = vmatpush1.bf16.msra.mxu1 %v3922_v8  ;;  %v3946_v8 = vld [vmem:[#allocation24 + $0x100] ss:$8 sps:$4 sm:$0xff]  }
 0x63a   : > { %2942 = vmatprep.subr.bf16.mxu1 %v3930_v42 }
 0x63b   : > { %2425 = vmatpush1.bf16.msra.mxu0 %v3919_v1 }
 0x63c   : > { %2426 = vmatprep.subr.bf16.mxu0 %v3927_v51 }
 0x63d   : > { %2943 = vmatpush1.bf16.msra.mxu1 %v3928_v9 }
 0x63e   : > { %2944 = vmatprep.subr.bf16.mxu1 %v3936_v58 }
 0x63f   : > { %2427 = vmatpush1.bf16.msra.mxu0 %v3925_v2 }
 0x640   : > { %2428 = vmatprep.subr.bf16.mxu0 %v3933_v3 }
 0x641   : > { %2945 = vmatpush1.bf16.msra.mxu1 %v3934_v34  ;;  %v3952_v34 = vld [vmem:[#allocation24 + $0x110] ss:$8 sps:$4 sm:$0xff]  }
 0x642   : > { %2946 = vmatprep.subr.bf16.mxu1 %v3942_v4  ;;  %v3957_v4 = vld [vmem:[#allocation21 + $0x124] ss:$8 sps:$4 sm:$0xff]  }
 0x643   : > { %2429 = vmatpush1.bf16.msra.mxu0 %v3931_v38 }
 0x644   : > { %2430 = vmatprep.subr.bf16.mxu0 %v3939_v35 }
 0x645   : > { %2947 = vmatpush1.bf16.msra.mxu1 %v3940_v20 }
 0x646   : > { %2967 = vmatprep.subr.bf16.mxu1 %v3948_v10  ;;  %v3958_v10 = vld [vmem:[#allocation24 + $0x120] ss:$8 sps:$4 sm:$0xff]  }
 0x647   : > { %2431 = vmatpush1.bf16.msra.mxu0 %v3937_v63  ;;  %v3960_v63 = vld [vmem:[#allocation24 + $0x124] ss:$8 sps:$4 sm:$0xff]  }
 0x648   : > { %2451 = vmatprep.subr.bf16.mxu0 %v3945_v36  ;;  %v3955_v36 = vld [vmem:[#allocation21 + $0x120] ss:$8 sps:$4 sm:$0xff]  }
 0x6ad   : > { %v1902_v21 = vpop.xlane.xlu1 %1901 }
 0x6ae   : > { %v1903_v52 = vrot.slane %v1902_v21, 4 }
 0x6b0   : > { %v1904_v54 = vadd.f32 %v1903_v52, %v1902_v21  ;;  %v5551_v21 = vrot.slane %v1962_v23, %v5173_v16  ;;  %v3949_v16 = vld [vmem:[#allocation21 + $0x110] ss:$8 sps:$4 sm:$0xff]  }
 0x6b1   : > { %v3961_v23 = vld [vmem:[#allocation21 + $0x130] ss:$8 sps:$4 sm:$0xff]  }
 0x6b2   : > { %v1905_v0 = vrot.slane %v1904_v54, 2 }
 0x6b4   : > { %v1906_v14 = vadd.f32 %v1905_v0, %v1904_v54 }
 0x6b6   : > { %v1907_v22 = vrot.slane %v1906_v14, 1 }
 0x6b8   : > { %v1908_v25 = vadd.f32 %v1907_v22, %v1906_v14 }
 0x6ba   : > { %3562 = vpush %v1908_v25 }
 0x6eb   : > { %s3563_s8 = spop %3562 }
 0x6ec   : > { %s1910_s3 = smul.f32 0.000114889706, %s3563_s8  ;;  %s5783_s8 = sld [smem:[#allocation54_spill]] }
 0x6ee   : > { %s1911_s30 = sadd.f32 1e-08, %s1910_s3 }
 0x6f0   : > { %v1912_v32 = vstv %s1911_s30  ;;  %s3031_s30 = scalar_lea.sflag [#allocation6], %s5112_s2 }
 0x6f1   : > { %4041 = vrsqrt.f32 %v1912_v32  ;;  %v3963_v32 = vld [vmem:[#allocation21 + $0x134] ss:$8 sps:$4 sm:$0xff]  }
 0x6f2   : > { %s5618_s3 = scalar_lea.hbm %s5783_s8, %s3566_s19 }
 0x6fb   : > { %v4042_v61 = vpop.eup %4041 }
 0x6fc   : > { %3564 = vpush %v4042_v61  ;;  %v3966_v61 = vld [vmem:[#allocation24 + $0x134] ss:$8 sps:$4 sm:$0xff]  }
 0x72d   : > { %s3565_s0 = spop %3564 }
 0x72e   : > { %v5521_v7 = vstv %s3565_s0  ;;  %s4445_s0 = scalar_lea.vmem %s5604_s7, 768 }
 0x72f   : > { %v1917_v56 = vmul.f32 %v5521_v7, %v5469_v17  ;;  %v1921_v60 = vmul.f32 %v5521_v7, %v5483_v11  ;;  %v1916_v29 = vmul.f32 %v5521_v7, %v5466_v59  ;;  %v1920_v5 = vmul.f32 %v5521_v7, %v5479_v46  ;;  %p4446_p11 = scmp.ne.s32.totalorder %s5604_s7, %s4445_s0 }
 0x730   : > { %v1925_v45 = vmul.f32 %v5521_v7, %v5497_v26  ;;  %v1924_v17 = vmul.f32 %v5521_v7, %v5491_v24  ;;  %v1941_v11 = vrot.slane %v1928_v47, %v5169_v13  ;;  %v1919_v26 = vmul.f32 %v5521_v7, %v5477_v40  ;;  %v3943_v24 = vld [vmem:[#allocation21 + $0x100] ss:$8 sps:$4 sm:$0xff]   ;;  %v3951_v40 = vld [vmem:[#allocation21 + $0x114] ss:$8 sps:$4 sm:$0xff]  }
 0x731   : > { %v1951_v19 = vmul.f32 %v1937_v41, %v1917_v56  ;;  %v1955_v27 = vmul.f32 %v1937_v41, %v1921_v60  ;;  %v1950_v43 = vmul.f32 %v1933_v18, %v1916_v29  ;;  %v1954_v30 = vmul.f32 %v1933_v18, %v1920_v5  ;;  %v3970_v56 = vld [vmem:[#allocation24 + $0x140] ss:$8 sps:$4 sm:$0xff]   ;;  %v3975_v60 = vld [vmem:[#allocation21 + $0x154] ss:$8 sps:$4 sm:$0xff]   ;;  %v3973_v5 = vld [vmem:[#allocation21 + $0x150] ss:$8 sps:$4 sm:$0xff]   ;;  %p4447_p12 = pnand %p4446_p11, %p5784_p0 }
 0x732   : > { %v1959_v33 = vmul.f32 %v1937_v41, %v1925_v45  ;;  %v1923_v57 = vmul.f32 %v5521_v7, %v5493_v44  ;;  %v1918_v42 = vmul.f32 %v5521_v7, %v5471_v6  ;;  %v1922_v2 = vmul.f32 %v5521_v7, %v5487_v37  ;;  %v3954_v44 = vld [vmem:[#allocation24 + $0x114] ss:$8 sps:$4 sm:$0xff]   ;;  %v3964_v41 = vld [vmem:[#allocation24 + $0x130] ss:$8 sps:$4 sm:$0xff]  }
 0x733   : > { %v1985_v59 = vadd.f32 %v1971_v39, %v1951_v19  ;;  %v1989_v55 = vadd.f32 %v1971_v39, %v1955_v27  ;;  %v1984_v50 = vadd.f32 %v1967_v49, %v1950_v43  ;;  %v1988_v46 = vadd.f32 %v1967_v49, %v1954_v30  ;;  %v3978_v29 = vld [vmem:[#allocation24 + $0x154] ss:$8 sps:$4 sm:$0xff]   ;;  %v3976_v45 = vld [vmem:[#allocation24 + $0x150] ss:$8 sps:$4 sm:$0xff]   ;;  %v3981_v19 = vld [vmem:[#allocation21 + $0x164] ss:$8 sps:$4 sm:$0xff]   ;;  %p4448_p13 = pneg %p4447_p12 }
 0x734   : > { %v1993_v31 = vadd.f32 %v1971_v39, %v1959_v33  ;;  %v1958_v9 = vmul.f32 %v1933_v18, %v1924_v17  ;;  %v1952_v52 = vmul.f32 %v1941_v11, %v1918_v42  ;;  %v1956_v13 = vmul.f32 %v1941_v11, %v1922_v2  ;;  %v3969_v18 = vld [vmem:[#allocation21 + $0x144] ss:$8 sps:$4 sm:$0xff]   ;;  %v3979_v43 = vld [vmem:[#allocation21 + $0x160] ss:$8 sps:$4 sm:$0xff]   ;;  %v3987_v33 = vld [vmem:[#allocation21 + $0x174] ss:$8 sps:$4 sm:$0xff]  }
 0x735   : > { %v1997_v1 = vpack.c.bf16 %v1989_v55, %v1985_v59  ;;  %v1996_v51 = vpack.c.bf16 %v1988_v46, %v1984_v50  ;;  %v1926_v38 = vmul.f32 %v5521_v7, %v5501_v48  ;;  %v1953_v6 = vmul.f32 %v5538_v62, %v1919_v26  ;;  %v3972_v39 = vld [vmem:[#allocation24 + $0x144] ss:$8 sps:$4 sm:$0xff]   ;;  %v3982_v30 = vld [vmem:[#allocation24 + $0x160] ss:$8 sps:$4 sm:$0xff]   ;;  %v3990_v17 = vld [vmem:[#allocation24 + $0x174] ss:$8 sps:$4 sm:$0xff]  }
 0x736   : > { %v2001_v3 = vpack.c.bf16 %v1993_v31, %v1993_v31  ;;  %v1957_v37 = vmul.f32 %v5538_v62, %v1923_v57  ;;  %v1986_v58 = vadd.f32 %v1975_v28, %v1952_v52  ;;  %v1990_v54 = vadd.f32 %v1975_v28, %v1956_v13  ;;  %v3984_v27 = vld [vmem:[#allocation24 + $0x164] ss:$8 sps:$4 sm:$0xff]   ;;  %v3988_v59 = vld [vmem:[#allocation24 + $0x170] ss:$8 sps:$4 sm:$0xff]   ;;  %v3994_v31 = vld [vmem:[#allocation24 + $0x180] ss:$8 sps:$4 sm:$0xff]  }
 0x737   : > { %2432 = vmatprep.mubr.bf16.mxu0 %v1997_v1  ;;  %2948 = vmatprep.mubr.bf16.mxu1 %v1997_v1  ;;  %v1960_v35 = vmul.f32 %v1941_v11, %v1926_v38  ;;  %v1992_v0 = vadd.f32 %v1967_v49, %v1958_v9  ;;  %v1987_v14 = vadd.f32 %v5551_v21, %v1953_v6  ;;  %v3967_v49 = vld [vmem:[#allocation21 + $0x140] ss:$8 sps:$4 sm:$0xff]   ;;  %v3985_v11 = vld [vmem:[#allocation21 + $0x170] ss:$8 sps:$4 sm:$0xff]   ;;  %v3993_v55 = vld [vmem:[#allocation21 + $0x184] ss:$8 sps:$4 sm:$0xff]  }
 0x738   : > { %2433 = vmatmul.mubr.bf16.vlgmr.msra.gmra.mrb[8].mxu0 %v1996_v51  ;;  %2949 = vmatmul.mubr.bf16.vlgmr.msra.gmra.mrb[8].mxu1 %v1996_v51  ;;  %v5557_v48 = vpack.c.bf16 %v1990_v54, %v1986_v58  ;;  %v1991_v22 = vadd.f32 %v5551_v21, %v1957_v37  ;;  %v3996_v50 = vld [vmem:[#allocation24 + $0x184] ss:$8 sps:$4 sm:$0xff]   ;;  %v3999_v26 = vld [vmem:[#allocation21 + $0x194] ss:$8 sps:$4 sm:$0xff]   ;;  %v4006_v42 = vld [vmem:[#allocation24 + $0x1a0] ss:$8 sps:$4 sm:$0xff]  }
 0x739   : > { %2452 = vmatpush1.bf16.msra.mxu0 %v3943_v24  ;;  %2968 = vmatpush1.bf16.msra.mxu1 %v3946_v8  ;;  %v5559_v20 = vadd.f32 %v1975_v28, %v1960_v35  ;;  %v2000_v25 = vpack.c.bf16 %v1992_v0, %v1992_v0  ;;  %v3991_v46 = vld [vmem:[#allocation21 + $0x180] ss:$8 sps:$4 sm:$0xff]   ;;  %v3997_v28 = vld [vmem:[#allocation21 + $0x190] ss:$8 sps:$4 sm:$0xff]   ;;  %v4005_v24 = vld [vmem:[#allocation21 + $0x1a4] ss:$8 sps:$4 sm:$0xff]   ;;  %v1927_v35 = vmul.f32 %v5521_v7, %v5507_v53 }
 0x73a   : > { %2442 = vmatprep.mubr.bf16.mxu0 %v2001_v3  ;;  %2958 = vmatprep.mubr.bf16.mxu1 %v2001_v3  ;;  %v1999_v47 = vpack.c.bf16 %v1991_v22, %v1987_v14  ;;  %v4002_v57 = vld [vmem:[#allocation24 + $0x194] ss:$8 sps:$4 sm:$0xff]   ;;  %v4000_v1 = vld [vmem:[#allocation24 + $0x190] ss:$8 sps:$4 sm:$0xff]   ;;  %v4008_v8 = vld [vmem:[#allocation24 + $0x1a4] ss:$8 sps:$4 sm:$0xff]  }
 0x73b   : > { %2453 = vmatprep.subr.bf16.mxu0 %v3951_v40  ;;  %2969 = vmatprep.subr.bf16.mxu1 %v3954_v44  ;;  %v4003_v51 = vld [vmem:[#allocation21 + $0x1a0] ss:$8 sps:$4 sm:$0xff]   ;;  %v4011_v2 = vld [vmem:[#allocation21 + $0x1b4] ss:$8 sps:$4 sm:$0xff]   ;;  %v4009_v40 = vld [vmem:[#allocation21 + $0x1b0] ss:$8 sps:$4 sm:$0xff]   ;;  %v1961_v22 = vmul.f32 %v5538_v62, %v1927_v35  ;;  %v2002_v7 = vpack.c.bf16 %v5559_v20, %v5559_v20 }
 0x73c   : > { %v4014_v9 = vld [vmem:[#allocation24 + $0x1b4] ss:$8 sps:$4 sm:$0xff]   ;;  %v4012_v44 = vld [vmem:[#allocation24 + $0x1b0] ss:$8 sps:$4 sm:$0xff]   ;;  %v4017_v52 = vld [vmem:[#allocation21 + $0x1c4] ss:$8 sps:$4 sm:$0xff]  }
 0x73d   : > { %2454 = vmatpush1.bf16.msra.mxu0 %v3949_v16  ;;  %2970 = vmatpush1.bf16.msra.mxu1 %v3952_v34  ;;  %v4020_v13 = vld [vmem:[#allocation24 + $0x1c4] ss:$8 sps:$4 sm:$0xff]   ;;  %v4018_v3 = vld [vmem:[#allocation24 + $0x1c0] ss:$8 sps:$4 sm:$0xff]   ;;  %v4023_v6 = vld [vmem:[#allocation21 + $0x1d4] ss:$8 sps:$4 sm:$0xff]  }
 0x73e   : > { %2455 = vmatprep.subr.bf16.mxu0 %v3957_v4  ;;  %2971 = vmatprep.subr.bf16.mxu1 %v3960_v63  ;;  %v4015_v38 = vld [vmem:[#allocation21 + $0x1c0] ss:$8 sps:$4 sm:$0xff]   ;;  %v4021_v16 = vld [vmem:[#allocation21 + $0x1d0] ss:$8 sps:$4 sm:$0xff]   ;;  %v4029_v58 = vld [vmem:[#allocation21 + $0x1e4] ss:$8 sps:$4 sm:$0xff]  }
 0x73f   : > { %v4026_v37 = vld [vmem:[#allocation24 + $0x1d4] ss:$8 sps:$4 sm:$0xff]   ;;  %v4024_v34 = vld [vmem:[#allocation24 + $0x1d0] ss:$8 sps:$4 sm:$0xff]   ;;  %v4032_v54 = vld [vmem:[#allocation24 + $0x1e4] ss:$8 sps:$4 sm:$0xff]  }
 0x740   : > { %2443 = vmatmul.mubr.bf16.gmra.mrb[12].mxu0 %v2000_v25  ;;  %2959 = vmatmul.mubr.bf16.gmra.mrb[12].mxu1 %v2000_v25  ;;  %v4027_v4 = vld [vmem:[#allocation21 + $0x1e0] ss:$8 sps:$4 sm:$0xff]   ;;  %v4035_v0 = vld [vmem:[#allocation21 + $0x1f4] ss:$8 sps:$4 sm:$0xff]   ;;  %v1995_v25 = vadd.f32 %v5551_v21, %v1961_v22 }
 0x741   : > { %2456 = vmatpush1.bf16.msra.mxu0 %v3955_v36  ;;  %2972 = vmatpush1.bf16.msra.mxu1 %v3958_v10  ;;  %v4030_v63 = vld [vmem:[#allocation24 + $0x1e0] ss:$8 sps:$4 sm:$0xff]   ;;  %v4038_v14 = vld [vmem:[#allocation24 + $0x1f4] ss:$8 sps:$4 sm:$0xff]   ;;  %v4036_v10 = vld [vmem:[#allocation24 + $0x1f0] ss:$8 sps:$4 sm:$0xff]  }
 0x742   : > { %2483 = vmatprep.mubr.bf16.mxu0 %v1999_v47  ;;  %2999 = vmatprep.mubr.bf16.mxu1 %v1999_v47  ;;  %v4033_v36 = vld [vmem:[#allocation21 + $0x1f0] ss:$8 sps:$4 sm:$0xff]   ;;  %v2003_v53 = vpack.c.bf16 %v1995_v25, %v1995_v25 }
 0x743   : > { %2457 = vmatprep.subr.bf16.mxu0 %v3963_v32  ;;  %2973 = vmatprep.subr.bf16.mxu1 %v3966_v61 }
 0x745   : > { %2458 = vmatpush1.bf16.msra.mxu0 %v3961_v23  ;;  %2974 = vmatpush1.bf16.msra.mxu1 %v3964_v41 }
 0x746   : > { %2459 = vmatprep.subr.bf16.mxu0 %v3969_v18  ;;  %2975 = vmatprep.subr.bf16.mxu1 %v3972_v39  ;;  %v2068_v39 = vld [vmem:[#allocation22] sm:$0x3] }
 0x747   : > { %v2077_v20 = vrot.slane %v2068_v39, %v5171_v15 }
 0x749   : > { %2460 = vmatpush1.bf16.msra.mxu0 %v3967_v49  ;;  %2976 = vmatpush1.bf16.msra.mxu1 %v3970_v56  ;;  %v2584_v49 = vld [vmem:[#allocation25] sm:$0x3] }
 0x74a   : > { %2461 = vmatprep.subr.bf16.mxu0 %v3975_v60  ;;  %2977 = vmatprep.subr.bf16.mxu1 %v3978_v29  ;;  %v2589_v56 = vrot.slane %v2584_v49, %v5167_v12  ;;  %v2593_v60 = vrot.slane %v2584_v49, %v5171_v15 }
 0x74d   : > { %2462 = vmatpush1.bf16.msra.mxu0 %v3973_v5  ;;  %2978 = vmatpush1.bf16.msra.mxu1 %v3976_v45  ;;  %v2502_v5 = vld [vmem:[%s5127_s23] sm:$0xff] }
 0x74e   : > { %2463 = vmatprep.subr.bf16.mxu0 %v3981_v19  ;;  %2979 = vmatprep.subr.bf16.mxu1 %v3984_v27 }
 0x751   : > { %2464 = vmatpush1.bf16.msra.mxu0 %v3979_v43  ;;  %2980 = vmatpush1.bf16.msra.mxu1 %v3982_v30  ;;  %v2503_v30 = vld [vmem:[%s5127_s23 + $0x8] sm:$0xff] }
 0x752   : > { %2465 = vmatprep.subr.bf16.mxu0 %v3987_v33  ;;  %2981 = vmatprep.subr.bf16.mxu1 %v3990_v17 }
 0x755   : > { %2466 = vmatpush1.bf16.msra.mxu0 %v3985_v11  ;;  %2982 = vmatpush1.bf16.msra.mxu1 %v3988_v59 }
 0x756   : > { %2467 = vmatprep.subr.bf16.mxu0 %v3993_v55  ;;  %2983 = vmatprep.subr.bf16.mxu1 %v3996_v50 }
 0x759   : > { %2468 = vmatpush1.bf16.msra.mxu0 %v3991_v46  ;;  %2984 = vmatpush1.bf16.msra.mxu1 %v3994_v31  ;;  %v4043_v46 = vld [vmem:[%s5119_s22] sm:$0xff] }
 0x75a   : > { %2469 = vmatprep.subr.bf16.mxu0 %v3999_v26  ;;  %2985 = vmatprep.subr.bf16.mxu1 %v4002_v57 }
 0x75d   : > { %2470 = vmatpush1.bf16.msra.mxu0 %v3997_v28  ;;  %2986 = vmatpush1.bf16.msra.mxu1 %v4000_v1  ;;  %v2505_v28 = vld [vmem:[%s5127_s23 + $0x18] sm:$0xff] }
 0x75e   : > { %2471 = vmatprep.subr.bf16.mxu0 %v4005_v24  ;;  %2987 = vmatprep.subr.bf16.mxu1 %v4008_v8  ;;  %v4044_v8 = vld [vmem:[%s5119_s22 + $0x8] sm:$0xff] }
 0x761   : > { %2472 = vmatpush1.bf16.msra.mxu0 %v4003_v51  ;;  %2988 = vmatpush1.bf16.msra.mxu1 %v4006_v42 }
 0x762   : > { %2473 = vmatprep.subr.bf16.mxu0 %v4011_v2  ;;  %2989 = vmatprep.subr.bf16.mxu1 %v4014_v9 }
 0x765   : > { %2474 = vmatpush1.bf16.msra.mxu0 %v4009_v40  ;;  %2990 = vmatpush1.bf16.msra.mxu1 %v4012_v44  ;;  %v4045_v40 = vld [vmem:[%s5119_s22 + $0x10] sm:$0xff] }
 0x766   : > { %2475 = vmatprep.subr.bf16.mxu0 %v4017_v52  ;;  %2991 = vmatprep.subr.bf16.mxu1 %v4020_v13  ;;  %v4046_v13 = vld [vmem:[%s5119_s22 + $0x18] sm:$0xff] }
 0x769   : > { %2476 = vmatpush1.bf16.msra.mxu0 %v4015_v38  ;;  %2992 = vmatpush1.bf16.msra.mxu1 %v4018_v3 }
 0x76a   : > { %2477 = vmatprep.subr.bf16.mxu0 %v4023_v6  ;;  %2993 = vmatprep.subr.bf16.mxu1 %v4026_v37 }
 0x76d   : > { %2478 = vmatpush1.bf16.msra.mxu0 %v4021_v16  ;;  %2994 = vmatpush1.bf16.msra.mxu1 %v4024_v34 }
 0x76e   : > { %2479 = vmatprep.subr.bf16.mxu0 %v4029_v58  ;;  %2995 = vmatprep.subr.bf16.mxu1 %v4032_v54  ;;  %v2506_v58 = vld [vmem:[%s5127_s23 + $0x20] sm:$0x1] }
 0x771   : > { %2480 = vmatpush1.bf16.msra.mxu0 %v4027_v4  ;;  %2996 = vmatpush1.bf16.msra.mxu1 %v4030_v63 }
 0x772   : > { %2481 = vmatprep.subr.bf16.mxu0 %v4035_v0  ;;  %2997 = vmatprep.subr.bf16.mxu1 %v4038_v14  ;;  %v2507_v0 = vld [vmem:[%s5127_s23 + $0x28] sm:$0x1] }
 0x775   : > { %2482 = vmatpush1.bf16.msra.mxu0 %v4033_v36  ;;  %2998 = vmatpush1.bf16.msra.mxu1 %v4036_v10 }
 0x778   : > { %2484 = vmatmul.mubr.bf16.vlgmr.msra.gmra.mrb[8].mxu0 %v5557_v48  ;;  %3000 = vmatmul.mubr.bf16.vlgmr.msra.gmra.mrb[8].mxu1 %v5557_v48  ;;  %v2073_v48 = vrot.slane %v2068_v39, %v5167_v12  ;;  %v2504_v12 = vld [vmem:[%s5127_s23 + $0x10] sm:$0xff] }
 0x779   : > { %2493 = vmatprep.mubr.bf16.mxu0 %v2003_v53  ;;  %3009 = vmatprep.mubr.bf16.mxu1 %v2003_v53 }
 0x780   : > { %2494 = vmatmul.mubr.bf16.gmra.mrb[16].mxu0 %v2002_v7  ;;  %3010 = vmatmul.mubr.bf16.gmra.mrb[16].mxu1 %v2002_v7  ;;  %v4047_v7 = vld [vmem:[%s5119_s22 + $0x20] sm:$0x1] }
 0x813   : > { %v2444_v62 = vpop.f32.mrb[12].mxu0  ;;  %v2960_v32 = vpop.f32.mrb[12].mxu1 }
 0x814   : > { %v2446_v61 = vpop.f32.mrb[13].mxu0  ;;  %v2962_v47 = vpop.f32.mrb[13].mxu1  ;;  %v2445_v3 = vadd.f32 %v2444_v62, %v2073_v48  ;;  %v2961_v6 = vadd.f32 %v2960_v32, %v2589_v56 }
 0x815   : > { %v2448_v21 = vpop.f32.mrb[14].mxu0  ;;  %v2964_v23 = vpop.f32.mrb[14].mxu1  ;;  %v2447_v37 = vadd.f32 %v2446_v61, %v2077_v20  ;;  %v2963_v16 = vadd.f32 %v2962_v47, %v2593_v60 }
 0x816   : > { %v2449_v41 = vpop.f32.mrb[15].mxu0  ;;  %v2965_v18 = vpop.f32.mrb[15].mxu1  ;;  %v4048_v21 = vld [vmem:[%s5119_s22 + $0x28] sm:$0x1]  ;;  %s4595_s22 = smov [#allocation27]  }
 0x817   : > { %s4449_s6 = sshll.u32 %s4595_s22, 4  ;;  %s4450_s6 = int_to_ptr.vmem [resolvable:$false] %s4449_s6 }
 0x818   : > { %s4451_s23 = scalar_lea.vmem %s4450_s6, 1536  ;;  %p4452_p1 = scmp.lt.s32.totalorder %s5604_s7, %s4450_s6 }
 0x819   : > { %p4453_p3 = scmp.lt.s32.totalorder %s4451_s23, %s4445_s0 }
 0x81b   : > { %p4454_p5 = por %p4453_p3, %p4452_p1 }
 0x81d   : > { %p4455_p2 = pnand %p4454_p5, %p4448_p13 }
 0x84b   : > { %v2485_v29 = vpop.f32.mrb[8].mxu0  ;;  %v3001_v45 = vpop.f32.mrb[8].mxu1 }
 0x84c   : > { %v3533_v19 = vadd.f32 %v2485_v29, %v2073_v48  ;;  %v3537_v27 = vadd.f32 %v3001_v45, %v2589_v56  ;;  %v2487_v43 = vpop.f32.mrb[9].mxu0  ;;  %v3003_v33 = vpop.f32.mrb[9].mxu1 }
 0x84d   : > { %v3534_v17 = vadd.f32 %v2487_v43, %v2077_v20  ;;  %v3538_v11 = vadd.f32 %v3003_v33, %v2593_v60  ;;  %v2489_v59 = vpop.f32.mrb[10].mxu0  ;;  %v3005_v55 = vpop.f32.mrb[10].mxu1 }
 0x84e   : > { %v2508_v50 = vadd.f32 %v3533_v19, %v2502_v5  ;;  %v3018_v15 = vadd.f32 %v4043_v46, %v3537_v27  ;;  %v3535_v31 = vadd.f32 %v2489_v59, %v2073_v48  ;;  %v3539_v26 = vadd.f32 %v3005_v55, %v2589_v56  ;;  %v2491_v57 = vpop.f32.mrb[11].mxu0  ;;  %v3007_v1 = vpop.f32.mrb[11].mxu1 }
 0x84f   : > { %v2509_v24 = vadd.f32 %v3534_v17, %v2503_v30  ;;  %v3019_v51 = vadd.f32 %v4044_v8, %v3538_v11  ;;  %v3536_v42 = vadd.f32 %v2491_v57, %v2077_v20  ;;  %v3540_v2 = vadd.f32 %v3007_v1, %v2593_v60 }
 0x850   : > { %2514 = vst [vmem:[%s5582_s16] sm:$0xff] %v2508_v50  ;;  %3024 = vst [vmem:[%s5586_s1] sm:$0xff] %v3018_v15  ;;  %v2510_v9 = vadd.f32 %v3535_v31, %v2504_v12  ;;  %v3020_v44 = vadd.f32 %v4045_v40, %v3539_v26 }
 0x851   : > { %2515 = vst [vmem:[%s5582_s16 + $0x8] sm:$0xff] %v2509_v24  ;;  %3025 = vst [vmem:[%s5586_s1 + $0x8] sm:$0xff] %v3019_v51  ;;  %v2511_v52 = vadd.f32 %v3536_v42, %v2505_v28  ;;  %v3021_v38 = vadd.f32 %v4046_v13, %v3540_v2 }
 0x852   : > { %2516 = vst [vmem:[%s5582_s16 + $0x10] sm:$0xff] %v2510_v9  ;;  %3026 = vst [vmem:[%s5586_s1 + $0x10] sm:$0xff] %v3020_v44 }
 0x853   : > { %2517 = vst [vmem:[%s5582_s16 + $0x18] sm:$0xff] %v2511_v52  ;;  %3027 = vst [vmem:[%s5586_s1 + $0x18] sm:$0xff] %v3021_v38  ;;  %v2495_v34 = vpop.f32.mrb[16].mxu0  ;;  %v3011_v54 = vpop.f32.mrb[16].mxu1 }
 0x854   : > { %v2496_v35 = vadd.f32 %v2495_v34, %v2445_v3  ;;  %v3012_v4 = vadd.f32 %v3011_v54, %v2961_v6  ;;  %v2497_v63 = vpop.f32.mrb[17].mxu0  ;;  %v3013_v14 = vpop.f32.mrb[17].mxu1 }
 0x855   : > { %v2498_v22 = vadd.f32 %v2497_v63, %v2447_v37  ;;  %v3014_v36 = vadd.f32 %v3013_v14, %v2963_v16  ;;  %v2499_v10 = vpop.f32.mrb[18].mxu0  ;;  %v3015_v25 = vpop.f32.mrb[18].mxu1 }
 0x856   : > { %v2512_v53 = vadd.f32 %v2506_v58, %v2496_v35  ;;  %v3022_v62 = vadd.f32 %v4047_v7, %v3012_v4  ;;  %v2500_v32 = vpop.f32.mrb[19].mxu0  ;;  %v3016_v61 = vpop.f32.mrb[19].mxu1 }
 0x857   : > { %v2513_v47 = vadd.f32 %v2507_v0, %v2498_v22  ;;  %v3023_v23 = vadd.f32 %v4048_v21, %v3014_v36 }
 0x858   : > { %2518 = vst [vmem:[%s5582_s16 + $0x20] sm:$0x1] %v2512_v53  ;;  %3028 = vst [vmem:[%s5586_s1 + $0x20] sm:$0x1] %v3022_v62 }
 0x859   : > { %2519 = vst [vmem:[%s5582_s16 + $0x28] sm:$0x1] %v2513_v47  ;;  %3029 = vst [vmem:[%s5586_s1 + $0x28] sm:$0x1] %v3023_v23 }
 0x85a   : > { %4458 = shalt.err (!%p4455_p2)
}
 0x85b   : > { %s4459_s16 = scalar_lea.hbm %s5611_s5, 768  ;;  %s4463_s10 = scalar_lea.hbm %s5782_s25, 1536 }
 0x85c   : > { %p4460_p4 = scmp.ne.s32.totalorder %s5611_s5, %s4459_s16  ;;  %p4464_p7 = scmp.lt.u32.totalorder %s5611_s5, %s5782_s25 }
 0x85d   : > { %p4465_p9 = scmp.lt.u32.totalorder %s4463_s10, %s4459_s16  ;;  %p4467_p11 = scmp.lt.u32.totalorder %s4459_s16, %s5611_s5 }
 0x85e   : > { %p4461_p10 = pnand %p4460_p4, %p5784_p0 }
 0x85f   : > { %p4466_p8 = por %p4465_p9, %p4464_p7 }
 0x860   : > { %p4462_p6 = pneg %p4461_p10 }
 0x861   : > { %p4468_p12 = por %p4467_p11, %p4466_p8 }
 0x863   : > { %p4469_p13 = pnand %p4468_p12, %p4462_p6 }
 0x865   : > { %4472 = shalt.err (!%p4469_p13)
}
 0x866   : > { %s4596_s0 = smov 256   ;;  %s4597_s6 = smov 16  }
 0x867   : > { %3620 = dma.vmem_to_hbm [thread:$0]  (%p5784_p0), %s5604_s7, 768, %s5611_s5, %s3031_s30, %s4596_s0, %s4596_s0, %s4597_s6  }
 0x868   : > { %s3036_s23 = scalar_lea.sflag [#allocation29], %s5112_s2  ;;  %s4473_s16 = scalar_lea.vmem %s5602_s21, 768 }
 0x869   : > { %p4474_p1 = scmp.ne.s32.totalorder %s5602_s21, %s4473_s16  ;;  %s4598_s1 = smov [#allocation28]  }
 0x86a   : > { %s4477_s19 = sshll.u32 %s4598_s1, 4  ;;  %s4478_s19 = int_to_ptr.vmem [resolvable:$false] %s4477_s19 }
 0x86b   : > { %p4475_p3 = pnand %p4474_p1, %p5784_p0  ;;  %s4479_s10 = scalar_lea.vmem %s4478_s19, 1536 }
 0x86c   : > { %p4480_p2 = scmp.lt.s32.totalorder %s5602_s21, %s4478_s19  ;;  %p4481_p4 = scmp.lt.s32.totalorder %s4479_s10, %s4473_s16 }
 0x86d   : > { %p4476_p5 = pneg %p4475_p3 }
 0x86e   : > { %p4482_p10 = por %p4481_p4, %p4480_p2 }
 0x870   : > { %p4483_p6 = pnand %p4482_p10, %p4476_p5 }
 0x872   : > { %4486 = shalt.err (!%p4483_p6)
}
 0x873   : > { %s4487_s7 = scalar_lea.hbm %s5618_s3, 768  ;;  %s4491_s28 = scalar_lea.hbm %s5783_s8, 1536 }
 0x874   : > { %p4488_p7 = scmp.ne.s32.totalorder %s5618_s3, %s4487_s7  ;;  %p4492_p11 = scmp.lt.u32.totalorder %s5618_s3, %s5783_s8 }
 0x875   : > { %p4493_p12 = scmp.lt.u32.totalorder %s4491_s28, %s4487_s7  ;;  %p4495_p1 = scmp.lt.u32.totalorder %s4487_s7, %s5618_s3 }
 0x876   : > { %p4489_p9 = pnand %p4488_p7, %p5784_p0 }
 0x877   : > { %p4494_p13 = por %p4493_p12, %p4492_p11 }
 0x878   : > { %p4490_p8 = pneg %p4489_p9 }
 0x879   : > { %p4496_p3 = por %p4495_p1, %p4494_p13 }
 0x87b   : > { %p4497_p5 = pnand %p4496_p3, %p4490_p8 }
 0x87d   : > { %4500 = shalt.err (!%p4497_p5)
}
 0x87e   : > { %3621 = dma.vmem_to_hbm [thread:$0]  (%p5784_p0), %s5602_s21, 768, %s5618_s3, %s3036_s23, %s4596_s0, %s4596_s0, %s4597_s6  }
 0x87f PF: > { %s5785_s16 = sld [smem:[#allocation41_spill]]  ;;  %p5786_p2 = scmp.ne.s32.totalorder %s5757_s27, 0 }
 0x880   : > { %p5787_p4 = scmp.ge.s32.totalorder %s4575_s9, 2 }
 0x882   : > { %p3669_p10 = pnand %p5787_p4, %p5786_p2 }
 0x885   : > { %s3080_s19 = sand.u32 1, %s5785_s16  }
 0x886   : > { %s3081_s10 = scalar_lea.sflag [#allocation6], %s3080_s19 }
 0x887   : > { %4554 = dma.done.wait (!%p3669_p10), %s3081_s10, 768  }
 0x888   : > { %4556 = vsyncadd (!%p3669_p10), %s3081_s10, 4294966528  ;;  %s3090_s18 = scalar_lea.sflag [#allocation29], %s3080_s19 }
 0x889   : > { %4558 = dma.done.wait (!%p3669_p10), %s3090_s18, 768  }
 0x88a   : > { %4560 = vsyncadd (!%p3669_p10), %s3090_s18, 4294966528  ;;  %p45_p0 = scmp.ge.s32.totalorder %s4989_s17, 4   ;;  %s5788_s28 = smov %s4567_s4 }
 0x88b   : > { %s5789_s4 = smov %s4571_s29  ;;  %s5790_s29 = smov %s5000_s20 }
 0x88c   : > { %s5791_s9 = smov %s4989_s17  ;;  %47 = sbr.rel (!%p45_p0) target bundleno = 29 (0x1d), region = 209 }
 0x893   :  { %3095 = vsyncpa [#allocation5], 1 }
 0x894   :  { %3097 = vsyncpa [#allocation5 + $0x1], 1 }
 0x895   :  { %3098 = vsyncpa [#allocation8], 1 }
 0x896   :  { %3100 = vsyncpa [#allocation8 + $0x1], 1 }
 0x897   :  { %3101 = vsyncpa [#allocation11], 1 }
 0x898   :  { %3102 = vsyncpa [#allocation14], 1 }
 0x899   :  { %3103 = vsyncpa [#allocation17], 1 }
 0x89a   :  { %3104 = vsyncpa [#allocation20], 1 }
 0x89b   :  { %3105 = vsyncpa [#allocation23], 1 }
 0x89c   :  { %3106 = vsyncpa [#allocation26], 1 }
 0x89d   :  { %3107 = vsyncpa [#allocation6], 1 }
 0x89e   :  { %3109 = vsyncpa [#allocation6 + $0x1], 1 }
 0x89f   :  { %3110 = vsyncpa [#allocation29], 1 }
 0x8a0   :  { %3112 = vsyncpa [#allocation29 + $0x1], 1 }

// kernel: model_forward.9
= control target key start
LH: loop header
LB: loop body
LE: loop exit
PB: predicated region body
PF: predicated region fallthrough
CT: control target
= control target key end

     0   :  { %s5156_s0 = inlined_call_operand.hbm [shape: f32[2,17,256], index: 0, kind: input, shape index: {}]   ;;  %s5157_s1 = inlined_call_operand.hbm [shape: f32[2,17,256], index: 1, kind: input, shape index: {}]   ;;  %s5158_s2 = inlined_call_operand.hbm [shape: bf16[2,17,256], index: 2, kind: input, shape index: {}]   ;;  %s5159_s3 = inlined_call_operand.hbm [shape: bf16[256,128], index: 3, kind: input, shape index: {}]   ;;  %s5160_s4 = inlined_call_operand.hbm [shape: bf16[256,512], index: 4, kind: input, shape index: {}]   ;;  %s5161_s5 = inlined_call_operand.hbm [shape: f32[1,512], index: 5, kind: input, shape index: {}]   ;;  %s5162_s6 = inlined_call_operand.<no memory space> [shape: f32[1,1], index: 6, kind: input, shape index: {}]   ;;  %s5163_s7 = inlined_call_operand.hbm [shape: f32[1,512], index: 7, kind: input, shape index: {}]   ;;  %s5164_s8 = inlined_call_operand.hbm [shape: f32[1,512], index: 8, kind: input, shape index: {}]   ;;  %s5165_s9 = inlined_call_operand.hbm [shape: f32[3,512], index: 9, kind: input, shape index: {}]   ;;  %s5166_s10 = inlined_call_operand.hbm [shape: f32[1,512], index: 10, kind: input, shape index: {}]   ;;  %s5167_s11 = inlined_call_operand.<no memory space> [shape: f32[1,1], index: 11, kind: input, shape index: {}]   ;;  %s5168_s12 = inlined_call_operand.hbm [shape: f32[1,512], index: 12, kind: input, shape index: {}]   ;;  %s5169_s13 = inlined_call_operand.hbm [shape: f32[1,512], index: 13, kind: input, shape index: {}]   ;;  %s5170_s14 = inlined_call_operand.hbm [shape: bf16[512,256], index: 14, kind: input, shape index: {}]   ;;  %s5171_s15 = inlined_call_operand.hbm [shape: f32[1,256], index: 15, kind: input, shape index: {}]   ;;  %s5172_s16 = inlined_call_operand.hbm [shape: f32[2,17,128], index: 16, kind: output, shape index: {}]  }
   0x1   :  { %5199 = sst [smem:[#allocation42_spill]] %s5156_s0 }
   0x2   :  { %5200 = sst [smem:[#allocation43_spill]] %s5157_s1 }
   0x3   :  { %5201 = sst [smem:[#allocation44_spill]] %s5158_s2 }
   0x4   :  { %5202 = sst [smem:[#allocation45_spill]] %s5159_s3 }
   0x5   :  { %5203 = sst [smem:[#allocation46_spill]] %s5160_s4 }
   0x6   :  { %5204 = sst [smem:[#allocation47_spill]] %s5161_s5 }
   0x7   :  { %5205 = sst [smem:[#allocation48_spill]] %s5163_s7 }
   0x8   :  { %5206 = sst [smem:[#allocation49_spill]] %s5164_s8 }
   0x9   :  { %5207 = sst [smem:[#allocation50_spill]] %s5165_s9 }
   0xa   :  { %5208 = sst [smem:[#allocation51_spill]] %s5166_s10 }
   0xb   :  { %5209 = sst [smem:[#allocation52_spill]] %s5168_s12 }
   0xc   :  { %5210 = sst [smem:[#allocation53_spill]] %s5169_s13 }
   0xd   :  { %5211 = sst [smem:[#allocation54_spill]] %s5170_s14 }
   0xe   :  { %5212 = sst [smem:[#allocation55_spill]] %s5171_s15 }
   0xf   :  { %5213 = sst [smem:[#allocation56_spill]] %s5172_s16 }
  0x10   :  { %21 = sst [smem:[#allocation2]] %s5162_s6 }
  0x11   :  { %22 = sst [smem:[#allocation3]] %s5167_s11 }
  0x12   :  { %23 = vsyncpa [#allocation5], 0 }
  0x13   :  { %25 = vsyncpa [#allocation5 + $0x1], 0 }
  0x14   :  { %26 = vsyncpa [#allocation8], 0 }
  0x15   :  { %28 = vsyncpa [#allocation8 + $0x1], 0 }
  0x16   :  { %29 = vsyncpa [#allocation11], 0 }
  0x17   :  { %30 = vsyncpa [#allocation14], 0 }
  0x18   :  { %31 = vsyncpa [#allocation17], 0 }
  0x19   :  { %32 = vsyncpa [#allocation20], 0 }
  0x1a   :  { %33 = vsyncpa [#allocation23], 0 }
  0x1b   :  { %34 = vsyncpa [#allocation26], 0 }
  0x1c   :  { %35 = vsyncpa [#allocation6], 0 }
  0x1d   :  { %37 = vsyncpa [#allocation6 + $0x1], 0  ;;  %s4179_s25 = smov 0   ;;  %s4181_s26 = smov 0  }
  0x1e   :  { %s4183_s6 = smov 0   ;;  %s4185_s27 = smov 0  }
  0x1f LB: > { %5214 = sst [smem:[#allocation37_spill]] %s4059_s6  ;;  %s4065_s11 = smov [#allocation10]   ;;  %s4063_s27 = sphi %s4185_s27, %s5270_s27   ;;  %s4059_s6 = sphi %s4183_s6, %s5272_s6   ;;  %s4055_s26 = sphi %s4181_s26, %s5274_s26   ;;  %s4051_s25 = sphi %s4179_s25, %s5273_s25  }
  0x20   : > { %s437_s28 = sshll.u32 %s4065_s11, 4  ;;  %s4200_s29 = sadd.s32 4294967295, %s4063_s27   ;;  %s4205_s28 = int_to_ptr.vmem [resolvable:$true] %s437_s28 }
  0x21   : > { %p2936_p0 = scmp.ge.s32.totalorder %s4063_s27, 1  ;;  %p5179_p1 = scmp.eq.s32.totalorder %s4200_s29, 0 }
  0x22   : > { %p425_p2 = scmp.lt.s32.totalorder %s4063_s27, 3  ;;  %s4066_s0 = smov [#allocation13]  }
  0x23   : > { %s464_s17 = sshll.u32 %s4066_s0, 4  ;;  %s4067_s19 = smov [#allocation16]   ;;  %s4220_s17 = int_to_ptr.vmem [resolvable:$true] %s464_s17 }
  0x24   : > { %p4207_p3 = pnand %p2936_p0, %p425_p2  ;;  %s489_s20 = sshll.u32 %s4067_s19, 4  ;;  %s4222_s20 = int_to_ptr.vmem [resolvable:$true] %s489_s20 }
  0x25   : > { %s5218_s3 = sld [smem:[#allocation45_spill]] }
  0x26   : > { %s5215_s30 = scalar_select %p4207_p3, 1, 0 }
  0x27   : > { %p3236_p5 = pneg %p4207_p3 }
  0x28   : > { %5216 = sst [smem:[#allocation38_spill]] %s5215_s30 }
  0x29   : > { %p4216_p6 = pnand %p3236_p5, %p5179_p1 }
  0x2b   : > { %s5217_s18 = scalar_select %p4216_p6, 1, 0 }
  0x2c   : > { %s3571_s23 = scalar_lea.hbm %s5218_s3, 2048  ;;  %p4232_p8 = pneg %p4216_p6 }
  0x2d   : > { %p3572_p7 = scmp.ne.s32.totalorder %s5218_s3, %s3571_s23  ;;  %p3578_p11 = scmp.lt.u32.totalorder %s3571_s23, %s5218_s3 }
  0x2e   : > { %s5219_s0 = scalar_select %p4232_p8, 1, 0 }
  0x2f   : > { %p3574_p9 = pnand %p4232_p8, %p3572_p7 }
  0x31   : > { %p3575_p10 = pneg %p3574_p9 }
  0x33   : > { %p3580_p12 = pnand %p3578_p11, %p3575_p10 }
  0x35   : > { %3583 = shalt.err (!%p3580_p12)
}
  0x36   : > { %s3584_s21 = scalar_lea.vmem %s4205_s28, 2048  ;;  %p3592_p5 = scmp.lt.s32.totalorder %s4205_s28, %s4205_s28 }
  0x37   : > { %p3585_p13 = scmp.ne.s32.totalorder %s4205_s28, %s3584_s21  ;;  %p3593_p4 = scmp.lt.s32.totalorder %s3584_s21, %s3584_s21 }
  0x39   : > { %p3587_p0 = pnand %p3585_p13, %p4232_p8  ;;  %p3594_p7 = por %p3593_p4, %p3592_p5 }
  0x3b   : > { %p3588_p2 = pneg %p3587_p0 }
  0x3d   : > { %p3595_p9 = pnand %p3594_p7, %p3588_p2 }
  0x3f   : > { %3598 = shalt.err (!%p3595_p9)
}
  0x40   : > { %s4068_s22 = smov 64   ;;  %s4069_s16 = smov 4  }
  0x41   : > { %3239 = dma.hbm_to_vmem [thread:$0]  (!%p4216_p6), %s5218_s3, 2048, %s4205_s28, [#allocation11], %s4068_s22, %s4068_s22, %s4069_s16  }
  0x42   : > { %s5220_s5 = sld [smem:[#allocation47_spill]] }
  0x48   : > { %s3599_s30 = scalar_lea.hbm %s5220_s5, 64 }
  0x49   : > { %p3600_p4 = scmp.ne.s32.totalorder %s5220_s5, %s3599_s30  ;;  %p3606_p12 = scmp.lt.u32.totalorder %s3599_s30, %s5220_s5 }
  0x4b   : > { %p3602_p10 = pnand %p3600_p4, %p4232_p8 }
  0x4d   : > { %p3603_p11 = pneg %p3602_p10 }
  0x4f   : > { %p3608_p13 = pnand %p3606_p12, %p3603_p11 }
  0x51   : > { %3611 = shalt.err (!%p3608_p13)
}
  0x52   : > { %s3612_s28 = scalar_lea.vmem %s4220_s17, 64  ;;  %p3620_p7 = scmp.lt.s32.totalorder %s4220_s17, %s4220_s17 }
  0x53   : > { %p3613_p0 = scmp.ne.s32.totalorder %s4220_s17, %s3612_s28  ;;  %p3621_p9 = scmp.lt.s32.totalorder %s3612_s28, %s3612_s28 }
  0x55   : > { %p3615_p2 = pnand %p3613_p0, %p4232_p8  ;;  %p3622_p4 = por %p3621_p9, %p3620_p7 }
  0x57   : > { %p3616_p5 = pneg %p3615_p2 }
  0x59   : > { %p3623_p10 = pnand %p3622_p4, %p3616_p5 }
  0x5b   : > { %3626 = shalt.err (!%p3623_p10)
}
  0x5c   : > { %3245 = dma.hbm_to_vmem [thread:$0]  (!%p4216_p6), %s5220_s5, 64, %s4220_s17, [#allocation14]  }
  0x5d   : > { %s5221_s8 = sld [smem:[#allocation49_spill]] }
  0x63   : > { %s3627_s22 = scalar_lea.hbm %s5221_s8, 64 }
  0x64   : > { %p3628_p11 = scmp.ne.s32.totalorder %s5221_s8, %s3627_s22  ;;  %p3634_p0 = scmp.lt.u32.totalorder %s3627_s22, %s5221_s8 }
  0x66   : > { %p3630_p12 = pnand %p3628_p11, %p4232_p8 }
  0x68   : > { %p3631_p13 = pneg %p3630_p12 }
  0x6a   : > { %p3636_p2 = pnand %p3634_p0, %p3631_p13 }
  0x6c   : > { %3639 = shalt.err (!%p3636_p2)
}
  0x6d   : > { %s3640_s17 = scalar_lea.vmem %s4222_s20, 64  ;;  %p3648_p4 = scmp.lt.s32.totalorder %s4222_s20, %s4222_s20 }
  0x6e   : > { %p3641_p5 = scmp.ne.s32.totalorder %s4222_s20, %s3640_s17  ;;  %p3649_p10 = scmp.lt.s32.totalorder %s3640_s17, %s3640_s17 }
  0x70   : > { %p3643_p7 = pnand %p3641_p5, %p4232_p8  ;;  %p3650_p11 = por %p3649_p10, %p3648_p4 }
  0x72   : > { %p3644_p9 = pneg %p3643_p7 }
  0x74   : > { %p3651_p12 = pnand %p3650_p11, %p3644_p9 }
  0x76   : > { %3654 = shalt.err (!%p3651_p12)
}
  0x77   : > { %3251 = dma.hbm_to_vmem [thread:$0]  (!%p4216_p6), %s5221_s8, 64, %s4222_s20, [#allocation17]  }
  0x78   : > { %s4070_s28 = smov [#allocation19]   ;;  %s4071_s14 = smov [#allocation22]  }
  0x79   : > { %s511_s2 = sshll.u32 %s4070_s28, 4  ;;  %s536_s15 = sshll.u32 %s4071_s14, 4  ;;  %s512_s2 = int_to_ptr.vmem [resolvable:$true] %s511_s2  ;;  %s537_s15 = int_to_ptr.vmem [resolvable:$true] %s536_s15 }
  0x7a   : > { %s5222_s10 = sld [smem:[#allocation51_spill]] }
  0x80   : > { %s3655_s16 = scalar_lea.hbm %s5222_s10, 64 }
  0x81   : > { %p3656_p13 = scmp.ne.s32.totalorder %s5222_s10, %s3655_s16  ;;  %p3662_p5 = scmp.lt.u32.totalorder %s3655_s16, %s5222_s10 }
  0x83   : > { %p3658_p0 = pnand %p3656_p13, %p4232_p8 }
  0x85   : > { %p3659_p2 = pneg %p3658_p0 }
  0x87   : > { %p3664_p7 = pnand %p3662_p5, %p3659_p2 }
  0x89   : > { %3667 = shalt.err (!%p3664_p7)
}
  0x8a   : > { %s3668_s20 = scalar_lea.vmem %s512_s2, 64  ;;  %p3676_p11 = scmp.lt.s32.totalorder %s512_s2, %s512_s2 }
  0x8b   : > { %p3669_p9 = scmp.ne.s32.totalorder %s512_s2, %s3668_s20  ;;  %p3677_p12 = scmp.lt.s32.totalorder %s3668_s20, %s3668_s20 }
  0x8d   : > { %p3671_p4 = pnand %p3669_p9, %p4232_p8  ;;  %p3678_p1 = por %p3677_p12, %p3676_p11 }
  0x8f   : > { %p3672_p10 = pneg %p3671_p4 }
  0x91   : > { %p3679_p3 = pnand %p3678_p1, %p3672_p10 }
  0x93   : > { %3682 = shalt.err (!%p3679_p3)
}
  0x94   : > { %3257 = dma.hbm_to_vmem [thread:$0]  (!%p4216_p6), %s5222_s10, 64, %s512_s2, [#allocation20]  }
  0x95   : > { %s5223_s13 = sld [smem:[#allocation53_spill]] }
  0x9b   : > { %s3683_s30 = scalar_lea.hbm %s5223_s13, 64 }
  0x9c   : > { %p3684_p13 = scmp.ne.s32.totalorder %s5223_s13, %s3683_s30  ;;  %p3690_p3 = scmp.lt.u32.totalorder %s3683_s30, %s5223_s13 }
  0x9e   : > { %p3686_p0 = pnand %p3684_p13, %p4232_p8 }
  0xa0   : > { %p3687_p1 = pneg %p3686_p0 }
  0xa2   : > { %p3692_p2 = pnand %p3690_p3, %p3687_p1 }
  0xa4   : > { %3695 = shalt.err (!%p3692_p2)
}
  0xa5   : > { %s3696_s11 = scalar_lea.vmem %s537_s15, 64  ;;  %p3704_p4 = scmp.lt.s32.totalorder %s537_s15, %s537_s15 }
  0xa6   : > { %p3697_p5 = scmp.ne.s32.totalorder %s537_s15, %s3696_s11  ;;  %p3705_p10 = scmp.lt.s32.totalorder %s3696_s11, %s3696_s11 }
  0xa8   : > { %p3699_p7 = pnand %p3697_p5, %p4232_p8  ;;  %p3706_p11 = por %p3705_p10, %p3704_p4 }
  0xaa   : > { %p3700_p9 = pneg %p3699_p7 }
  0xac   : > { %p3707_p12 = pnand %p3706_p11, %p3700_p9 }
  0xae   : > { %3710 = shalt.err (!%p3707_p12)
}
  0xaf   : > { %3263 = dma.hbm_to_vmem [thread:$0]  (!%p4216_p6), %s5223_s13, 64, %s537_s15, [#allocation23]  }
  0xb0   : > { %s2935_s20 = sadd.s32 4294967294, %s4063_s27   ;;  %s4337_s19 = sadd.s32 1, %s4063_s27  }
  0xb1   : > { %5224 = sst [smem:[#allocation39_spill]] %s4337_s19  ;;  %s50_s21 = sadd.s32 1, %s4059_s6 }
  0xb2   : > { %s47_s28 = ssub.s32 %s4063_s27, %s4337_s19  ;;  %p57_p13 = scmp.ne.s32.totalorder %s4059_s6, %s4055_s26 }
  0xb3   : > { %p48_p0 = scmp.eq.s32.totalorder %s47_s28, 0  ;;  %p58_p1 = scmp.eq.s32.totalorder %s4063_s27, 0 }
  0xb4   : > { %p63_p3 = scmp.ne.s32.totalorder %s4055_s26, %s4051_s25  ;;  %p412_p2 = scmp.eq.s32.totalorder %s4200_s29, 1 }
  0xb5   : > { %s4349_s14 = scalar_select %p48_p0, %s4059_s6, %s50_s21  }
  0xb6   : > { %p59_p5 = por %p58_p1, %p57_p13  ;;  %p5226_p7 = scmp.eq.s32.totalorder %s4200_s29, 0 }
  0xb7   : > { %5225 = sst [smem:[#allocation40_spill]] %s4349_s14  ;;  %p4357_p4 = por %p412_p2, %p57_p13 }
  0xb8   : > { %p4353_p9 = por %p5226_p7, %p63_p3  ;;  %p418_p10 = scmp.eq.s32.totalorder %s2935_s20, 1 }
  0xb9   : > { %s5228_s30 = scalar_select %p4357_p4, 1, 0 }
  0xba   : > { %s5227_s15 = scalar_select %p4353_p9, 1, 0 }
  0xbb   : > { %p4361_p11 = por %p418_p10, %p63_p3  ;;  %p3295_p12 = scmp.lt.s32.totalorder %s4063_s27, 2 }
  0xbc   : > { %s4367_s16 = sand.u32 1, %s4059_s6   ;;  %s5182_s23 = smul.u32 768, %s4063_s27 }
  0xbd   : > { %s5229_s22 = scalar_select %p4361_p11, 1, 0 }
  0xbe   : > { %s5181_s24 = smul.u32 48, %s4367_s16  ;;  %p4371_p0 = pnand %p3295_p12, %p59_p5 }
  0xbf   : > { %5230 = sst [smem:[#allocation41_spill]] %s5229_s22  ;;  %s592_s2 = sand.u32 1, %s4063_s27  }
  0xc0   : > { %s5231_s11 = scalar_select %p4371_p0, 1, 0 }
  0xc1   : > { %s5232_s1 = sld [smem:[#allocation43_spill]]  ;;  %s596_s28 = scalar_lea.vmem [#allocation7], %s5181_s24 }
  0xc2   : > { %s603_s3 = sshll.u32 %s596_s28, 4  ;;  %s4072_s5 = smov [#allocation12]   ;;  %s4385_s3 = int_to_ptr.vmem [resolvable:$true] %s603_s3 }
  0xc3   : > { %s450_s8 = sshll.u32 %s4072_s5, 4  ;;  %s4389_s10 = scalar_lea.sflag [#allocation8], %s592_s2  ;;  %s4387_s8 = int_to_ptr.vmem [resolvable:$true] %s450_s8 }
  0xc4   : > { %p4395_p1 = pneg %p4371_p0 }
  0xc6   : > { %s5233_s17 = scalar_select %p4395_p1, 1, 0 }
  0xc7   : > { %s4381_s21 = scalar_lea.hbm %s5232_s1, %s5182_s23  ;;  %s3716_s5 = scalar_lea.hbm %s5232_s1, 1536 }
  0xc8   : > { %s3711_s13 = scalar_lea.hbm %s4381_s21, 768  ;;  %p3717_p5 = scmp.lt.u32.totalorder %s4381_s21, %s5232_s1 }
  0xc9   : > { %p3712_p13 = scmp.ne.s32.totalorder %s4381_s21, %s3711_s13  ;;  %p3718_p7 = scmp.lt.u32.totalorder %s3716_s5, %s3711_s13 }
  0xca   : > { %p3720_p12 = scmp.lt.u32.totalorder %s3711_s13, %s4381_s21 }
  0xcb   : > { %p3714_p3 = pnand %p4395_p1, %p3712_p13  ;;  %p3719_p10 = por %p3718_p7, %p3717_p5 }
  0xcd   : > { %p3715_p2 = pneg %p3714_p3  ;;  %p3721_p11 = por %p3720_p12, %p3719_p10 }
  0xcf   : > { %p3722_p4 = pnand %p3721_p11, %p3715_p2 }
  0xd1   : > { %3725 = shalt.err (!%p3722_p4)
}
  0xd2   : > { %s3726_s2 = scalar_lea.vmem %s4385_s3, 768  ;;  %s4073_s20 = smov [#allocation7]  }
  0xd3   : > { %p3727_p13 = scmp.ne.s32.totalorder %s4385_s3, %s3726_s2  ;;  %s3731_s28 = sshll.u32 %s4073_s20, 4  ;;  %s3732_s28 = int_to_ptr.vmem [resolvable:$false] %s3731_s28 }
  0xd4   : > { %s3733_s23 = scalar_lea.vmem %s3732_s28, 1536  ;;  %p3734_p6 = scmp.lt.s32.totalorder %s4385_s3, %s3732_s28 }
  0xd5   : > { %p3729_p3 = pnand %p3727_p13, %p4395_p1  ;;  %p3735_p8 = scmp.lt.s32.totalorder %s3733_s23, %s3726_s2 }
  0xd7   : > { %p3730_p9 = pneg %p3729_p3  ;;  %p3736_p5 = por %p3735_p8, %p3734_p6 }
  0xd9   : > { %p3737_p7 = pnand %p3736_p5, %p3730_p9 }
  0xdb   : > { %3740 = shalt.err (!%p3737_p7)
}
  0xdc   : > { %s5196_s13 = smov 256   ;;  %s5197_s24 = smov 16  }
  0xdd   : > { %3276 = dma.hbm_to_vmem [thread:$0]  (!%p4371_p0), %s4381_s21, 768, %s4385_s3, %s4389_s10, %s5196_s13, %s5196_s13, %s5197_s24  }
  0xde   : > { %s5234_s4 = sld [smem:[#allocation46_spill]]  ;;  %p5235_p8 = scmp.ne.s32.totalorder %s5219_s0, 0 }
  0xe4   : > { %s3741_s28 = scalar_lea.hbm %s5234_s4, 8192 }
  0xe5   : > { %p3742_p6 = scmp.ne.s32.totalorder %s5234_s4, %s3741_s28  ;;  %p3748_p11 = scmp.lt.u32.totalorder %s3741_s28, %s5234_s4 }
  0xe7   : > { %p3744_p9 = pnand %p3742_p6, %p5235_p8 }
  0xe9   : > { %p3745_p4 = pneg %p3744_p9 }
  0xeb   : > { %p3750_p2 = pnand %p3748_p11, %p3745_p4 }
  0xed   : > { %3753 = shalt.err (!%p3750_p2)
}
  0xee   : > { %s3754_s3 = scalar_lea.vmem %s4387_s8, 8192  ;;  %p3762_p3 = scmp.lt.s32.totalorder %s4387_s8, %s4387_s8 }
  0xef   : > { %p3755_p10 = scmp.ne.s32.totalorder %s4387_s8, %s3754_s3  ;;  %p3763_p5 = scmp.lt.s32.totalorder %s3754_s3, %s3754_s3 }
  0xf1   : > { %p3757_p12 = pnand %p3755_p10, %p5235_p8  ;;  %p3764_p7 = por %p3763_p5, %p3762_p3 }
  0xf3   : > { %p3758_p13 = pneg %p3757_p12 }
  0xf5   : > { %p3765_p6 = pnand %p3764_p7, %p3758_p13 }
  0xf7   : > { %3768 = shalt.err (!%p3765_p6)
}
  0xf8   : > { %p5236_p9 = scmp.ne.s32.totalorder %s5217_s18, 0  ;;  %s4076_s21 = smov [#allocation15]  }
  0xf9   : > { %s478_s5 = sshll.u32 %s4076_s21, 4  ;;  %s4077_s20 = smov [#allocation18]   ;;  %s479_s5 = int_to_ptr.vmem [resolvable:$true] %s478_s5 }
  0xfa   : > { %3242 = dma.hbm_to_vmem [thread:$0]  (!%p5236_p9), %s5234_s4, 8192, %s4387_s8, [#allocation11], %s5196_s13, %s5196_s13, %s5197_s24  }
  0xfb   : > { %s500_s28 = sshll.u32 %s4077_s20, 4  ;;  %s5237_s7 = sld [smem:[#allocation48_spill]]  ;;  %s4448_s28 = int_to_ptr.vmem [resolvable:$true] %s500_s28 }
 0x101   : > { %s3769_s3 = scalar_lea.hbm %s5237_s7, 64 }
 0x102   : > { %p3770_p4 = scmp.ne.s32.totalorder %s5237_s7, %s3769_s3  ;;  %p3776_p10 = scmp.lt.u32.totalorder %s3769_s3, %s5237_s7 }
 0x104   : > { %p3772_p11 = pnand %p3770_p4, %p5235_p8 }
 0x106   : > { %p3773_p2 = pneg %p3772_p11 }
 0x108   : > { %p3778_p12 = pnand %p3776_p10, %p3773_p2 }
 0x10a   : > { %3781 = shalt.err (!%p3778_p12)
}
 0x10b   : > { %s3782_s14 = scalar_lea.vmem %s479_s5, 64  ;;  %p3790_p7 = scmp.lt.s32.totalorder %s479_s5, %s479_s5 }
 0x10c   : > { %p3783_p13 = scmp.ne.s32.totalorder %s479_s5, %s3782_s14  ;;  %p3791_p6 = scmp.lt.s32.totalorder %s3782_s14, %s3782_s14 }
 0x10e   : > { %p3785_p3 = pnand %p3783_p13, %p5235_p8  ;;  %p3792_p0 = por %p3791_p6, %p3790_p7 }
 0x110   : > { %p3786_p5 = pneg %p3785_p3 }
 0x112   : > { %p3793_p1 = pnand %p3792_p0, %p3786_p5 }
 0x114   : > { %3796 = shalt.err (!%p3793_p1)
}
 0x115   : > { %3248 = dma.hbm_to_vmem [thread:$0]  (!%p5236_p9), %s5237_s7, 64, %s479_s5, [#allocation14]  }
 0x116   : > { %s5238_s9 = sld [smem:[#allocation50_spill]] }
 0x11c   : > { %s3797_s2 = scalar_lea.hbm %s5238_s9, 256 }
 0x11d   : > { %p3798_p4 = scmp.ne.s32.totalorder %s5238_s9, %s3797_s2  ;;  %p3804_p0 = scmp.lt.u32.totalorder %s3797_s2, %s5238_s9 }
 0x11f   : > { %p3800_p11 = pnand %p3798_p4, %p5235_p8 }
 0x121   : > { %p3801_p2 = pneg %p3800_p11 }
 0x123   : > { %p3806_p1 = pnand %p3804_p0, %p3801_p2 }
 0x125   : > { %3809 = shalt.err (!%p3806_p1)
}
 0x126   : > { %s3810_s5 = scalar_lea.vmem %s4448_s28, 256  ;;  %p3818_p3 = scmp.lt.s32.totalorder %s4448_s28, %s4448_s28 }
 0x127   : > { %p3811_p10 = scmp.ne.s32.totalorder %s4448_s28, %s3810_s5  ;;  %p3819_p5 = scmp.lt.s32.totalorder %s3810_s5, %s3810_s5 }
 0x129   : > { %p3813_p12 = pnand %p3811_p10, %p5235_p8  ;;  %p3820_p7 = por %p3819_p5, %p3818_p3 }
 0x12b   : > { %p3814_p13 = pneg %p3813_p12 }
 0x12d   : > { %p3821_p6 = pnand %p3820_p7, %p3814_p13 }
 0x12f   : > { %3824 = shalt.err (!%p3821_p6)
}
 0x130   : > { %3254 = dma.hbm_to_vmem [thread:$0]  (!%p5236_p9), %s5238_s9, 256, %s4448_s28, [#allocation17]  }
 0x131   : > { %s4078_s19 = smov [#allocation21]   ;;  %s4079_s20 = smov [#allocation24]  }
 0x132   : > { %s525_s21 = sshll.u32 %s4078_s19, 4  ;;  %s546_s2 = sshll.u32 %s4079_s20, 4  ;;  %s526_s21 = int_to_ptr.vmem [resolvable:$true] %s525_s21  ;;  %s4491_s2 = int_to_ptr.vmem [resolvable:$true] %s546_s2 }
 0x133   : > { %s5239_s12 = sld [smem:[#allocation52_spill]] }
 0x139   : > { %s3825_s1 = scalar_lea.hbm %s5239_s12, 64 }
 0x13a   : > { %p3826_p4 = scmp.ne.s32.totalorder %s5239_s12, %s3825_s1  ;;  %p3832_p0 = scmp.lt.u32.totalorder %s3825_s1, %s5239_s12 }
 0x13c   : > { %p3828_p11 = pnand %p3826_p4, %p5235_p8 }
 0x13e   : > { %p3829_p2 = pneg %p3828_p11 }
 0x140   : > { %p3834_p1 = pnand %p3832_p0, %p3829_p2 }
 0x142   : > { %3837 = shalt.err (!%p3834_p1)
}
 0x143   : > { %s3838_s6 = scalar_lea.vmem %s526_s21, 64  ;;  %p3846_p3 = scmp.lt.s32.totalorder %s526_s21, %s526_s21 }
 0x144   : > { %p3839_p10 = scmp.ne.s32.totalorder %s526_s21, %s3838_s6  ;;  %p3847_p5 = scmp.lt.s32.totalorder %s3838_s6, %s3838_s6 }
 0x146   : > { %p3841_p12 = pnand %p3839_p10, %p5235_p8  ;;  %p3848_p7 = por %p3847_p5, %p3846_p3 }
 0x148   : > { %p3842_p13 = pneg %p3841_p12 }
 0x14a   : > { %p3849_p6 = pnand %p3848_p7, %p3842_p13 }
 0x14c   : > { %3852 = shalt.err (!%p3849_p6)
}
 0x14d   : > { %3260 = dma.hbm_to_vmem [thread:$0]  (!%p5236_p9), %s5239_s12, 64, %s526_s21, [#allocation20]  }
 0x14e   : > { %s5240_s1 = sld [smem:[#allocation54_spill]] }
 0x154   : > { %s3853_s8 = scalar_lea.hbm %s5240_s1, 8192 }
 0x155   : > { %p3854_p4 = scmp.ne.s32.totalorder %s5240_s1, %s3853_s8  ;;  %p3860_p0 = scmp.lt.u32.totalorder %s3853_s8, %s5240_s1 }
 0x157   : > { %p3856_p11 = pnand %p3854_p4, %p5235_p8 }
 0x159   : > { %p3857_p2 = pneg %p3856_p11 }
 0x15b   : > { %p3862_p1 = pnand %p3860_p0, %p3857_p2 }
 0x15d   : > { %3865 = shalt.err (!%p3862_p1)
}
 0x15e   : > { %s3866_s21 = scalar_lea.vmem %s4491_s2, 8192  ;;  %p3874_p3 = scmp.lt.s32.totalorder %s4491_s2, %s4491_s2 }
 0x15f   : > { %p3867_p10 = scmp.ne.s32.totalorder %s4491_s2, %s3866_s21  ;;  %p3875_p5 = scmp.lt.s32.totalorder %s3866_s21, %s3866_s21 }
 0x161   : > { %p3869_p12 = pnand %p3867_p10, %p5235_p8  ;;  %p3876_p7 = por %p3875_p5, %p3874_p3 }
 0x163   : > { %p3870_p13 = pneg %p3869_p12 }
 0x165   : > { %p3877_p6 = pnand %p3876_p7, %p3870_p13 }
 0x167   : > { %3880 = shalt.err (!%p3877_p6)
}
 0x168   : > { %s4080_s19 = smov 128   ;;  %s4081_s20 = smov 8  }
 0x169   : > { %3266 = dma.hbm_to_vmem [thread:$0]  (!%p5236_p9), %s5240_s1, 8192, %s4491_s2, [#allocation23], %s4080_s19, %s4080_s19, %s4081_s20  }
 0x16a   : > { %s4082_s8 = smov [#allocation25]   ;;  %s5241_s14 = smul.u32 768, %s4063_s27 }
 0x16b   : > { %s560_s5 = sshll.u32 %s4082_s8, 4  ;;  %s5242_s21 = sld [smem:[#allocation42_spill]]  ;;  %s561_s5 = int_to_ptr.vmem [resolvable:$true] %s560_s5 }
 0x16c   : > { %s5243_s7 = sld [smem:[#allocation55_spill]] }
 0x171   : > { %s4542_s13 = scalar_lea.hbm %s5242_s21, %s5241_s14 }
 0x172   : > { %s3881_s9 = scalar_lea.hbm %s5243_s7, 32 }
 0x173   : > { %p3882_p4 = scmp.ne.s32.totalorder %s5243_s7, %s3881_s9  ;;  %p3888_p0 = scmp.lt.u32.totalorder %s3881_s9, %s5243_s7 }
 0x175   : > { %p3884_p11 = pnand %p3882_p4, %p5235_p8 }
 0x177   : > { %p3885_p2 = pneg %p3884_p11 }
 0x179   : > { %p3890_p1 = pnand %p3888_p0, %p3885_p2 }
 0x17b   : > { %3893 = shalt.err (!%p3890_p1)
}
 0x17c   : > { %s3894_s3 = scalar_lea.vmem %s561_s5, 32  ;;  %p3902_p3 = scmp.lt.s32.totalorder %s561_s5, %s561_s5 }
 0x17d   : > { %p3895_p10 = scmp.ne.s32.totalorder %s561_s5, %s3894_s3  ;;  %p3903_p5 = scmp.lt.s32.totalorder %s3894_s3, %s3894_s3 }
 0x17f   : > { %p3897_p12 = pnand %p3895_p10, %p5235_p8  ;;  %p3904_p7 = por %p3903_p5, %p3902_p3 }
 0x181   : > { %p3898_p13 = pneg %p3897_p12 }
 0x183   : > { %p3905_p6 = pnand %p3904_p7, %p3898_p13 }
 0x185   : > { %3908 = shalt.err (!%p3905_p6)
}
 0x186   : > { %3269 = dma.hbm_to_vmem [thread:$0]  (!%p5236_p9), %s5243_s7, 32, %s561_s5, [#allocation26]  }
 0x187   : > { %s5244_s9 = smul.u32 48, %s4367_s16  ;;  %s572_s8 = scalar_lea.sflag [#allocation5], %s4367_s16 }
 0x188   : > { %s3167_s24 = smul.u32 24, %s4367_s16  ;;  %s3909_s14 = scalar_lea.hbm %s4542_s13, 768 }
 0x189   : > { %s575_s0 = scalar_lea.vmem [#allocation4], %s5244_s9  ;;  %s3168_s18 = smul.u32 384, %s4063_s27 }
 0x18a   : > { %s582_s22 = sshll.u32 %s575_s0, 4  ;;  %p3910_p8 = scmp.ne.s32.totalorder %s4542_s13, %s3909_s14  ;;  %s4565_s22 = int_to_ptr.vmem [resolvable:$true] %s582_s22 }
 0x18b   : > { %p5245_p4 = scmp.ne.s32.totalorder %s5233_s17, 0  ;;  %s3914_s2 = scalar_lea.hbm %s5242_s21, 1536 }
 0x18c   : > { %p3915_p9 = scmp.lt.u32.totalorder %s4542_s13, %s5242_s21  ;;  %p3916_p0 = scmp.lt.u32.totalorder %s3914_s2, %s3909_s14 }
 0x18d   : > { %p3912_p11 = pnand %p3910_p8, %p5245_p4  ;;  %p3918_p10 = scmp.lt.u32.totalorder %s3909_s14, %s4542_s13 }
 0x18e   : > { %p3917_p1 = por %p3916_p0, %p3915_p9 }
 0x18f   : > { %p3913_p2 = pneg %p3912_p11 }
 0x190   : > { %p3919_p12 = por %p3918_p10, %p3917_p1 }
 0x192   : > { %p3920_p13 = pnand %p3919_p12, %p3913_p2 }
 0x194   : > { %3923 = shalt.err (!%p3920_p13)
}
 0x195   : > { %s3924_s5 = scalar_lea.vmem %s4565_s22, 768  ;;  %s4083_s4 = smov [#allocation4]  }
 0x196   : > { %p3925_p3 = scmp.ne.s32.totalorder %s4565_s22, %s3924_s5  ;;  %s3929_s12 = sshll.u32 %s4083_s4, 4  ;;  %s3930_s12 = int_to_ptr.vmem [resolvable:$false] %s3929_s12 }
 0x197   : > { %s3931_s9 = scalar_lea.vmem %s3930_s12, 1536  ;;  %p3932_p6 = scmp.lt.s32.totalorder %s4565_s22, %s3930_s12 }
 0x198   : > { %p3927_p5 = pnand %p3925_p3, %p5245_p4  ;;  %p3933_p8 = scmp.lt.s32.totalorder %s3931_s9, %s3924_s5 }
 0x19a   : > { %p3928_p7 = pneg %p3927_p5  ;;  %p3934_p11 = por %p3933_p8, %p3932_p6 }
 0x19c   : > { %p3935_p9 = pnand %p3934_p11, %p3928_p7 }
 0x19e   : > { %3938 = shalt.err (!%p3935_p9)
}
 0x19f   : > { %p5246_p2 = scmp.ne.s32.totalorder %s5231_s11, 0  ;;  %s5247_s0 = smov 16  }
 0x1a0   : > { %s5248_s14 = smov 256   ;;  %s5249_s2 = sld [smem:[#allocation44_spill]] }
 0x1a1   : > { %3273 = dma.hbm_to_vmem [thread:$0]  (!%p5246_p2), %s4542_s13, 768, %s4565_s22, %s572_s8, %s5248_s14, %s5248_s14, %s5247_s0  }
 0x1a2   : > { %s617_s3 = scalar_lea.vmem [#allocation9], %s3167_s24 }
 0x1a3   : > { %s624_s5 = sshll.u32 %s617_s3, 4  ;;  %s4604_s5 = int_to_ptr.vmem [resolvable:$true] %s624_s5 }
 0x1a6   : > { %s4600_s23 = scalar_lea.hbm %s5249_s2, %s3168_s18  ;;  %s3944_s8 = scalar_lea.hbm %s5249_s2, 768 }
 0x1a7   : > { %s3939_s4 = scalar_lea.hbm %s4600_s23, 384  ;;  %p3945_p12 = scmp.lt.u32.totalorder %s4600_s23, %s5249_s2 }
 0x1a8   : > { %p3940_p0 = scmp.ne.s32.totalorder %s4600_s23, %s3939_s4  ;;  %p3946_p13 = scmp.lt.u32.totalorder %s3944_s8, %s3939_s4 }
 0x1a9   : > { %p3948_p5 = scmp.lt.u32.totalorder %s3939_s4, %s4600_s23 }
 0x1aa   : > { %p3942_p1 = pnand %p3940_p0, %p5245_p4  ;;  %p3947_p3 = por %p3946_p13, %p3945_p12 }
 0x1ac   : > { %p3943_p10 = pneg %p3942_p1  ;;  %p3949_p7 = por %p3948_p5, %p3947_p3 }
 0x1ae   : > { %p3950_p6 = pnand %p3949_p7, %p3943_p10 }
 0x1b0   : > { %3953 = shalt.err (!%p3950_p6)
}
 0x1b1   : > { %s3954_s16 = scalar_lea.vmem %s4604_s5, 384  ;;  %s4084_s24 = smov [#allocation9]  }
 0x1b2   : > { %p3955_p8 = scmp.ne.s32.totalorder %s4604_s5, %s3954_s16  ;;  %s3959_s9 = sshll.u32 %s4084_s24, 4  ;;  %s3960_s9 = int_to_ptr.vmem [resolvable:$false] %s3959_s9 }
 0x1b3   : > { %s3961_s0 = scalar_lea.vmem %s3960_s9, 768  ;;  %p3962_p0 = scmp.lt.s32.totalorder %s4604_s5, %s3960_s9 }
 0x1b4   : > { %p3957_p11 = pnand %p3955_p8, %p5245_p4  ;;  %p3963_p1 = scmp.lt.s32.totalorder %s3961_s0, %s3954_s16 }
 0x1b6   : > { %p3958_p9 = pneg %p3957_p11  ;;  %p3964_p12 = por %p3963_p1, %p3962_p0 }
 0x1b8   : > { %p3965_p13 = pnand %p3964_p12, %p3958_p9 }
 0x1ba   : > { %3968 = shalt.err (!%p3965_p13)
}
 0x1bb   : > { %3279 = dma.hbm_to_vmem [thread:$0]  (!%p5246_p2), %s4600_s23, 384, %s4604_s5, %s4389_s10, %s4080_s19, %s4080_s19, %s4081_s20  }
 0x1bc   : > { %s5250_s17 = sld [smem:[#allocation38_spill]] }
 0x1c2   : > { %p5251_p4 = scmp.ne.s32.totalorder %s5250_s17, 0 }
 0x1c3   : > { %s4634_s14 = sand.u32 (!%p5251_p4), 1, %s4055_s26   ;;  %p5252_p10 = scmp.ne.s32.totalorder (!%p5251_p4), %s5227_s15, 0 }
 0x1c4   : > { %636 = sbr.rel (%p5251_p4) target bundleno = 2458 (0x99a), region = 84  ;;  %s639_s6 = scalar_lea.sflag (!%p5251_p4), [#allocation5], %s4634_s14 }
 0x1c5   : > { %s3169_s28 = smul.u32 (!%p5251_p4), 48, %s4634_s14 }
 0x1c7   : > { %s4638_s3 = scalar_lea.vmem (!%p5251_p4), [#allocation4], %s3169_s28 }
 0x1cb   : > { %4014 = dma.done.wait (%p5252_p10), %s639_s6, 768  }
 0x1cc   : > { %4016 = vsyncadd (%p5252_p10), %s639_s6, 4294966528  ;;  %s647_s10 = sand.u32 1, %s4200_s29   ;;  %s4645_s19 = scalar_lea.vmem [#allocation7], %s3169_s28 }
 0x1cd   : > { %s648_s11 = scalar_lea.sflag [#allocation8], %s647_s10 }
 0x1ce   : > { %4018 = dma.done.wait (%p5252_p10), %s648_s11, 1152  }
 0x1cf   : > { %4020 = vsyncadd (%p5252_p10), %s648_s11, 4294966144  ;;  %s3170_s20 = smul.u32 24, %s4634_s14  ;;  %p5253_p2 = scmp.eq.s32.totalorder %s4200_s29, 0 }
 0x1d1   : > { %s4654_s23 = scalar_lea.vmem [#allocation9], %s3170_s20 }
 0x1d2   : > { %4022 = dma.done.wait (%p5253_p2), [#allocation11], 10240   ;;  %p5254_p3 = pmov %p5253_p2 }
 0x1d3   : > { %p5255_p5 = pmov %p5253_p2 }
 0x1d4   : > { %4024 = vsyncadd (%p5254_p3), [#allocation11], 4294957056 }
 0x1d5   : > { %4026 = dma.done.wait (%p5255_p5), [#allocation14], 128   ;;  %p5256_p7 = pmov %p5253_p2 }
 0x1d6   : > { %p5257_p6 = pmov %p5253_p2 }
 0x1d7   : > { %4028 = vsyncadd (%p5256_p7), [#allocation14], 4294967168 }
 0x1d8   : > { %4030 = dma.done.wait (%p5257_p6), [#allocation17], 320   ;;  %p5258_p8 = pmov %p5253_p2 }
 0x1d9   : > { %p5259_p11 = pmov %p5253_p2 }
 0x1da   : > { %4032 = vsyncadd (%p5258_p8), [#allocation17], 4294966976 }
 0x1db   : > { %4034 = dma.done.wait (%p5259_p11), [#allocation20], 128   ;;  %p5260_p9 = pmov %p5253_p2 }
 0x1dc   : > { %p5261_p0 = pmov %p5253_p2 }
 0x1dd   : > { %4036 = vsyncadd (%p5260_p9), [#allocation20], 4294967168 }
 0x1de   : > { %4038 = dma.done.wait (%p5261_p0), [#allocation23], 8256   ;;  %p5262_p1 = pmov %p5261_p0 }
 0x1df   : > { %p5263_p12 = pmov %p5261_p0 }
 0x1e0   : > { %4040 = vsyncadd (%p5262_p1), [#allocation23], 4294959040 }
 0x1e1   : > { %4042 = dma.done.wait (%p5263_p12), [#allocation26], 32   ;;  %p5264_p13 = pmov %p5261_p0 }
 0x1e2   : > { %v3359_v0 = vld [vmem:[#allocation12 + $0x4] ss:$16 sps:$4 sm:$0xff]   ;;  %v3361_v1 = vld [vmem:[#allocation12] ss:$16 sps:$4 sm:$0xff]   ;;  %v765_v13 = vld [vmem:[%s4638_s3 + $0x8] sm:$0xff]  ;;  %s1294_s15 = sld [smem:[#allocation2]] }
 0x1e3   : > { %4044 = vsyncadd (%p5264_p13), [#allocation26], 4294967264  ;;  %1180 = vmatprep.subr.bf16.mxu1 %v3359_v0  ;;  %v3362_v2 = vld [vmem:[#allocation12 + $0x24] ss:$16 sps:$4 sm:$0xff]   ;;  %v3364_v3 = vld [vmem:[#allocation12 + $0x20] ss:$16 sps:$4 sm:$0xff]  }
 0x1e4   : > { %1181 = vmatpush1.bf16.msra.mxu1 %v3361_v1  ;;  %v3365_v4 = vld [vmem:[#allocation12 + $0x44] ss:$16 sps:$4 sm:$0xff]   ;;  %v3367_v5 = vld [vmem:[#allocation12 + $0x40] ss:$16 sps:$4 sm:$0xff]   ;;  %v767_v14 = vld [vmem:[%s4638_s3 + $0x18] sm:$0xff]  ;;  %vm1327_vm10 = vcmask 1040384  }
 0x1e5   : > { %1182 = vmatprep.subr.bf16.mxu1 %v3362_v2  ;;  %v3368_v6 = vld [vmem:[#allocation12 + $0x64] ss:$16 sps:$4 sm:$0xff]   ;;  %v3370_v7 = vld [vmem:[#allocation12 + $0x60] ss:$16 sps:$4 sm:$0xff]   ;;  %v4682_v15 = vpack.c.bf16 %v767_v14, %v765_v13  ;;  %v3409_v37 = vld [vmem:[#allocation12 + $0xc] ss:$16 sps:$4 sm:$0xff]  }
 0x1e6   : > { %v3371_v8 = vld [vmem:[#allocation12 + $0x84] ss:$16 sps:$4 sm:$0xff]   ;;  %v3373_v9 = vld [vmem:[#allocation12 + $0x80] ss:$16 sps:$4 sm:$0xff]   ;;  %v769_v38 = vld [vmem:[%s4638_s3 + $0x28] sm:$0x1] }
 0x1e7   : > { %v3374_v10 = vld [vmem:[#allocation12 + $0xa4] ss:$16 sps:$4 sm:$0xff]   ;;  %v3376_v11 = vld [vmem:[#allocation12 + $0xa0] ss:$16 sps:$4 sm:$0xff]   ;;  %1212 = vmatprep.mubr.bf16.mxu1 %v4682_v15  ;;  %v3407_v39 = vld [vmem:[#allocation12 + $0x8] ss:$16 sps:$4 sm:$0xff]   ;;  %v4690_v42 = vpack.c.bf16 %v769_v38, %v769_v38 }
 0x1e8   : > { %1183 = vmatpush1.bf16.msra.mxu1 %v3364_v3  ;;  %v3377_v12 = vld [vmem:[#allocation12 + $0xc4] ss:$16 sps:$4 sm:$0xff]   ;;  %v3379_v16 = vld [vmem:[#allocation12 + $0xc0] ss:$16 sps:$4 sm:$0xff]   ;;  %v3412_v41 = vld [vmem:[#allocation12 + $0x2c] ss:$16 sps:$4 sm:$0xff]  }
 0x1e9   : > { %1184 = vmatprep.subr.bf16.mxu1 %v3365_v4  ;;  %v3380_v17 = vld [vmem:[#allocation12 + $0xe4] ss:$16 sps:$4 sm:$0xff]   ;;  %v3382_v18 = vld [vmem:[#allocation12 + $0xe0] ss:$16 sps:$4 sm:$0xff]   ;;  %v3410_v43 = vld [vmem:[#allocation12 + $0x28] ss:$16 sps:$4 sm:$0xff]  }
 0x1ea   : > { %v3383_v19 = vld [vmem:[#allocation12 + $0x104] ss:$16 sps:$4 sm:$0xff]   ;;  %v3385_v20 = vld [vmem:[#allocation12 + $0x100] ss:$16 sps:$4 sm:$0xff]   ;;  %v3415_v45 = vld [vmem:[#allocation12 + $0x4c] ss:$16 sps:$4 sm:$0xff]  }
 0x1eb   : > { %v3386_v21 = vld [vmem:[#allocation12 + $0x124] ss:$16 sps:$4 sm:$0xff]   ;;  %v3388_v22 = vld [vmem:[#allocation12 + $0x120] ss:$16 sps:$4 sm:$0xff]   ;;  %v3413_v46 = vld [vmem:[#allocation12 + $0x48] ss:$16 sps:$4 sm:$0xff]  }
 0x1ec   : > { %1185 = vmatpush1.bf16.msra.mxu1 %v3367_v5  ;;  %v3389_v23 = vld [vmem:[#allocation12 + $0x144] ss:$16 sps:$4 sm:$0xff]   ;;  %v3391_v24 = vld [vmem:[#allocation12 + $0x140] ss:$16 sps:$4 sm:$0xff]   ;;  %v3418_v47 = vld [vmem:[#allocation12 + $0x6c] ss:$16 sps:$4 sm:$0xff]  }
 0x1ed   : > { %1186 = vmatprep.subr.bf16.mxu1 %v3368_v6  ;;  %v3392_v25 = vld [vmem:[#allocation12 + $0x164] ss:$16 sps:$4 sm:$0xff]   ;;  %v3394_v26 = vld [vmem:[#allocation12 + $0x160] ss:$16 sps:$4 sm:$0xff]   ;;  %v3416_v49 = vld [vmem:[#allocation12 + $0x68] ss:$16 sps:$4 sm:$0xff]  }
 0x1ee   : > { %v3395_v27 = vld [vmem:[#allocation12 + $0x184] ss:$16 sps:$4 sm:$0xff]   ;;  %v3397_v28 = vld [vmem:[#allocation12 + $0x180] ss:$16 sps:$4 sm:$0xff]   ;;  %v3421_v50 = vld [vmem:[#allocation12 + $0x8c] ss:$16 sps:$4 sm:$0xff]  }
 0x1ef   : > { %v3398_v29 = vld [vmem:[#allocation12 + $0x1a4] ss:$16 sps:$4 sm:$0xff]   ;;  %v3400_v30 = vld [vmem:[#allocation12 + $0x1a0] ss:$16 sps:$4 sm:$0xff]   ;;  %v3419_v51 = vld [vmem:[#allocation12 + $0x88] ss:$16 sps:$4 sm:$0xff]  }
 0x1f0   : > { %1187 = vmatpush1.bf16.msra.mxu1 %v3370_v7  ;;  %v3401_v31 = vld [vmem:[#allocation12 + $0x1c4] ss:$16 sps:$4 sm:$0xff]   ;;  %v3403_v32 = vld [vmem:[#allocation12 + $0x1c0] ss:$16 sps:$4 sm:$0xff]   ;;  %v3424_v52 = vld [vmem:[#allocation12 + $0xac] ss:$16 sps:$4 sm:$0xff]  }
 0x1f1   : > { %1188 = vmatprep.subr.bf16.mxu1 %v3371_v8  ;;  %v3404_v33 = vld [vmem:[#allocation12 + $0x1e4] ss:$16 sps:$4 sm:$0xff]   ;;  %v3406_v34 = vld [vmem:[#allocation12 + $0x1e0] ss:$16 sps:$4 sm:$0xff]   ;;  %v3422_v53 = vld [vmem:[#allocation12 + $0xa8] ss:$16 sps:$4 sm:$0xff]  }
 0x1f2   : > { %v764_v35 = vld [vmem:[%s4638_s3] sm:$0xff]  ;;  %v766_v36 = vld [vmem:[%s4638_s3 + $0x10] sm:$0xff]  ;;  %v3427_v54 = vld [vmem:[#allocation12 + $0xcc] ss:$16 sps:$4 sm:$0xff]   ;;  %s4805_s12 = sld [smem:[#allocation3]]  ;;  %vm1529_vm13 = vcmask 1041408  }
 0x1f3   : > { %v4688_v40 = vpack.c.bf16 %v766_v36, %v764_v35  ;;  %v768_v44 = vld [vmem:[%s4638_s3 + $0x20] sm:$0x1]  ;;  %v3425_v55 = vld [vmem:[#allocation12 + $0xc8] ss:$16 sps:$4 sm:$0xff]   ;;  %v3430_v56 = vld [vmem:[#allocation12 + $0xec] ss:$16 sps:$4 sm:$0xff]  }
 0x1f4   : > { %1189 = vmatpush1.bf16.msra.mxu1 %v3373_v9  ;;  %v772_v48 = vpack.c.bf16 %v768_v44, %v768_v44  ;;  %v3428_v57 = vld [vmem:[#allocation12 + $0xe8] ss:$16 sps:$4 sm:$0xff]   ;;  %v3433_v58 = vld [vmem:[#allocation12 + $0x10c] ss:$16 sps:$4 sm:$0xff]   ;;  %vm1615_vm14 = vcmask 1046528   ;;  %vm1707_vm15 = vcmask 1045504  }
 0x1f5   : > { %1190 = vmatprep.subr.bf16.mxu1 %v3374_v10  ;;  %v3431_v59 = vld [vmem:[#allocation12 + $0x108] ss:$16 sps:$4 sm:$0xff]   ;;  %v3436_v60 = vld [vmem:[#allocation12 + $0x12c] ss:$16 sps:$4 sm:$0xff]   ;;  %s762_s6 = scalar_lea.vmem [#allocation27], %s3170_s20  ;;  %s3183_s10 = smul.u32 384, %s4200_s29 }
 0x1f6   : > { %v3434_v61 = vld [vmem:[#allocation12 + $0x128] ss:$16 sps:$4 sm:$0xff]   ;;  %v3439_v62 = vld [vmem:[#allocation12 + $0x14c] ss:$16 sps:$4 sm:$0xff]   ;;  %s2714_s3 = sshll.u32 %s762_s6, 4  ;;  %p5266_p10 = scmp.ne.s32.totalorder %s5228_s30, 0  ;;  %s5107_s3 = int_to_ptr.vmem [resolvable:$true] %s2714_s3 }
 0x1f7   : > { %v3437_v63 = vld [vmem:[#allocation12 + $0x148] ss:$16 sps:$4 sm:$0xff]   ;;  %v3442_v0 = vld [vmem:[#allocation12 + $0x16c] ss:$16 sps:$4 sm:$0xff]   ;;  %s4085_s29 = smov [#allocation27]  }
 0x1f8   : > { %1191 = vmatpush1.bf16.msra.mxu1 %v3376_v11  ;;  %v3440_v1 = vld [vmem:[#allocation12 + $0x168] ss:$16 sps:$4 sm:$0xff]   ;;  %v3445_v2 = vld [vmem:[#allocation12 + $0x18c] ss:$16 sps:$4 sm:$0xff]  }
 0x1f9   : > { %1192 = vmatprep.subr.bf16.mxu1 %v3377_v12  ;;  %v3443_v3 = vld [vmem:[#allocation12 + $0x188] ss:$16 sps:$4 sm:$0xff]   ;;  %v3448_v4 = vld [vmem:[#allocation12 + $0x1ac] ss:$16 sps:$4 sm:$0xff]  }
 0x1fa   : > { %v3446_v5 = vld [vmem:[#allocation12 + $0x1a8] ss:$16 sps:$4 sm:$0xff]   ;;  %v3451_v6 = vld [vmem:[#allocation12 + $0x1cc] ss:$16 sps:$4 sm:$0xff]  }
 0x1fb   : > { %v3449_v7 = vld [vmem:[#allocation12 + $0x1c8] ss:$16 sps:$4 sm:$0xff]   ;;  %v3454_v8 = vld [vmem:[#allocation12 + $0x1ec] ss:$16 sps:$4 sm:$0xff]  }
 0x1fc   : > { %1193 = vmatpush1.bf16.msra.mxu1 %v3379_v16  ;;  %v3452_v9 = vld [vmem:[#allocation12 + $0x1e8] ss:$16 sps:$4 sm:$0xff]  }
 0x1fd   : > { %1194 = vmatprep.subr.bf16.mxu1 %v3380_v17 }
 0x200   : > { %1195 = vmatpush1.bf16.msra.mxu1 %v3382_v18  ;;  %v840_v18 = vlaneseq }
 0x201   : > { %1196 = vmatprep.subr.bf16.mxu1 %v3383_v19 }
 0x202   : > { %v841_v19 = vshrl.u32 %v840_v18, 7 }
 0x204   : > { %1197 = vmatpush1.bf16.msra.mxu1 %v3385_v20  ;;  %v4698_v20 = vsub.s32 0, %v841_v19 }
 0x205   : > { %1198 = vmatprep.subr.bf16.mxu1 %v3386_v21  ;;  %v4700_v21 = vsub.s32 1, %v841_v19 }
 0x208   : > { %1199 = vmatpush1.bf16.msra.mxu1 %v3388_v22  ;;  %v838_v22 = vld [vmem:[#allocation13] sm:$0xf] }
 0x209   : > { %1200 = vmatprep.subr.bf16.mxu1 %v3389_v23  ;;  %v843_v23 = vrot.slane %v838_v22, %v4698_v20 }
 0x20c   : > { %1201 = vmatpush1.bf16.msra.mxu1 %v3391_v24  ;;  %v847_v24 = vrot.slane %v838_v22, %v4700_v21 }
 0x20d   : > { %1202 = vmatprep.subr.bf16.mxu1 %v3392_v25 }
 0x210   : > { %1203 = vmatpush1.bf16.msra.mxu1 %v3394_v26 }
 0x211   : > { %1204 = vmatprep.subr.bf16.mxu1 %v3395_v27  ;;  %v4704_v27 = vsub.s32 2, %v841_v19 }
 0x214   : > { %1205 = vmatpush1.bf16.msra.mxu1 %v3397_v28  ;;  %v1295_v28 = vstv %s1294_s15  ;;  %s2701_s15 = scalar_lea.sflag [#allocation6], %s4634_s14 }
 0x215   : > { %1206 = vmatprep.subr.bf16.mxu1 %v3398_v29  ;;  %v4706_v29 = vsub.s32 3, %v841_v19 }
 0x218   : > { %1207 = vmatpush1.bf16.msra.mxu1 %v3400_v30 }
 0x219   : > { %1208 = vmatprep.subr.bf16.mxu1 %v3401_v31 }
 0x21c   : > { %1209 = vmatpush1.bf16.msra.mxu1 %v3403_v32  ;;  %v851_v32 = vrot.slane %v838_v22, %v4704_v27 }
 0x21d   : > { %1210 = vmatprep.subr.bf16.mxu1 %v3404_v33  ;;  %v855_v33 = vrot.slane %v838_v22, %v4706_v29 }
 0x220   : > { %1211 = vmatpush1.bf16.msra.mxu1 %v3406_v34 }
 0x221   : > { %1231 = vmatprep.subr.bf16.mxu1 %v3409_v37 }
 0x223   : > { %1213 = vmatmul.mubr.bf16.vlgmr.msra.gmra.mrb[0].mxu1 %v4688_v40 }
 0x224   : > { %1232 = vmatpush1.bf16.msra.mxu1 %v3407_v39  ;;  %1222 = vmatprep.mubr.bf16.mxu1 %v4690_v42 }
 0x225   : > { %1233 = vmatprep.subr.bf16.mxu1 %v3412_v41 }
 0x228   : > { %1234 = vmatpush1.bf16.msra.mxu1 %v3410_v43 }
 0x229   : > { %1235 = vmatprep.subr.bf16.mxu1 %v3415_v45 }
 0x22b   : > { %1223 = vmatmul.mubr.bf16.gmra.mrb[4].mxu1 %v772_v48 }
 0x22c   : > { %1236 = vmatpush1.bf16.msra.mxu1 %v3413_v46  ;;  %1263 = vmatprep.mubr.bf16.mxu1 %v4682_v15 }
 0x22d   : > { %1237 = vmatprep.subr.bf16.mxu1 %v3418_v47 }
 0x230   : > { %1238 = vmatpush1.bf16.msra.mxu1 %v3416_v49 }
 0x231   : > { %1239 = vmatprep.subr.bf16.mxu1 %v3421_v50 }
 0x234   : > { %1240 = vmatpush1.bf16.msra.mxu1 %v3419_v51 }
 0x235   : > { %1241 = vmatprep.subr.bf16.mxu1 %v3424_v52 }
 0x238   : > { %1242 = vmatpush1.bf16.msra.mxu1 %v3422_v53 }
 0x239   : > { %1243 = vmatprep.subr.bf16.mxu1 %v3427_v54 }
 0x23c   : > { %1244 = vmatpush1.bf16.msra.mxu1 %v3425_v55 }
 0x23d   : > { %1245 = vmatprep.subr.bf16.mxu1 %v3430_v56 }
 0x240   : > { %1246 = vmatpush1.bf16.msra.mxu1 %v3428_v57 }
 0x241   : > { %1247 = vmatprep.subr.bf16.mxu1 %v3433_v58 }
 0x244   : > { %1248 = vmatpush1.bf16.msra.mxu1 %v3431_v59 }
 0x245   : > { %1249 = vmatprep.subr.bf16.mxu1 %v3436_v60 }
 0x248   : > { %1250 = vmatpush1.bf16.msra.mxu1 %v3434_v61 }
 0x249   : > { %1251 = vmatprep.subr.bf16.mxu1 %v3439_v62 }
 0x24c   : > { %1252 = vmatpush1.bf16.msra.mxu1 %v3437_v63 }
 0x24d   : > { %1253 = vmatprep.subr.bf16.mxu1 %v3442_v0 }
 0x250   : > { %1254 = vmatpush1.bf16.msra.mxu1 %v3440_v1 }
 0x251   : > { %1255 = vmatprep.subr.bf16.mxu1 %v3445_v2 }
 0x254   : > { %1256 = vmatpush1.bf16.msra.mxu1 %v3443_v3 }
 0x255   : > { %1257 = vmatprep.subr.bf16.mxu1 %v3448_v4 }
 0x258   : > { %1258 = vmatpush1.bf16.msra.mxu1 %v3446_v5 }
 0x259   : > { %1259 = vmatprep.subr.bf16.mxu1 %v3451_v6 }
 0x25c   : > { %1260 = vmatpush1.bf16.msra.mxu1 %v3449_v7 }
 0x25d   : > { %1261 = vmatprep.subr.bf16.mxu1 %v3454_v8 }
 0x260   : > { %1262 = vmatpush1.bf16.msra.mxu1 %v3452_v9 }
 0x263   : > { %1264 = vmatmul.mubr.bf16.vlgmr.msra.gmra.mrb[8].mxu1 %v4688_v40 }
 0x264   : > { %1273 = vmatprep.mubr.bf16.mxu1 %v4690_v42 }
 0x26b   : > { %1274 = vmatmul.mubr.bf16.gmra.mrb[12].mxu1 %v772_v48 }
 0x2f6   : > { %v1214_v10 = vpop.f32.mrb[0].mxu1 }
 0x2f7   : > { %v1216_v11 = vpop.f32.mrb[1].mxu1  ;;  %v1215_v25 = vadd.f32 %v1214_v10, %v843_v23 }
 0x2f8   : > { %v1218_v12 = vpop.f32.mrb[2].mxu1  ;;  %v1217_v26 = vadd.f32 %v1216_v11, %v847_v24 }
 0x2f9   : > { %v1220_v13 = vpop.f32.mrb[3].mxu1  ;;  %v1296_v30 = vmul.f32 %v1295_v28, %v1215_v25  ;;  %vm1282_vm0 = vcmp.gt.f32.partialorder %v1215_v25, 0.0  ;;  %v1219_v37 = vadd.f32 %v1218_v12, %v843_v23 }
 0x2fa   : > { %v1297_v31 = vmul.f32 %v1295_v28, %v1217_v26  ;;  %vm1283_vm1 = vcmp.gt.f32.partialorder %v1217_v26, 0.0  ;;  %v1221_v42 = vadd.f32 %v1220_v13, %v847_v24 }
 0x2fb   : > { %v4710_v35 = vsel %vm1282_vm0, %v1215_v25, %v1296_v30  ;;  %v1300_v47 = vmul.f32 %v1295_v28, %v1219_v37  ;;  %vm1286_vm4 = vcmp.gt.f32.partialorder %v1219_v37, 0.0 }
 0x2fc   : > { %v4712_v36 = vsel %vm1283_vm1, %v1217_v26, %v1297_v31  ;;  %v1301_v53 = vmul.f32 %v1295_v28, %v1221_v42  ;;  %vm1287_vm5 = vcmp.gt.f32.partialorder %v1221_v42, 0.0 }
 0x2fd   : > { %v1320_v45 = vadd.f32 %v4712_v36, %v4710_v35  ;;  %v1312_v58 = vsel %vm1286_vm4, %v1219_v37, %v1300_v47 }
 0x2fe   : > { %v1224_v14 = vpop.f32.mrb[4].mxu1  ;;  %v1313_v1 = vsel %vm1287_vm5, %v1221_v42, %v1301_v53 }
 0x2ff   : > { %v1226_v15 = vpop.f32.mrb[5].mxu1  ;;  %v1225_v50 = vadd.f32 %v1224_v14, %v843_v23 }
 0x300   : > { %v1228_v16 = vpop.f32.mrb[6].mxu1  ;;  %v1227_v55 = vadd.f32 %v1226_v15, %v847_v24 }
 0x301   : > { %v1229_v17 = vpop.f32.mrb[7].mxu1  ;;  %v1304_v61 = vmul.f32 %v1295_v28, %v1225_v50  ;;  %vm1290_vm7 = vcmp.gt.f32.partialorder %v1225_v50, 0.0 }
 0x302   : > { %v1305_v4 = vmul.f32 %v1295_v28, %v1227_v55  ;;  %vm1291_vm9 = vcmp.gt.f32.partialorder %v1227_v55, 0.0 }
 0x303   : > { %v1316_v8 = vsel %vm1290_vm7, %v1225_v50, %v1304_v61 }
 0x304   : > { %v1317_v12 = vsel %vm1291_vm9, %v1227_v55, %v1305_v4  ;;  %v1328_v15 = vsel %vm1327_vm10, %v1316_v8, 0.0 }
 0x305   : > { %v1330_v18 = vsel %vm1327_vm10, %v1317_v12, 0.0 }
 0x336   : > { %v1265_v34 = vpop.f32.mrb[8].mxu1 }
 0x337   : > { %v1266_v38 = vadd.f32 %v1265_v34, %v851_v32  ;;  %v1267_v39 = vpop.f32.mrb[9].mxu1 }
 0x338   : > { %v1268_v40 = vadd.f32 %v1267_v39, %v855_v33  ;;  %v1269_v41 = vpop.f32.mrb[10].mxu1 }
 0x339   : > { %vm1284_vm2 = vcmp.gt.f32.partialorder %v1266_v38, 0.0  ;;  %v1298_v43 = vmul.f32 %v1295_v28, %v1266_v38  ;;  %v1271_v44 = vpop.f32.mrb[11].mxu1  ;;  %v1270_v49 = vadd.f32 %v1269_v41, %v851_v32 }
 0x33a   : > { %vm1285_vm3 = vcmp.gt.f32.partialorder %v1268_v40, 0.0  ;;  %v1299_v46 = vmul.f32 %v1295_v28, %v1268_v40  ;;  %v1272_v54 = vadd.f32 %v1271_v44, %v855_v33 }
 0x33b   : > { %v4716_v48 = vsel %vm1284_vm2, %v1266_v38, %v1298_v43  ;;  %v1302_v59 = vmul.f32 %v1295_v28, %v1270_v49  ;;  %vm1288_vm6 = vcmp.gt.f32.partialorder %v1270_v49, 0.0 }
 0x33c   : > { %v1321_v51 = vadd.f32 %v1320_v45, %v4716_v48  ;;  %v1311_v52 = vsel %vm1285_vm3, %v1268_v40, %v1299_v46  ;;  %v1303_v2 = vmul.f32 %v1295_v28, %v1272_v54  ;;  %vm1289_vm8 = vcmp.gt.f32.partialorder %v1272_v54, 0.0 }
 0x33d   : > { %v1314_v7 = vsel %vm1288_vm6, %v1270_v49, %v1302_v59 }
 0x33e   : > { %v1322_v56 = vadd.f32 %v1321_v51, %v1311_v52  ;;  %v1275_v57 = vpop.f32.mrb[12].mxu1  ;;  %v1315_v11 = vsel %vm1289_vm8, %v1272_v54, %v1303_v2 }
 0x33f   : > { %v1277_v60 = vpop.f32.mrb[13].mxu1  ;;  %v1276_v63 = vadd.f32 %v1275_v57, %v851_v32 }
 0x340   : > { %v1323_v62 = vadd.f32 %v1322_v56, %v1312_v58  ;;  %v1279_v0 = vpop.f32.mrb[14].mxu1  ;;  %v1278_v6 = vadd.f32 %v1277_v60, %v855_v33 }
 0x341   : > { %v1280_v3 = vpop.f32.mrb[15].mxu1  ;;  %v1306_v10 = vmul.f32 %v1295_v28, %v1276_v63  ;;  %vm1292_vm11 = vcmp.gt.f32.partialorder %v1276_v63, 0.0 }
 0x342   : > { %v1324_v5 = vadd.f32 %v1323_v62, %v1313_v1  ;;  %v1307_v14 = vmul.f32 %v1295_v28, %v1278_v6  ;;  %vm1293_vm12 = vcmp.gt.f32.partialorder %v1278_v6, 0.0 }
 0x343   : > { %v1318_v16 = vsel %vm1292_vm11, %v1276_v63, %v1306_v10 }
 0x344   : > { %v1325_v9 = vadd.f32 %v1324_v5, %v1314_v7  ;;  %v1319_v19 = vsel %vm1293_vm12, %v1278_v6, %v1307_v14  ;;  %v1332_v23 = vsel %vm1327_vm10, %v1318_v16, 0.0 }
 0x345   : > { %v1334_v25 = vsel %vm1327_vm10, %v1319_v19, 0.0 }
 0x346   : > { %v1326_v13 = vadd.f32 %v1325_v9, %v1315_v11 }
 0x348   : > { %v1329_v17 = vadd.f32 %v1328_v15, %v1326_v13 }
 0x34a   : > { %v1331_v22 = vadd.f32 %v1330_v18, %v1329_v17 }
 0x34c   : > { %v1333_v24 = vadd.f32 %v1332_v23, %v1331_v22  ;;  %v1413_v23 = vld [vmem:[#allocation15] sm:$0xf] }
 0x34e   : > { %v1335_v26 = vadd.f32 %v1334_v25, %v1333_v24  ;;  %v1447_v24 = vld [vmem:[#allocation16] sm:$0xf]  ;;  %v1534_v25 = vld [vmem:[#allocation18] ss:$4 sm:$0xf] }
 0x350   : > { %1336 = vadd.xlane.f32.xlu0 %v1335_v26 }
 0x3dd   : > { %v1337_v30 = vpop.xlane.xlu0 %1336 }
 0x3de   : > { %v1338_v31 = vrot.slane %v1337_v30, 4 }
 0x3e0   : > { %v1339_v32 = vadd.f32 %v1338_v31, %v1337_v30  ;;  %v1418_v30 = vrot.slane %v1413_v23, %v4698_v20  ;;  %v1422_v31 = vrot.slane %v1413_v23, %v4700_v21 }
 0x3e2   : > { %v1340_v28 = vrot.slane %v1339_v32, 2 }
 0x3e4   : > { %v1341_v33 = vadd.f32 %v1340_v28, %v1339_v32  ;;  %v1426_v32 = vrot.slane %v1413_v23, %v4704_v27  ;;  %v1430_v28 = vrot.slane %v1413_v23, %v4706_v29 }
 0x3e6   : > { %v1342_v34 = vrot.slane %v1341_v33, 1 }
 0x3e8   : > { %v1343_v37 = vadd.f32 %v1342_v34, %v1341_v33  ;;  %v1452_v33 = vrot.slane %v1447_v24, %v4698_v20  ;;  %v1456_v34 = vrot.slane %v1447_v24, %v4700_v21 }
 0x3ea   : > { %3171 = vpush %v1343_v37  ;;  %v1460_v37 = vrot.slane %v1447_v24, %v4704_v27 }
 0x41b   : > { %s3172_s5 = spop %3171 }
 0x41c   : > { %s1345_s4 = smul.f32 0.000114889706, %s3172_s5  ;;  %s3969_s5 = scalar_lea.vmem %s5107_s3, 384 }
 0x41d   : > { %p3970_p4 = scmp.ne.s32.totalorder %s5107_s3, %s3969_s5 }
 0x41e   : > { %v1346_v38 = vstv %s1345_s4  ;;  %s3973_s4 = sshll.u32 %s4085_s29, 4  ;;  %s3974_s4 = int_to_ptr.vmem [resolvable:$false] %s3973_s4 }
 0x41f   : > { %v4724_v39 = vsub.f32 %v4710_v35, %v1346_v38  ;;  %v4727_v40 = vsub.f32 %v4712_v36, %v1346_v38  ;;  %v4730_v41 = vsub.f32 %v4716_v48, %v1346_v38  ;;  %v4736_v44 = vsub.f32 %v1311_v52, %v1346_v38  ;;  %p3971_p2 = pnand %p3970_p4, %p5266_p10  ;;  %p3976_p5 = scmp.lt.s32.totalorder %s5107_s3, %s3974_s4 }
 0x420   : > { %v4738_v45 = vsub.f32 %v1312_v58, %v1346_v38  ;;  %v4742_v47 = vsub.f32 %v1313_v1, %v1346_v38  ;;  %v4746_v49 = vsub.f32 %v1314_v7, %v1346_v38  ;;  %v1355_v52 = vsub.f32 %v1316_v8, %v1346_v38 }
 0x421   : > { %v1359_v42 = vmul.f32 %v4724_v39, %v4724_v39  ;;  %v1360_v43 = vmul.f32 %v4727_v40, %v4727_v40  ;;  %v1361_v35 = vmul.f32 %v4730_v41, %v4730_v41  ;;  %v1362_v36 = vmul.f32 %v4736_v44, %v4736_v44  ;;  %p3972_p3 = pneg %p3971_p2 }
 0x422   : > { %v1363_v50 = vmul.f32 %v4738_v45, %v4738_v45  ;;  %v4750_v53 = vsub.f32 %v1315_v11, %v1346_v38  ;;  %v1364_v54 = vmul.f32 %v4742_v47, %v4742_v47  ;;  %v1356_v56 = vsub.f32 %v1317_v12, %v1346_v38 }
 0x423   : > { %v1371_v46 = vadd.f32 %v1360_v43, %v1359_v42  ;;  %v1365_v57 = vmul.f32 %v4746_v49, %v4746_v49  ;;  %v1357_v59 = vsub.f32 %v1318_v16, %v1346_v38  ;;  %v1367_v60 = vmul.f32 %v1355_v52, %v1355_v52 }
 0x424   : > { %v1366_v61 = vmul.f32 %v4750_v53, %v4750_v53  ;;  %v1358_v63 = vsub.f32 %v1319_v19, %v1346_v38  ;;  %v1368_v0 = vmul.f32 %v1356_v56, %v1356_v56  ;;  %v1464_v38 = vrot.slane %v1447_v24, %v4706_v29 }
 0x425   : > { %v1372_v48 = vadd.f32 %v1371_v46, %v1361_v35  ;;  %v1369_v2 = vmul.f32 %v1357_v59, %v1357_v59  ;;  %v1378_v3 = vsel %vm1327_vm10, %v1367_v60, 0.0  ;;  %v4771_v42 = vrot.slane %v1534_v25, %v4698_v20 }
 0x426   : > { %v1370_v5 = vmul.f32 %v1358_v63, %v1358_v63  ;;  %v1380_v6 = vsel %vm1327_vm10, %v1368_v0, 0.0 }
 0x427   : > { %v1373_v51 = vadd.f32 %v1372_v48, %v1362_v36  ;;  %v1382_v8 = vsel %vm1327_vm10, %v1369_v2, 0.0  ;;  %v1569_v48 = vld [vmem:[#allocation18 + $0x1] ss:$4 sm:$0xf] }
 0x428   : > { %v1384_v10 = vsel %vm1327_vm10, %v1370_v5, 0.0  ;;  %v4797_v5 = vrot.slane %v1569_v48, %v4704_v27 }
 0x429   : > { %v1374_v55 = vadd.f32 %v1373_v51, %v1363_v50 }
 0x42b   : > { %v1375_v58 = vadd.f32 %v1374_v55, %v1364_v54 }
 0x42d   : > { %v1376_v62 = vadd.f32 %v1375_v58, %v1365_v57 }
 0x42f   : > { %v1377_v1 = vadd.f32 %v1376_v62, %v1366_v61 }
 0x431   : > { %v1379_v4 = vadd.f32 %v1378_v3, %v1377_v1 }
 0x433   : > { %v1381_v7 = vadd.f32 %v1380_v6, %v1379_v4  ;;  %v4794_v4 = vrot.slane %v1569_v48, %v4700_v21  ;;  %v4800_v6 = vrot.slane %v1569_v48, %v4706_v29 }
 0x435   : > { %v1383_v9 = vadd.f32 %v1382_v8, %v1381_v7 }
 0x437   : > { %v1385_v11 = vadd.f32 %v1384_v10, %v1383_v9 }
 0x439   : > { %1386 = vadd.xlane.f32.xlu0 %v1385_v11 }
 0x4c6   : > { %v1387_v12 = vpop.xlane.xlu0 %1386 }
 0x4c7   : > { %v1388_v13 = vrot.slane %v1387_v12, 4 }
 0x4c9   : > { %v1389_v14 = vadd.f32 %v1388_v13, %v1387_v12  ;;  %v1752_v12 = vld [vmem:[#allocation19] sm:$0xf] }
 0x4cb   : > { %v1390_v15 = vrot.slane %v1389_v14, 2 }
 0x4cd   : > { %v1391_v16 = vadd.f32 %v1390_v15, %v1389_v14 }
 0x4cf   : > { %v1392_v17 = vrot.slane %v1391_v16, 1 }
 0x4d1   : > { %v1393_v18 = vadd.f32 %v1392_v17, %v1391_v16 }
 0x4d3   : > { %3173 = vpush %v1393_v18 }
 0x504   : > { %s3174_s13 = spop %3173 }
 0x505   : > { %s1395_s22 = smul.f32 0.000114889706, %s3174_s13  ;;  %s3975_s13 = scalar_lea.vmem %s3974_s4, 768 }
 0x506   : > { %p3977_p7 = scmp.lt.s32.totalorder %s3975_s13, %s3969_s5 }
 0x507   : > { %s1396_s8 = sadd.f32 1e-08, %s1395_s22 }
 0x508   : > { %p3978_p6 = por %p3977_p7, %p3976_p5 }
 0x509   : > { %v1397_v19 = vstv %s1396_s8 }
 0x50a   : > { %3567 = vrsqrt.f32 %v1397_v19  ;;  %p3979_p8 = pnand %p3978_p6, %p3972_p3 }
 0x514   : > { %v3568_v22 = vpop.eup %3567 }
 0x515   : > { %3175 = vpush %v3568_v22 }
 0x546   : > { %s3176_s18 = spop %3175 }
 0x547   : > { %v1400_v26 = vstv %s3176_s18 }
 0x548   : > { %v1401_v43 = vmul.f32 %v1400_v26, %v4724_v39  ;;  %v1402_v35 = vmul.f32 %v1400_v26, %v4727_v40  ;;  %v1405_v46 = vmul.f32 %v1400_v26, %v4738_v45  ;;  %v1406_v36 = vmul.f32 %v1400_v26, %v4742_v47 }
 0x549   : > { %v1403_v50 = vmul.f32 %v1400_v26, %v4730_v41  ;;  %v1407_v51 = vmul.f32 %v1400_v26, %v4746_v49  ;;  %v1409_v54 = vmul.f32 %v1400_v26, %v1355_v52  ;;  %v1410_v55 = vmul.f32 %v1400_v26, %v1356_v56  ;;  %v1661_v56 = vld [vmem:[#allocation18 + $0x2] ss:$4 sm:$0xf] }
 0x54a   : > { %v1404_v57 = vmul.f32 %v1400_v26, %v4736_v44  ;;  %v1408_v58 = vmul.f32 %v1400_v26, %v4750_v53  ;;  %v1411_v60 = vmul.f32 %v1400_v26, %v1357_v59  ;;  %v1412_v61 = vmul.f32 %v1400_v26, %v1358_v63 }
 0x54b   : > { %v4782_v39 = vrot.slane %v1534_v25, %v4700_v21  ;;  %v4785_v40 = vrot.slane %v1534_v25, %v4704_v27  ;;  %v4788_v45 = vrot.slane %v1534_v25, %v4706_v29  ;;  %v4791_v41 = vrot.slane %v1569_v48, %v4698_v20 }
 0x54c   : > { %v1435_v47 = vmul.f32 %v1418_v30, %v1401_v43  ;;  %v1436_v49 = vmul.f32 %v1422_v31, %v1402_v35  ;;  %v1439_v52 = vmul.f32 %v1418_v30, %v1405_v46  ;;  %v1440_v44 = vmul.f32 %v1422_v31, %v1406_v36 }
 0x54d   : > { %v1437_v53 = vmul.f32 %v1426_v32, %v1403_v50  ;;  %v1441_v59 = vmul.f32 %v1426_v32, %v1407_v51  ;;  %v1443_v62 = vmul.f32 %v1418_v30, %v1409_v54  ;;  %v1444_v63 = vmul.f32 %v1422_v31, %v1410_v55 }
 0x54e   : > { %v1438_v0 = vmul.f32 %v1430_v28, %v1404_v57  ;;  %v1442_v1 = vmul.f32 %v1430_v28, %v1408_v58  ;;  %v1445_v2 = vmul.f32 %v1426_v32, %v1411_v60  ;;  %v1446_v3 = vmul.f32 %v1430_v28, %v1412_v61 }
 0x54f   : > { %v4803_v7 = vrot.slane %v1661_v56, %v4698_v20  ;;  %v1469_v8 = vadd.f32 %v1452_v33, %v1435_v47  ;;  %v1470_v9 = vadd.f32 %v1456_v34, %v1436_v49  ;;  %v1473_v10 = vadd.f32 %v1452_v33, %v1439_v52 }
 0x550   : > { %v1474_v11 = vadd.f32 %v1456_v34, %v1440_v44  ;;  %v1471_v13 = vadd.f32 %v1460_v37, %v1437_v53  ;;  %v1475_v14 = vadd.f32 %v1460_v37, %v1441_v59  ;;  %v1477_v15 = vadd.f32 %v1452_v33, %v1443_v62 }
 0x551   : > { %v1478_v16 = vadd.f32 %v1456_v34, %v1444_v63  ;;  %v1472_v17 = vadd.f32 %v1464_v38, %v1438_v0  ;;  %v1476_v18 = vadd.f32 %v1464_v38, %v1442_v1  ;;  %v1479_v19 = vadd.f32 %v1460_v37, %v1445_v2 }
 0x552   : > { %v1480_v22 = vadd.f32 %v1464_v38, %v1446_v3  ;;  %v4808_v23 = vrot.slane %v1661_v56, %v4700_v21  ;;  %v4811_v24 = vrot.slane %v1661_v56, %v4704_v27  ;;  %v4814_v25 = vrot.slane %v1661_v56, %v4706_v29 }
 0x553   : > { %v4817_v26 = vrot.slane %v1752_v12, %v4698_v20  ;;  %v1493_v30 = vrot.slane %v1469_v8, 7  ;;  %v1494_v31 = vrot.slane %v1470_v9, 7  ;;  %v1497_v32 = vrot.slane %v1473_v10, 7 }
 0x554   : > { %v1499_v28 = vrot.slane %v1474_v11, 7  ;;  %v1495_v33 = vrot.slane %v1471_v13, 7  ;;  %v1501_v34 = vrot.slane %v1475_v14, 7  ;;  %v1505_v37 = vrot.slane %v1477_v15, 7 }
 0x555   : > { %v1507_v38 = vrot.slane %v1478_v16, 7  ;;  %v1496_v43 = vrot.slane %v1472_v17, 7  ;;  %v1503_v35 = vrot.slane %v1476_v18, 7  ;;  %v1509_v46 = vrot.slane %v1479_v19, 7 }
 0x556   : > { %v1511_v36 = vrot.slane %v1480_v22, 7  ;;  %v4820_v48 = vrot.slane %v1752_v12, %v4700_v21  ;;  %v4823_v50 = vrot.slane %v1752_v12, %v4704_v27  ;;  %v4826_v51 = vrot.slane %v1752_v12, %v4706_v29 }
 0x557   : > { %v4829_v54 = vstv %s4805_s12  ;;  %v1498_v55 = vsel %vm1327_vm10, %v1493_v30, %v1497_v32  ;;  %v1500_v57 = vsel %vm1327_vm10, %v1494_v31, %v1499_v28  ;;  %v1525_v58 = vsel %vm1327_vm10, 0.0, %v1493_v30 }
 0x558   : > { %v1526_v60 = vsel %vm1327_vm10, 0.0, %v1494_v31  ;;  %v1502_v61 = vsel %vm1327_vm10, %v1495_v33, %v1501_v34  ;;  %v1506_v47 = vsel %vm1327_vm10, %v1497_v32, %v1505_v37  ;;  %v1508_v49 = vsel %vm1327_vm10, %v1499_v28, %v1507_v38 }
 0x559   : > { %v1527_v52 = vsel %vm1327_vm10, 0.0, %v1495_v33  ;;  %v4840_v44 = vsel %vm1327_vm10, %v1496_v43, %v1503_v35  ;;  %v1510_v56 = vsel %vm1327_vm10, %v1501_v34, %v1509_v46  ;;  %v1512_v53 = vsel %vm1327_vm10, %v1503_v35, %v1511_v36 }
 0x55a   : > { %v1528_v59 = vsel %vm1327_vm10, 0.0, %v1496_v43  ;;  %v1591_v62 = vmul.f32 %v4791_v41, %v1525_v58  ;;  %v1592_v63 = vmul.f32 %v4794_v4, %v1526_v60  ;;  %v1595_v0 = vmul.f32 %v4791_v41, %v1498_v55 }
 0x55b   : > { %v4849_v1 = vmul.f32 %v4794_v4, %v1500_v57  ;;  %v4852_v2 = vsel %vm1529_vm13, %v1506_v47, 0.0  ;;  %v4855_v3 = vsel %vm1529_vm13, %v1508_v49, 0.0  ;;  %v1593_v8 = vmul.f32 %v4797_v5, %v1527_v52 }
 0x55c   : > { %v4859_v9 = vmul.f32 %v4797_v5, %v1502_v61  ;;  %v4862_v10 = vsel %vm1529_vm13, %v1510_v56, 0.0  ;;  %v4865_v11 = vsel %vm1529_vm13, %v1512_v53, 0.0  ;;  %v1556_v12 = vmul.f32 %v4771_v42, %v1525_v58 }
 0x55d   : > { %v1557_v13 = vmul.f32 %v4782_v39, %v1526_v60  ;;  %v1558_v14 = vmul.f32 %v4785_v40, %v1527_v52  ;;  %v1559_v15 = vmul.f32 %v4788_v45, %v1528_v59  ;;  %v1594_v16 = vmul.f32 %v4800_v6, %v1528_v59 }
 0x55e   : > { %v4874_v17 = vmul.f32 %v4800_v6, %v4840_v44  ;;  %v1616_v18 = vrot.slane %v1591_v62, 1  ;;  %v1617_v19 = vrot.slane %v1595_v0, 1  ;;  %v1619_v22 = vrot.slane %v1592_v63, 1 }
 0x55f   : > { %v1620_v30 = vrot.slane %v4849_v1, 1  ;;  %v1560_v31 = vmul.f32 %v4771_v42, %v1498_v55  ;;  %v4880_v32 = vmul.f32 %v4791_v41, %v4852_v2  ;;  %v1622_v28 = vrot.slane %v1593_v8, 1 }
 0x560   : > { %v1623_v33 = vrot.slane %v4859_v9, 1  ;;  %v1561_v34 = vmul.f32 %v4782_v39, %v1500_v57  ;;  %v1562_v37 = vmul.f32 %v4785_v40, %v1502_v61  ;;  %v1683_v38 = vmul.f32 %v4803_v7, %v1525_v58 }
 0x561   : > { %v1684_v43 = vmul.f32 %v4808_v23, %v1526_v60  ;;  %v4889_v35 = vmul.f32 %v4794_v4, %v4855_v3  ;;  %v4893_v46 = vmul.f32 %v4797_v5, %v4862_v10  ;;  %v1687_v41 = vmul.f32 %v4803_v7, %v1498_v55 }
 0x562   : > { %v1688_v36 = vmul.f32 %v4808_v23, %v1500_v57  ;;  %v1618_v47 = vsel %vm1615_vm14, %v1616_v18, %v1617_v19  ;;  %v1621_v49 = vsel %vm1615_vm14, %v1619_v22, %v1620_v30  ;;  %v1625_v56 = vrot.slane %v1594_v16, 1 }
 0x563   : > { %v1626_v58 = vrot.slane %v4874_v17, 1  ;;  %v1624_v60 = vsel %vm1615_vm14, %v1622_v28, %v1623_v33  ;;  %v1628_v4 = vrot.slane %v4880_v32, 1  ;;  %v1685_v53 = vmul.f32 %v4811_v24, %v1527_v52 }
 0x564   : > { %v1689_v5 = vmul.f32 %v4811_v24, %v1502_v61  ;;  %v1708_v62 = vrot.slane %v1683_v38, 2  ;;  %v1709_v63 = vrot.slane %v1687_v41, 2  ;;  %v1711_v55 = vrot.slane %v1684_v43, 2 }
 0x565   : > { %v1712_v0 = vrot.slane %v1688_v36, 2  ;;  %v1648_v57 = vadd.f32 %v1618_v47, %v1556_v12  ;;  %v1649_v1 = vadd.f32 %v1621_v49, %v1557_v13  ;;  %v1686_v8 = vmul.f32 %v4814_v25, %v1528_v59 }
 0x566   : > { %v4907_v9 = vmul.f32 %v4814_v25, %v4840_v44  ;;  %v4911_v16 = vmul.f32 %v4800_v6, %v4865_v11  ;;  %v1627_v52 = vsel %vm1615_vm14, %v1625_v56, %v1626_v58  ;;  %v1630_v61 = vrot.slane %v4889_v35, 1 }
 0x567   : > { %v1632_v17 = vrot.slane %v4893_v46, 1  ;;  %v1629_v18 = vsel %vm1615_vm14, %v1617_v19, %v1628_v4  ;;  %v1691_v12 = vmul.f32 %v4803_v7, %v4852_v2  ;;  %v1714_v59 = vrot.slane %v1685_v53, 2 }
 0x568   : > { %v1715_v13 = vrot.slane %v1689_v5, 2  ;;  %v1650_v22 = vadd.f32 %v1624_v60, %v1558_v14  ;;  %v1692_v32 = vmul.f32 %v4808_v23, %v4855_v3  ;;  %v1710_v6 = vsel %vm1707_vm15, %v1708_v62, %v1709_v63 }
 0x569   : > { %v1713_v28 = vsel %vm1707_vm15, %v1711_v55, %v1712_v0  ;;  %v1717_v38 = vrot.slane %v1686_v8, 2  ;;  %v1718_v43 = vrot.slane %v4907_v9, 2  ;;  %v1740_v35 = vadd.f32 %v1710_v6, %v1648_v57 }
 0x56a   : > { %v1741_v46 = vadd.f32 %v1713_v28, %v1649_v1  ;;  %v1563_v19 = vmul.f32 %v4788_v45, %v4840_v44  ;;  %v1634_v7 = vrot.slane %v4911_v16, 1  ;;  %v1651_v41 = vadd.f32 %v1627_v52, %v1559_v15 }
 0x56b   : > { %v1693_v14 = vmul.f32 %v4811_v24, %v4862_v10  ;;  %v1631_v23 = vsel %vm1615_vm14, %v1620_v30, %v1630_v61  ;;  %v1633_v36 = vsel %vm1615_vm14, %v1623_v33, %v1632_v17  ;;  %v1716_v47 = vsel %vm1707_vm15, %v1714_v59, %v1715_v13 }
 0x56c   : > { %v1720_v49 = vrot.slane %v1691_v12, 2  ;;  %v1652_v56 = vadd.f32 %v1629_v18, %v1560_v31  ;;  %v1694_v60 = vmul.f32 %v4814_v25, %v4865_v11  ;;  %v1722_v53 = vrot.slane %v1692_v32, 2 }
 0x56d   : > { %v1742_v5 = vadd.f32 %v1716_v47, %v1650_v22  ;;  %v1564_v44 = vmul.f32 %v4771_v42, %v4852_v2  ;;  %v1719_v15 = vsel %vm1707_vm15, %v1717_v38, %v1718_v43  ;;  %v1774_v24 = vadd.f32 %v4817_v26, %v1740_v35 }
 0x56e   : > { %v1775_v30 = vadd.f32 %v4820_v48, %v1741_v46  ;;  %v1565_v33 = vmul.f32 %v4782_v39, %v4855_v3  ;;  %v1653_v62 = vadd.f32 %v1631_v23, %v1561_v34  ;;  %v1724_v55 = vrot.slane %v1693_v14, 2 }
 0x56f   : > { %v1743_v31 = vadd.f32 %v1719_v15, %v1651_v41  ;;  %v1635_v57 = vsel %vm1615_vm14, %v1626_v58, %v1634_v7  ;;  %v1654_v25 = vadd.f32 %v1633_v36, %v1562_v37  ;;  %v1656_v1 = vadd.f32 %v1628_v4, %v1564_v44 }
 0x570   : > { %v1721_v8 = vsel %vm1707_vm15, %v1709_v63, %v1720_v49  ;;  %v1723_v42 = vsel %vm1707_vm15, %v1712_v0, %v1722_v53  ;;  %v1726_v2 = vrot.slane %v1694_v60, 2  ;;  %v1776_v16 = vadd.f32 %v4823_v50, %v1742_v5 }
 0x571   : > { %v1744_v9 = vadd.f32 %v1721_v8, %v1652_v56  ;;  %vm1786_vm0 = vcmp.gt.f32.partialorder %v1774_v24, 0.0  ;;  %vm1787_vm1 = vcmp.gt.f32.partialorder %v1775_v30, 0.0  ;;  %v1800_v52 = vmul.f32 %v4829_v54, %v1774_v24 }
 0x572   : > { %v1801_v39 = vmul.f32 %v4829_v54, %v1775_v30  ;;  %v1655_v3 = vadd.f32 %v1635_v57, %v1563_v19  ;;  %v1725_v34 = vsel %vm1707_vm15, %v1715_v13, %v1724_v55  ;;  %v1745_v58 = vadd.f32 %v1723_v42, %v1653_v62 }
 0x573   : > { %v1777_v37 = vadd.f32 %v4826_v51, %v1743_v31  ;;  %v1566_v4 = vmul.f32 %v4785_v40, %v4862_v10  ;;  %v1567_v63 = vmul.f32 %v4788_v45, %v4865_v11  ;;  %v1657_v0 = vadd.f32 %v1630_v61, %v1565_v33 }
 0x574   : > { %v1746_v18 = vadd.f32 %v1725_v34, %v1654_v25  ;;  %v1778_v12 = vadd.f32 %v4817_v26, %v1744_v9  ;;  %v1802_v59 = vmul.f32 %v4829_v54, %v1776_v16  ;;  %v4955_v22 = vsel %vm1786_vm0, %v1774_v24, %v1800_v52 }
 0x575   : > { %v4957_v32 = vsel %vm1787_vm1, %v1775_v30, %v1801_v39  ;;  %v1658_v13 = vadd.f32 %v1632_v17, %v1566_v4  ;;  %v1727_v6 = vsel %vm1707_vm15, %v1718_v43, %v1726_v2  ;;  %v1748_v28 = vadd.f32 %v1720_v49, %v1656_v1 }
 0x576   : > { %vm1788_vm2 = vcmp.gt.f32.partialorder %v1776_v16, 0.0  ;;  %v1747_v38 = vadd.f32 %v1727_v6, %v1655_v3  ;;  %v1779_v40 = vadd.f32 %v4820_v48, %v1745_v58  ;;  %v1803_v45 = vmul.f32 %v4829_v54, %v1777_v37 }
 0x577   : > { %v1659_v10 = vadd.f32 %v1634_v7, %v1567_v63  ;;  %v1749_v11 = vadd.f32 %v1722_v53, %v1657_v0  ;;  %vm1789_vm3 = vcmp.gt.f32.partialorder %v1777_v37, 0.0  ;;  %v1824_v61 = vadd.f32 %v4957_v32, %v4955_v22 }
 0x578   : > { %v1780_v35 = vadd.f32 %v4823_v50, %v1746_v18  ;;  %v1804_v46 = vmul.f32 %v4829_v54, %v1778_v12  ;;  %v1814_v17 = vsel %vm1788_vm2, %v1776_v16, %v1802_v59  ;;  %v1750_v19 = vadd.f32 %v1724_v55, %v1658_v13 }
 0x579   : > { %v1782_v43 = vadd.f32 %v4817_v26, %v1748_v28  ;;  %vm1790_vm4 = vcmp.gt.f32.partialorder %v1778_v12, 0.0  ;;  %v1825_v41 = vadd.f32 %v1824_v61, %v1814_v17  ;;  %v1781_v14 = vadd.f32 %v4826_v51, %v1747_v38 }
 0x57a   : > { %v1805_v23 = vmul.f32 %v4829_v54, %v1779_v40  ;;  %v1815_v7 = vsel %vm1789_vm3, %v1777_v37, %v1803_v45  ;;  %v1751_v36 = vadd.f32 %v1726_v2, %v1659_v10  ;;  %v1783_v47 = vadd.f32 %v4820_v48, %v1749_v11 }
 0x57b   : > { %vm1791_vm5 = vcmp.gt.f32.partialorder %v1779_v40, 0.0  ;;  %v1826_v49 = vadd.f32 %v1825_v41, %v1815_v7  ;;  %v1806_v56 = vmul.f32 %v4829_v54, %v1780_v35  ;;  %v1816_v60 = vsel %vm1790_vm4, %v1778_v12, %v1804_v46 }
 0x57c   : > { %v1784_v53 = vadd.f32 %v4823_v50, %v1750_v19  ;;  %vm1792_vm6 = vcmp.gt.f32.partialorder %v1780_v35, 0.0  ;;  %v1808_v26 = vmul.f32 %v4829_v54, %v1782_v43  ;;  %vm1794_vm7 = vcmp.gt.f32.partialorder %v1782_v43, 0.0 }
 0x57d   : > { %v1827_v5 = vadd.f32 %v1826_v49, %v1816_v60  ;;  %v1807_v44 = vmul.f32 %v4829_v54, %v1781_v14  ;;  %v1817_v15 = vsel %vm1791_vm5, %v1779_v40, %v1805_v23  ;;  %v1785_v24 = vadd.f32 %v4826_v51, %v1751_v36 }
 0x57e   : > { %vm1793_vm8 = vcmp.gt.f32.partialorder %v1781_v14, 0.0  ;;  %v1809_v48 = vmul.f32 %v4829_v54, %v1783_v47  ;;  %vm1795_vm9 = vcmp.gt.f32.partialorder %v1783_v47, 0.0  ;;  %v1818_v33 = vsel %vm1792_vm6, %v1780_v35, %v1806_v56 }
 0x57f   : > { %v1828_v30 = vadd.f32 %v1827_v5, %v1817_v15  ;;  %v1810_v62 = vmul.f32 %v4829_v54, %v1784_v53  ;;  %v1820_v55 = vsel %vm1794_vm7, %v1782_v43, %v1808_v26  ;;  %vm1796_vm11 = vcmp.gt.f32.partialorder %v1784_v53, 0.0 }
 0x580   : > { %v1819_v31 = vsel %vm1793_vm8, %v1781_v14, %v1807_v44  ;;  %v1811_v57 = vmul.f32 %v4829_v54, %v1785_v24  ;;  %v1821_v25 = vsel %vm1795_vm9, %v1783_v47, %v1809_v48  ;;  %vm1797_vm12 = vcmp.gt.f32.partialorder %v1785_v24, 0.0 }
 0x581   : > { %v1829_v50 = vadd.f32 %v1828_v30, %v1818_v33  ;;  %v1831_v8 = vsel %vm1327_vm10, %v1820_v55, 0.0  ;;  %v1822_v51 = vsel %vm1796_vm11, %v1784_v53, %v1810_v62  ;;  %v1833_v2 = vsel %vm1327_vm10, %v1821_v25, 0.0 }
 0x582   : > { %v1823_v9 = vsel %vm1797_vm12, %v1785_v24, %v1811_v57  ;;  %v1835_v52 = vsel %vm1327_vm10, %v1822_v51, 0.0  ;;  %v3455_v57 = vld [vmem:[#allocation24 + $0x4] ss:$8 sps:$4 sm:$0xff]  }
 0x583   : > { %v1830_v1 = vadd.f32 %v1829_v50, %v1819_v31  ;;  %v1837_v3 = vsel %vm1327_vm10, %v1823_v9, 0.0  ;;  %2388 = vmatprep.subr.bf16.mxu0 %v3455_v57 }
 0x585   : > { %v1832_v42 = vadd.f32 %v1831_v8, %v1830_v1  ;;  %v3458_v1 = vld [vmem:[#allocation24 + $0x14] ss:$8 sps:$4 sm:$0xff]   ;;  %v3460_v8 = vld [vmem:[#allocation24 + $0x10] ss:$8 sps:$4 sm:$0xff]  }
 0x587   : > { %v1834_v16 = vadd.f32 %v1833_v2, %v1832_v42  ;;  %v3463_v42 = vld [vmem:[#allocation24 + $0x20] ss:$8 sps:$4 sm:$0xff]   ;;  %v3464_v2 = vld [vmem:[#allocation24 + $0x34] ss:$8 sps:$4 sm:$0xff]  }
 0x589   : > { %v1836_v39 = vadd.f32 %v1835_v52, %v1834_v16  ;;  %v3467_v16 = vld [vmem:[#allocation24 + $0x44] ss:$8 sps:$4 sm:$0xff]   ;;  %v3469_v52 = vld [vmem:[#allocation24 + $0x40] ss:$8 sps:$4 sm:$0xff]  }
 0x58b   : > { %v1838_v34 = vadd.f32 %v1837_v3, %v1836_v39  ;;  %v3470_v39 = vld [vmem:[#allocation24 + $0x54] ss:$8 sps:$4 sm:$0xff]   ;;  %v3472_v3 = vld [vmem:[#allocation24 + $0x50] ss:$8 sps:$4 sm:$0xff]  }
 0x58d   : > { %1839 = vadd.xlane.f32.xlu1 %v1838_v34  ;;  %v3473_v34 = vld [vmem:[#allocation24 + $0x64] ss:$8 sps:$4 sm:$0xff]  }
 0x61a   : > { %v1840_v58 = vpop.xlane.xlu1 %1839 }
 0x61b   : > { %v1841_v54 = vrot.slane %v1840_v58, 4 }
 0x61d   : > { %v1842_v37 = vadd.f32 %v1841_v54, %v1840_v58  ;;  %v3475_v58 = vld [vmem:[#allocation24 + $0x60] ss:$8 sps:$4 sm:$0xff]   ;;  %v3476_v54 = vld [vmem:[#allocation24 + $0x74] ss:$8 sps:$4 sm:$0xff]  }
 0x61f   : > { %v1843_v4 = vrot.slane %v1842_v37, 2 }
 0x621   : > { %v1844_v63 = vadd.f32 %v1843_v4, %v1842_v37  ;;  %v3478_v37 = vld [vmem:[#allocation24 + $0x70] ss:$8 sps:$4 sm:$0xff]   ;;  %v3479_v4 = vld [vmem:[#allocation24 + $0x84] ss:$8 sps:$4 sm:$0xff]  }
 0x623   : > { %v1845_v0 = vrot.slane %v1844_v63, 1 }
 0x625   : > { %v1846_v18 = vadd.f32 %v1845_v0, %v1844_v63  ;;  %v3481_v63 = vld [vmem:[#allocation24 + $0x80] ss:$8 sps:$4 sm:$0xff]   ;;  %v3482_v0 = vld [vmem:[#allocation24 + $0x94] ss:$8 sps:$4 sm:$0xff]  }
 0x627   : > { %3177 = vpush %v1846_v18  ;;  %v3484_v18 = vld [vmem:[#allocation24 + $0x90] ss:$8 sps:$4 sm:$0xff]  }
 0x658   : > { %s3178_s16 = spop %3177 }
 0x659   : > { %s1848_s24 = smul.f32 0.000114889706, %s3178_s16 }
 0x65b   : > { %v1849_v12 = vstv %s1848_s24 }
 0x65c   : > { %v4983_v59 = vsub.f32 %v4955_v22, %v1849_v12  ;;  %v4986_v13 = vsub.f32 %v4957_v32, %v1849_v12  ;;  %v4988_v6 = vsub.f32 %v1814_v17, %v1849_v12  ;;  %v4994_v40 = vsub.f32 %v1815_v7, %v1849_v12 }
 0x65d   : > { %v4996_v45 = vsub.f32 %v1816_v60, %v1849_v12  ;;  %v5000_v11 = vsub.f32 %v1817_v15, %v1849_v12  ;;  %v5004_v35 = vsub.f32 %v1818_v33, %v1849_v12  ;;  %v5008_v19 = vsub.f32 %v1820_v55, %v1849_v12 }
 0x65e   : > { %v1862_v28 = vmul.f32 %v4983_v59, %v4983_v59  ;;  %v1863_v38 = vmul.f32 %v4986_v13, %v4986_v13  ;;  %v1864_v10 = vmul.f32 %v4988_v6, %v4988_v6  ;;  %v1865_v32 = vmul.f32 %v4994_v40, %v4994_v40 }
 0x65f   : > { %v1866_v46 = vmul.f32 %v4996_v45, %v4996_v45  ;;  %v5010_v43 = vsub.f32 %v1819_v31, %v1849_v12  ;;  %v1867_v41 = vmul.f32 %v5000_v11, %v5000_v11  ;;  %v5014_v23 = vsub.f32 %v1821_v25, %v1849_v12  ;;  %v3457_v25 = vld [vmem:[#allocation24] ss:$8 sps:$4 sm:$0xff]  }
 0x660   : > { %v1874_v22 = vadd.f32 %v1863_v38, %v1862_v28  ;;  %v1868_v7 = vmul.f32 %v5004_v35, %v5004_v35  ;;  %v5018_v47 = vsub.f32 %v1822_v51, %v1849_v12  ;;  %v1870_v49 = vmul.f32 %v5008_v19, %v5008_v19  ;;  %2389 = vmatpush1.bf16.msra.mxu0 %v3457_v25  ;;  %v3461_v51 = vld [vmem:[#allocation24 + $0x24] ss:$8 sps:$4 sm:$0xff]   ;;  %v3487_v28 = vld [vmem:[#allocation24 + $0xa0] ss:$8 sps:$4 sm:$0xff]   ;;  %v3488_v38 = vld [vmem:[#allocation24 + $0xb4] ss:$8 sps:$4 sm:$0xff]  }
 0x661   : > { %v1869_v56 = vmul.f32 %v5010_v43, %v5010_v43  ;;  %v5024_v53 = vsub.f32 %v1823_v9, %v1849_v12  ;;  %v1871_v26 = vmul.f32 %v5014_v23, %v5014_v23  ;;  %2390 = vmatprep.subr.bf16.mxu0 %v3458_v1  ;;  %v3466_v9 = vld [vmem:[#allocation24 + $0x30] ss:$8 sps:$4 sm:$0xff]   ;;  %v3485_v12 = vld [vmem:[#allocation24 + $0xa4] ss:$8 sps:$4 sm:$0xff]  }
 0x662   : > { %v1875_v61 = vadd.f32 %v1874_v22, %v1864_v10  ;;  %v1872_v44 = vmul.f32 %v5018_v47, %v5018_v47  ;;  %v1881_v15 = vsel %vm1327_vm10, %v1870_v49, 0.0  ;;  %v3490_v10 = vld [vmem:[#allocation24 + $0xb0] ss:$8 sps:$4 sm:$0xff]   ;;  %v3491_v22 = vld [vmem:[#allocation24 + $0xc4] ss:$8 sps:$4 sm:$0xff]  }
 0x663   : > { %v1873_v48 = vmul.f32 %v5024_v53, %v5024_v53  ;;  %v1883_v30 = vsel %vm1327_vm10, %v1871_v26, 0.0 }
 0x664   : > { %v1876_v17 = vadd.f32 %v1875_v61, %v1865_v32  ;;  %v1885_v62 = vsel %vm1327_vm10, %v1872_v44, 0.0  ;;  %2391 = vmatpush1.bf16.msra.mxu0 %v3460_v8  ;;  %v3493_v32 = vld [vmem:[#allocation24 + $0xc0] ss:$8 sps:$4 sm:$0xff]   ;;  %v3494_v61 = vld [vmem:[#allocation24 + $0xd4] ss:$8 sps:$4 sm:$0xff]  }
 0x665   : > { %v1887_v50 = vsel %vm1327_vm10, %v1873_v48, 0.0  ;;  %2392 = vmatprep.subr.bf16.mxu0 %v3461_v51  ;;  %v3505_v44 = vld [vmem:[#allocation24 + $0x104] ss:$8 sps:$4 sm:$0xff]  }
 0x666   : > { %v1877_v14 = vadd.f32 %v1876_v17, %v1866_v46  ;;  %v3496_v46 = vld [vmem:[#allocation24 + $0xd0] ss:$8 sps:$4 sm:$0xff]  }
 0x668   : > { %v1878_v36 = vadd.f32 %v1877_v14, %v1867_v41  ;;  %2393 = vmatpush1.bf16.msra.mxu0 %v3463_v42  ;;  %v3497_v14 = vld [vmem:[#allocation24 + $0xe4] ss:$8 sps:$4 sm:$0xff]  }
 0x669   : > { %2394 = vmatprep.subr.bf16.mxu0 %v3464_v2 }
 0x66a   : > { %v1879_v60 = vadd.f32 %v1878_v36, %v1868_v7  ;;  %v3499_v7 = vld [vmem:[#allocation24 + $0xe0] ss:$8 sps:$4 sm:$0xff]   ;;  %v3500_v36 = vld [vmem:[#allocation24 + $0xf4] ss:$8 sps:$4 sm:$0xff]  }
 0x66c   : > { %v1880_v5 = vadd.f32 %v1879_v60, %v1869_v56  ;;  %2395 = vmatpush1.bf16.msra.mxu0 %v3466_v9  ;;  %v3502_v56 = vld [vmem:[#allocation24 + $0xf0] ss:$8 sps:$4 sm:$0xff]  }
 0x66d   : > { %2396 = vmatprep.subr.bf16.mxu0 %v3467_v16 }
 0x66e   : > { %v1882_v24 = vadd.f32 %v1881_v15, %v1880_v5 }
 0x670   : > { %v1884_v33 = vadd.f32 %v1883_v30, %v1882_v24  ;;  %2397 = vmatpush1.bf16.msra.mxu0 %v3469_v52  ;;  %v1916_v30 = vld [vmem:[#allocation21] sm:$0xf] }
 0x671   : > { %2398 = vmatprep.subr.bf16.mxu0 %v3470_v39  ;;  %v1929_v42 = vrot.slane %v1916_v30, %v4704_v27  ;;  %v5054_v9 = vrot.slane %v1916_v30, %v4706_v29 }
 0x672   : > { %v1886_v55 = vadd.f32 %v1885_v62, %v1884_v33  ;;  %v1950_v33 = vld [vmem:[#allocation22] sm:$0xf]  ;;  %v1925_v62 = vrot.slane %v1916_v30, %v4700_v21 }
 0x673   : > { %v1955_v57 = vrot.slane %v1950_v33, %v4698_v20 }
 0x674   : > { %v1888_v31 = vadd.f32 %v1887_v50, %v1886_v55  ;;  %2399 = vmatpush1.bf16.msra.mxu0 %v3472_v3  ;;  %v1921_v55 = vrot.slane %v1916_v30, %v4698_v20  ;;  %v3523_v30 = vld [vmem:[#allocation24 + $0x164] ss:$8 sps:$4 sm:$0xff]  }
 0x675   : > { %2400 = vmatprep.subr.bf16.mxu0 %v3473_v34 }
 0x676   : > { %1889 = vadd.xlane.f32.xlu1 %v1888_v31  ;;  %v1959_v31 = vrot.slane %v1950_v33, %v4700_v21 }
 0x678   : > { %2401 = vmatpush1.bf16.msra.mxu0 %v3475_v58 }
 0x679   : > { %2402 = vmatprep.subr.bf16.mxu0 %v3476_v54 }
 0x67c   : > { %2403 = vmatpush1.bf16.msra.mxu0 %v3478_v37  ;;  %v1963_v37 = vrot.slane %v1950_v33, %v4704_v27 }
 0x67d   : > { %2404 = vmatprep.subr.bf16.mxu0 %v3479_v4 }
 0x680   : > { %2405 = vmatpush1.bf16.msra.mxu0 %v3481_v63 }
 0x681   : > { %2406 = vmatprep.subr.bf16.mxu0 %v3482_v0  ;;  %v3503_v0 = vld [vmem:[#allocation24 + $0x100] ss:$8 sps:$4 sm:$0xff]  }
 0x684   : > { %2407 = vmatpush1.bf16.msra.mxu0 %v3484_v18 }
 0x685   : > { %2408 = vmatprep.subr.bf16.mxu0 %v3485_v12 }
 0x688   : > { %2409 = vmatpush1.bf16.msra.mxu0 %v3487_v28 }
 0x689   : > { %2410 = vmatprep.subr.bf16.mxu0 %v3488_v38 }
 0x68c   : > { %2411 = vmatpush1.bf16.msra.mxu0 %v3490_v10  ;;  %v5070_v10 = vrot.slane %v1950_v33, %v4706_v29  ;;  %v3521_v33 = vld [vmem:[#allocation24 + $0x160] ss:$8 sps:$4 sm:$0xff]  }
 0x68d   : > { %2412 = vmatprep.subr.bf16.mxu0 %v3491_v22 }
 0x690   : > { %2413 = vmatpush1.bf16.msra.mxu0 %v3493_v32 }
 0x691   : > { %2414 = vmatprep.subr.bf16.mxu0 %v3494_v61 }
 0x694   : > { %2415 = vmatpush1.bf16.msra.mxu0 %v3496_v46 }
 0x695   : > { %2416 = vmatprep.subr.bf16.mxu0 %v3497_v14 }
 0x698   : > { %2417 = vmatpush1.bf16.msra.mxu0 %v3499_v7 }
 0x699   : > { %2418 = vmatprep.subr.bf16.mxu0 %v3500_v36 }
 0x69c   : > { %2419 = vmatpush1.bf16.msra.mxu0 %v3502_v56 }
 0x69d   : > { %2439 = vmatprep.subr.bf16.mxu0 %v3505_v44  ;;  %v3517_v44 = vld [vmem:[#allocation24 + $0x144] ss:$8 sps:$4 sm:$0xff]  }
 0x703   : > { %v1890_v17 = vpop.xlane.xlu1 %1889 }
 0x704   : > { %v1891_v41 = vrot.slane %v1890_v17, 4 }
 0x706   : > { %v1892_v49 = vadd.f32 %v1891_v41, %v1890_v17  ;;  %v3511_v41 = vld [vmem:[#allocation24 + $0x124] ss:$8 sps:$4 sm:$0xff]  }
 0x708   : > { %v1893_v60 = vrot.slane %v1892_v49, 2 }
 0x70a   : > { %v1894_v26 = vadd.f32 %v1893_v60, %v1892_v49  ;;  %v3509_v49 = vld [vmem:[#allocation24 + $0x120] ss:$8 sps:$4 sm:$0xff]   ;;  %v3514_v60 = vld [vmem:[#allocation24 + $0x134] ss:$8 sps:$4 sm:$0xff]  }
 0x70c   : > { %v1895_v5 = vrot.slane %v1894_v26, 1 }
 0x70e   : > { %v1896_v15 = vadd.f32 %v1895_v5, %v1894_v26  ;;  %v3512_v5 = vld [vmem:[#allocation24 + $0x130] ss:$8 sps:$4 sm:$0xff]  }
 0x710   : > { %3179 = vpush %v1896_v15  ;;  %v3515_v15 = vld [vmem:[#allocation24 + $0x140] ss:$8 sps:$4 sm:$0xff]  }
 0x741   : > { %s3180_s9 = spop %3179 }
 0x742   : > { %s1898_s0 = smul.f32 0.000114889706, %s3180_s9 }
 0x744   : > { %s1899_s17 = sadd.f32 1e-08, %s1898_s0 }
 0x746   : > { %v1900_v24 = vstv %s1899_s17 }
 0x747   : > { %3569 = vrsqrt.f32 %v1900_v24  ;;  %v3520_v24 = vld [vmem:[#allocation24 + $0x154] ss:$8 sps:$4 sm:$0xff]  }
 0x751   : > { %v3570_v48 = vpop.eup %3569 }
 0x752   : > { %3181 = vpush %v3570_v48  ;;  %v3518_v48 = vld [vmem:[#allocation24 + $0x150] ss:$8 sps:$4 sm:$0xff]  }
 0x783   : > { %s3182_s28 = spop %3181 }
 0x784   : > { %v5038_v50 = vstv %s3182_s28 }
 0x785   : > { %v1905_v25 = vmul.f32 %v5038_v50, %v4986_v13  ;;  %v1909_v1 = vmul.f32 %v5038_v50, %v5000_v11  ;;  %v1904_v8 = vmul.f32 %v5038_v50, %v4983_v59  ;;  %v1908_v51 = vmul.f32 %v5038_v50, %v4996_v45 }
 0x786   : > { %v1913_v2 = vmul.f32 %v5038_v50, %v5014_v23  ;;  %v1912_v11 = vmul.f32 %v5038_v50, %v5008_v19  ;;  %v1907_v59 = vmul.f32 %v5038_v50, %v4994_v40  ;;  %v1911_v45 = vmul.f32 %v5038_v50, %v5010_v43  ;;  %v3508_v40 = vld [vmem:[#allocation24 + $0x114] ss:$8 sps:$4 sm:$0xff]  }
 0x787   : > { %v1939_v16 = vmul.f32 %v1925_v62, %v1905_v25  ;;  %v1943_v52 = vmul.f32 %v1925_v62, %v1909_v1  ;;  %v1938_v13 = vmul.f32 %v1921_v55, %v1904_v8  ;;  %v1942_v39 = vmul.f32 %v1921_v55, %v1908_v51  ;;  %v3532_v25 = vld [vmem:[#allocation24 + $0x194] ss:$8 sps:$4 sm:$0xff]   ;;  %v3530_v1 = vld [vmem:[#allocation24 + $0x190] ss:$8 sps:$4 sm:$0xff]   ;;  %v3535_v8 = vld [vmem:[#allocation24 + $0x1a4] ss:$8 sps:$4 sm:$0xff]  }
 0x788   : > { %v1947_v3 = vmul.f32 %v1925_v62, %v1913_v2  ;;  %v1906_v12 = vmul.f32 %v5038_v50, %v4988_v6  ;;  %v1910_v19 = vmul.f32 %v5038_v50, %v5004_v35  ;;  %v1946_v28 = vmul.f32 %v1921_v55, %v1912_v11  ;;  %v3506_v6 = vld [vmem:[#allocation24 + $0x110] ss:$8 sps:$4 sm:$0xff]   ;;  %v3526_v62 = vld [vmem:[#allocation24 + $0x174] ss:$8 sps:$4 sm:$0xff]   ;;  %v3533_v51 = vld [vmem:[#allocation24 + $0x1a0] ss:$8 sps:$4 sm:$0xff]  }
 0x789   : > { %v1973_v34 = vadd.f32 %v1959_v31, %v1939_v16  ;;  %v1977_v58 = vadd.f32 %v1959_v31, %v1943_v52  ;;  %v1972_v23 = vadd.f32 %v1955_v57, %v1938_v13  ;;  %v1976_v54 = vadd.f32 %v1955_v57, %v1942_v39  ;;  %v3524_v55 = vld [vmem:[#allocation24 + $0x170] ss:$8 sps:$4 sm:$0xff]   ;;  %v3541_v16 = vld [vmem:[#allocation24 + $0x1c4] ss:$8 sps:$4 sm:$0xff]   ;;  %v3539_v52 = vld [vmem:[#allocation24 + $0x1c0] ss:$8 sps:$4 sm:$0xff]  }
 0x78a   : > { %v1981_v4 = vadd.f32 %v1959_v31, %v1947_v3  ;;  %v1941_v43 = vmul.f32 %v5054_v9, %v1907_v59  ;;  %v1945_v38 = vmul.f32 %v5054_v9, %v1911_v45  ;;  %v1940_v22 = vmul.f32 %v1929_v42, %v1906_v12  ;;  %v3529_v31 = vld [vmem:[#allocation24 + $0x184] ss:$8 sps:$4 sm:$0xff]   ;;  %v3536_v2 = vld [vmem:[#allocation24 + $0x1b0] ss:$8 sps:$4 sm:$0xff]   ;;  %v3544_v13 = vld [vmem:[#allocation24 + $0x1d4] ss:$8 sps:$4 sm:$0xff]  }
 0x78b   : > { %v1985_v63 = vpack.c.bf16 %v1977_v58, %v1973_v34  ;;  %v1984_v18 = vpack.c.bf16 %v1976_v54, %v1972_v23  ;;  %v1944_v32 = vmul.f32 %v1929_v42, %v1910_v19  ;;  %v1914_v61 = vmul.f32 %v5038_v50, %v5018_v47  ;;  %v3542_v39 = vld [vmem:[#allocation24 + $0x1d0] ss:$8 sps:$4 sm:$0xff]   ;;  %v3547_v3 = vld [vmem:[#allocation24 + $0x1e4] ss:$8 sps:$4 sm:$0xff]   ;;  %v3545_v59 = vld [vmem:[#allocation24 + $0x1e0] ss:$8 sps:$4 sm:$0xff]  }
 0x78c   : > { %v1989_v27 = vpack.c.bf16 %v1981_v4, %v1981_v4  ;;  %v5074_v35 = vadd.f32 %v1963_v37, %v1940_v22  ;;  %v1980_v29 = vadd.f32 %v1955_v57, %v1946_v28  ;;  %v1975_v14 = vadd.f32 %v5070_v10, %v1941_v43  ;;  %v3527_v57 = vld [vmem:[#allocation24 + $0x180] ss:$8 sps:$4 sm:$0xff]   ;;  %v3550_v45 = vld [vmem:[#allocation24 + $0x1f4] ss:$8 sps:$4 sm:$0xff]   ;;  %v3548_v58 = vld [vmem:[#allocation24 + $0x1f0] ss:$8 sps:$4 sm:$0xff]  }
 0x78d   : > { %2420 = vmatprep.mubr.bf16.mxu0 %v1985_v63  ;;  %v5076_v46 = vadd.f32 %v1963_v37, %v1944_v32  ;;  %v1948_v17 = vmul.f32 %v1929_v42, %v1914_v61  ;;  %v1979_v7 = vadd.f32 %v5070_v10, %v1945_v38  ;;  %v3538_v42 = vld [vmem:[#allocation24 + $0x1b4] ss:$8 sps:$4 sm:$0xff]   ;;  %v1915_v11 = vmul.f32 %v5038_v50, %v5024_v53  ;;  %v3553_v4 = vld [vmem:[#allocation10 + $0x48] sm:$0xff]   ;;  %v3555_v63 = vld [vmem:[#allocation10 + $0x50] sm:$0xff]  }
 0x78e   : > { %2421 = vmatmul.mubr.bf16.vlgmr.msra.gmra.mrb[0].mxu0 %v1984_v18  ;;  %v1988_v56 = vpack.c.bf16 %v1980_v29, %v1980_v29  ;;  %v3551_v50 = vld [vmem:[#allocation10 + $0x40] sm:$0xff]   ;;  %v3557_v18 = vld [vmem:[#allocation10 + $0x58] sm:$0xff]   ;;  %v3561_v28 = vld [vmem:[#allocation10 + $0x68] sm:$0xff]  }
 0x78f   : > { %2440 = vmatpush1.bf16.msra.mxu0 %v3503_v0  ;;  %2430 = vmatprep.mubr.bf16.mxu0 %v1989_v27  ;;  %v1986_v36 = vpack.c.bf16 %v5076_v46, %v5074_v35  ;;  %v5082_v47 = vadd.f32 %v1963_v37, %v1948_v17  ;;  %v1987_v26 = vpack.c.bf16 %v1979_v7, %v1975_v14  ;;  %v3552_v37 = vld [vmem:[#allocation10] sm:$0xff]   ;;  %v3556_v0 = vld [vmem:[#allocation10 + $0x10] sm:$0xff]   ;;  %v3558_v12 = vld [vmem:[#allocation10 + $0x18] sm:$0xff]  }
 0x790   : > { %2441 = vmatprep.subr.bf16.mxu0 %v3508_v40  ;;  %v1949_v34 = vmul.f32 %v5054_v9, %v1915_v11  ;;  %3139 = vmatprep.subr.bf16.mxu1 %v3551_v50  ;;  %v3554_v9 = vld [vmem:[#allocation10 + $0x8] sm:$0xff]   ;;  %v3559_v19 = vld [vmem:[#allocation10 + $0x60] sm:$0xff]   ;;  %v3563_v38 = vld [vmem:[#allocation10 + $0x70] sm:$0xff]  }
 0x791   : > { %v1990_v53 = vpack.c.bf16 %v5082_v47, %v5082_v47  ;;  %3147 = vmatpush3.bf16.msra.mxu1 %v3552_v37  ;;  %v3560_v40 = vld [vmem:[#allocation10 + $0x20] sm:$0xff]   ;;  %v3562_v43 = vld [vmem:[#allocation10 + $0x28] sm:$0xff]   ;;  %v3565_v27 = vld [vmem:[#allocation10 + $0x78] sm:$0xff]  }
 0x792   : > { %v1983_v23 = vadd.f32 %v5070_v10, %v1949_v34  ;;  %3140 = vmatprep.subr.bf16.mxu1 %v3553_v4  ;;  %v3564_v10 = vld [vmem:[#allocation10 + $0x30] sm:$0xff]   ;;  %v3566_v22 = vld [vmem:[#allocation10 + $0x38] sm:$0xff]   ;;  %v2056_v46 = vld [vmem:[#allocation25] sm:$0x3] }
 0x793   : > { %2442 = vmatpush1.bf16.msra.mxu0 %v3506_v6  ;;  %v2061_v17 = vrot.slane %v2056_v46, %v4698_v20  ;;  %v2490_v14 = vld [vmem:[%s4645_s19] sm:$0xff]  ;;  %v2493_v20 = vld [vmem:[%s4645_s19 + $0x18] sm:$0xff] }
 0x794   : > { %2443 = vmatprep.subr.bf16.mxu0 %v3511_v41  ;;  %v1991_v54 = vpack.c.bf16 %v1983_v23, %v1983_v23  ;;  %v2065_v41 = vrot.slane %v2056_v46, %v4700_v21  ;;  %v2502_v7 = vld [vmem:[%s4654_s23] sm:$0xff] }
 0x795   : > { %3148 = vmatpush3.bf16.msra.mxu1 %v3554_v9 }
 0x796   : > { %2431 = vmatmul.mubr.bf16.gmra.mrb[4].mxu0 %v1988_v56  ;;  %3141 = vmatprep.subr.bf16.mxu1 %v3555_v63  ;;  %v2491_v56 = vld [vmem:[%s4645_s19 + $0x8] sm:$0xff] }
 0x797   : > { %2444 = vmatpush1.bf16.msra.mxu0 %v3509_v49  ;;  %2471 = vmatprep.mubr.bf16.mxu0 %v1987_v26 }
 0x798   : > { %2445 = vmatprep.subr.bf16.mxu0 %v3514_v60 }
 0x799   : > { %3149 = vmatpush3.bf16.msra.mxu1 %v3556_v0 }
 0x79a   : > { %3142 = vmatprep.subr.bf16.mxu1 %v3557_v18 }
 0x79b   : > { %2446 = vmatpush1.bf16.msra.mxu0 %v3512_v5  ;;  %v2492_v5 = vld [vmem:[%s4645_s19 + $0x10] sm:$0xff] }
 0x79c   : > { %2447 = vmatprep.subr.bf16.mxu0 %v3517_v44 }
 0x79d   : > { %3150 = vmatpush3.bf16.msra.mxu1 %v3558_v12 }
 0x79e   : > { %3143 = vmatprep.subr.bf16.mxu1 %v3559_v19 }
 0x79f   : > { %2448 = vmatpush1.bf16.msra.mxu0 %v3515_v15  ;;  %v2505_v15 = vunpack.c.l.bf16 %v2502_v7 }
 0x7a0   : > { %2449 = vmatprep.subr.bf16.mxu0 %v3520_v24 }
 0x7a1   : > { %3151 = vmatpush3.bf16.msra.mxu1 %v3560_v40 }
 0x7a2   : > { %3144 = vmatprep.subr.bf16.mxu1 %v3561_v28 }
 0x7a3   : > { %2450 = vmatpush1.bf16.msra.mxu0 %v3518_v48 }
 0x7a4   : > { %2451 = vmatprep.subr.bf16.mxu0 %v3523_v30 }
 0x7a5   : > { %3152 = vmatpush3.bf16.msra.mxu1 %v3562_v43 }
 0x7a6   : > { %3145 = vmatprep.subr.bf16.mxu1 %v3563_v38 }
 0x7a7   : > { %2452 = vmatpush1.bf16.msra.mxu0 %v3521_v33  ;;  %v2506_v33 = vunpack.c.h.bf16 %v2502_v7 }
 0x7a8   : > { %2453 = vmatprep.subr.bf16.mxu0 %v3526_v62 }
 0x7a9   : > { %3153 = vmatpush3.bf16.msra.mxu1 %v3564_v10 }
 0x7aa   : > { %3146 = vmatprep.subr.bf16.mxu1 %v3565_v27 }
 0x7ab   : > { %2454 = vmatpush1.bf16.msra.mxu0 %v3524_v55 }
 0x7ac   : > { %2455 = vmatprep.subr.bf16.mxu0 %v3529_v31 }
 0x7ad   : > { %3154 = vmatpush3.bf16.msra.mxu1 %v3566_v22 }
 0x7af   : > { %2456 = vmatpush1.bf16.msra.mxu0 %v3527_v57 }
 0x7b0   : > { %2457 = vmatprep.subr.bf16.mxu0 %v3532_v25  ;;  %v2504_v25 = vld [vmem:[%s4654_s23 + $0x10] sm:$0x11] }
 0x7b1   : > { %v2509_v11 = vunpack.c.l.bf16 %v2504_v25 }
 0x7b3   : > { %2458 = vmatpush1.bf16.msra.mxu0 %v3530_v1 }
 0x7b4   : > { %2459 = vmatprep.subr.bf16.mxu0 %v3535_v8 }
 0x7b7   : > { %2460 = vmatpush1.bf16.msra.mxu0 %v3533_v51 }
 0x7b8   : > { %2461 = vmatprep.subr.bf16.mxu0 %v3538_v42 }
 0x7bb   : > { %2462 = vmatpush1.bf16.msra.mxu0 %v3536_v2 }
 0x7bc   : > { %2463 = vmatprep.subr.bf16.mxu0 %v3541_v16 }
 0x7bf   : > { %2464 = vmatpush1.bf16.msra.mxu0 %v3539_v52 }
 0x7c0   : > { %2465 = vmatprep.subr.bf16.mxu0 %v3544_v13  ;;  %v2494_v13 = vld [vmem:[%s4645_s19 + $0x20] sm:$0x1] }
 0x7c3   : > { %2466 = vmatpush1.bf16.msra.mxu0 %v3542_v39 }
 0x7c4   : > { %2467 = vmatprep.subr.bf16.mxu0 %v3547_v3 }
 0x7c7   : > { %2468 = vmatpush1.bf16.msra.mxu0 %v3545_v59 }
 0x7c8   : > { %2469 = vmatprep.subr.bf16.mxu0 %v3550_v45  ;;  %v2495_v45 = vld [vmem:[%s4645_s19 + $0x28] sm:$0x1] }
 0x7cb   : > { %2470 = vmatpush1.bf16.msra.mxu0 %v3548_v58 }
 0x7cc   : > { %3111 = vmatprep.subr.bf16.mxu0 %v3551_v50 }
 0x7ce   : > { %2472 = vmatmul.mubr.bf16.vlgmr.msra.gmra.mrb[0].mxu0 %v1986_v36  ;;  %v2503_v36 = vld [vmem:[%s4654_s23 + $0x8] sm:$0xff]  ;;  %s5265_s23 = sld [smem:[#allocation56_spill]] }
 0x7cf   : > { %2481 = vmatprep.mubr.bf16.mxu0 %v1991_v54  ;;  %3112 = vmatpush3.bf16.msra.mxu0 %v3552_v37  ;;  %v2507_v48 = vunpack.c.l.bf16 %v2503_v36  ;;  %v2508_v55 = vunpack.c.h.bf16 %v2503_v36  ;;  %v2510_v54 = vunpack.c.h.bf16 %v2504_v25 }
 0x7d0   : > { %3113 = vmatprep.subr.bf16.mxu0 %v3553_v4 }
 0x7d3   : > { %3114 = vmatpush3.bf16.msra.mxu0 %v3554_v9 }
 0x7d4   : > { %3115 = vmatprep.subr.bf16.mxu0 %v3555_v63  ;;  %s5112_s20 = scalar_lea.hbm %s5265_s23, %s3183_s10 }
 0x7d6   : > { %2482 = vmatmul.mubr.bf16.gmra.mrb[8].mxu0 %v1990_v53 }
 0x7d7   : > { %3116 = vmatpush3.bf16.msra.mxu0 %v3556_v0 }
 0x7d8   : > { %3117 = vmatprep.subr.bf16.mxu0 %v3557_v18 }
 0x7db   : > { %3118 = vmatpush3.bf16.msra.mxu0 %v3558_v12 }
 0x7dc   : > { %3119 = vmatprep.subr.bf16.mxu0 %v3559_v19 }
 0x7df   : > { %3120 = vmatpush3.bf16.msra.mxu0 %v3560_v40 }
 0x7e0   : > { %3121 = vmatprep.subr.bf16.mxu0 %v3561_v28 }
 0x7e3   : > { %3122 = vmatpush3.bf16.msra.mxu0 %v3562_v43 }
 0x7e4   : > { %3123 = vmatprep.subr.bf16.mxu0 %v3563_v38 }
 0x7e7   : > { %3124 = vmatpush3.bf16.msra.mxu0 %v3564_v10 }
 0x7e8   : > { %3125 = vmatprep.subr.bf16.mxu0 %v3565_v27 }
 0x7eb   : > { %3126 = vmatpush3.bf16.msra.mxu0 %v3566_v22 }
 0x869   : > { %v2432_v32 = vpop.f32.mrb[4].mxu0 }
 0x86a   : > { %v2434_v61 = vpop.f32.mrb[5].mxu0  ;;  %v2433_v1 = vadd.f32 %v2432_v32, %v2061_v17 }
 0x86b   : > { %v2436_v6 = vpop.f32.mrb[6].mxu0  ;;  %v2435_v42 = vadd.f32 %v2434_v61, %v2065_v41 }
 0x86c   : > { %v2437_v35 = vpop.f32.mrb[7].mxu0 }
 0x8a1   : > { %v2473_v29 = vpop.f32.mrb[0].mxu0 }
 0x8a2   : > { %v3155_v47 = vadd.f32 %v2473_v29, %v2061_v17  ;;  %v2475_v49 = vpop.f32.mrb[1].mxu0 }
 0x8a3   : > { %v3156_v60 = vadd.f32 %v2475_v49, %v2065_v41  ;;  %v2477_v26 = vpop.f32.mrb[2].mxu0 }
 0x8a4   : > { %v2496_v44 = vadd.f32 %v3155_v47, %v2490_v14  ;;  %v3157_v24 = vadd.f32 %v2477_v26, %v2061_v17  ;;  %v2479_v30 = vpop.f32.mrb[3].mxu0 }
 0x8a5   : > { %v2497_v21 = vadd.f32 %v3156_v60, %v2491_v56  ;;  %v3158_v62 = vadd.f32 %v2479_v30, %v2065_v41 }
 0x8a6   : > { %v2498_v31 = vadd.f32 %v3157_v24, %v2492_v5  ;;  %v2511_v8 = vmul.f32 %v2505_v15, %v2496_v44 }
 0x8a7   : > { %v2499_v57 = vadd.f32 %v3158_v62, %v2493_v20  ;;  %v2512_v2 = vmul.f32 %v2506_v33, %v2497_v21 }
 0x8a8   : > { %v2513_v51 = vmul.f32 %v2507_v48, %v2498_v31 }
 0x8a9   : > { %v2514_v16 = vmul.f32 %v2508_v55, %v2499_v57  ;;  %v2483_v52 = vpop.f32.mrb[8].mxu0 }
 0x8aa   : > { %v2517_v39 = vpack.c.bf16 %v2513_v51, %v2511_v8  ;;  %v2484_v3 = vadd.f32 %v2483_v52, %v2433_v1  ;;  %v2485_v59 = vpop.f32.mrb[9].mxu0 }
 0x8ab   : > { %v2486_v34 = vadd.f32 %v2485_v59, %v2435_v42  ;;  %v2487_v58 = vpop.f32.mrb[10].mxu0  ;;  %v2518_v23 = vpack.c.bf16 %v2514_v16, %v2512_v2 }
 0x8ac   : > { %v2500_v53 = vadd.f32 %v2494_v13, %v2484_v3  ;;  %v2488_v50 = vpop.f32.mrb[11].mxu0 }
 0x8ad   : > { %v2501_v37 = vadd.f32 %v2495_v45, %v2486_v34  ;;  %2681 = vmatprep.mubr.bf16.mxu0 %v2518_v23 }
 0x8ae   : > { %v2515_v4 = vmul.f32 %v2509_v11, %v2500_v53  ;;  %2682 = vmatmul.mubr.bf16.vlgmr.msra.gmra.mrb[12].mxu0 %v2517_v39 }
 0x8af   : > { %v2516_v9 = vmul.f32 %v2510_v54, %v2501_v37 }
 0x8b0   : > { %v2519_v0 = vpack.c.bf16 %v2515_v4, %v2515_v4 }
 0x8b1   : > { %v2520_v63 = vpack.c.bf16 %v2516_v9, %v2516_v9 }
 0x8b3   : > { %2689 = vmatprep.mubr.bf16.mxu1 %v2520_v63 }
 0x8b4   : > { %2690 = vmatmul.mubr.bf16.vlgmr.msra.gmra.mrb[16].mxu1 %v2519_v0 }
 0x981   : > { %v3127_v18 = vpop.f32.mrb[12].mxu0 }
 0x982   : > { %v3128_v12 = vpop.f32.mrb[13].mxu0 }
 0x983   : > { %v3129_v19 = vadd.f32 %v3128_v12, %v3127_v18  ;;  %v3130_v40 = vpop.f32.mrb[14].mxu0 }
 0x984   : > { %v3131_v28 = vpop.f32.mrb[15].mxu0 }
 0x985   : > { %2697 = vst [vmem:[%s762_s6] sm:$0xff] %v3129_v19  ;;  %v3132_v43 = vadd.f32 %v3131_v28, %v3130_v40 }
 0x987   : > { %2698 = vst [vmem:[%s762_s6 + $0x8] sm:$0xff] %v3132_v43  ;;  %v3133_v38 = vpop.f32.mrb[16].mxu1 }
 0x988   : > { %v3134_v10 = vpop.f32.mrb[17].mxu1 }
 0x989   : > { %v3135_v27 = vadd.f32 %v3134_v10, %v3133_v38  ;;  %v3136_v22 = vpop.f32.mrb[18].mxu1 }
 0x98a   : > { %v3137_v32 = vpop.f32.mrb[19].mxu1 }
 0x98b   : > { %2699 = vst [vmem:[%s762_s6 + $0x10] sm:$0x1] %v3135_v27 }
 0x98c   : > { %3982 = shalt.err (!%p3979_p8)
}
 0x98d   : > { %s3983_s22 = scalar_lea.hbm %s5112_s20, 384  ;;  %s3987_s12 = scalar_lea.hbm %s5265_s23, 768 }
 0x98e   : > { %p3984_p11 = scmp.ne.s32.totalorder %s5112_s20, %s3983_s22  ;;  %p3988_p1 = scmp.lt.u32.totalorder %s5112_s20, %s5265_s23 }
 0x98f   : > { %p3989_p12 = scmp.lt.u32.totalorder %s3987_s12, %s3983_s22  ;;  %p3991_p4 = scmp.lt.u32.totalorder %s3983_s22, %s5112_s20 }
 0x990   : > { %p3985_p9 = pnand %p3984_p11, %p5266_p10 }
 0x991   : > { %p3990_p13 = por %p3989_p12, %p3988_p1 }
 0x992   : > { %p3986_p0 = pneg %p3985_p9 }
 0x993   : > { %p3992_p2 = por %p3991_p4, %p3990_p13 }
 0x995   : > { %p3993_p3 = pnand %p3992_p2, %p3986_p0 }
 0x997   : > { %3996 = shalt.err (!%p3993_p3)
}
 0x998   : > { %s4086_s9 = smov 128   ;;  %s4087_s0 = smov 8  }
 0x999   : > { %3234 = dma.vmem_to_hbm [thread:$0]  (%p5266_p10), %s5107_s3, 384, %s5112_s20, %s2701_s15, %s4086_s9, %s4086_s9, %s4087_s0  }
 0x99a PF: > { %s5267_s17 = sld [smem:[#allocation41_spill]]  ;;  %s2729_s28 = sand.u32 1, %s4051_s25  }
 0x99b   : > { %p5269_p7 = scmp.ge.s32.totalorder %s4063_s27, 2  ;;  %s2730_s6 = scalar_lea.sflag [#allocation6], %s2729_s28 }
 0x9a0   : > { %p5268_p5 = scmp.ne.s32.totalorder %s5267_s17, 0 }
 0x9a2   : > { %p3281_p6 = pnand %p5269_p7, %p5268_p5 }
 0x9a4   : > { %4046 = dma.done.wait (!%p3281_p6), %s2730_s6, 384  }
 0x9a5   : > { %4048 = vsyncadd (!%p3281_p6), %s2730_s6, 4294966912  ;;  %s5270_s27 = sld [smem:[#allocation39_spill]]  ;;  %s5271_s10 = sld [smem:[#allocation37_spill]] }
 0x9a6   : > { %s5272_s6 = sld [smem:[#allocation40_spill]]  ;;  %s5273_s25 = smov %s4055_s26 }
 0x9ab   : > { %p40_p8 = scmp.ge.s32.totalorder %s5270_s27, 4   ;;  %s5274_s26 = smov %s5271_s10 }
 0x9ad   :  { %42 = sbr.rel (!%p40_p8) target bundleno = 31 (0x1f), region = 199 }
 0x9b4   :  { %2735 = vsyncpa [#allocation5], 1 }
 0x9b5   :  { %2737 = vsyncpa [#allocation5 + $0x1], 1 }
 0x9b6   :  { %2738 = vsyncpa [#allocation8], 1 }
 0x9b7   :  { %2740 = vsyncpa [#allocation8 + $0x1], 1 }
 0x9b8   :  { %2741 = vsyncpa [#allocation11], 1 }
 0x9b9   :  { %2742 = vsyncpa [#allocation14], 1 }
 0x9ba   :  { %2743 = vsyncpa [#allocation17], 1 }
 0x9bb   :  { %2744 = vsyncpa [#allocation20], 1 }
 0x9bc   :  { %2745 = vsyncpa [#allocation23], 1 }
 0x9bd   :  { %2746 = vsyncpa [#allocation26], 1 }
 0x9be   :  { %2747 = vsyncpa [#allocation6], 1 }
 0x9bf   :  { %2749 = vsyncpa [#allocation6 + $0x1], 1 }

</bundles_post_ra>
